<compile_context>
chip_gen: v7x
topology: tpu7x:2x2x1
jax: 0.10.0
libtpu: 0.0.40
codegen_flags: <defaults>
</compile_context>

<pallas_src>
import numpy as np

import jax
import jax.numpy as jnp
from jax.experimental import pallas as pl
from jax.experimental.pallas import tpu as pltpu

THETA = 0.7
BN_EPS = 1e-5
NEG = -1e30  # "no ReLU" lower bound


# --------------------------------------------------------------------------
# In-kernel helpers (everything lives on the 8x8 base grid => M = 64 rows)
# --------------------------------------------------------------------------
def _conv3x3(buf_ref, w_ref, scale, bias, lower):
    """3x3 'same' conv on the padded 10x10 base grid + folded BN + bounded ReLU.

    buf_ref: (10, 10, Cin) zero-bordered scratch holding the input interior.
    w_ref:   (9, Cin, Cout) taps, row-major over (dy, dx).
    scale / bias / lower broadcast against the (64, Cout) f32 result.
    """
    cin = w_ref.shape[1]
    cout = w_ref.shape[2]
    acc = jnp.zeros((64, cout), jnp.float32)
    for t in range(9):
        dy, dx = divmod(t, 3)
        tap = buf_ref[dy:dy + 8, dx:dx + 8, 0:cin]          # (8, 8, Cin)
        acc = acc + jnp.dot(tap.reshape(64, cin).astype(w_ref.dtype), w_ref[t],
                            preferred_element_type=jnp.float32)
    return jnp.maximum(acc * scale + bias, lower)


def _mmb(x, w_ref, b_ref):
    """x @ w + b with f32 accumulation (kernel==stride ConvTranspose2d etc.)."""
    return jnp.dot(x.astype(w_ref.dtype), w_ref[...],
                   preferred_element_type=jnp.float32) + b_ref[...]


# --------------------------------------------------------------------------
# Single fused decoder kernel (one grid step == one batch element)
# --------------------------------------------------------------------------
def _decoder_kernel(z_ref,
                    wz, sz, bz, lbz,
                    wfc2, sfc2, bfc2,
                    wl1a, sl1a, bl1a,
                    wl1b, sl1b, bl1b,
                    wl1u, bl1u,
                    ws2u, bs2u,
                    ws3u, bs3u,
                    wl2a, sl2a, bl2a,
                    wl2b, sl2b, bl2b,
                    wl2u, bl2u,
                    wl3a, sl3a, bl3a,
                    wl3b, sl3b, bl3b,
                    wl3u, bl3u,
                    out_ref,
                    pz, p_fc1, p_out0, p_l1, p_x1, p_l2, p_x2, p_l3,
                    sk2, sk3):
    # Zero the padded scratches (interiors are fully overwritten below; the
    # zero 1-px border is what implements the convs' zero padding).  Done per
    # step because a megacore-parallel grid split never runs program 0 on the
    # second core; the cost is ~60 vreg stores.
    for buf in (pz, p_fc1, p_out0, p_l1, p_x1, p_l2, p_x2, p_l3):
        buf[...] = jnp.zeros_like(buf)

    # ---- 8x8 base grid: z into its padded scratch ---------------------------
    pz[1:9, 1:9, :] = z_ref[0]

    # ---- fused "reads z" conv: [fc1 | skip1(1x1-up folded) | skip2 | skip3] --
    y = _conv3x3(pz, wz, sz[...], bz[...], lbz[...])          # (64, 256)
    fc1 = y[:, 0:64]
    s1 = y[:, 64:128]
    s2 = y[:, 128:192]       # 32 real cols + 32 zero-weight cols
    s3 = y[:, 192:256]       # 16 real cols + 48 zero-weight cols

    # skip_l2 / skip_l3 transposed convs: per-base-pixel matmuls (zero-padded
    # contraction rows in ws2u / ws3u make the pad columns of y irrelevant).
    sk2[...] = _mmb(s2, ws2u, bs2u)                           # (64, 128)
    sk3[...] = _mmb(s3, ws3u, bs3u)                           # (64, 256)

    # ---- first_conv second conv, then out0 = . + skip_l1(z) ------------------
    p_fc1[1:9, 1:9, :] = fc1.reshape(8, 8, 64)
    out0 = _conv3x3(p_fc1, wfc2, sfc2[...], bfc2[...], 0.0) + s1

    # ---- l1: DoubleConv(64->32->32) @8x8, then l1-up + skip_l2-up ------------
    p_out0[1:9, 1:9, :] = out0.reshape(8, 8, 64)
    a = _conv3x3(p_out0, wl1a, sl1a[...], bl1a[...], 0.0)     # (64, 32)
    p_l1[1:9, 1:9, :] = a.reshape(8, 8, 32)
    a = _conv3x3(p_l1, wl1b, sl1b[...], bl1b[...], 0.0)       # (64, 32)
    x1 = _mmb(a, wl1u, bl1u) + sk2[...]                       # (64,128) == 16x16x32

    # ---- l2: DoubleConv(32->16->16) @16x16, composed onto the base grid ------
    p_x1[1:9, 1:9, :] = x1.reshape(8, 8, 128)
    a = _conv3x3(p_x1, wl2a, sl2a[...], bl2a[...], 0.0)       # (64, 64)
    p_l2[1:9, 1:9, :] = a.reshape(8, 8, 64)
    a = _conv3x3(p_l2, wl2b, sl2b[...], bl2b[...], 0.0)       # (64, 64)
    x2 = _mmb(a, wl2u, bl2u) + sk3[...]                       # (64,256) == 32x32x16

    # ---- l3: DoubleConv(16->3->3) @32x32, composed; up-conv; sigmoid ---------
    p_x2[1:9, 1:9, :] = x2.reshape(8, 8, 256)
    a = _conv3x3(p_x2, wl3a, sl3a[...], bl3a[...], 0.0)       # (64, 48)
    p_l3[1:9, 1:9, :] = a.reshape(8, 8, 48)
    a = _conv3x3(p_l3, wl3b, sl3b[...], bl3b[...], 0.0)       # (64, 48)
    out_ref[0] = jax.nn.sigmoid(_mmb(a, wl3u, bl3u))          # (64,192) == 64x64x3


# --------------------------------------------------------------------------
# pallas_call wrapper
# --------------------------------------------------------------------------
def _const_spec(shape):
    nd = len(shape)

    def imap(n):
        return (0,) * nd

    return pl.BlockSpec(shape, imap)


_WEIGHT_ORDER = ("z", "fc2", "l1a", "l1b", "l1up", "s2up", "s3up",
                 "l2a", "l2b", "l2up", "l3a", "l3b", "l3up")


def unet_decoder_forward(z_nchw, p):
    z = jnp.transpose(z_nchw, (0, 2, 3, 1)).astype(jnp.float32)   # NCHW -> NHWC
    n, _, _, cin = z.shape
    weights = tuple(w for name in _WEIGHT_ORDER for w in p[name])

    grid_spec = pltpu.PrefetchScalarGridSpec(
        num_scalar_prefetch=0,
        grid=(n,),
        in_specs=[pl.BlockSpec((1, 8, 8, cin), lambda i: (i, 0, 0, 0))]
                 + [_const_spec(w.shape) for w in weights],
        out_specs=pl.BlockSpec((1, 64, 192), lambda i: (i, 0, 0)),
        scratch_shapes=[
            pltpu.VMEM((10, 10, cin), jnp.float32),   # pz
            pltpu.VMEM((10, 10, 64), jnp.float32),    # p_fc1
            pltpu.VMEM((10, 10, 64), jnp.float32),    # p_out0
            pltpu.VMEM((10, 10, 32), jnp.float32),    # p_l1
            pltpu.VMEM((10, 10, 128), jnp.float32),   # p_x1
            pltpu.VMEM((10, 10, 64), jnp.float32),    # p_l2
            pltpu.VMEM((10, 10, 256), jnp.float32),   # p_x2
            pltpu.VMEM((10, 10, 48), jnp.float32),    # p_l3
            pltpu.VMEM((64, 128), jnp.float32),       # sk2
            pltpu.VMEM((64, 256), jnp.float32),       # sk3
        ],
    )
    out = pl.pallas_call(
        _decoder_kernel,
        grid_spec=grid_spec,
        out_shape=jax.ShapeDtypeStruct((n, 64, 192), jnp.float32),
        compiler_params=pltpu.CompilerParams(
            dimension_semantics=("parallel",)),
    )(z, *weights)

    # (N, by*8+bx, (qy, qx, c)) -> NCHW (N, 3, 64, 64).  Fine pixel (8*by+qy,
    # 8*bx+qx).  The only XLA relayout left (needed for NCHW output anyway).
    out = out.reshape(n, 8, 8, 8, 8, 3)
    out = jnp.transpose(out, (0, 5, 1, 3, 2, 4)).reshape(n, 3, 64, 64)
    return out


# --------------------------------------------------------------------------
# Parameter construction: synthetic weights, CDC fold, BN fold, and the
# sub-pixel (parity-stacked) composition of the 16x16/32x32 stages onto the
# 8x8 base grid.  All host-side (plain numpy/jnp) -> zero kernel risk.
# --------------------------------------------------------------------------
def _cdc3x3(key, cin, cout, theta=THETA):
    """3x3 conv weight with the central-difference term folded into the center
    tap; returned as (3, 3, cin, cout)."""
    w = jax.random.normal(key, (3, 3, cin, cout), jnp.float32) * 0.1
    return w.at[1, 1].add(-theta * w.sum(axis=(0, 1)))


def _bn_fold(cout, eps=BN_EPS):
    # PyTorch-init running stats: mean=0, var=1, gamma=1, beta=0.
    scale = jnp.full((cout,), 1.0 / np.sqrt(1.0 + eps), jnp.float32)
    bias = jnp.zeros((cout,), jnp.float32)
    return scale, bias


def _convT(key, cin, cout, k):
    kw, kb = jax.random.split(key)
    w = jax.random.normal(kw, (cin, k, k, cout), jnp.float32) * 0.1
    b = jax.random.normal(kb, (cout,), jnp.float32) * 0.1
    return w, b


def _compose_conv3x3(wf, f):
    """Fine-resolution 3x3 'same' conv (3,3,Ci,Co) at upsample factor f -> the
    exactly equivalent 3x3 conv on the 8x8 base grid with parity-stacked
    channels: (9, f*f*Ci, f*f*Co); rows (py,px,ci), cols (qy,qx,co)."""
    wf = np.asarray(wf, np.float32)
    ci, co = wf.shape[2], wf.shape[3]
    wb = np.zeros((3, 3, f, f, ci, f, f, co), np.float32)
    for qy in range(f):
        for dy in range(3):
            sy = qy + dy - 1
            by, py = 1 + sy // f, sy % f
            for qx in range(f):
                for dx in range(3):
                    sx = qx + dx - 1
                    bx, px = 1 + sx // f, sx % f
                    wb[by, bx, py, px, :, qy, qx, :] += wf[dy, dx]
    return jnp.asarray(wb.reshape(9, f * f * ci, f * f * co))


def _compose_convT(w, b, f_in, k):
    """ConvTranspose2d(kernel==stride==k) applied at upsample factor f_in ->
    a pure per-base-pixel matmul in the parity-stacked representation:
    weight (f_in^2*Ci, (f_in*k)^2*Co), bias ((f_in*k)^2*Co,)."""
    w = np.asarray(w, np.float32)            # (Ci, k, k, Co)
    ci, _, _, co = w.shape
    f_out = f_in * k
    wb = np.zeros((f_in, f_in, ci, f_out, f_out, co), np.float32)
    for qy in range(f_out):
        for qx in range(f_out):
            wb[qy // k, qx // k, :, qy, qx, :] = w[:, qy % k, qx % k, :]
    wb = jnp.asarray(wb.reshape(f_in * f_in * ci, f_out * f_out * co))
    return wb, jnp.tile(b, f_out * f_out)


def init_params(key, in_ch=4):
    ks = jax.random.split(key, 17)
    p = {}

    # ---- fused z-conv: [fc1 0:64 | skip1(1x1-up folded) 64:128 |
    #                     skip2 128:160 | skip3 192:208], remaining cols zero.
    w_fc1 = _cdc3x3(ks[0], in_ch, 64)
    s_fc1, b_fc1 = _bn_fold(64)
    w_sk1 = _cdc3x3(ks[2], in_ch, 64)
    w1u, b1u = _convT(ks[3], 64, 64, 1)                        # 1x1 convT
    w_sk1f = jnp.einsum("yxim,mo->yxio", w_sk1, w1u.reshape(64, 64))
    w_sk2 = _cdc3x3(ks[7], in_ch, 32)
    w_sk3 = _cdc3x3(ks[12], in_ch, 16)

    wz = jnp.zeros((3, 3, in_ch, 256), jnp.float32)
    wz = wz.at[..., 0:64].set(w_fc1).at[..., 64:128].set(w_sk1f)
    wz = wz.at[..., 128:160].set(w_sk2).at[..., 192:208].set(w_sk3)
    sz = jnp.ones((256,), jnp.float32).at[0:64].set(s_fc1)
    bz = jnp.zeros((256,), jnp.float32).at[0:64].set(b_fc1).at[64:128].set(b1u)
    lbz = jnp.full((256,), NEG, jnp.float32).at[0:64].set(0.0)  # ReLU only fc1
    p["z"] = (wz.reshape(9, in_ch, 256).astype(jnp.float32),    # K=4: stay f32
              sz[None], bz[None], lbz[None])

    def conv_pack(k_, cin, cout, f=1):
        w = _cdc3x3(k_, cin, cout)
        s, b = _bn_fold(cout)
        if f > 1:
            w = _compose_conv3x3(w, f)
            s, b = jnp.tile(s, f * f), jnp.tile(b, f * f)
        else:
            w = w.reshape(9, cin, cout)
        return (w.astype(jnp.bfloat16), s[None], b[None])

    def up_pack(k_, cin, cout, k, f_in=1, pad_rows=None):
        w, b = _convT(k_, cin, cout, k)
        wb, bb = _compose_convT(w, b, f_in, k)
        if pad_rows is not None:            # zero contraction rows: lets the
            wb = jnp.zeros((pad_rows, wb.shape[1]),   # kernel feed the 64-wide
                           jnp.float32).at[:wb.shape[0]].set(wb)  # y slices
        return (wb.astype(jnp.bfloat16), bb[None])

    p["fc2"] = conv_pack(ks[1], 64, 64)
    p["l1a"] = conv_pack(ks[4], 64, 32)
    p["l1b"] = conv_pack(ks[5], 32, 32)
    p["l1up"] = up_pack(ks[6], 32, 32, 2)                       # 8x8 -> 16x16
    p["s2up"] = up_pack(ks[8], 32, 32, 2, pad_rows=64)
    p["s3up"] = up_pack(ks[13], 16, 16, 4, pad_rows=64)
    p["l2a"] = conv_pack(ks[9], 32, 16, f=2)                    # @16x16
    p["l2b"] = conv_pack(ks[10], 16, 16, f=2)
    p["l2up"] = up_pack(ks[11], 16, 16, 2, f_in=2)              # 16x16 -> 32x32
    p["l3a"] = conv_pack(ks[14], 16, 3, f=4)                    # @32x32
    p["l3b"] = conv_pack(ks[15], 3, 3, f=4)
    p["l3up"] = up_pack(ks[16], 3, 3, 2, f_in=4)                # 32x32 -> 64x64
    return p


# --------------------------------------------------------------------------
if __name__ == "__main__":
    key = jax.random.PRNGKey(0)
    pkey, zkey = jax.random.split(key)
    params = init_params(pkey, in_ch=4)

    # z: (N, C, H, W) = (2, 4, 8, 8)  -> output (2, 3, 64, 64)
    z = jax.random.normal(zkey, (2, 4, 8, 8), jnp.float32)

    out = jax.jit(unet_decoder_forward)(z, params)
    out = jax.block_until_ready(out)

    assert out.shape == (2, 3, 64, 64), out.shape
    assert out.dtype == jnp.float32
    assert bool(jnp.all((out >= 0.0) & (out <= 1.0)))  # sigmoid range
    assert bool(jnp.all(jnp.isfinite(out)))
    print("KERNEL_OK")
</pallas_src>

<mosaic_0001>
module attributes {stable_mosaic.version = 11 : i64} {
  func.func @_decoder_kernel(%arg0: i32, %arg1: memref<1x8x8x4xf32, #tpu.memory_space<vmem>>, %arg2: memref<9x4x256xf32, #tpu.memory_space<vmem>>, %arg3: memref<1x256xf32, #tpu.memory_space<vmem>>, %arg4: memref<1x256xf32, #tpu.memory_space<vmem>>, %arg5: memref<1x256xf32, #tpu.memory_space<vmem>>, %arg6: memref<9x64x64xbf16, #tpu.memory_space<vmem>>, %arg7: memref<1x64xf32, #tpu.memory_space<vmem>>, %arg8: memref<1x64xf32, #tpu.memory_space<vmem>>, %arg9: memref<9x64x32xbf16, #tpu.memory_space<vmem>>, %arg10: memref<1x32xf32, #tpu.memory_space<vmem>>, %arg11: memref<1x32xf32, #tpu.memory_space<vmem>>, %arg12: memref<9x32x32xbf16, #tpu.memory_space<vmem>>, %arg13: memref<1x32xf32, #tpu.memory_space<vmem>>, %arg14: memref<1x32xf32, #tpu.memory_space<vmem>>, %arg15: memref<32x128xbf16, #tpu.memory_space<vmem>>, %arg16: memref<1x128xf32, #tpu.memory_space<vmem>>, %arg17: memref<64x128xbf16, #tpu.memory_space<vmem>>, %arg18: memref<1x128xf32, #tpu.memory_space<vmem>>, %arg19: memref<64x256xbf16, #tpu.memory_space<vmem>>, %arg20: memref<1x256xf32, #tpu.memory_space<vmem>>, %arg21: memref<9x128x64xbf16, #tpu.memory_space<vmem>>, %arg22: memref<1x64xf32, #tpu.memory_space<vmem>>, %arg23: memref<1x64xf32, #tpu.memory_space<vmem>>, %arg24: memref<9x64x64xbf16, #tpu.memory_space<vmem>>, %arg25: memref<1x64xf32, #tpu.memory_space<vmem>>, %arg26: memref<1x64xf32, #tpu.memory_space<vmem>>, %arg27: memref<64x256xbf16, #tpu.memory_space<vmem>>, %arg28: memref<1x256xf32, #tpu.memory_space<vmem>>, %arg29: memref<9x256x48xbf16, #tpu.memory_space<vmem>>, %arg30: memref<1x48xf32, #tpu.memory_space<vmem>>, %arg31: memref<1x48xf32, #tpu.memory_space<vmem>>, %arg32: memref<9x48x48xbf16, #tpu.memory_space<vmem>>, %arg33: memref<1x48xf32, #tpu.memory_space<vmem>>, %arg34: memref<1x48xf32, #tpu.memory_space<vmem>>, %arg35: memref<48x192xbf16, #tpu.memory_space<vmem>>, %arg36: memref<1x192xf32, #tpu.memory_space<vmem>>, %arg37: memref<1x64x192xf32, #tpu.memory_space<vmem>>, %arg38: memref<10x10x4xf32, #tpu.memory_space<vmem>>, %arg39: memref<10x10x64xf32, #tpu.memory_space<vmem>>, %arg40: memref<10x10x64xf32, #tpu.memory_space<vmem>>, %arg41: memref<10x10x32xf32, #tpu.memory_space<vmem>>, %arg42: memref<10x10x128xf32, #tpu.memory_space<vmem>>, %arg43: memref<10x10x64xf32, #tpu.memory_space<vmem>>, %arg44: memref<10x10x256xf32, #tpu.memory_space<vmem>>, %arg45: memref<10x10x48xf32, #tpu.memory_space<vmem>>, %arg46: memref<64x128xf32, #tpu.memory_space<vmem>>, %arg47: memref<64x256xf32, #tpu.memory_space<vmem>>) attributes {dimension_semantics = [#tpu.dimension_semantics<parallel>], iteration_bounds = array<i64: 2>, scalar_prefetch = 0 : i64, scratch_operands = 10 : i64, tpu.core_type = #tpu.core_type<tc>, window_params = [{transform_indices = @transform_0, window_bounds = array<i64: 1, 8, 8, 4>}, {pipeline_mode = #tpu.pipeline_mode<synchronous>, transform_indices = @transform_1, window_bounds = array<i64: 9, 4, 256>}, {pipeline_mode = #tpu.pipeline_mode<synchronous>, transform_indices = @transform_2, window_bounds = array<i64: 1, 256>}, {pipeline_mode = #tpu.pipeline_mode<synchronous>, transform_indices = @transform_3, window_bounds = array<i64: 1, 256>}, {pipeline_mode = #tpu.pipeline_mode<synchronous>, transform_indices = @transform_4, window_bounds = array<i64: 1, 256>}, {pipeline_mode = #tpu.pipeline_mode<synchronous>, transform_indices = @transform_5, window_bounds = array<i64: 9, 64, 64>}, {pipeline_mode = #tpu.pipeline_mode<synchronous>, transform_indices = @transform_6, window_bounds = array<i64: 1, 64>}, {pipeline_mode = #tpu.pipeline_mode<synchronous>, transform_indices = @transform_7, window_bounds = array<i64: 1, 64>}, {pipeline_mode = #tpu.pipeline_mode<synchronous>, transform_indices = @transform_8, window_bounds = array<i64: 9, 64, 32>}, {pipeline_mode = #tpu.pipeline_mode<synchronous>, transform_indices = @transform_9, window_bounds = array<i64: 1, 32>}, {pipeline_mode = #tpu.pipeline_mode<synchronous>, transform_indices = @transform_10, window_bounds = array<i64: 1, 32>}, {pipeline_mode = #tpu.pipeline_mode<synchronous>, transform_indices = @transform_11, window_bounds = array<i64: 9, 32, 32>}, {pipeline_mode = #tpu.pipeline_mode<synchronous>, transform_indices = @transform_12, window_bounds = array<i64: 1, 32>}, {pipeline_mode = #tpu.pipeline_mode<synchronous>, transform_indices = @transform_13, window_bounds = array<i64: 1, 32>}, {pipeline_mode = #tpu.pipeline_mode<synchronous>, transform_indices = @transform_14, window_bounds = array<i64: 32, 128>}, {pipeline_mode = #tpu.pipeline_mode<synchronous>, transform_indices = @transform_15, window_bounds = array<i64: 1, 128>}, {pipeline_mode = #tpu.pipeline_mode<synchronous>, transform_indices = @transform_16, window_bounds = array<i64: 64, 128>}, {pipeline_mode = #tpu.pipeline_mode<synchronous>, transform_indices = @transform_17, window_bounds = array<i64: 1, 128>}, {pipeline_mode = #tpu.pipeline_mode<synchronous>, transform_indices = @transform_18, window_bounds = array<i64: 64, 256>}, {pipeline_mode = #tpu.pipeline_mode<synchronous>, transform_indices = @transform_19, window_bounds = array<i64: 1, 256>}, {pipeline_mode = #tpu.pipeline_mode<synchronous>, transform_indices = @transform_20, window_bounds = array<i64: 9, 128, 64>}, {pipeline_mode = #tpu.pipeline_mode<synchronous>, transform_indices = @transform_21, window_bounds = array<i64: 1, 64>}, {pipeline_mode = #tpu.pipeline_mode<synchronous>, transform_indices = @transform_22, window_bounds = array<i64: 1, 64>}, {pipeline_mode = #tpu.pipeline_mode<synchronous>, transform_indices = @transform_23, window_bounds = array<i64: 9, 64, 64>}, {pipeline_mode = #tpu.pipeline_mode<synchronous>, transform_indices = @transform_24, window_bounds = array<i64: 1, 64>}, {pipeline_mode = #tpu.pipeline_mode<synchronous>, transform_indices = @transform_25, window_bounds = array<i64: 1, 64>}, {pipeline_mode = #tpu.pipeline_mode<synchronous>, transform_indices = @transform_26, window_bounds = array<i64: 64, 256>}, {pipeline_mode = #tpu.pipeline_mode<synchronous>, transform_indices = @transform_27, window_bounds = array<i64: 1, 256>}, {pipeline_mode = #tpu.pipeline_mode<synchronous>, transform_indices = @transform_28, window_bounds = array<i64: 9, 256, 48>}, {pipeline_mode = #tpu.pipeline_mode<synchronous>, transform_indices = @transform_29, window_bounds = array<i64: 1, 48>}, {pipeline_mode = #tpu.pipeline_mode<synchronous>, transform_indices = @transform_30, window_bounds = array<i64: 1, 48>}, {pipeline_mode = #tpu.pipeline_mode<synchronous>, transform_indices = @transform_31, window_bounds = array<i64: 9, 48, 48>}, {pipeline_mode = #tpu.pipeline_mode<synchronous>, transform_indices = @transform_32, window_bounds = array<i64: 1, 48>}, {pipeline_mode = #tpu.pipeline_mode<synchronous>, transform_indices = @transform_33, window_bounds = array<i64: 1, 48>}, {pipeline_mode = #tpu.pipeline_mode<synchronous>, transform_indices = @transform_34, window_bounds = array<i64: 48, 192>}, {pipeline_mode = #tpu.pipeline_mode<synchronous>, transform_indices = @transform_35, window_bounds = array<i64: 1, 192>}, {transform_indices = @transform_36, window_bounds = array<i64: 1, 64, 192>}]} {
    %cst = arith.constant 0.000000e+00 : f32
    %0 = vector.broadcast %cst : f32 to vector<10x10x4xf32>
    %c0 = arith.constant 0 : index
    %c0_0 = arith.constant 0 : index
    %c0_1 = arith.constant 0 : index
    %1 = vector.load %arg38[%c0, %c0_0, %c0_1] : memref<10x10x4xf32, #tpu.memory_space<vmem>>, vector<10x10x4xf32>
    tpu.vector_store %arg38[%c0, %c0_0, %c0_1], %0 {strides = array<i32>} : memref<10x10x4xf32, #tpu.memory_space<vmem>>, vector<10x10x4xf32>,
    %cst_2 = arith.constant 0.000000e+00 : f32
    %2 = vector.broadcast %cst_2 : f32 to vector<10x10x64xf32>
    %c0_3 = arith.constant 0 : index
    %c0_4 = arith.constant 0 : index
    %c0_5 = arith.constant 0 : index
    %3 = vector.load %arg39[%c0_3, %c0_4, %c0_5] : memref<10x10x64xf32, #tpu.memory_space<vmem>>, vector<10x10x64xf32>
    tpu.vector_store %arg39[%c0_3, %c0_4, %c0_5], %2 {strides = array<i32>} : memref<10x10x64xf32, #tpu.memory_space<vmem>>, vector<10x10x64xf32>,
    %cst_6 = arith.constant 0.000000e+00 : f32
    %4 = vector.broadcast %cst_6 : f32 to vector<10x10x64xf32>
    %c0_7 = arith.constant 0 : index
    %c0_8 = arith.constant 0 : index
    %c0_9 = arith.constant 0 : index
    %5 = vector.load %arg40[%c0_7, %c0_8, %c0_9] : memref<10x10x64xf32, #tpu.memory_space<vmem>>, vector<10x10x64xf32>
    tpu.vector_store %arg40[%c0_7, %c0_8, %c0_9], %4 {strides = array<i32>} : memref<10x10x64xf32, #tpu.memory_space<vmem>>, vector<10x10x64xf32>,
    %cst_10 = arith.constant 0.000000e+00 : f32
    %6 = vector.broadcast %cst_10 : f32 to vector<10x10x32xf32>
    %c0_11 = arith.constant 0 : index
    %c0_12 = arith.constant 0 : index
    %c0_13 = arith.constant 0 : index
    %7 = vector.load %arg41[%c0_11, %c0_12, %c0_13] : memref<10x10x32xf32, #tpu.memory_space<vmem>>, vector<10x10x32xf32>
    tpu.vector_store %arg41[%c0_11, %c0_12, %c0_13], %6 {strides = array<i32>} : memref<10x10x32xf32, #tpu.memory_space<vmem>>, vector<10x10x32xf32>,
    %cst_14 = arith.constant 0.000000e+00 : f32
    %8 = vector.broadcast %cst_14 : f32 to vector<10x10x128xf32>
    %c0_15 = arith.constant 0 : index
    %c0_16 = arith.constant 0 : index
    %c0_17 = arith.constant 0 : index
    %9 = vector.load %arg42[%c0_15, %c0_16, %c0_17] : memref<10x10x128xf32, #tpu.memory_space<vmem>>, vector<10x10x128xf32>
    tpu.vector_store %arg42[%c0_15, %c0_16, %c0_17], %8 {strides = array<i32>} : memref<10x10x128xf32, #tpu.memory_space<vmem>>, vector<10x10x128xf32>,
    %cst_18 = arith.constant 0.000000e+00 : f32
    %10 = vector.broadcast %cst_18 : f32 to vector<10x10x64xf32>
    %c0_19 = arith.constant 0 : index
    %c0_20 = arith.constant 0 : index
    %c0_21 = arith.constant 0 : index
    %11 = vector.load %arg43[%c0_19, %c0_20, %c0_21] : memref<10x10x64xf32, #tpu.memory_space<vmem>>, vector<10x10x64xf32>
    tpu.vector_store %arg43[%c0_19, %c0_20, %c0_21], %10 {strides = array<i32>} : memref<10x10x64xf32, #tpu.memory_space<vmem>>, vector<10x10x64xf32>,
    %cst_22 = arith.constant 0.000000e+00 : f32
    %12 = vector.broadcast %cst_22 : f32 to vector<10x10x256xf32>
    %c0_23 = arith.constant 0 : index
    %c0_24 = arith.constant 0 : index
    %c0_25 = arith.constant 0 : index
    %13 = vector.load %arg44[%c0_23, %c0_24, %c0_25] : memref<10x10x256xf32, #tpu.memory_space<vmem>>, vector<10x10x256xf32>
    tpu.vector_store %arg44[%c0_23, %c0_24, %c0_25], %12 {strides = array<i32>} : memref<10x10x256xf32, #tpu.memory_space<vmem>>, vector<10x10x256xf32>,
    %cst_26 = arith.constant 0.000000e+00 : f32
    %14 = vector.broadcast %cst_26 : f32 to vector<10x10x48xf32>
    %c0_27 = arith.constant 0 : index
    %c0_28 = arith.constant 0 : index
    %c0_29 = arith.constant 0 : index
    %15 = vector.load %arg45[%c0_27, %c0_28, %c0_29] : memref<10x10x48xf32, #tpu.memory_space<vmem>>, vector<10x10x48xf32>
    tpu.vector_store %arg45[%c0_27, %c0_28, %c0_29], %14 {strides = array<i32>} : memref<10x10x48xf32, #tpu.memory_space<vmem>>, vector<10x10x48xf32>,
    %c0_30 = arith.constant 0 : index
    %c0_31 = arith.constant 0 : index
    %c0_32 = arith.constant 0 : index
    %c0_33 = arith.constant 0 : index
    %16 = vector.load %arg1[%c0_30, %c0_31, %c0_32, %c0_33] : memref<1x8x8x4xf32, #tpu.memory_space<vmem>>, vector<1x8x8x4xf32>
    %17 = vector.shape_cast %16 : vector<1x8x8x4xf32> to vector<8x8x4xf32>
    %c1 = arith.constant 1 : index
    %c1_34 = arith.constant 1 : index
    %c0_35 = arith.constant 0 : index
    %18 = vector.load %arg38[%c1, %c1_34, %c0_35] : memref<10x10x4xf32, #tpu.memory_space<vmem>>, vector<8x8x4xf32>
    tpu.vector_store %arg38[%c1, %c1_34, %c0_35], %17 {strides = array<i32>} : memref<10x10x4xf32, #tpu.memory_space<vmem>>, vector<8x8x4xf32>,
    %c0_36 = arith.constant 0 : index
    %c0_37 = arith.constant 0 : index
    %19 = vector.load %arg3[%c0_36, %c0_37] : memref<1x256xf32, #tpu.memory_space<vmem>>, vector<1x256xf32>
    %c0_38 = arith.constant 0 : index
    %c0_39 = arith.constant 0 : index
    %20 = vector.load %arg4[%c0_38, %c0_39] : memref<1x256xf32, #tpu.memory_space<vmem>>, vector<1x256xf32>
    %c0_40 = arith.constant 0 : index
    %c0_41 = arith.constant 0 : index
    %21 = vector.load %arg5[%c0_40, %c0_41] : memref<1x256xf32, #tpu.memory_space<vmem>>, vector<1x256xf32>
    %cst_42 = arith.constant 0.000000e+00 : f32
    %22 = vector.broadcast %cst_42 : f32 to vector<64x256xf32>
    %c0_43 = arith.constant 0 : index
    %c0_44 = arith.constant 0 : index
    %c0_45 = arith.constant 0 : index
    %23 = vector.load %arg38[%c0_43, %c0_44, %c0_45] : memref<10x10x4xf32, #tpu.memory_space<vmem>>, vector<8x8x4xf32>
    %24 = vector.shape_cast %23 : vector<8x8x4xf32> to vector<64x4xf32>
    %c0_46 = arith.constant 0 : index
    %c0_47 = arith.constant 0 : index
    %c0_48 = arith.constant 0 : index
    %25 = vector.load %arg2[%c0_46, %c0_47, %c0_48] : memref<9x4x256xf32, #tpu.memory_space<vmem>>, vector<1x4x256xf32>
    %26 = vector.shape_cast %25 : vector<1x4x256xf32> to vector<4x256xf32>
    %cst_49 = arith.constant dense<0.000000e+00> : vector<64x256xf32>
    %27 = tpu.matmul %24, %26, %cst_49 {dimension_numbers = #tpu.dot_dimension_numbers<[1], [0], [0], [1], [0, 0, 1, 1], [], []>} : vector<64x4xf32>, vector<4x256xf32>, vector<64x256xf32> -> vector<64x256xf32>
    %28 = arith.addf %22, %27 : vector<64x256xf32>
    %c0_50 = arith.constant 0 : index
    %c1_51 = arith.constant 1 : index
    %c0_52 = arith.constant 0 : index
    %29 = vector.load %arg38[%c0_50, %c1_51, %c0_52] : memref<10x10x4xf32, #tpu.memory_space<vmem>>, vector<8x8x4xf32>
    %30 = vector.shape_cast %29 : vector<8x8x4xf32> to vector<64x4xf32>
    %c1_53 = arith.constant 1 : index
    %c0_54 = arith.constant 0 : index
    %c0_55 = arith.constant 0 : index
    %31 = vector.load %arg2[%c1_53, %c0_54, %c0_55] : memref<9x4x256xf32, #tpu.memory_space<vmem>>, vector<1x4x256xf32>
    %32 = vector.shape_cast %31 : vector<1x4x256xf32> to vector<4x256xf32>
    %cst_56 = arith.constant dense<0.000000e+00> : vector<64x256xf32>
    %33 = tpu.matmul %30, %32, %cst_56 {dimension_numbers = #tpu.dot_dimension_numbers<[1], [0], [0], [1], [0, 0, 1, 1], [], []>} : vector<64x4xf32>, vector<4x256xf32>, vector<64x256xf32> -> vector<64x256xf32>
    %34 = arith.addf %28, %33 : vector<64x256xf32>
    %c0_57 = arith.constant 0 : index
    %c2 = arith.constant 2 : index
    %c0_58 = arith.constant 0 : index
    %35 = vector.load %arg38[%c0_57, %c2, %c0_58] : memref<10x10x4xf32, #tpu.memory_space<vmem>>, vector<8x8x4xf32>
    %36 = vector.shape_cast %35 : vector<8x8x4xf32> to vector<64x4xf32>
    %c2_59 = arith.constant 2 : index
    %c0_60 = arith.constant 0 : index
    %c0_61 = arith.constant 0 : index
    %37 = vector.load %arg2[%c2_59, %c0_60, %c0_61] : memref<9x4x256xf32, #tpu.memory_space<vmem>>, vector<1x4x256xf32>
    %38 = vector.shape_cast %37 : vector<1x4x256xf32> to vector<4x256xf32>
    %cst_62 = arith.constant dense<0.000000e+00> : vector<64x256xf32>
    %39 = tpu.matmul %36, %38, %cst_62 {dimension_numbers = #tpu.dot_dimension_numbers<[1], [0], [0], [1], [0, 0, 1, 1], [], []>} : vector<64x4xf32>, vector<4x256xf32>, vector<64x256xf32> -> vector<64x256xf32>
    %40 = arith.addf %34, %39 : vector<64x256xf32>
    %c1_63 = arith.constant 1 : index
    %c0_64 = arith.constant 0 : index
    %c0_65 = arith.constant 0 : index
    %41 = vector.load %arg38[%c1_63, %c0_64, %c0_65] : memref<10x10x4xf32, #tpu.memory_space<vmem>>, vector<8x8x4xf32>
    %42 = vector.shape_cast %41 : vector<8x8x4xf32> to vector<64x4xf32>
    %c3 = arith.constant 3 : index
    %c0_66 = arith.constant 0 : index
    %c0_67 = arith.constant 0 : index
    %43 = vector.load %arg2[%c3, %c0_66, %c0_67] : memref<9x4x256xf32, #tpu.memory_space<vmem>>, vector<1x4x256xf32>
    %44 = vector.shape_cast %43 : vector<1x4x256xf32> to vector<4x256xf32>
    %cst_68 = arith.constant dense<0.000000e+00> : vector<64x256xf32>
    %45 = tpu.matmul %42, %44, %cst_68 {dimension_numbers = #tpu.dot_dimension_numbers<[1], [0], [0], [1], [0, 0, 1, 1], [], []>} : vector<64x4xf32>, vector<4x256xf32>, vector<64x256xf32> -> vector<64x256xf32>
    %46 = arith.addf %40, %45 : vector<64x256xf32>
    %c1_69 = arith.constant 1 : index
    %c1_70 = arith.constant 1 : index
    %c0_71 = arith.constant 0 : index
    %47 = vector.load %arg38[%c1_69, %c1_70, %c0_71] : memref<10x10x4xf32, #tpu.memory_space<vmem>>, vector<8x8x4xf32>
    %48 = vector.shape_cast %47 : vector<8x8x4xf32> to vector<64x4xf32>
    %c4 = arith.constant 4 : index
    %c0_72 = arith.constant 0 : index
    %c0_73 = arith.constant 0 : index
    %49 = vector.load %arg2[%c4, %c0_72, %c0_73] : memref<9x4x256xf32, #tpu.memory_space<vmem>>, vector<1x4x256xf32>
    %50 = vector.shape_cast %49 : vector<1x4x256xf32> to vector<4x256xf32>
    %cst_74 = arith.constant dense<0.000000e+00> : vector<64x256xf32>
    %51 = tpu.matmul %48, %50, %cst_74 {dimension_numbers = #tpu.dot_dimension_numbers<[1], [0], [0], [1], [0, 0, 1, 1], [], []>} : vector<64x4xf32>, vector<4x256xf32>, vector<64x256xf32> -> vector<64x256xf32>
    %52 = arith.addf %46, %51 : vector<64x256xf32>
    %c1_75 = arith.constant 1 : index
    %c2_76 = arith.constant 2 : index
    %c0_77 = arith.constant 0 : index
    %53 = vector.load %arg38[%c1_75, %c2_76, %c0_77] : memref<10x10x4xf32, #tpu.memory_space<vmem>>, vector<8x8x4xf32>
    %54 = vector.shape_cast %53 : vector<8x8x4xf32> to vector<64x4xf32>
    %c5 = arith.constant 5 : index
    %c0_78 = arith.constant 0 : index
    %c0_79 = arith.constant 0 : index
    %55 = vector.load %arg2[%c5, %c0_78, %c0_79] : memref<9x4x256xf32, #tpu.memory_space<vmem>>, vector<1x4x256xf32>
    %56 = vector.shape_cast %55 : vector<1x4x256xf32> to vector<4x256xf32>
    %cst_80 = arith.constant dense<0.000000e+00> : vector<64x256xf32>
    %57 = tpu.matmul %54, %56, %cst_80 {dimension_numbers = #tpu.dot_dimension_numbers<[1], [0], [0], [1], [0, 0, 1, 1], [], []>} : vector<64x4xf32>, vector<4x256xf32>, vector<64x256xf32> -> vector<64x256xf32>
    %58 = arith.addf %52, %57 : vector<64x256xf32>
    %c2_81 = arith.constant 2 : index
    %c0_82 = arith.constant 0 : index
    %c0_83 = arith.constant 0 : index
    %59 = vector.load %arg38[%c2_81, %c0_82, %c0_83] : memref<10x10x4xf32, #tpu.memory_space<vmem>>, vector<8x8x4xf32>
    %60 = vector.shape_cast %59 : vector<8x8x4xf32> to vector<64x4xf32>
    %c6 = arith.constant 6 : index
    %c0_84 = arith.constant 0 : index
    %c0_85 = arith.constant 0 : index
    %61 = vector.load %arg2[%c6, %c0_84, %c0_85] : memref<9x4x256xf32, #tpu.memory_space<vmem>>, vector<1x4x256xf32>
    %62 = vector.shape_cast %61 : vector<1x4x256xf32> to vector<4x256xf32>
    %cst_86 = arith.constant dense<0.000000e+00> : vector<64x256xf32>
    %63 = tpu.matmul %60, %62, %cst_86 {dimension_numbers = #tpu.dot_dimension_numbers<[1], [0], [0], [1], [0, 0, 1, 1], [], []>} : vector<64x4xf32>, vector<4x256xf32>, vector<64x256xf32> -> vector<64x256xf32>
    %64 = arith.addf %58, %63 : vector<64x256xf32>
    %c2_87 = arith.constant 2 : index
    %c1_88 = arith.constant 1 : index
    %c0_89 = arith.constant 0 : index
    %65 = vector.load %arg38[%c2_87, %c1_88, %c0_89] : memref<10x10x4xf32, #tpu.memory_space<vmem>>, vector<8x8x4xf32>
    %66 = vector.shape_cast %65 : vector<8x8x4xf32> to vector<64x4xf32>
    %c7 = arith.constant 7 : index
    %c0_90 = arith.constant 0 : index
    %c0_91 = arith.constant 0 : index
    %67 = vector.load %arg2[%c7, %c0_90, %c0_91] : memref<9x4x256xf32, #tpu.memory_space<vmem>>, vector<1x4x256xf32>
    %68 = vector.shape_cast %67 : vector<1x4x256xf32> to vector<4x256xf32>
    %cst_92 = arith.constant dense<0.000000e+00> : vector<64x256xf32>
    %69 = tpu.matmul %66, %68, %cst_92 {dimension_numbers = #tpu.dot_dimension_numbers<[1], [0], [0], [1], [0, 0, 1, 1], [], []>} : vector<64x4xf32>, vector<4x256xf32>, vector<64x256xf32> -> vector<64x256xf32>
    %70 = arith.addf %64, %69 : vector<64x256xf32>
    %c2_93 = arith.constant 2 : index
    %c2_94 = arith.constant 2 : index
    %c0_95 = arith.constant 0 : index
    %71 = vector.load %arg38[%c2_93, %c2_94, %c0_95] : memref<10x10x4xf32, #tpu.memory_space<vmem>>, vector<8x8x4xf32>
    %72 = vector.shape_cast %71 : vector<8x8x4xf32> to vector<64x4xf32>
    %c8 = arith.constant 8 : index
    %c0_96 = arith.constant 0 : index
    %c0_97 = arith.constant 0 : index
    %73 = vector.load %arg2[%c8, %c0_96, %c0_97] : memref<9x4x256xf32, #tpu.memory_space<vmem>>, vector<1x4x256xf32>
    %74 = vector.shape_cast %73 : vector<1x4x256xf32> to vector<4x256xf32>
    %cst_98 = arith.constant dense<0.000000e+00> : vector<64x256xf32>
    %75 = tpu.matmul %72, %74, %cst_98 {dimension_numbers = #tpu.dot_dimension_numbers<[1], [0], [0], [1], [0, 0, 1, 1], [], []>} : vector<64x4xf32>, vector<4x256xf32>, vector<64x256xf32> -> vector<64x256xf32>
    %76 = arith.addf %70, %75 : vector<64x256xf32>
    %77 = vector.broadcast %19 : vector<1x256xf32> to vector<64x256xf32>
    %78 = arith.mulf %76, %77 : vector<64x256xf32>
    %79 = vector.broadcast %20 : vector<1x256xf32> to vector<64x256xf32>
    %80 = arith.addf %78, %79 : vector<64x256xf32>
    %81 = vector.broadcast %21 : vector<1x256xf32> to vector<64x256xf32>
    %82 = arith.maximumf %80, %81 : vector<64x256xf32>
    %83 = vector.extract_strided_slice %82 {offsets = [0, 0], sizes = [64, 64], strides = [1, 1]} : vector<64x256xf32> to vector<64x64xf32>
    %84 = vector.extract_strided_slice %82 {offsets = [0, 64], sizes = [64, 64], strides = [1, 1]} : vector<64x256xf32> to vector<64x64xf32>
    %85 = vector.extract_strided_slice %82 {offsets = [0, 128], sizes = [64, 64], strides = [1, 1]} : vector<64x256xf32> to vector<64x64xf32>
    %86 = vector.extract_strided_slice %82 {offsets = [0, 192], sizes = [64, 64], strides = [1, 1]} : vector<64x256xf32> to vector<64x64xf32>
    %87 = arith.truncf %85 : vector<64x64xf32> to vector<64x64xbf16>
    %c0_99 = arith.constant 0 : index
    %c0_100 = arith.constant 0 : index
    %88 = vector.load %arg17[%c0_99, %c0_100] : memref<64x128xbf16, #tpu.memory_space<vmem>>, vector<64x128xbf16>
    %cst_101 = arith.constant dense<0.000000e+00> : vector<64x128xf32>
    %89 = tpu.matmul %87, %88, %cst_101 {dimension_numbers = #tpu.dot_dimension_numbers<[1], [0], [0], [1], [0, 0, 1, 1], [], []>} : vector<64x64xbf16>, vector<64x128xbf16>, vector<64x128xf32> -> vector<64x128xf32>
    %c0_102 = arith.constant 0 : index
    %c0_103 = arith.constant 0 : index
    %90 = vector.load %arg18[%c0_102, %c0_103] : memref<1x128xf32, #tpu.memory_space<vmem>>, vector<1x128xf32>
    %91 = vector.broadcast %90 : vector<1x128xf32> to vector<64x128xf32>
    %92 = arith.addf %89, %91 : vector<64x128xf32>
    %c0_104 = arith.constant 0 : index
    %c0_105 = arith.constant 0 : index
    %93 = vector.load %arg46[%c0_104, %c0_105] : memref<64x128xf32, #tpu.memory_space<vmem>>, vector<64x128xf32>
    tpu.vector_store %arg46[%c0_104, %c0_105], %92 {strides = array<i32>} : memref<64x128xf32, #tpu.memory_space<vmem>>, vector<64x128xf32>,
    %94 = arith.truncf %86 : vector<64x64xf32> to vector<64x64xbf16>
    %c0_106 = arith.constant 0 : index
    %c0_107 = arith.constant 0 : index
    %95 = vector.load %arg19[%c0_106, %c0_107] : memref<64x256xbf16, #tpu.memory_space<vmem>>, vector<64x256xbf16>
    %cst_108 = arith.constant dense<0.000000e+00> : vector<64x256xf32>
    %96 = tpu.matmul %94, %95, %cst_108 {dimension_numbers = #tpu.dot_dimension_numbers<[1], [0], [0], [1], [0, 0, 1, 1], [], []>} : vector<64x64xbf16>, vector<64x256xbf16>, vector<64x256xf32> -> vector<64x256xf32>
    %c0_109 = arith.constant 0 : index
    %c0_110 = arith.constant 0 : index
    %97 = vector.load %arg20[%c0_109, %c0_110] : memref<1x256xf32, #tpu.memory_space<vmem>>, vector<1x256xf32>
    %98 = vector.broadcast %97 : vector<1x256xf32> to vector<64x256xf32>
    %99 = arith.addf %96, %98 : vector<64x256xf32>
    %c0_111 = arith.constant 0 : index
    %c0_112 = arith.constant 0 : index
    %100 = vector.load %arg47[%c0_111, %c0_112] : memref<64x256xf32, #tpu.memory_space<vmem>>, vector<64x256xf32>
    tpu.vector_store %arg47[%c0_111, %c0_112], %99 {strides = array<i32>} : memref<64x256xf32, #tpu.memory_space<vmem>>, vector<64x256xf32>,
    %101 = vector.shape_cast %83 : vector<64x64xf32> to vector<8x8x64xf32>
    %c1_113 = arith.constant 1 : index
    %c1_114 = arith.constant 1 : index
    %c0_115 = arith.constant 0 : index
    %102 = vector.load %arg39[%c1_113, %c1_114, %c0_115] : memref<10x10x64xf32, #tpu.memory_space<vmem>>, vector<8x8x64xf32>
    tpu.vector_store %arg39[%c1_113, %c1_114, %c0_115], %101 {strides = array<i32>} : memref<10x10x64xf32, #tpu.memory_space<vmem>>, vector<8x8x64xf32>,
    %c0_116 = arith.constant 0 : index
    %c0_117 = arith.constant 0 : index
    %103 = vector.load %arg7[%c0_116, %c0_117] : memref<1x64xf32, #tpu.memory_space<vmem>>, vector<1x64xf32>
    %c0_118 = arith.constant 0 : index
    %c0_119 = arith.constant 0 : index
    %104 = vector.load %arg8[%c0_118, %c0_119] : memref<1x64xf32, #tpu.memory_space<vmem>>, vector<1x64xf32>
    %cst_120 = arith.constant 0.000000e+00 : f32
    %105 = vector.broadcast %cst_120 : f32 to vector<64x64xf32>
    %c0_121 = arith.constant 0 : index
    %c0_122 = arith.constant 0 : index
    %c0_123 = arith.constant 0 : index
    %106 = vector.load %arg39[%c0_121, %c0_122, %c0_123] : memref<10x10x64xf32, #tpu.memory_space<vmem>>, vector<8x8x64xf32>
    %107 = vector.shape_cast %106 : vector<8x8x64xf32> to vector<64x64xf32>
    %108 = arith.truncf %107 : vector<64x64xf32> to vector<64x64xbf16>
    %c0_124 = arith.constant 0 : index
    %c0_125 = arith.constant 0 : index
    %c0_126 = arith.constant 0 : index
    %109 = vector.load %arg6[%c0_124, %c0_125, %c0_126] : memref<9x64x64xbf16, #tpu.memory_space<vmem>>, vector<1x64x64xbf16>
    %110 = vector.shape_cast %109 : vector<1x64x64xbf16> to vector<64x64xbf16>
    %cst_127 = arith.constant dense<0.000000e+00> : vector<64x64xf32>
    %111 = tpu.matmul %108, %110, %cst_127 {dimension_numbers = #tpu.dot_dimension_numbers<[1], [0], [0], [1], [0, 0, 1, 1], [], []>} : vector<64x64xbf16>, vector<64x64xbf16>, vector<64x64xf32> -> vector<64x64xf32>
    %112 = arith.addf %105, %111 : vector<64x64xf32>
    %c0_128 = arith.constant 0 : index
    %c1_129 = arith.constant 1 : index
    %c0_130 = arith.constant 0 : index
    %113 = vector.load %arg39[%c0_128, %c1_129, %c0_130] : memref<10x10x64xf32, #tpu.memory_space<vmem>>, vector<8x8x64xf32>
    %114 = vector.shape_cast %113 : vector<8x8x64xf32> to vector<64x64xf32>
    %115 = arith.truncf %114 : vector<64x64xf32> to vector<64x64xbf16>
    %c1_131 = arith.constant 1 : index
    %c0_132 = arith.constant 0 : index
    %c0_133 = arith.constant 0 : index
    %116 = vector.load %arg6[%c1_131, %c0_132, %c0_133] : memref<9x64x64xbf16, #tpu.memory_space<vmem>>, vector<1x64x64xbf16>
    %117 = vector.shape_cast %116 : vector<1x64x64xbf16> to vector<64x64xbf16>
    %cst_134 = arith.constant dense<0.000000e+00> : vector<64x64xf32>
    %118 = tpu.matmul %115, %117, %cst_134 {dimension_numbers = #tpu.dot_dimension_numbers<[1], [0], [0], [1], [0, 0, 1, 1], [], []>} : vector<64x64xbf16>, vector<64x64xbf16>, vector<64x64xf32> -> vector<64x64xf32>
    %119 = arith.addf %112, %118 : vector<64x64xf32>
    %c0_135 = arith.constant 0 : index
    %c2_136 = arith.constant 2 : index
    %c0_137 = arith.constant 0 : index
    %120 = vector.load %arg39[%c0_135, %c2_136, %c0_137] : memref<10x10x64xf32, #tpu.memory_space<vmem>>, vector<8x8x64xf32>
    %121 = vector.shape_cast %120 : vector<8x8x64xf32> to vector<64x64xf32>
    %122 = arith.truncf %121 : vector<64x64xf32> to vector<64x64xbf16>
    %c2_138 = arith.constant 2 : index
    %c0_139 = arith.constant 0 : index
    %c0_140 = arith.constant 0 : index
    %123 = vector.load %arg6[%c2_138, %c0_139, %c0_140] : memref<9x64x64xbf16, #tpu.memory_space<vmem>>, vector<1x64x64xbf16>
    %124 = vector.shape_cast %123 : vector<1x64x64xbf16> to vector<64x64xbf16>
    %cst_141 = arith.constant dense<0.000000e+00> : vector<64x64xf32>
    %125 = tpu.matmul %122, %124, %cst_141 {dimension_numbers = #tpu.dot_dimension_numbers<[1], [0], [0], [1], [0, 0, 1, 1], [], []>} : vector<64x64xbf16>, vector<64x64xbf16>, vector<64x64xf32> -> vector<64x64xf32>
    %126 = arith.addf %119, %125 : vector<64x64xf32>
    %c1_142 = arith.constant 1 : index
    %c0_143 = arith.constant 0 : index
    %c0_144 = arith.constant 0 : index
    %127 = vector.load %arg39[%c1_142, %c0_143, %c0_144] : memref<10x10x64xf32, #tpu.memory_space<vmem>>, vector<8x8x64xf32>
    %128 = vector.shape_cast %127 : vector<8x8x64xf32> to vector<64x64xf32>
    %129 = arith.truncf %128 : vector<64x64xf32> to vector<64x64xbf16>
    %c3_145 = arith.constant 3 : index
    %c0_146 = arith.constant 0 : index
    %c0_147 = arith.constant 0 : index
    %130 = vector.load %arg6[%c3_145, %c0_146, %c0_147] : memref<9x64x64xbf16, #tpu.memory_space<vmem>>, vector<1x64x64xbf16>
    %131 = vector.shape_cast %130 : vector<1x64x64xbf16> to vector<64x64xbf16>
    %cst_148 = arith.constant dense<0.000000e+00> : vector<64x64xf32>
    %132 = tpu.matmul %129, %131, %cst_148 {dimension_numbers = #tpu.dot_dimension_numbers<[1], [0], [0], [1], [0, 0, 1, 1], [], []>} : vector<64x64xbf16>, vector<64x64xbf16>, vector<64x64xf32> -> vector<64x64xf32>
    %133 = arith.addf %126, %132 : vector<64x64xf32>
    %c1_149 = arith.constant 1 : index
    %c1_150 = arith.constant 1 : index
    %c0_151 = arith.constant 0 : index
    %134 = vector.load %arg39[%c1_149, %c1_150, %c0_151] : memref<10x10x64xf32, #tpu.memory_space<vmem>>, vector<8x8x64xf32>
    %135 = vector.shape_cast %134 : vector<8x8x64xf32> to vector<64x64xf32>
    %136 = arith.truncf %135 : vector<64x64xf32> to vector<64x64xbf16>
    %c4_152 = arith.constant 4 : index
    %c0_153 = arith.constant 0 : index
    %c0_154 = arith.constant 0 : index
    %137 = vector.load %arg6[%c4_152, %c0_153, %c0_154] : memref<9x64x64xbf16, #tpu.memory_space<vmem>>, vector<1x64x64xbf16>
    %138 = vector.shape_cast %137 : vector<1x64x64xbf16> to vector<64x64xbf16>
    %cst_155 = arith.constant dense<0.000000e+00> : vector<64x64xf32>
    %139 = tpu.matmul %136, %138, %cst_155 {dimension_numbers = #tpu.dot_dimension_numbers<[1], [0], [0], [1], [0, 0, 1, 1], [], []>} : vector<64x64xbf16>, vector<64x64xbf16>, vector<64x64xf32> -> vector<64x64xf32>
    %140 = arith.addf %133, %139 : vector<64x64xf32>
    %c1_156 = arith.constant 1 : index
    %c2_157 = arith.constant 2 : index
    %c0_158 = arith.constant 0 : index
    %141 = vector.load %arg39[%c1_156, %c2_157, %c0_158] : memref<10x10x64xf32, #tpu.memory_space<vmem>>, vector<8x8x64xf32>
    %142 = vector.shape_cast %141 : vector<8x8x64xf32> to vector<64x64xf32>
    %143 = arith.truncf %142 : vector<64x64xf32> to vector<64x64xbf16>
    %c5_159 = arith.constant 5 : index
    %c0_160 = arith.constant 0 : index
    %c0_161 = arith.constant 0 : index
    %144 = vector.load %arg6[%c5_159, %c0_160, %c0_161] : memref<9x64x64xbf16, #tpu.memory_space<vmem>>, vector<1x64x64xbf16>
    %145 = vector.shape_cast %144 : vector<1x64x64xbf16> to vector<64x64xbf16>
    %cst_162 = arith.constant dense<0.000000e+00> : vector<64x64xf32>
    %146 = tpu.matmul %143, %145, %cst_162 {dimension_numbers = #tpu.dot_dimension_numbers<[1], [0], [0], [1], [0, 0, 1, 1], [], []>} : vector<64x64xbf16>, vector<64x64xbf16>, vector<64x64xf32> -> vector<64x64xf32>
    %147 = arith.addf %140, %146 : vector<64x64xf32>
    %c2_163 = arith.constant 2 : index
    %c0_164 = arith.constant 0 : index
    %c0_165 = arith.constant 0 : index
    %148 = vector.load %arg39[%c2_163, %c0_164, %c0_165] : memref<10x10x64xf32, #tpu.memory_space<vmem>>, vector<8x8x64xf32>
    %149 = vector.shape_cast %148 : vector<8x8x64xf32> to vector<64x64xf32>
    %150 = arith.truncf %149 : vector<64x64xf32> to vector<64x64xbf16>
    %c6_166 = arith.constant 6 : index
    %c0_167 = arith.constant 0 : index
    %c0_168 = arith.constant 0 : index
    %151 = vector.load %arg6[%c6_166, %c0_167, %c0_168] : memref<9x64x64xbf16, #tpu.memory_space<vmem>>, vector<1x64x64xbf16>
    %152 = vector.shape_cast %151 : vector<1x64x64xbf16> to vector<64x64xbf16>
    %cst_169 = arith.constant dense<0.000000e+00> : vector<64x64xf32>
    %153 = tpu.matmul %150, %152, %cst_169 {dimension_numbers = #tpu.dot_dimension_numbers<[1], [0], [0], [1], [0, 0, 1, 1], [], []>} : vector<64x64xbf16>, vector<64x64xbf16>, vector<64x64xf32> -> vector<64x64xf32>
    %154 = arith.addf %147, %153 : vector<64x64xf32>
    %c2_170 = arith.constant 2 : index
    %c1_171 = arith.constant 1 : index
    %c0_172 = arith.constant 0 : index
    %155 = vector.load %arg39[%c2_170, %c1_171, %c0_172] : memref<10x10x64xf32, #tpu.memory_space<vmem>>, vector<8x8x64xf32>
    %156 = vector.shape_cast %155 : vector<8x8x64xf32> to vector<64x64xf32>
    %157 = arith.truncf %156 : vector<64x64xf32> to vector<64x64xbf16>
    %c7_173 = arith.constant 7 : index
    %c0_174 = arith.constant 0 : index
    %c0_175 = arith.constant 0 : index
    %158 = vector.load %arg6[%c7_173, %c0_174, %c0_175] : memref<9x64x64xbf16, #tpu.memory_space<vmem>>, vector<1x64x64xbf16>
    %159 = vector.shape_cast %158 : vector<1x64x64xbf16> to vector<64x64xbf16>
    %cst_176 = arith.constant dense<0.000000e+00> : vector<64x64xf32>
    %160 = tpu.matmul %157, %159, %cst_176 {dimension_numbers = #tpu.dot_dimension_numbers<[1], [0], [0], [1], [0, 0, 1, 1], [], []>} : vector<64x64xbf16>, vector<64x64xbf16>, vector<64x64xf32> -> vector<64x64xf32>
    %161 = arith.addf %154, %160 : vector<64x64xf32>
    %c2_177 = arith.constant 2 : index
    %c2_178 = arith.constant 2 : index
    %c0_179 = arith.constant 0 : index
    %162 = vector.load %arg39[%c2_177, %c2_178, %c0_179] : memref<10x10x64xf32, #tpu.memory_space<vmem>>, vector<8x8x64xf32>
    %163 = vector.shape_cast %162 : vector<8x8x64xf32> to vector<64x64xf32>
    %164 = arith.truncf %163 : vector<64x64xf32> to vector<64x64xbf16>
    %c8_180 = arith.constant 8 : index
    %c0_181 = arith.constant 0 : index
    %c0_182 = arith.constant 0 : index
    %165 = vector.load %arg6[%c8_180, %c0_181, %c0_182] : memref<9x64x64xbf16, #tpu.memory_space<vmem>>, vector<1x64x64xbf16>
    %166 = vector.shape_cast %165 : vector<1x64x64xbf16> to vector<64x64xbf16>
    %cst_183 = arith.constant dense<0.000000e+00> : vector<64x64xf32>
    %167 = tpu.matmul %164, %166, %cst_183 {dimension_numbers = #tpu.dot_dimension_numbers<[1], [0], [0], [1], [0, 0, 1, 1], [], []>} : vector<64x64xbf16>, vector<64x64xbf16>, vector<64x64xf32> -> vector<64x64xf32>
    %168 = arith.addf %161, %167 : vector<64x64xf32>
    %169 = vector.broadcast %103 : vector<1x64xf32> to vector<64x64xf32>
    %170 = arith.mulf %168, %169 : vector<64x64xf32>
    %171 = vector.broadcast %104 : vector<1x64xf32> to vector<64x64xf32>
    %172 = arith.addf %170, %171 : vector<64x64xf32>
    %cst_184 = arith.constant 0.000000e+00 : f32
    %173 = vector.broadcast %cst_184 : f32 to vector<64x64xf32>
    %174 = arith.maximumf %172, %173 : vector<64x64xf32>
    %175 = arith.addf %174, %84 : vector<64x64xf32>
    %176 = vector.shape_cast %175 : vector<64x64xf32> to vector<8x8x64xf32>
    %c1_185 = arith.constant 1 : index
    %c1_186 = arith.constant 1 : index
    %c0_187 = arith.constant 0 : index
    %177 = vector.load %arg40[%c1_185, %c1_186, %c0_187] : memref<10x10x64xf32, #tpu.memory_space<vmem>>, vector<8x8x64xf32>
    tpu.vector_store %arg40[%c1_185, %c1_186, %c0_187], %176 {strides = array<i32>} : memref<10x10x64xf32, #tpu.memory_space<vmem>>, vector<8x8x64xf32>,
    %c0_188 = arith.constant 0 : index
    %c0_189 = arith.constant 0 : index
    %178 = vector.load %arg10[%c0_188, %c0_189] : memref<1x32xf32, #tpu.memory_space<vmem>>, vector<1x32xf32>
    %c0_190 = arith.constant 0 : index
    %c0_191 = arith.constant 0 : index
    %179 = vector.load %arg11[%c0_190, %c0_191] : memref<1x32xf32, #tpu.memory_space<vmem>>, vector<1x32xf32>
    %cst_192 = arith.constant 0.000000e+00 : f32
    %180 = vector.broadcast %cst_192 : f32 to vector<64x32xf32>
    %c0_193 = arith.constant 0 : index
    %c0_194 = arith.constant 0 : index
    %c0_195 = arith.constant 0 : index
    %181 = vector.load %arg40[%c0_193, %c0_194, %c0_195] : memref<10x10x64xf32, #tpu.memory_space<vmem>>, vector<8x8x64xf32>
    %182 = vector.shape_cast %181 : vector<8x8x64xf32> to vector<64x64xf32>
    %183 = arith.truncf %182 : vector<64x64xf32> to vector<64x64xbf16>
    %c0_196 = arith.constant 0 : index
    %c0_197 = arith.constant 0 : index
    %c0_198 = arith.constant 0 : index
    %184 = vector.load %arg9[%c0_196, %c0_197, %c0_198] : memref<9x64x32xbf16, #tpu.memory_space<vmem>>, vector<1x64x32xbf16>
    %185 = vector.shape_cast %184 : vector<1x64x32xbf16> to vector<64x32xbf16>
    %cst_199 = arith.constant dense<0.000000e+00> : vector<64x32xf32>
    %186 = tpu.matmul %183, %185, %cst_199 {dimension_numbers = #tpu.dot_dimension_numbers<[1], [0], [0], [1], [0, 0, 1, 1], [], []>} : vector<64x64xbf16>, vector<64x32xbf16>, vector<64x32xf32> -> vector<64x32xf32>
    %187 = arith.addf %180, %186 : vector<64x32xf32>
    %c0_200 = arith.constant 0 : index
    %c1_201 = arith.constant 1 : index
    %c0_202 = arith.constant 0 : index
    %188 = vector.load %arg40[%c0_200, %c1_201, %c0_202] : memref<10x10x64xf32, #tpu.memory_space<vmem>>, vector<8x8x64xf32>
    %189 = vector.shape_cast %188 : vector<8x8x64xf32> to vector<64x64xf32>
    %190 = arith.truncf %189 : vector<64x64xf32> to vector<64x64xbf16>
    %c1_203 = arith.constant 1 : index
    %c0_204 = arith.constant 0 : index
    %c0_205 = arith.constant 0 : index
    %191 = vector.load %arg9[%c1_203, %c0_204, %c0_205] : memref<9x64x32xbf16, #tpu.memory_space<vmem>>, vector<1x64x32xbf16>
    %192 = vector.shape_cast %191 : vector<1x64x32xbf16> to vector<64x32xbf16>
    %cst_206 = arith.constant dense<0.000000e+00> : vector<64x32xf32>
    %193 = tpu.matmul %190, %192, %cst_206 {dimension_numbers = #tpu.dot_dimension_numbers<[1], [0], [0], [1], [0, 0, 1, 1], [], []>} : vector<64x64xbf16>, vector<64x32xbf16>, vector<64x32xf32> -> vector<64x32xf32>
    %194 = arith.addf %187, %193 : vector<64x32xf32>
    %c0_207 = arith.constant 0 : index
    %c2_208 = arith.constant 2 : index
    %c0_209 = arith.constant 0 : index
    %195 = vector.load %arg40[%c0_207, %c2_208, %c0_209] : memref<10x10x64xf32, #tpu.memory_space<vmem>>, vector<8x8x64xf32>
    %196 = vector.shape_cast %195 : vector<8x8x64xf32> to vector<64x64xf32>
    %197 = arith.truncf %196 : vector<64x64xf32> to vector<64x64xbf16>
    %c2_210 = arith.constant 2 : index
    %c0_211 = arith.constant 0 : index
    %c0_212 = arith.constant 0 : index
    %198 = vector.load %arg9[%c2_210, %c0_211, %c0_212] : memref<9x64x32xbf16, #tpu.memory_space<vmem>>, vector<1x64x32xbf16>
    %199 = vector.shape_cast %198 : vector<1x64x32xbf16> to vector<64x32xbf16>
    %cst_213 = arith.constant dense<0.000000e+00> : vector<64x32xf32>
    %200 = tpu.matmul %197, %199, %cst_213 {dimension_numbers = #tpu.dot_dimension_numbers<[1], [0], [0], [1], [0, 0, 1, 1], [], []>} : vector<64x64xbf16>, vector<64x32xbf16>, vector<64x32xf32> -> vector<64x32xf32>
    %201 = arith.addf %194, %200 : vector<64x32xf32>
    %c1_214 = arith.constant 1 : index
    %c0_215 = arith.constant 0 : index
    %c0_216 = arith.constant 0 : index
    %202 = vector.load %arg40[%c1_214, %c0_215, %c0_216] : memref<10x10x64xf32, #tpu.memory_space<vmem>>, vector<8x8x64xf32>
    %203 = vector.shape_cast %202 : vector<8x8x64xf32> to vector<64x64xf32>
    %204 = arith.truncf %203 : vector<64x64xf32> to vector<64x64xbf16>
    %c3_217 = arith.constant 3 : index
    %c0_218 = arith.constant 0 : index
    %c0_219 = arith.constant 0 : index
    %205 = vector.load %arg9[%c3_217, %c0_218, %c0_219] : memref<9x64x32xbf16, #tpu.memory_space<vmem>>, vector<1x64x32xbf16>
    %206 = vector.shape_cast %205 : vector<1x64x32xbf16> to vector<64x32xbf16>
    %cst_220 = arith.constant dense<0.000000e+00> : vector<64x32xf32>
    %207 = tpu.matmul %204, %206, %cst_220 {dimension_numbers = #tpu.dot_dimension_numbers<[1], [0], [0], [1], [0, 0, 1, 1], [], []>} : vector<64x64xbf16>, vector<64x32xbf16>, vector<64x32xf32> -> vector<64x32xf32>
    %208 = arith.addf %201, %207 : vector<64x32xf32>
    %c1_221 = arith.constant 1 : index
    %c1_222 = arith.constant 1 : index
    %c0_223 = arith.constant 0 : index
    %209 = vector.load %arg40[%c1_221, %c1_222, %c0_223] : memref<10x10x64xf32, #tpu.memory_space<vmem>>, vector<8x8x64xf32>
    %210 = vector.shape_cast %209 : vector<8x8x64xf32> to vector<64x64xf32>
    %211 = arith.truncf %210 : vector<64x64xf32> to vector<64x64xbf16>
    %c4_224 = arith.constant 4 : index
    %c0_225 = arith.constant 0 : index
    %c0_226 = arith.constant 0 : index
    %212 = vector.load %arg9[%c4_224, %c0_225, %c0_226] : memref<9x64x32xbf16, #tpu.memory_space<vmem>>, vector<1x64x32xbf16>
    %213 = vector.shape_cast %212 : vector<1x64x32xbf16> to vector<64x32xbf16>
    %cst_227 = arith.constant dense<0.000000e+00> : vector<64x32xf32>
    %214 = tpu.matmul %211, %213, %cst_227 {dimension_numbers = #tpu.dot_dimension_numbers<[1], [0], [0], [1], [0, 0, 1, 1], [], []>} : vector<64x64xbf16>, vector<64x32xbf16>, vector<64x32xf32> -> vector<64x32xf32>
    %215 = arith.addf %208, %214 : vector<64x32xf32>
    %c1_228 = arith.constant 1 : index
    %c2_229 = arith.constant 2 : index
    %c0_230 = arith.constant 0 : index
    %216 = vector.load %arg40[%c1_228, %c2_229, %c0_230] : memref<10x10x64xf32, #tpu.memory_space<vmem>>, vector<8x8x64xf32>
    %217 = vector.shape_cast %216 : vector<8x8x64xf32> to vector<64x64xf32>
    %218 = arith.truncf %217 : vector<64x64xf32> to vector<64x64xbf16>
    %c5_231 = arith.constant 5 : index
    %c0_232 = arith.constant 0 : index
    %c0_233 = arith.constant 0 : index
    %219 = vector.load %arg9[%c5_231, %c0_232, %c0_233] : memref<9x64x32xbf16, #tpu.memory_space<vmem>>, vector<1x64x32xbf16>
    %220 = vector.shape_cast %219 : vector<1x64x32xbf16> to vector<64x32xbf16>
    %cst_234 = arith.constant dense<0.000000e+00> : vector<64x32xf32>
    %221 = tpu.matmul %218, %220, %cst_234 {dimension_numbers = #tpu.dot_dimension_numbers<[1], [0], [0], [1], [0, 0, 1, 1], [], []>} : vector<64x64xbf16>, vector<64x32xbf16>, vector<64x32xf32> -> vector<64x32xf32>
    %222 = arith.addf %215, %221 : vector<64x32xf32>
    %c2_235 = arith.constant 2 : index
    %c0_236 = arith.constant 0 : index
    %c0_237 = arith.constant 0 : index
    %223 = vector.load %arg40[%c2_235, %c0_236, %c0_237] : memref<10x10x64xf32, #tpu.memory_space<vmem>>, vector<8x8x64xf32>
    %224 = vector.shape_cast %223 : vector<8x8x64xf32> to vector<64x64xf32>
    %225 = arith.truncf %224 : vector<64x64xf32> to vector<64x64xbf16>
    %c6_238 = arith.constant 6 : index
    %c0_239 = arith.constant 0 : index
    %c0_240 = arith.constant 0 : index
    %226 = vector.load %arg9[%c6_238, %c0_239, %c0_240] : memref<9x64x32xbf16, #tpu.memory_space<vmem>>, vector<1x64x32xbf16>
    %227 = vector.shape_cast %226 : vector<1x64x32xbf16> to vector<64x32xbf16>
    %cst_241 = arith.constant dense<0.000000e+00> : vector<64x32xf32>
    %228 = tpu.matmul %225, %227, %cst_241 {dimension_numbers = #tpu.dot_dimension_numbers<[1], [0], [0], [1], [0, 0, 1, 1], [], []>} : vector<64x64xbf16>, vector<64x32xbf16>, vector<64x32xf32> -> vector<64x32xf32>
    %229 = arith.addf %222, %228 : vector<64x32xf32>
    %c2_242 = arith.constant 2 : index
    %c1_243 = arith.constant 1 : index
    %c0_244 = arith.constant 0 : index
    %230 = vector.load %arg40[%c2_242, %c1_243, %c0_244] : memref<10x10x64xf32, #tpu.memory_space<vmem>>, vector<8x8x64xf32>
    %231 = vector.shape_cast %230 : vector<8x8x64xf32> to vector<64x64xf32>
    %232 = arith.truncf %231 : vector<64x64xf32> to vector<64x64xbf16>
    %c7_245 = arith.constant 7 : index
    %c0_246 = arith.constant 0 : index
    %c0_247 = arith.constant 0 : index
    %233 = vector.load %arg9[%c7_245, %c0_246, %c0_247] : memref<9x64x32xbf16, #tpu.memory_space<vmem>>, vector<1x64x32xbf16>
    %234 = vector.shape_cast %233 : vector<1x64x32xbf16> to vector<64x32xbf16>
    %cst_248 = arith.constant dense<0.000000e+00> : vector<64x32xf32>
    %235 = tpu.matmul %232, %234, %cst_248 {dimension_numbers = #tpu.dot_dimension_numbers<[1], [0], [0], [1], [0, 0, 1, 1], [], []>} : vector<64x64xbf16>, vector<64x32xbf16>, vector<64x32xf32> -> vector<64x32xf32>
    %236 = arith.addf %229, %235 : vector<64x32xf32>
    %c2_249 = arith.constant 2 : index
    %c2_250 = arith.constant 2 : index
    %c0_251 = arith.constant 0 : index
    %237 = vector.load %arg40[%c2_249, %c2_250, %c0_251] : memref<10x10x64xf32, #tpu.memory_space<vmem>>, vector<8x8x64xf32>
    %238 = vector.shape_cast %237 : vector<8x8x64xf32> to vector<64x64xf32>
    %239 = arith.truncf %238 : vector<64x64xf32> to vector<64x64xbf16>
    %c8_252 = arith.constant 8 : index
    %c0_253 = arith.constant 0 : index
    %c0_254 = arith.constant 0 : index
    %240 = vector.load %arg9[%c8_252, %c0_253, %c0_254] : memref<9x64x32xbf16, #tpu.memory_space<vmem>>, vector<1x64x32xbf16>
    %241 = vector.shape_cast %240 : vector<1x64x32xbf16> to vector<64x32xbf16>
    %cst_255 = arith.constant dense<0.000000e+00> : vector<64x32xf32>
    %242 = tpu.matmul %239, %241, %cst_255 {dimension_numbers = #tpu.dot_dimension_numbers<[1], [0], [0], [1], [0, 0, 1, 1], [], []>} : vector<64x64xbf16>, vector<64x32xbf16>, vector<64x32xf32> -> vector<64x32xf32>
    %243 = arith.addf %236, %242 : vector<64x32xf32>
    %244 = vector.broadcast %178 : vector<1x32xf32> to vector<64x32xf32>
    %245 = arith.mulf %243, %244 : vector<64x32xf32>
    %246 = vector.broadcast %179 : vector<1x32xf32> to vector<64x32xf32>
    %247 = arith.addf %245, %246 : vector<64x32xf32>
    %cst_256 = arith.constant 0.000000e+00 : f32
    %248 = vector.broadcast %cst_256 : f32 to vector<64x32xf32>
    %249 = arith.maximumf %247, %248 : vector<64x32xf32>
    %250 = vector.shape_cast %249 : vector<64x32xf32> to vector<8x8x32xf32>
    %c1_257 = arith.constant 1 : index
    %c1_258 = arith.constant 1 : index
    %c0_259 = arith.constant 0 : index
    %251 = vector.load %arg41[%c1_257, %c1_258, %c0_259] : memref<10x10x32xf32, #tpu.memory_space<vmem>>, vector<8x8x32xf32>
    tpu.vector_store %arg41[%c1_257, %c1_258, %c0_259], %250 {strides = array<i32>} : memref<10x10x32xf32, #tpu.memory_space<vmem>>, vector<8x8x32xf32>,
    %c0_260 = arith.constant 0 : index
    %c0_261 = arith.constant 0 : index
    %252 = vector.load %arg13[%c0_260, %c0_261] : memref<1x32xf32, #tpu.memory_space<vmem>>, vector<1x32xf32>
    %c0_262 = arith.constant 0 : index
    %c0_263 = arith.constant 0 : index
    %253 = vector.load %arg14[%c0_262, %c0_263] : memref<1x32xf32, #tpu.memory_space<vmem>>, vector<1x32xf32>
    %cst_264 = arith.constant 0.000000e+00 : f32
    %254 = vector.broadcast %cst_264 : f32 to vector<64x32xf32>
    %c0_265 = arith.constant 0 : index
    %c0_266 = arith.constant 0 : index
    %c0_267 = arith.constant 0 : index
    %255 = vector.load %arg41[%c0_265, %c0_266, %c0_267] : memref<10x10x32xf32, #tpu.memory_space<vmem>>, vector<8x8x32xf32>
    %256 = vector.shape_cast %255 : vector<8x8x32xf32> to vector<64x32xf32>
    %257 = arith.truncf %256 : vector<64x32xf32> to vector<64x32xbf16>
    %c0_268 = arith.constant 0 : index
    %c0_269 = arith.constant 0 : index
    %c0_270 = arith.constant 0 : index
    %258 = vector.load %arg12[%c0_268, %c0_269, %c0_270] : memref<9x32x32xbf16, #tpu.memory_space<vmem>>, vector<1x32x32xbf16>
    %259 = vector.shape_cast %258 : vector<1x32x32xbf16> to vector<32x32xbf16>
    %cst_271 = arith.constant dense<0.000000e+00> : vector<64x32xf32>
    %260 = tpu.matmul %257, %259, %cst_271 {dimension_numbers = #tpu.dot_dimension_numbers<[1], [0], [0], [1], [0, 0, 1, 1], [], []>} : vector<64x32xbf16>, vector<32x32xbf16>, vector<64x32xf32> -> vector<64x32xf32>
    %261 = arith.addf %254, %260 : vector<64x32xf32>
    %c0_272 = arith.constant 0 : index
    %c1_273 = arith.constant 1 : index
    %c0_274 = arith.constant 0 : index
    %262 = vector.load %arg41[%c0_272, %c1_273, %c0_274] : memref<10x10x32xf32, #tpu.memory_space<vmem>>, vector<8x8x32xf32>
    %263 = vector.shape_cast %262 : vector<8x8x32xf32> to vector<64x32xf32>
    %264 = arith.truncf %263 : vector<64x32xf32> to vector<64x32xbf16>
    %c1_275 = arith.constant 1 : index
    %c0_276 = arith.constant 0 : index
    %c0_277 = arith.constant 0 : index
    %265 = vector.load %arg12[%c1_275, %c0_276, %c0_277] : memref<9x32x32xbf16, #tpu.memory_space<vmem>>, vector<1x32x32xbf16>
    %266 = vector.shape_cast %265 : vector<1x32x32xbf16> to vector<32x32xbf16>
    %cst_278 = arith.constant dense<0.000000e+00> : vector<64x32xf32>
    %267 = tpu.matmul %264, %266, %cst_278 {dimension_numbers = #tpu.dot_dimension_numbers<[1], [0], [0], [1], [0, 0, 1, 1], [], []>} : vector<64x32xbf16>, vector<32x32xbf16>, vector<64x32xf32> -> vector<64x32xf32>
    %268 = arith.addf %261, %267 : vector<64x32xf32>
    %c0_279 = arith.constant 0 : index
    %c2_280 = arith.constant 2 : index
    %c0_281 = arith.constant 0 : index
    %269 = vector.load %arg41[%c0_279, %c2_280, %c0_281] : memref<10x10x32xf32, #tpu.memory_space<vmem>>, vector<8x8x32xf32>
    %270 = vector.shape_cast %269 : vector<8x8x32xf32> to vector<64x32xf32>
    %271 = arith.truncf %270 : vector<64x32xf32> to vector<64x32xbf16>
    %c2_282 = arith.constant 2 : index
    %c0_283 = arith.constant 0 : index
    %c0_284 = arith.constant 0 : index
    %272 = vector.load %arg12[%c2_282, %c0_283, %c0_284] : memref<9x32x32xbf16, #tpu.memory_space<vmem>>, vector<1x32x32xbf16>
    %273 = vector.shape_cast %272 : vector<1x32x32xbf16> to vector<32x32xbf16>
    %cst_285 = arith.constant dense<0.000000e+00> : vector<64x32xf32>
    %274 = tpu.matmul %271, %273, %cst_285 {dimension_numbers = #tpu.dot_dimension_numbers<[1], [0], [0], [1], [0, 0, 1, 1], [], []>} : vector<64x32xbf16>, vector<32x32xbf16>, vector<64x32xf32> -> vector<64x32xf32>
    %275 = arith.addf %268, %274 : vector<64x32xf32>
    %c1_286 = arith.constant 1 : index
    %c0_287 = arith.constant 0 : index
    %c0_288 = arith.constant 0 : index
    %276 = vector.load %arg41[%c1_286, %c0_287, %c0_288] : memref<10x10x32xf32, #tpu.memory_space<vmem>>, vector<8x8x32xf32>
    %277 = vector.shape_cast %276 : vector<8x8x32xf32> to vector<64x32xf32>
    %278 = arith.truncf %277 : vector<64x32xf32> to vector<64x32xbf16>
    %c3_289 = arith.constant 3 : index
    %c0_290 = arith.constant 0 : index
    %c0_291 = arith.constant 0 : index
    %279 = vector.load %arg12[%c3_289, %c0_290, %c0_291] : memref<9x32x32xbf16, #tpu.memory_space<vmem>>, vector<1x32x32xbf16>
    %280 = vector.shape_cast %279 : vector<1x32x32xbf16> to vector<32x32xbf16>
    %cst_292 = arith.constant dense<0.000000e+00> : vector<64x32xf32>
    %281 = tpu.matmul %278, %280, %cst_292 {dimension_numbers = #tpu.dot_dimension_numbers<[1], [0], [0], [1], [0, 0, 1, 1], [], []>} : vector<64x32xbf16>, vector<32x32xbf16>, vector<64x32xf32> -> vector<64x32xf32>
    %282 = arith.addf %275, %281 : vector<64x32xf32>
    %c1_293 = arith.constant 1 : index
    %c1_294 = arith.constant 1 : index
    %c0_295 = arith.constant 0 : index
    %283 = vector.load %arg41[%c1_293, %c1_294, %c0_295] : memref<10x10x32xf32, #tpu.memory_space<vmem>>, vector<8x8x32xf32>
    %284 = vector.shape_cast %283 : vector<8x8x32xf32> to vector<64x32xf32>
    %285 = arith.truncf %284 : vector<64x32xf32> to vector<64x32xbf16>
    %c4_296 = arith.constant 4 : index
    %c0_297 = arith.constant 0 : index
    %c0_298 = arith.constant 0 : index
    %286 = vector.load %arg12[%c4_296, %c0_297, %c0_298] : memref<9x32x32xbf16, #tpu.memory_space<vmem>>, vector<1x32x32xbf16>
    %287 = vector.shape_cast %286 : vector<1x32x32xbf16> to vector<32x32xbf16>
    %cst_299 = arith.constant dense<0.000000e+00> : vector<64x32xf32>
    %288 = tpu.matmul %285, %287, %cst_299 {dimension_numbers = #tpu.dot_dimension_numbers<[1], [0], [0], [1], [0, 0, 1, 1], [], []>} : vector<64x32xbf16>, vector<32x32xbf16>, vector<64x32xf32> -> vector<64x32xf32>
    %289 = arith.addf %282, %288 : vector<64x32xf32>
    %c1_300 = arith.constant 1 : index
    %c2_301 = arith.constant 2 : index
    %c0_302 = arith.constant 0 : index
    %290 = vector.load %arg41[%c1_300, %c2_301, %c0_302] : memref<10x10x32xf32, #tpu.memory_space<vmem>>, vector<8x8x32xf32>
    %291 = vector.shape_cast %290 : vector<8x8x32xf32> to vector<64x32xf32>
    %292 = arith.truncf %291 : vector<64x32xf32> to vector<64x32xbf16>
    %c5_303 = arith.constant 5 : index
    %c0_304 = arith.constant 0 : index
    %c0_305 = arith.constant 0 : index
    %293 = vector.load %arg12[%c5_303, %c0_304, %c0_305] : memref<9x32x32xbf16, #tpu.memory_space<vmem>>, vector<1x32x32xbf16>
    %294 = vector.shape_cast %293 : vector<1x32x32xbf16> to vector<32x32xbf16>
    %cst_306 = arith.constant dense<0.000000e+00> : vector<64x32xf32>
    %295 = tpu.matmul %292, %294, %cst_306 {dimension_numbers = #tpu.dot_dimension_numbers<[1], [0], [0], [1], [0, 0, 1, 1], [], []>} : vector<64x32xbf16>, vector<32x32xbf16>, vector<64x32xf32> -> vector<64x32xf32>
    %296 = arith.addf %289, %295 : vector<64x32xf32>
    %c2_307 = arith.constant 2 : index
    %c0_308 = arith.constant 0 : index
    %c0_309 = arith.constant 0 : index
    %297 = vector.load %arg41[%c2_307, %c0_308, %c0_309] : memref<10x10x32xf32, #tpu.memory_space<vmem>>, vector<8x8x32xf32>
    %298 = vector.shape_cast %297 : vector<8x8x32xf32> to vector<64x32xf32>
    %299 = arith.truncf %298 : vector<64x32xf32> to vector<64x32xbf16>
    %c6_310 = arith.constant 6 : index
    %c0_311 = arith.constant 0 : index
    %c0_312 = arith.constant 0 : index
    %300 = vector.load %arg12[%c6_310, %c0_311, %c0_312] : memref<9x32x32xbf16, #tpu.memory_space<vmem>>, vector<1x32x32xbf16>
    %301 = vector.shape_cast %300 : vector<1x32x32xbf16> to vector<32x32xbf16>
    %cst_313 = arith.constant dense<0.000000e+00> : vector<64x32xf32>
    %302 = tpu.matmul %299, %301, %cst_313 {dimension_numbers = #tpu.dot_dimension_numbers<[1], [0], [0], [1], [0, 0, 1, 1], [], []>} : vector<64x32xbf16>, vector<32x32xbf16>, vector<64x32xf32> -> vector<64x32xf32>
    %303 = arith.addf %296, %302 : vector<64x32xf32>
    %c2_314 = arith.constant 2 : index
    %c1_315 = arith.constant 1 : index
    %c0_316 = arith.constant 0 : index
    %304 = vector.load %arg41[%c2_314, %c1_315, %c0_316] : memref<10x10x32xf32, #tpu.memory_space<vmem>>, vector<8x8x32xf32>
    %305 = vector.shape_cast %304 : vector<8x8x32xf32> to vector<64x32xf32>
    %306 = arith.truncf %305 : vector<64x32xf32> to vector<64x32xbf16>
    %c7_317 = arith.constant 7 : index
    %c0_318 = arith.constant 0 : index
    %c0_319 = arith.constant 0 : index
    %307 = vector.load %arg12[%c7_317, %c0_318, %c0_319] : memref<9x32x32xbf16, #tpu.memory_space<vmem>>, vector<1x32x32xbf16>
    %308 = vector.shape_cast %307 : vector<1x32x32xbf16> to vector<32x32xbf16>
    %cst_320 = arith.constant dense<0.000000e+00> : vector<64x32xf32>
    %309 = tpu.matmul %306, %308, %cst_320 {dimension_numbers = #tpu.dot_dimension_numbers<[1], [0], [0], [1], [0, 0, 1, 1], [], []>} : vector<64x32xbf16>, vector<32x32xbf16>, vector<64x32xf32> -> vector<64x32xf32>
    %310 = arith.addf %303, %309 : vector<64x32xf32>
    %c2_321 = arith.constant 2 : index
    %c2_322 = arith.constant 2 : index
    %c0_323 = arith.constant 0 : index
    %311 = vector.load %arg41[%c2_321, %c2_322, %c0_323] : memref<10x10x32xf32, #tpu.memory_space<vmem>>, vector<8x8x32xf32>
    %312 = vector.shape_cast %311 : vector<8x8x32xf32> to vector<64x32xf32>
    %313 = arith.truncf %312 : vector<64x32xf32> to vector<64x32xbf16>
    %c8_324 = arith.constant 8 : index
    %c0_325 = arith.constant 0 : index
    %c0_326 = arith.constant 0 : index
    %314 = vector.load %arg12[%c8_324, %c0_325, %c0_326] : memref<9x32x32xbf16, #tpu.memory_space<vmem>>, vector<1x32x32xbf16>
    %315 = vector.shape_cast %314 : vector<1x32x32xbf16> to vector<32x32xbf16>
    %cst_327 = arith.constant dense<0.000000e+00> : vector<64x32xf32>
    %316 = tpu.matmul %313, %315, %cst_327 {dimension_numbers = #tpu.dot_dimension_numbers<[1], [0], [0], [1], [0, 0, 1, 1], [], []>} : vector<64x32xbf16>, vector<32x32xbf16>, vector<64x32xf32> -> vector<64x32xf32>
    %317 = arith.addf %310, %316 : vector<64x32xf32>
    %318 = vector.broadcast %252 : vector<1x32xf32> to vector<64x32xf32>
    %319 = arith.mulf %317, %318 : vector<64x32xf32>
    %320 = vector.broadcast %253 : vector<1x32xf32> to vector<64x32xf32>
    %321 = arith.addf %319, %320 : vector<64x32xf32>
    %cst_328 = arith.constant 0.000000e+00 : f32
    %322 = vector.broadcast %cst_328 : f32 to vector<64x32xf32>
    %323 = arith.maximumf %321, %322 : vector<64x32xf32>
    %324 = arith.truncf %323 : vector<64x32xf32> to vector<64x32xbf16>
    %c0_329 = arith.constant 0 : index
    %c0_330 = arith.constant 0 : index
    %325 = vector.load %arg15[%c0_329, %c0_330] : memref<32x128xbf16, #tpu.memory_space<vmem>>, vector<32x128xbf16>
    %cst_331 = arith.constant dense<0.000000e+00> : vector<64x128xf32>
    %326 = tpu.matmul %324, %325, %cst_331 {dimension_numbers = #tpu.dot_dimension_numbers<[1], [0], [0], [1], [0, 0, 1, 1], [], []>} : vector<64x32xbf16>, vector<32x128xbf16>, vector<64x128xf32> -> vector<64x128xf32>
    %c0_332 = arith.constant 0 : index
    %c0_333 = arith.constant 0 : index
    %327 = vector.load %arg16[%c0_332, %c0_333] : memref<1x128xf32, #tpu.memory_space<vmem>>, vector<1x128xf32>
    %328 = vector.broadcast %327 : vector<1x128xf32> to vector<64x128xf32>
    %329 = arith.addf %326, %328 : vector<64x128xf32>
    %c0_334 = arith.constant 0 : index
    %c0_335 = arith.constant 0 : index
    %330 = vector.load %arg46[%c0_334, %c0_335] : memref<64x128xf32, #tpu.memory_space<vmem>>, vector<64x128xf32>
    %331 = arith.addf %329, %330 : vector<64x128xf32>
    %332 = vector.shape_cast %331 : vector<64x128xf32> to vector<8x8x128xf32>
    %c1_336 = arith.constant 1 : index
    %c1_337 = arith.constant 1 : index
    %c0_338 = arith.constant 0 : index
    %333 = vector.load %arg42[%c1_336, %c1_337, %c0_338] : memref<10x10x128xf32, #tpu.memory_space<vmem>>, vector<8x8x128xf32>
    tpu.vector_store %arg42[%c1_336, %c1_337, %c0_338], %332 {strides = array<i32>} : memref<10x10x128xf32, #tpu.memory_space<vmem>>, vector<8x8x128xf32>,
    %c0_339 = arith.constant 0 : index
    %c0_340 = arith.constant 0 : index
    %334 = vector.load %arg22[%c0_339, %c0_340] : memref<1x64xf32, #tpu.memory_space<vmem>>, vector<1x64xf32>
    %c0_341 = arith.constant 0 : index
    %c0_342 = arith.constant 0 : index
    %335 = vector.load %arg23[%c0_341, %c0_342] : memref<1x64xf32, #tpu.memory_space<vmem>>, vector<1x64xf32>
    %cst_343 = arith.constant 0.000000e+00 : f32
    %336 = vector.broadcast %cst_343 : f32 to vector<64x64xf32>
    %c0_344 = arith.constant 0 : index
    %c0_345 = arith.constant 0 : index
    %c0_346 = arith.constant 0 : index
    %337 = vector.load %arg42[%c0_344, %c0_345, %c0_346] : memref<10x10x128xf32, #tpu.memory_space<vmem>>, vector<8x8x128xf32>
    %338 = vector.shape_cast %337 : vector<8x8x128xf32> to vector<64x128xf32>
    %339 = arith.truncf %338 : vector<64x128xf32> to vector<64x128xbf16>
    %c0_347 = arith.constant 0 : index
    %c0_348 = arith.constant 0 : index
    %c0_349 = arith.constant 0 : index
    %340 = vector.load %arg21[%c0_347, %c0_348, %c0_349] : memref<9x128x64xbf16, #tpu.memory_space<vmem>>, vector<1x128x64xbf16>
    %341 = vector.shape_cast %340 : vector<1x128x64xbf16> to vector<128x64xbf16>
    %cst_350 = arith.constant dense<0.000000e+00> : vector<64x64xf32>
    %342 = tpu.matmul %339, %341, %cst_350 {dimension_numbers = #tpu.dot_dimension_numbers<[1], [0], [0], [1], [0, 0, 1, 1], [], []>} : vector<64x128xbf16>, vector<128x64xbf16>, vector<64x64xf32> -> vector<64x64xf32>
    %343 = arith.addf %336, %342 : vector<64x64xf32>
    %c0_351 = arith.constant 0 : index
    %c1_352 = arith.constant 1 : index
    %c0_353 = arith.constant 0 : index
    %344 = vector.load %arg42[%c0_351, %c1_352, %c0_353] : memref<10x10x128xf32, #tpu.memory_space<vmem>>, vector<8x8x128xf32>
    %345 = vector.shape_cast %344 : vector<8x8x128xf32> to vector<64x128xf32>
    %346 = arith.truncf %345 : vector<64x128xf32> to vector<64x128xbf16>
    %c1_354 = arith.constant 1 : index
    %c0_355 = arith.constant 0 : index
    %c0_356 = arith.constant 0 : index
    %347 = vector.load %arg21[%c1_354, %c0_355, %c0_356] : memref<9x128x64xbf16, #tpu.memory_space<vmem>>, vector<1x128x64xbf16>
    %348 = vector.shape_cast %347 : vector<1x128x64xbf16> to vector<128x64xbf16>
    %cst_357 = arith.constant dense<0.000000e+00> : vector<64x64xf32>
    %349 = tpu.matmul %346, %348, %cst_357 {dimension_numbers = #tpu.dot_dimension_numbers<[1], [0], [0], [1], [0, 0, 1, 1], [], []>} : vector<64x128xbf16>, vector<128x64xbf16>, vector<64x64xf32> -> vector<64x64xf32>
    %350 = arith.addf %343, %349 : vector<64x64xf32>
    %c0_358 = arith.constant 0 : index
    %c2_359 = arith.constant 2 : index
    %c0_360 = arith.constant 0 : index
    %351 = vector.load %arg42[%c0_358, %c2_359, %c0_360] : memref<10x10x128xf32, #tpu.memory_space<vmem>>, vector<8x8x128xf32>
    %352 = vector.shape_cast %351 : vector<8x8x128xf32> to vector<64x128xf32>
    %353 = arith.truncf %352 : vector<64x128xf32> to vector<64x128xbf16>
    %c2_361 = arith.constant 2 : index
    %c0_362 = arith.constant 0 : index
    %c0_363 = arith.constant 0 : index
    %354 = vector.load %arg21[%c2_361, %c0_362, %c0_363] : memref<9x128x64xbf16, #tpu.memory_space<vmem>>, vector<1x128x64xbf16>
    %355 = vector.shape_cast %354 : vector<1x128x64xbf16> to vector<128x64xbf16>
    %cst_364 = arith.constant dense<0.000000e+00> : vector<64x64xf32>
    %356 = tpu.matmul %353, %355, %cst_364 {dimension_numbers = #tpu.dot_dimension_numbers<[1], [0], [0], [1], [0, 0, 1, 1], [], []>} : vector<64x128xbf16>, vector<128x64xbf16>, vector<64x64xf32> -> vector<64x64xf32>
    %357 = arith.addf %350, %356 : vector<64x64xf32>
    %c1_365 = arith.constant 1 : index
    %c0_366 = arith.constant 0 : index
    %c0_367 = arith.constant 0 : index
    %358 = vector.load %arg42[%c1_365, %c0_366, %c0_367] : memref<10x10x128xf32, #tpu.memory_space<vmem>>, vector<8x8x128xf32>
    %359 = vector.shape_cast %358 : vector<8x8x128xf32> to vector<64x128xf32>
    %360 = arith.truncf %359 : vector<64x128xf32> to vector<64x128xbf16>
    %c3_368 = arith.constant 3 : index
    %c0_369 = arith.constant 0 : index
    %c0_370 = arith.constant 0 : index
    %361 = vector.load %arg21[%c3_368, %c0_369, %c0_370] : memref<9x128x64xbf16, #tpu.memory_space<vmem>>, vector<1x128x64xbf16>
    %362 = vector.shape_cast %361 : vector<1x128x64xbf16> to vector<128x64xbf16>
    %cst_371 = arith.constant dense<0.000000e+00> : vector<64x64xf32>
    %363 = tpu.matmul %360, %362, %cst_371 {dimension_numbers = #tpu.dot_dimension_numbers<[1], [0], [0], [1], [0, 0, 1, 1], [], []>} : vector<64x128xbf16>, vector<128x64xbf16>, vector<64x64xf32> -> vector<64x64xf32>
    %364 = arith.addf %357, %363 : vector<64x64xf32>
    %c1_372 = arith.constant 1 : index
    %c1_373 = arith.constant 1 : index
    %c0_374 = arith.constant 0 : index
    %365 = vector.load %arg42[%c1_372, %c1_373, %c0_374] : memref<10x10x128xf32, #tpu.memory_space<vmem>>, vector<8x8x128xf32>
    %366 = vector.shape_cast %365 : vector<8x8x128xf32> to vector<64x128xf32>
    %367 = arith.truncf %366 : vector<64x128xf32> to vector<64x128xbf16>
    %c4_375 = arith.constant 4 : index
    %c0_376 = arith.constant 0 : index
    %c0_377 = arith.constant 0 : index
    %368 = vector.load %arg21[%c4_375, %c0_376, %c0_377] : memref<9x128x64xbf16, #tpu.memory_space<vmem>>, vector<1x128x64xbf16>
    %369 = vector.shape_cast %368 : vector<1x128x64xbf16> to vector<128x64xbf16>
    %cst_378 = arith.constant dense<0.000000e+00> : vector<64x64xf32>
    %370 = tpu.matmul %367, %369, %cst_378 {dimension_numbers = #tpu.dot_dimension_numbers<[1], [0], [0], [1], [0, 0, 1, 1], [], []>} : vector<64x128xbf16>, vector<128x64xbf16>, vector<64x64xf32> -> vector<64x64xf32>
    %371 = arith.addf %364, %370 : vector<64x64xf32>
    %c1_379 = arith.constant 1 : index
    %c2_380 = arith.constant 2 : index
    %c0_381 = arith.constant 0 : index
    %372 = vector.load %arg42[%c1_379, %c2_380, %c0_381] : memref<10x10x128xf32, #tpu.memory_space<vmem>>, vector<8x8x128xf32>
    %373 = vector.shape_cast %372 : vector<8x8x128xf32> to vector<64x128xf32>
    %374 = arith.truncf %373 : vector<64x128xf32> to vector<64x128xbf16>
    %c5_382 = arith.constant 5 : index
    %c0_383 = arith.constant 0 : index
    %c0_384 = arith.constant 0 : index
    %375 = vector.load %arg21[%c5_382, %c0_383, %c0_384] : memref<9x128x64xbf16, #tpu.memory_space<vmem>>, vector<1x128x64xbf16>
    %376 = vector.shape_cast %375 : vector<1x128x64xbf16> to vector<128x64xbf16>
    %cst_385 = arith.constant dense<0.000000e+00> : vector<64x64xf32>
    %377 = tpu.matmul %374, %376, %cst_385 {dimension_numbers = #tpu.dot_dimension_numbers<[1], [0], [0], [1], [0, 0, 1, 1], [], []>} : vector<64x128xbf16>, vector<128x64xbf16>, vector<64x64xf32> -> vector<64x64xf32>
    %378 = arith.addf %371, %377 : vector<64x64xf32>
    %c2_386 = arith.constant 2 : index
    %c0_387 = arith.constant 0 : index
    %c0_388 = arith.constant 0 : index
    %379 = vector.load %arg42[%c2_386, %c0_387, %c0_388] : memref<10x10x128xf32, #tpu.memory_space<vmem>>, vector<8x8x128xf32>
    %380 = vector.shape_cast %379 : vector<8x8x128xf32> to vector<64x128xf32>
    %381 = arith.truncf %380 : vector<64x128xf32> to vector<64x128xbf16>
    %c6_389 = arith.constant 6 : index
    %c0_390 = arith.constant 0 : index
    %c0_391 = arith.constant 0 : index
    %382 = vector.load %arg21[%c6_389, %c0_390, %c0_391] : memref<9x128x64xbf16, #tpu.memory_space<vmem>>, vector<1x128x64xbf16>
    %383 = vector.shape_cast %382 : vector<1x128x64xbf16> to vector<128x64xbf16>
    %cst_392 = arith.constant dense<0.000000e+00> : vector<64x64xf32>
    %384 = tpu.matmul %381, %383, %cst_392 {dimension_numbers = #tpu.dot_dimension_numbers<[1], [0], [0], [1], [0, 0, 1, 1], [], []>} : vector<64x128xbf16>, vector<128x64xbf16>, vector<64x64xf32> -> vector<64x64xf32>
    %385 = arith.addf %378, %384 : vector<64x64xf32>
    %c2_393 = arith.constant 2 : index
    %c1_394 = arith.constant 1 : index
    %c0_395 = arith.constant 0 : index
    %386 = vector.load %arg42[%c2_393, %c1_394, %c0_395] : memref<10x10x128xf32, #tpu.memory_space<vmem>>, vector<8x8x128xf32>
    %387 = vector.shape_cast %386 : vector<8x8x128xf32> to vector<64x128xf32>
    %388 = arith.truncf %387 : vector<64x128xf32> to vector<64x128xbf16>
    %c7_396 = arith.constant 7 : index
    %c0_397 = arith.constant 0 : index
    %c0_398 = arith.constant 0 : index
    %389 = vector.load %arg21[%c7_396, %c0_397, %c0_398] : memref<9x128x64xbf16, #tpu.memory_space<vmem>>, vector<1x128x64xbf16>
    %390 = vector.shape_cast %389 : vector<1x128x64xbf16> to vector<128x64xbf16>
    %cst_399 = arith.constant dense<0.000000e+00> : vector<64x64xf32>
    %391 = tpu.matmul %388, %390, %cst_399 {dimension_numbers = #tpu.dot_dimension_numbers<[1], [0], [0], [1], [0, 0, 1, 1], [], []>} : vector<64x128xbf16>, vector<128x64xbf16>, vector<64x64xf32> -> vector<64x64xf32>
    %392 = arith.addf %385, %391 : vector<64x64xf32>
    %c2_400 = arith.constant 2 : index
    %c2_401 = arith.constant 2 : index
    %c0_402 = arith.constant 0 : index
    %393 = vector.load %arg42[%c2_400, %c2_401, %c0_402] : memref<10x10x128xf32, #tpu.memory_space<vmem>>, vector<8x8x128xf32>
    %394 = vector.shape_cast %393 : vector<8x8x128xf32> to vector<64x128xf32>
    %395 = arith.truncf %394 : vector<64x128xf32> to vector<64x128xbf16>
    %c8_403 = arith.constant 8 : index
    %c0_404 = arith.constant 0 : index
    %c0_405 = arith.constant 0 : index
    %396 = vector.load %arg21[%c8_403, %c0_404, %c0_405] : memref<9x128x64xbf16, #tpu.memory_space<vmem>>, vector<1x128x64xbf16>
    %397 = vector.shape_cast %396 : vector<1x128x64xbf16> to vector<128x64xbf16>
    %cst_406 = arith.constant dense<0.000000e+00> : vector<64x64xf32>
    %398 = tpu.matmul %395, %397, %cst_406 {dimension_numbers = #tpu.dot_dimension_numbers<[1], [0], [0], [1], [0, 0, 1, 1], [], []>} : vector<64x128xbf16>, vector<128x64xbf16>, vector<64x64xf32> -> vector<64x64xf32>
    %399 = arith.addf %392, %398 : vector<64x64xf32>
    %400 = vector.broadcast %334 : vector<1x64xf32> to vector<64x64xf32>
    %401 = arith.mulf %399, %400 : vector<64x64xf32>
    %402 = vector.broadcast %335 : vector<1x64xf32> to vector<64x64xf32>
    %403 = arith.addf %401, %402 : vector<64x64xf32>
    %cst_407 = arith.constant 0.000000e+00 : f32
    %404 = vector.broadcast %cst_407 : f32 to vector<64x64xf32>
    %405 = arith.maximumf %403, %404 : vector<64x64xf32>
    %406 = vector.shape_cast %405 : vector<64x64xf32> to vector<8x8x64xf32>
    %c1_408 = arith.constant 1 : index
    %c1_409 = arith.constant 1 : index
    %c0_410 = arith.constant 0 : index
    %407 = vector.load %arg43[%c1_408, %c1_409, %c0_410] : memref<10x10x64xf32, #tpu.memory_space<vmem>>, vector<8x8x64xf32>
    tpu.vector_store %arg43[%c1_408, %c1_409, %c0_410], %406 {strides = array<i32>} : memref<10x10x64xf32, #tpu.memory_space<vmem>>, vector<8x8x64xf32>,
    %c0_411 = arith.constant 0 : index
    %c0_412 = arith.constant 0 : index
    %408 = vector.load %arg25[%c0_411, %c0_412] : memref<1x64xf32, #tpu.memory_space<vmem>>, vector<1x64xf32>
    %c0_413 = arith.constant 0 : index
    %c0_414 = arith.constant 0 : index
    %409 = vector.load %arg26[%c0_413, %c0_414] : memref<1x64xf32, #tpu.memory_space<vmem>>, vector<1x64xf32>
    %cst_415 = arith.constant 0.000000e+00 : f32
    %410 = vector.broadcast %cst_415 : f32 to vector<64x64xf32>
    %c0_416 = arith.constant 0 : index
    %c0_417 = arith.constant 0 : index
    %c0_418 = arith.constant 0 : index
    %411 = vector.load %arg43[%c0_416, %c0_417, %c0_418] : memref<10x10x64xf32, #tpu.memory_space<vmem>>, vector<8x8x64xf32>
    %412 = vector.shape_cast %411 : vector<8x8x64xf32> to vector<64x64xf32>
    %413 = arith.truncf %412 : vector<64x64xf32> to vector<64x64xbf16>
    %c0_419 = arith.constant 0 : index
    %c0_420 = arith.constant 0 : index
    %c0_421 = arith.constant 0 : index
    %414 = vector.load %arg24[%c0_419, %c0_420, %c0_421] : memref<9x64x64xbf16, #tpu.memory_space<vmem>>, vector<1x64x64xbf16>
    %415 = vector.shape_cast %414 : vector<1x64x64xbf16> to vector<64x64xbf16>
    %cst_422 = arith.constant dense<0.000000e+00> : vector<64x64xf32>
    %416 = tpu.matmul %413, %415, %cst_422 {dimension_numbers = #tpu.dot_dimension_numbers<[1], [0], [0], [1], [0, 0, 1, 1], [], []>} : vector<64x64xbf16>, vector<64x64xbf16>, vector<64x64xf32> -> vector<64x64xf32>
    %417 = arith.addf %410, %416 : vector<64x64xf32>
    %c0_423 = arith.constant 0 : index
    %c1_424 = arith.constant 1 : index
    %c0_425 = arith.constant 0 : index
    %418 = vector.load %arg43[%c0_423, %c1_424, %c0_425] : memref<10x10x64xf32, #tpu.memory_space<vmem>>, vector<8x8x64xf32>
    %419 = vector.shape_cast %418 : vector<8x8x64xf32> to vector<64x64xf32>
    %420 = arith.truncf %419 : vector<64x64xf32> to vector<64x64xbf16>
    %c1_426 = arith.constant 1 : index
    %c0_427 = arith.constant 0 : index
    %c0_428 = arith.constant 0 : index
    %421 = vector.load %arg24[%c1_426, %c0_427, %c0_428] : memref<9x64x64xbf16, #tpu.memory_space<vmem>>, vector<1x64x64xbf16>
    %422 = vector.shape_cast %421 : vector<1x64x64xbf16> to vector<64x64xbf16>
    %cst_429 = arith.constant dense<0.000000e+00> : vector<64x64xf32>
    %423 = tpu.matmul %420, %422, %cst_429 {dimension_numbers = #tpu.dot_dimension_numbers<[1], [0], [0], [1], [0, 0, 1, 1], [], []>} : vector<64x64xbf16>, vector<64x64xbf16>, vector<64x64xf32> -> vector<64x64xf32>
    %424 = arith.addf %417, %423 : vector<64x64xf32>
    %c0_430 = arith.constant 0 : index
    %c2_431 = arith.constant 2 : index
    %c0_432 = arith.constant 0 : index
    %425 = vector.load %arg43[%c0_430, %c2_431, %c0_432] : memref<10x10x64xf32, #tpu.memory_space<vmem>>, vector<8x8x64xf32>
    %426 = vector.shape_cast %425 : vector<8x8x64xf32> to vector<64x64xf32>
    %427 = arith.truncf %426 : vector<64x64xf32> to vector<64x64xbf16>
    %c2_433 = arith.constant 2 : index
    %c0_434 = arith.constant 0 : index
    %c0_435 = arith.constant 0 : index
    %428 = vector.load %arg24[%c2_433, %c0_434, %c0_435] : memref<9x64x64xbf16, #tpu.memory_space<vmem>>, vector<1x64x64xbf16>
    %429 = vector.shape_cast %428 : vector<1x64x64xbf16> to vector<64x64xbf16>
    %cst_436 = arith.constant dense<0.000000e+00> : vector<64x64xf32>
    %430 = tpu.matmul %427, %429, %cst_436 {dimension_numbers = #tpu.dot_dimension_numbers<[1], [0], [0], [1], [0, 0, 1, 1], [], []>} : vector<64x64xbf16>, vector<64x64xbf16>, vector<64x64xf32> -> vector<64x64xf32>
    %431 = arith.addf %424, %430 : vector<64x64xf32>
    %c1_437 = arith.constant 1 : index
    %c0_438 = arith.constant 0 : index
    %c0_439 = arith.constant 0 : index
    %432 = vector.load %arg43[%c1_437, %c0_438, %c0_439] : memref<10x10x64xf32, #tpu.memory_space<vmem>>, vector<8x8x64xf32>
    %433 = vector.shape_cast %432 : vector<8x8x64xf32> to vector<64x64xf32>
    %434 = arith.truncf %433 : vector<64x64xf32> to vector<64x64xbf16>
    %c3_440 = arith.constant 3 : index
    %c0_441 = arith.constant 0 : index
    %c0_442 = arith.constant 0 : index
    %435 = vector.load %arg24[%c3_440, %c0_441, %c0_442] : memref<9x64x64xbf16, #tpu.memory_space<vmem>>, vector<1x64x64xbf16>
    %436 = vector.shape_cast %435 : vector<1x64x64xbf16> to vector<64x64xbf16>
    %cst_443 = arith.constant dense<0.000000e+00> : vector<64x64xf32>
    %437 = tpu.matmul %434, %436, %cst_443 {dimension_numbers = #tpu.dot_dimension_numbers<[1], [0], [0], [1], [0, 0, 1, 1], [], []>} : vector<64x64xbf16>, vector<64x64xbf16>, vector<64x64xf32> -> vector<64x64xf32>
    %438 = arith.addf %431, %437 : vector<64x64xf32>
    %c1_444 = arith.constant 1 : index
    %c1_445 = arith.constant 1 : index
    %c0_446 = arith.constant 0 : index
    %439 = vector.load %arg43[%c1_444, %c1_445, %c0_446] : memref<10x10x64xf32, #tpu.memory_space<vmem>>, vector<8x8x64xf32>
    %440 = vector.shape_cast %439 : vector<8x8x64xf32> to vector<64x64xf32>
    %441 = arith.truncf %440 : vector<64x64xf32> to vector<64x64xbf16>
    %c4_447 = arith.constant 4 : index
    %c0_448 = arith.constant 0 : index
    %c0_449 = arith.constant 0 : index
    %442 = vector.load %arg24[%c4_447, %c0_448, %c0_449] : memref<9x64x64xbf16, #tpu.memory_space<vmem>>, vector<1x64x64xbf16>
    %443 = vector.shape_cast %442 : vector<1x64x64xbf16> to vector<64x64xbf16>
    %cst_450 = arith.constant dense<0.000000e+00> : vector<64x64xf32>
    %444 = tpu.matmul %441, %443, %cst_450 {dimension_numbers = #tpu.dot_dimension_numbers<[1], [0], [0], [1], [0, 0, 1, 1], [], []>} : vector<64x64xbf16>, vector<64x64xbf16>, vector<64x64xf32> -> vector<64x64xf32>
    %445 = arith.addf %438, %444 : vector<64x64xf32>
    %c1_451 = arith.constant 1 : index
    %c2_452 = arith.constant 2 : index
    %c0_453 = arith.constant 0 : index
    %446 = vector.load %arg43[%c1_451, %c2_452, %c0_453] : memref<10x10x64xf32, #tpu.memory_space<vmem>>, vector<8x8x64xf32>
    %447 = vector.shape_cast %446 : vector<8x8x64xf32> to vector<64x64xf32>
    %448 = arith.truncf %447 : vector<64x64xf32> to vector<64x64xbf16>
    %c5_454 = arith.constant 5 : index
    %c0_455 = arith.constant 0 : index
    %c0_456 = arith.constant 0 : index
    %449 = vector.load %arg24[%c5_454, %c0_455, %c0_456] : memref<9x64x64xbf16, #tpu.memory_space<vmem>>, vector<1x64x64xbf16>
    %450 = vector.shape_cast %449 : vector<1x64x64xbf16> to vector<64x64xbf16>
    %cst_457 = arith.constant dense<0.000000e+00> : vector<64x64xf32>
    %451 = tpu.matmul %448, %450, %cst_457 {dimension_numbers = #tpu.dot_dimension_numbers<[1], [0], [0], [1], [0, 0, 1, 1], [], []>} : vector<64x64xbf16>, vector<64x64xbf16>, vector<64x64xf32> -> vector<64x64xf32>
    %452 = arith.addf %445, %451 : vector<64x64xf32>
    %c2_458 = arith.constant 2 : index
    %c0_459 = arith.constant 0 : index
    %c0_460 = arith.constant 0 : index
    %453 = vector.load %arg43[%c2_458, %c0_459, %c0_460] : memref<10x10x64xf32, #tpu.memory_space<vmem>>, vector<8x8x64xf32>
    %454 = vector.shape_cast %453 : vector<8x8x64xf32> to vector<64x64xf32>
    %455 = arith.truncf %454 : vector<64x64xf32> to vector<64x64xbf16>
    %c6_461 = arith.constant 6 : index
    %c0_462 = arith.constant 0 : index
    %c0_463 = arith.constant 0 : index
    %456 = vector.load %arg24[%c6_461, %c0_462, %c0_463] : memref<9x64x64xbf16, #tpu.memory_space<vmem>>, vector<1x64x64xbf16>
    %457 = vector.shape_cast %456 : vector<1x64x64xbf16> to vector<64x64xbf16>
    %cst_464 = arith.constant dense<0.000000e+00> : vector<64x64xf32>
    %458 = tpu.matmul %455, %457, %cst_464 {dimension_numbers = #tpu.dot_dimension_numbers<[1], [0], [0], [1], [0, 0, 1, 1], [], []>} : vector<64x64xbf16>, vector<64x64xbf16>, vector<64x64xf32> -> vector<64x64xf32>
    %459 = arith.addf %452, %458 : vector<64x64xf32>
    %c2_465 = arith.constant 2 : index
    %c1_466 = arith.constant 1 : index
    %c0_467 = arith.constant 0 : index
    %460 = vector.load %arg43[%c2_465, %c1_466, %c0_467] : memref<10x10x64xf32, #tpu.memory_space<vmem>>, vector<8x8x64xf32>
    %461 = vector.shape_cast %460 : vector<8x8x64xf32> to vector<64x64xf32>
    %462 = arith.truncf %461 : vector<64x64xf32> to vector<64x64xbf16>
    %c7_468 = arith.constant 7 : index
    %c0_469 = arith.constant 0 : index
    %c0_470 = arith.constant 0 : index
    %463 = vector.load %arg24[%c7_468, %c0_469, %c0_470] : memref<9x64x64xbf16, #tpu.memory_space<vmem>>, vector<1x64x64xbf16>
    %464 = vector.shape_cast %463 : vector<1x64x64xbf16> to vector<64x64xbf16>
    %cst_471 = arith.constant dense<0.000000e+00> : vector<64x64xf32>
    %465 = tpu.matmul %462, %464, %cst_471 {dimension_numbers = #tpu.dot_dimension_numbers<[1], [0], [0], [1], [0, 0, 1, 1], [], []>} : vector<64x64xbf16>, vector<64x64xbf16>, vector<64x64xf32> -> vector<64x64xf32>
    %466 = arith.addf %459, %465 : vector<64x64xf32>
    %c2_472 = arith.constant 2 : index
    %c2_473 = arith.constant 2 : index
    %c0_474 = arith.constant 0 : index
    %467 = vector.load %arg43[%c2_472, %c2_473, %c0_474] : memref<10x10x64xf32, #tpu.memory_space<vmem>>, vector<8x8x64xf32>
    %468 = vector.shape_cast %467 : vector<8x8x64xf32> to vector<64x64xf32>
    %469 = arith.truncf %468 : vector<64x64xf32> to vector<64x64xbf16>
    %c8_475 = arith.constant 8 : index
    %c0_476 = arith.constant 0 : index
    %c0_477 = arith.constant 0 : index
    %470 = vector.load %arg24[%c8_475, %c0_476, %c0_477] : memref<9x64x64xbf16, #tpu.memory_space<vmem>>, vector<1x64x64xbf16>
    %471 = vector.shape_cast %470 : vector<1x64x64xbf16> to vector<64x64xbf16>
    %cst_478 = arith.constant dense<0.000000e+00> : vector<64x64xf32>
    %472 = tpu.matmul %469, %471, %cst_478 {dimension_numbers = #tpu.dot_dimension_numbers<[1], [0], [0], [1], [0, 0, 1, 1], [], []>} : vector<64x64xbf16>, vector<64x64xbf16>, vector<64x64xf32> -> vector<64x64xf32>
    %473 = arith.addf %466, %472 : vector<64x64xf32>
    %474 = vector.broadcast %408 : vector<1x64xf32> to vector<64x64xf32>
    %475 = arith.mulf %473, %474 : vector<64x64xf32>
    %476 = vector.broadcast %409 : vector<1x64xf32> to vector<64x64xf32>
    %477 = arith.addf %475, %476 : vector<64x64xf32>
    %cst_479 = arith.constant 0.000000e+00 : f32
    %478 = vector.broadcast %cst_479 : f32 to vector<64x64xf32>
    %479 = arith.maximumf %477, %478 : vector<64x64xf32>
    %480 = arith.truncf %479 : vector<64x64xf32> to vector<64x64xbf16>
    %c0_480 = arith.constant 0 : index
    %c0_481 = arith.constant 0 : index
    %481 = vector.load %arg27[%c0_480, %c0_481] : memref<64x256xbf16, #tpu.memory_space<vmem>>, vector<64x256xbf16>
    %cst_482 = arith.constant dense<0.000000e+00> : vector<64x256xf32>
    %482 = tpu.matmul %480, %481, %cst_482 {dimension_numbers = #tpu.dot_dimension_numbers<[1], [0], [0], [1], [0, 0, 1, 1], [], []>} : vector<64x64xbf16>, vector<64x256xbf16>, vector<64x256xf32> -> vector<64x256xf32>
    %c0_483 = arith.constant 0 : index
    %c0_484 = arith.constant 0 : index
    %483 = vector.load %arg28[%c0_483, %c0_484] : memref<1x256xf32, #tpu.memory_space<vmem>>, vector<1x256xf32>
    %484 = vector.broadcast %483 : vector<1x256xf32> to vector<64x256xf32>
    %485 = arith.addf %482, %484 : vector<64x256xf32>
    %c0_485 = arith.constant 0 : index
    %c0_486 = arith.constant 0 : index
    %486 = vector.load %arg47[%c0_485, %c0_486] : memref<64x256xf32, #tpu.memory_space<vmem>>, vector<64x256xf32>
    %487 = arith.addf %485, %486 : vector<64x256xf32>
    %488 = vector.shape_cast %487 : vector<64x256xf32> to vector<8x8x256xf32>
    %c1_487 = arith.constant 1 : index
    %c1_488 = arith.constant 1 : index
    %c0_489 = arith.constant 0 : index
    %489 = vector.load %arg44[%c1_487, %c1_488, %c0_489] : memref<10x10x256xf32, #tpu.memory_space<vmem>>, vector<8x8x256xf32>
    tpu.vector_store %arg44[%c1_487, %c1_488, %c0_489], %488 {strides = array<i32>} : memref<10x10x256xf32, #tpu.memory_space<vmem>>, vector<8x8x256xf32>,
    %c0_490 = arith.constant 0 : index
    %c0_491 = arith.constant 0 : index
    %490 = vector.load %arg30[%c0_490, %c0_491] : memref<1x48xf32, #tpu.memory_space<vmem>>, vector<1x48xf32>
    %c0_492 = arith.constant 0 : index
    %c0_493 = arith.constant 0 : index
    %491 = vector.load %arg31[%c0_492, %c0_493] : memref<1x48xf32, #tpu.memory_space<vmem>>, vector<1x48xf32>
    %cst_494 = arith.constant 0.000000e+00 : f32
    %492 = vector.broadcast %cst_494 : f32 to vector<64x48xf32>
    %c0_495 = arith.constant 0 : index
    %c0_496 = arith.constant 0 : index
    %c0_497 = arith.constant 0 : index
    %493 = vector.load %arg44[%c0_495, %c0_496, %c0_497] : memref<10x10x256xf32, #tpu.memory_space<vmem>>, vector<8x8x256xf32>
    %494 = vector.shape_cast %493 : vector<8x8x256xf32> to vector<64x256xf32>
    %495 = arith.truncf %494 : vector<64x256xf32> to vector<64x256xbf16>
    %c0_498 = arith.constant 0 : index
    %c0_499 = arith.constant 0 : index
    %c0_500 = arith.constant 0 : index
    %496 = vector.load %arg29[%c0_498, %c0_499, %c0_500] : memref<9x256x48xbf16, #tpu.memory_space<vmem>>, vector<1x256x48xbf16>
    %497 = vector.shape_cast %496 : vector<1x256x48xbf16> to vector<256x48xbf16>
    %cst_501 = arith.constant dense<0.000000e+00> : vector<64x48xf32>
    %498 = tpu.matmul %495, %497, %cst_501 {dimension_numbers = #tpu.dot_dimension_numbers<[1], [0], [0], [1], [0, 0, 1, 1], [], []>} : vector<64x256xbf16>, vector<256x48xbf16>, vector<64x48xf32> -> vector<64x48xf32>
    %499 = arith.addf %492, %498 : vector<64x48xf32>
    %c0_502 = arith.constant 0 : index
    %c1_503 = arith.constant 1 : index
    %c0_504 = arith.constant 0 : index
    %500 = vector.load %arg44[%c0_502, %c1_503, %c0_504] : memref<10x10x256xf32, #tpu.memory_space<vmem>>, vector<8x8x256xf32>
    %501 = vector.shape_cast %500 : vector<8x8x256xf32> to vector<64x256xf32>
    %502 = arith.truncf %501 : vector<64x256xf32> to vector<64x256xbf16>
    %c1_505 = arith.constant 1 : index
    %c0_506 = arith.constant 0 : index
    %c0_507 = arith.constant 0 : index
    %503 = vector.load %arg29[%c1_505, %c0_506, %c0_507] : memref<9x256x48xbf16, #tpu.memory_space<vmem>>, vector<1x256x48xbf16>
    %504 = vector.shape_cast %503 : vector<1x256x48xbf16> to vector<256x48xbf16>
    %cst_508 = arith.constant dense<0.000000e+00> : vector<64x48xf32>
    %505 = tpu.matmul %502, %504, %cst_508 {dimension_numbers = #tpu.dot_dimension_numbers<[1], [0], [0], [1], [0, 0, 1, 1], [], []>} : vector<64x256xbf16>, vector<256x48xbf16>, vector<64x48xf32> -> vector<64x48xf32>
    %506 = arith.addf %499, %505 : vector<64x48xf32>
    %c0_509 = arith.constant 0 : index
    %c2_510 = arith.constant 2 : index
    %c0_511 = arith.constant 0 : index
    %507 = vector.load %arg44[%c0_509, %c2_510, %c0_511] : memref<10x10x256xf32, #tpu.memory_space<vmem>>, vector<8x8x256xf32>
    %508 = vector.shape_cast %507 : vector<8x8x256xf32> to vector<64x256xf32>
    %509 = arith.truncf %508 : vector<64x256xf32> to vector<64x256xbf16>
    %c2_512 = arith.constant 2 : index
    %c0_513 = arith.constant 0 : index
    %c0_514 = arith.constant 0 : index
    %510 = vector.load %arg29[%c2_512, %c0_513, %c0_514] : memref<9x256x48xbf16, #tpu.memory_space<vmem>>, vector<1x256x48xbf16>
    %511 = vector.shape_cast %510 : vector<1x256x48xbf16> to vector<256x48xbf16>
    %cst_515 = arith.constant dense<0.000000e+00> : vector<64x48xf32>
    %512 = tpu.matmul %509, %511, %cst_515 {dimension_numbers = #tpu.dot_dimension_numbers<[1], [0], [0], [1], [0, 0, 1, 1], [], []>} : vector<64x256xbf16>, vector<256x48xbf16>, vector<64x48xf32> -> vector<64x48xf32>
    %513 = arith.addf %506, %512 : vector<64x48xf32>
    %c1_516 = arith.constant 1 : index
    %c0_517 = arith.constant 0 : index
    %c0_518 = arith.constant 0 : index
    %514 = vector.load %arg44[%c1_516, %c0_517, %c0_518] : memref<10x10x256xf32, #tpu.memory_space<vmem>>, vector<8x8x256xf32>
    %515 = vector.shape_cast %514 : vector<8x8x256xf32> to vector<64x256xf32>
    %516 = arith.truncf %515 : vector<64x256xf32> to vector<64x256xbf16>
    %c3_519 = arith.constant 3 : index
    %c0_520 = arith.constant 0 : index
    %c0_521 = arith.constant 0 : index
    %517 = vector.load %arg29[%c3_519, %c0_520, %c0_521] : memref<9x256x48xbf16, #tpu.memory_space<vmem>>, vector<1x256x48xbf16>
    %518 = vector.shape_cast %517 : vector<1x256x48xbf16> to vector<256x48xbf16>
    %cst_522 = arith.constant dense<0.000000e+00> : vector<64x48xf32>
    %519 = tpu.matmul %516, %518, %cst_522 {dimension_numbers = #tpu.dot_dimension_numbers<[1], [0], [0], [1], [0, 0, 1, 1], [], []>} : vector<64x256xbf16>, vector<256x48xbf16>, vector<64x48xf32> -> vector<64x48xf32>
    %520 = arith.addf %513, %519 : vector<64x48xf32>
    %c1_523 = arith.constant 1 : index
    %c1_524 = arith.constant 1 : index
    %c0_525 = arith.constant 0 : index
    %521 = vector.load %arg44[%c1_523, %c1_524, %c0_525] : memref<10x10x256xf32, #tpu.memory_space<vmem>>, vector<8x8x256xf32>
    %522 = vector.shape_cast %521 : vector<8x8x256xf32> to vector<64x256xf32>
    %523 = arith.truncf %522 : vector<64x256xf32> to vector<64x256xbf16>
    %c4_526 = arith.constant 4 : index
    %c0_527 = arith.constant 0 : index
    %c0_528 = arith.constant 0 : index
    %524 = vector.load %arg29[%c4_526, %c0_527, %c0_528] : memref<9x256x48xbf16, #tpu.memory_space<vmem>>, vector<1x256x48xbf16>
    %525 = vector.shape_cast %524 : vector<1x256x48xbf16> to vector<256x48xbf16>
    %cst_529 = arith.constant dense<0.000000e+00> : vector<64x48xf32>
    %526 = tpu.matmul %523, %525, %cst_529 {dimension_numbers = #tpu.dot_dimension_numbers<[1], [0], [0], [1], [0, 0, 1, 1], [], []>} : vector<64x256xbf16>, vector<256x48xbf16>, vector<64x48xf32> -> vector<64x48xf32>
    %527 = arith.addf %520, %526 : vector<64x48xf32>
    %c1_530 = arith.constant 1 : index
    %c2_531 = arith.constant 2 : index
    %c0_532 = arith.constant 0 : index
    %528 = vector.load %arg44[%c1_530, %c2_531, %c0_532] : memref<10x10x256xf32, #tpu.memory_space<vmem>>, vector<8x8x256xf32>
    %529 = vector.shape_cast %528 : vector<8x8x256xf32> to vector<64x256xf32>
    %530 = arith.truncf %529 : vector<64x256xf32> to vector<64x256xbf16>
    %c5_533 = arith.constant 5 : index
    %c0_534 = arith.constant 0 : index
    %c0_535 = arith.constant 0 : index
    %531 = vector.load %arg29[%c5_533, %c0_534, %c0_535] : memref<9x256x48xbf16, #tpu.memory_space<vmem>>, vector<1x256x48xbf16>
    %532 = vector.shape_cast %531 : vector<1x256x48xbf16> to vector<256x48xbf16>
    %cst_536 = arith.constant dense<0.000000e+00> : vector<64x48xf32>
    %533 = tpu.matmul %530, %532, %cst_536 {dimension_numbers = #tpu.dot_dimension_numbers<[1], [0], [0], [1], [0, 0, 1, 1], [], []>} : vector<64x256xbf16>, vector<256x48xbf16>, vector<64x48xf32> -> vector<64x48xf32>
    %534 = arith.addf %527, %533 : vector<64x48xf32>
    %c2_537 = arith.constant 2 : index
    %c0_538 = arith.constant 0 : index
    %c0_539 = arith.constant 0 : index
    %535 = vector.load %arg44[%c2_537, %c0_538, %c0_539] : memref<10x10x256xf32, #tpu.memory_space<vmem>>, vector<8x8x256xf32>
    %536 = vector.shape_cast %535 : vector<8x8x256xf32> to vector<64x256xf32>
    %537 = arith.truncf %536 : vector<64x256xf32> to vector<64x256xbf16>
    %c6_540 = arith.constant 6 : index
    %c0_541 = arith.constant 0 : index
    %c0_542 = arith.constant 0 : index
    %538 = vector.load %arg29[%c6_540, %c0_541, %c0_542] : memref<9x256x48xbf16, #tpu.memory_space<vmem>>, vector<1x256x48xbf16>
    %539 = vector.shape_cast %538 : vector<1x256x48xbf16> to vector<256x48xbf16>
    %cst_543 = arith.constant dense<0.000000e+00> : vector<64x48xf32>
    %540 = tpu.matmul %537, %539, %cst_543 {dimension_numbers = #tpu.dot_dimension_numbers<[1], [0], [0], [1], [0, 0, 1, 1], [], []>} : vector<64x256xbf16>, vector<256x48xbf16>, vector<64x48xf32> -> vector<64x48xf32>
    %541 = arith.addf %534, %540 : vector<64x48xf32>
    %c2_544 = arith.constant 2 : index
    %c1_545 = arith.constant 1 : index
    %c0_546 = arith.constant 0 : index
    %542 = vector.load %arg44[%c2_544, %c1_545, %c0_546] : memref<10x10x256xf32, #tpu.memory_space<vmem>>, vector<8x8x256xf32>
    %543 = vector.shape_cast %542 : vector<8x8x256xf32> to vector<64x256xf32>
    %544 = arith.truncf %543 : vector<64x256xf32> to vector<64x256xbf16>
    %c7_547 = arith.constant 7 : index
    %c0_548 = arith.constant 0 : index
    %c0_549 = arith.constant 0 : index
    %545 = vector.load %arg29[%c7_547, %c0_548, %c0_549] : memref<9x256x48xbf16, #tpu.memory_space<vmem>>, vector<1x256x48xbf16>
    %546 = vector.shape_cast %545 : vector<1x256x48xbf16> to vector<256x48xbf16>
    %cst_550 = arith.constant dense<0.000000e+00> : vector<64x48xf32>
    %547 = tpu.matmul %544, %546, %cst_550 {dimension_numbers = #tpu.dot_dimension_numbers<[1], [0], [0], [1], [0, 0, 1, 1], [], []>} : vector<64x256xbf16>, vector<256x48xbf16>, vector<64x48xf32> -> vector<64x48xf32>
    %548 = arith.addf %541, %547 : vector<64x48xf32>
    %c2_551 = arith.constant 2 : index
    %c2_552 = arith.constant 2 : index
    %c0_553 = arith.constant 0 : index
    %549 = vector.load %arg44[%c2_551, %c2_552, %c0_553] : memref<10x10x256xf32, #tpu.memory_space<vmem>>, vector<8x8x256xf32>
    %550 = vector.shape_cast %549 : vector<8x8x256xf32> to vector<64x256xf32>
    %551 = arith.truncf %550 : vector<64x256xf32> to vector<64x256xbf16>
    %c8_554 = arith.constant 8 : index
    %c0_555 = arith.constant 0 : index
    %c0_556 = arith.constant 0 : index
    %552 = vector.load %arg29[%c8_554, %c0_555, %c0_556] : memref<9x256x48xbf16, #tpu.memory_space<vmem>>, vector<1x256x48xbf16>
    %553 = vector.shape_cast %552 : vector<1x256x48xbf16> to vector<256x48xbf16>
    %cst_557 = arith.constant dense<0.000000e+00> : vector<64x48xf32>
    %554 = tpu.matmul %551, %553, %cst_557 {dimension_numbers = #tpu.dot_dimension_numbers<[1], [0], [0], [1], [0, 0, 1, 1], [], []>} : vector<64x256xbf16>, vector<256x48xbf16>, vector<64x48xf32> -> vector<64x48xf32>
    %555 = arith.addf %548, %554 : vector<64x48xf32>
    %556 = vector.broadcast %490 : vector<1x48xf32> to vector<64x48xf32>
    %557 = arith.mulf %555, %556 : vector<64x48xf32>
    %558 = vector.broadcast %491 : vector<1x48xf32> to vector<64x48xf32>
    %559 = arith.addf %557, %558 : vector<64x48xf32>
    %cst_558 = arith.constant 0.000000e+00 : f32
    %560 = vector.broadcast %cst_558 : f32 to vector<64x48xf32>
    %561 = arith.maximumf %559, %560 : vector<64x48xf32>
    %562 = vector.shape_cast %561 : vector<64x48xf32> to vector<8x8x48xf32>
    %c1_559 = arith.constant 1 : index
    %c1_560 = arith.constant 1 : index
    %c0_561 = arith.constant 0 : index
    %563 = vector.load %arg45[%c1_559, %c1_560, %c0_561] : memref<10x10x48xf32, #tpu.memory_space<vmem>>, vector<8x8x48xf32>
    tpu.vector_store %arg45[%c1_559, %c1_560, %c0_561], %562 {strides = array<i32>} : memref<10x10x48xf32, #tpu.memory_space<vmem>>, vector<8x8x48xf32>,
    %c0_562 = arith.constant 0 : index
    %c0_563 = arith.constant 0 : index
    %564 = vector.load %arg33[%c0_562, %c0_563] : memref<1x48xf32, #tpu.memory_space<vmem>>, vector<1x48xf32>
    %c0_564 = arith.constant 0 : index
    %c0_565 = arith.constant 0 : index
    %565 = vector.load %arg34[%c0_564, %c0_565] : memref<1x48xf32, #tpu.memory_space<vmem>>, vector<1x48xf32>
    %cst_566 = arith.constant 0.000000e+00 : f32
    %566 = vector.broadcast %cst_566 : f32 to vector<64x48xf32>
    %c0_567 = arith.constant 0 : index
    %c0_568 = arith.constant 0 : index
    %c0_569 = arith.constant 0 : index
    %567 = vector.load %arg45[%c0_567, %c0_568, %c0_569] : memref<10x10x48xf32, #tpu.memory_space<vmem>>, vector<8x8x48xf32>
    %568 = vector.shape_cast %567 : vector<8x8x48xf32> to vector<64x48xf32>
    %569 = arith.truncf %568 : vector<64x48xf32> to vector<64x48xbf16>
    %c0_570 = arith.constant 0 : index
    %c0_571 = arith.constant 0 : index
    %c0_572 = arith.constant 0 : index
    %570 = vector.load %arg32[%c0_570, %c0_571, %c0_572] : memref<9x48x48xbf16, #tpu.memory_space<vmem>>, vector<1x48x48xbf16>
    %571 = vector.shape_cast %570 : vector<1x48x48xbf16> to vector<48x48xbf16>
    %cst_573 = arith.constant dense<0.000000e+00> : vector<64x48xf32>
    %572 = tpu.matmul %569, %571, %cst_573 {dimension_numbers = #tpu.dot_dimension_numbers<[1], [0], [0], [1], [0, 0, 1, 1], [], []>} : vector<64x48xbf16>, vector<48x48xbf16>, vector<64x48xf32> -> vector<64x48xf32>
    %573 = arith.addf %566, %572 : vector<64x48xf32>
    %c0_574 = arith.constant 0 : index
    %c1_575 = arith.constant 1 : index
    %c0_576 = arith.constant 0 : index
    %574 = vector.load %arg45[%c0_574, %c1_575, %c0_576] : memref<10x10x48xf32, #tpu.memory_space<vmem>>, vector<8x8x48xf32>
    %575 = vector.shape_cast %574 : vector<8x8x48xf32> to vector<64x48xf32>
    %576 = arith.truncf %575 : vector<64x48xf32> to vector<64x48xbf16>
    %c1_577 = arith.constant 1 : index
    %c0_578 = arith.constant 0 : index
    %c0_579 = arith.constant 0 : index
    %577 = vector.load %arg32[%c1_577, %c0_578, %c0_579] : memref<9x48x48xbf16, #tpu.memory_space<vmem>>, vector<1x48x48xbf16>
    %578 = vector.shape_cast %577 : vector<1x48x48xbf16> to vector<48x48xbf16>
    %cst_580 = arith.constant dense<0.000000e+00> : vector<64x48xf32>
    %579 = tpu.matmul %576, %578, %cst_580 {dimension_numbers = #tpu.dot_dimension_numbers<[1], [0], [0], [1], [0, 0, 1, 1], [], []>} : vector<64x48xbf16>, vector<48x48xbf16>, vector<64x48xf32> -> vector<64x48xf32>
    %580 = arith.addf %573, %579 : vector<64x48xf32>
    %c0_581 = arith.constant 0 : index
    %c2_582 = arith.constant 2 : index
    %c0_583 = arith.constant 0 : index
    %581 = vector.load %arg45[%c0_581, %c2_582, %c0_583] : memref<10x10x48xf32, #tpu.memory_space<vmem>>, vector<8x8x48xf32>
    %582 = vector.shape_cast %581 : vector<8x8x48xf32> to vector<64x48xf32>
    %583 = arith.truncf %582 : vector<64x48xf32> to vector<64x48xbf16>
    %c2_584 = arith.constant 2 : index
    %c0_585 = arith.constant 0 : index
    %c0_586 = arith.constant 0 : index
    %584 = vector.load %arg32[%c2_584, %c0_585, %c0_586] : memref<9x48x48xbf16, #tpu.memory_space<vmem>>, vector<1x48x48xbf16>
    %585 = vector.shape_cast %584 : vector<1x48x48xbf16> to vector<48x48xbf16>
    %cst_587 = arith.constant dense<0.000000e+00> : vector<64x48xf32>
    %586 = tpu.matmul %583, %585, %cst_587 {dimension_numbers = #tpu.dot_dimension_numbers<[1], [0], [0], [1], [0, 0, 1, 1], [], []>} : vector<64x48xbf16>, vector<48x48xbf16>, vector<64x48xf32> -> vector<64x48xf32>
    %587 = arith.addf %580, %586 : vector<64x48xf32>
    %c1_588 = arith.constant 1 : index
    %c0_589 = arith.constant 0 : index
    %c0_590 = arith.constant 0 : index
    %588 = vector.load %arg45[%c1_588, %c0_589, %c0_590] : memref<10x10x48xf32, #tpu.memory_space<vmem>>, vector<8x8x48xf32>
    %589 = vector.shape_cast %588 : vector<8x8x48xf32> to vector<64x48xf32>
    %590 = arith.truncf %589 : vector<64x48xf32> to vector<64x48xbf16>
    %c3_591 = arith.constant 3 : index
    %c0_592 = arith.constant 0 : index
    %c0_593 = arith.constant 0 : index
    %591 = vector.load %arg32[%c3_591, %c0_592, %c0_593] : memref<9x48x48xbf16, #tpu.memory_space<vmem>>, vector<1x48x48xbf16>
    %592 = vector.shape_cast %591 : vector<1x48x48xbf16> to vector<48x48xbf16>
    %cst_594 = arith.constant dense<0.000000e+00> : vector<64x48xf32>
    %593 = tpu.matmul %590, %592, %cst_594 {dimension_numbers = #tpu.dot_dimension_numbers<[1], [0], [0], [1], [0, 0, 1, 1], [], []>} : vector<64x48xbf16>, vector<48x48xbf16>, vector<64x48xf32> -> vector<64x48xf32>
    %594 = arith.addf %587, %593 : vector<64x48xf32>
    %c1_595 = arith.constant 1 : index
    %c1_596 = arith.constant 1 : index
    %c0_597 = arith.constant 0 : index
    %595 = vector.load %arg45[%c1_595, %c1_596, %c0_597] : memref<10x10x48xf32, #tpu.memory_space<vmem>>, vector<8x8x48xf32>
    %596 = vector.shape_cast %595 : vector<8x8x48xf32> to vector<64x48xf32>
    %597 = arith.truncf %596 : vector<64x48xf32> to vector<64x48xbf16>
    %c4_598 = arith.constant 4 : index
    %c0_599 = arith.constant 0 : index
    %c0_600 = arith.constant 0 : index
    %598 = vector.load %arg32[%c4_598, %c0_599, %c0_600] : memref<9x48x48xbf16, #tpu.memory_space<vmem>>, vector<1x48x48xbf16>
    %599 = vector.shape_cast %598 : vector<1x48x48xbf16> to vector<48x48xbf16>
    %cst_601 = arith.constant dense<0.000000e+00> : vector<64x48xf32>
    %600 = tpu.matmul %597, %599, %cst_601 {dimension_numbers = #tpu.dot_dimension_numbers<[1], [0], [0], [1], [0, 0, 1, 1], [], []>} : vector<64x48xbf16>, vector<48x48xbf16>, vector<64x48xf32> -> vector<64x48xf32>
    %601 = arith.addf %594, %600 : vector<64x48xf32>
    %c1_602 = arith.constant 1 : index
    %c2_603 = arith.constant 2 : index
    %c0_604 = arith.constant 0 : index
    %602 = vector.load %arg45[%c1_602, %c2_603, %c0_604] : memref<10x10x48xf32, #tpu.memory_space<vmem>>, vector<8x8x48xf32>
    %603 = vector.shape_cast %602 : vector<8x8x48xf32> to vector<64x48xf32>
    %604 = arith.truncf %603 : vector<64x48xf32> to vector<64x48xbf16>
    %c5_605 = arith.constant 5 : index
    %c0_606 = arith.constant 0 : index
    %c0_607 = arith.constant 0 : index
    %605 = vector.load %arg32[%c5_605, %c0_606, %c0_607] : memref<9x48x48xbf16, #tpu.memory_space<vmem>>, vector<1x48x48xbf16>
    %606 = vector.shape_cast %605 : vector<1x48x48xbf16> to vector<48x48xbf16>
    %cst_608 = arith.constant dense<0.000000e+00> : vector<64x48xf32>
    %607 = tpu.matmul %604, %606, %cst_608 {dimension_numbers = #tpu.dot_dimension_numbers<[1], [0], [0], [1], [0, 0, 1, 1], [], []>} : vector<64x48xbf16>, vector<48x48xbf16>, vector<64x48xf32> -> vector<64x48xf32>
    %608 = arith.addf %601, %607 : vector<64x48xf32>
    %c2_609 = arith.constant 2 : index
    %c0_610 = arith.constant 0 : index
    %c0_611 = arith.constant 0 : index
    %609 = vector.load %arg45[%c2_609, %c0_610, %c0_611] : memref<10x10x48xf32, #tpu.memory_space<vmem>>, vector<8x8x48xf32>
    %610 = vector.shape_cast %609 : vector<8x8x48xf32> to vector<64x48xf32>
    %611 = arith.truncf %610 : vector<64x48xf32> to vector<64x48xbf16>
    %c6_612 = arith.constant 6 : index
    %c0_613 = arith.constant 0 : index
    %c0_614 = arith.constant 0 : index
    %612 = vector.load %arg32[%c6_612, %c0_613, %c0_614] : memref<9x48x48xbf16, #tpu.memory_space<vmem>>, vector<1x48x48xbf16>
    %613 = vector.shape_cast %612 : vector<1x48x48xbf16> to vector<48x48xbf16>
    %cst_615 = arith.constant dense<0.000000e+00> : vector<64x48xf32>
    %614 = tpu.matmul %611, %613, %cst_615 {dimension_numbers = #tpu.dot_dimension_numbers<[1], [0], [0], [1], [0, 0, 1, 1], [], []>} : vector<64x48xbf16>, vector<48x48xbf16>, vector<64x48xf32> -> vector<64x48xf32>
    %615 = arith.addf %608, %614 : vector<64x48xf32>
    %c2_616 = arith.constant 2 : index
    %c1_617 = arith.constant 1 : index
    %c0_618 = arith.constant 0 : index
    %616 = vector.load %arg45[%c2_616, %c1_617, %c0_618] : memref<10x10x48xf32, #tpu.memory_space<vmem>>, vector<8x8x48xf32>
    %617 = vector.shape_cast %616 : vector<8x8x48xf32> to vector<64x48xf32>
    %618 = arith.truncf %617 : vector<64x48xf32> to vector<64x48xbf16>
    %c7_619 = arith.constant 7 : index
    %c0_620 = arith.constant 0 : index
    %c0_621 = arith.constant 0 : index
    %619 = vector.load %arg32[%c7_619, %c0_620, %c0_621] : memref<9x48x48xbf16, #tpu.memory_space<vmem>>, vector<1x48x48xbf16>
    %620 = vector.shape_cast %619 : vector<1x48x48xbf16> to vector<48x48xbf16>
    %cst_622 = arith.constant dense<0.000000e+00> : vector<64x48xf32>
    %621 = tpu.matmul %618, %620, %cst_622 {dimension_numbers = #tpu.dot_dimension_numbers<[1], [0], [0], [1], [0, 0, 1, 1], [], []>} : vector<64x48xbf16>, vector<48x48xbf16>, vector<64x48xf32> -> vector<64x48xf32>
    %622 = arith.addf %615, %621 : vector<64x48xf32>
    %c2_623 = arith.constant 2 : index
    %c2_624 = arith.constant 2 : index
    %c0_625 = arith.constant 0 : index
    %623 = vector.load %arg45[%c2_623, %c2_624, %c0_625] : memref<10x10x48xf32, #tpu.memory_space<vmem>>, vector<8x8x48xf32>
    %624 = vector.shape_cast %623 : vector<8x8x48xf32> to vector<64x48xf32>
    %625 = arith.truncf %624 : vector<64x48xf32> to vector<64x48xbf16>
    %c8_626 = arith.constant 8 : index
    %c0_627 = arith.constant 0 : index
    %c0_628 = arith.constant 0 : index
    %626 = vector.load %arg32[%c8_626, %c0_627, %c0_628] : memref<9x48x48xbf16, #tpu.memory_space<vmem>>, vector<1x48x48xbf16>
    %627 = vector.shape_cast %626 : vector<1x48x48xbf16> to vector<48x48xbf16>
    %cst_629 = arith.constant dense<0.000000e+00> : vector<64x48xf32>
    %628 = tpu.matmul %625, %627, %cst_629 {dimension_numbers = #tpu.dot_dimension_numbers<[1], [0], [0], [1], [0, 0, 1, 1], [], []>} : vector<64x48xbf16>, vector<48x48xbf16>, vector<64x48xf32> -> vector<64x48xf32>
    %629 = arith.addf %622, %628 : vector<64x48xf32>
    %630 = vector.broadcast %564 : vector<1x48xf32> to vector<64x48xf32>
    %631 = arith.mulf %629, %630 : vector<64x48xf32>
    %632 = vector.broadcast %565 : vector<1x48xf32> to vector<64x48xf32>
    %633 = arith.addf %631, %632 : vector<64x48xf32>
    %cst_630 = arith.constant 0.000000e+00 : f32
    %634 = vector.broadcast %cst_630 : f32 to vector<64x48xf32>
    %635 = arith.maximumf %633, %634 : vector<64x48xf32>
    %636 = arith.truncf %635 : vector<64x48xf32> to vector<64x48xbf16>
    %c0_631 = arith.constant 0 : index
    %c0_632 = arith.constant 0 : index
    %637 = vector.load %arg35[%c0_631, %c0_632] : memref<48x192xbf16, #tpu.memory_space<vmem>>, vector<48x192xbf16>
    %cst_633 = arith.constant dense<0.000000e+00> : vector<64x192xf32>
    %638 = tpu.matmul %636, %637, %cst_633 {dimension_numbers = #tpu.dot_dimension_numbers<[1], [0], [0], [1], [0, 0, 1, 1], [], []>} : vector<64x48xbf16>, vector<48x192xbf16>, vector<64x192xf32> -> vector<64x192xf32>
    %c0_634 = arith.constant 0 : index
    %c0_635 = arith.constant 0 : index
    %639 = vector.load %arg36[%c0_634, %c0_635] : memref<1x192xf32, #tpu.memory_space<vmem>>, vector<1x192xf32>
    %640 = vector.broadcast %639 : vector<1x192xf32> to vector<64x192xf32>
    %641 = arith.addf %638, %640 : vector<64x192xf32>
    %642 = arith.negf %641 : vector<64x192xf32>
    %643 = math.exp %642 : vector<64x192xf32>
    %cst_636 = arith.constant 1.000000e+00 : f32
    %644 = vector.broadcast %cst_636 : f32 to vector<64x192xf32>
    %645 = arith.addf %644, %643 : vector<64x192xf32>
    %646 = arith.divf %644, %645 : vector<64x192xf32>
    %c0_637 = arith.constant 0 : index
    %c0_638 = arith.constant 0 : index
    %c0_639 = arith.constant 0 : index
    %647 = vector.load %arg37[%c0_637, %c0_638, %c0_639] : memref<1x64x192xf32, #tpu.memory_space<vmem>>, vector<1x64x192xf32>
    %648 = vector.shape_cast %647 : vector<1x64x192xf32> to vector<64x192xf32>
    %649 = vector.shape_cast %646 : vector<64x192xf32> to vector<1x64x192xf32>
    tpu.vector_store %arg37[%c0_637, %c0_638, %c0_639], %649 {strides = array<i32>} : memref<1x64x192xf32, #tpu.memory_space<vmem>>, vector<1x64x192xf32>,
    return
  }
  func.func @transform_0(%arg0: i32) -> (i32, i32, i32, i32) {
    %c0_i32 = arith.constant 0 : i32
    %c0_i32_0 = arith.constant 0 : i32
    %c0_i32_1 = arith.constant 0 : i32
    %c0_i32_2 = arith.constant 0 : i32
    return %arg0, %c0_i32, %c0_i32_0, %c0_i32_1 : i32, i32, i32, i32
  }
  func.func @transform_1(%arg0: i32) -> (i32, i32, i32) {
    %c0_i32 = arith.constant 0 : i32
    %c0_i32_0 = arith.constant 0 : i32
    %c0_i32_1 = arith.constant 0 : i32
    %c0_i32_2 = arith.constant 0 : i32
    return %c0_i32, %c0_i32_0, %c0_i32_1 : i32, i32, i32
  }
  func.func @transform_2(%arg0: i32) -> (i32, i32) {
    %c0_i32 = arith.constant 0 : i32
    %c0_i32_0 = arith.constant 0 : i32
    %c0_i32_1 = arith.constant 0 : i32
    return %c0_i32, %c0_i32_0 : i32, i32
  }
  func.func @transform_3(%arg0: i32) -> (i32, i32) {
    %c0_i32 = arith.constant 0 : i32
    %c0_i32_0 = arith.constant 0 : i32
    %c0_i32_1 = arith.constant 0 : i32
    return %c0_i32, %c0_i32_0 : i32, i32
  }
  func.func @transform_4(%arg0: i32) -> (i32, i32) {
    %c0_i32 = arith.constant 0 : i32
    %c0_i32_0 = arith.constant 0 : i32
    %c0_i32_1 = arith.constant 0 : i32
    return %c0_i32, %c0_i32_0 : i32, i32
  }
  func.func @transform_5(%arg0: i32) -> (i32, i32, i32) {
    %c0_i32 = arith.constant 0 : i32
    %c0_i32_0 = arith.constant 0 : i32
    %c0_i32_1 = arith.constant 0 : i32
    %c0_i32_2 = arith.constant 0 : i32
    return %c0_i32, %c0_i32_0, %c0_i32_1 : i32, i32, i32
  }
  func.func @transform_6(%arg0: i32) -> (i32, i32) {
    %c0_i32 = arith.constant 0 : i32
    %c0_i32_0 = arith.constant 0 : i32
    %c0_i32_1 = arith.constant 0 : i32
    return %c0_i32, %c0_i32_0 : i32, i32
  }
  func.func @transform_7(%arg0: i32) -> (i32, i32) {
    %c0_i32 = arith.constant 0 : i32
    %c0_i32_0 = arith.constant 0 : i32
    %c0_i32_1 = arith.constant 0 : i32
    return %c0_i32, %c0_i32_0 : i32, i32
  }
  func.func @transform_8(%arg0: i32) -> (i32, i32, i32) {
    %c0_i32 = arith.constant 0 : i32
    %c0_i32_0 = arith.constant 0 : i32
    %c0_i32_1 = arith.constant 0 : i32
    %c0_i32_2 = arith.constant 0 : i32
    return %c0_i32, %c0_i32_0, %c0_i32_1 : i32, i32, i32
  }
  func.func @transform_9(%arg0: i32) -> (i32, i32) {
    %c0_i32 = arith.constant 0 : i32
    %c0_i32_0 = arith.constant 0 : i32
    %c0_i32_1 = arith.constant 0 : i32
    return %c0_i32, %c0_i32_0 : i32, i32
  }
  func.func @transform_10(%arg0: i32) -> (i32, i32) {
    %c0_i32 = arith.constant 0 : i32
    %c0_i32_0 = arith.constant 0 : i32
    %c0_i32_1 = arith.constant 0 : i32
    return %c0_i32, %c0_i32_0 : i32, i32
  }
  func.func @transform_11(%arg0: i32) -> (i32, i32, i32) {
    %c0_i32 = arith.constant 0 : i32
    %c0_i32_0 = arith.constant 0 : i32
    %c0_i32_1 = arith.constant 0 : i32
    %c0_i32_2 = arith.constant 0 : i32
    return %c0_i32, %c0_i32_0, %c0_i32_1 : i32, i32, i32
  }
  func.func @transform_12(%arg0: i32) -> (i32, i32) {
    %c0_i32 = arith.constant 0 : i32
    %c0_i32_0 = arith.constant 0 : i32
    %c0_i32_1 = arith.constant 0 : i32
    return %c0_i32, %c0_i32_0 : i32, i32
  }
  func.func @transform_13(%arg0: i32) -> (i32, i32) {
    %c0_i32 = arith.constant 0 : i32
    %c0_i32_0 = arith.constant 0 : i32
    %c0_i32_1 = arith.constant 0 : i32
    return %c0_i32, %c0_i32_0 : i32, i32
  }
  func.func @transform_14(%arg0: i32) -> (i32, i32) {
    %c0_i32 = arith.constant 0 : i32
    %c0_i32_0 = arith.constant 0 : i32
    %c0_i32_1 = arith.constant 0 : i32
    return %c0_i32, %c0_i32_0 : i32, i32
  }
  func.func @transform_15(%arg0: i32) -> (i32, i32) {
    %c0_i32 = arith.constant 0 : i32
    %c0_i32_0 = arith.constant 0 : i32
    %c0_i32_1 = arith.constant 0 : i32
    return %c0_i32, %c0_i32_0 : i32, i32
  }
  func.func @transform_16(%arg0: i32) -> (i32, i32) {
    %c0_i32 = arith.constant 0 : i32
    %c0_i32_0 = arith.constant 0 : i32
    %c0_i32_1 = arith.constant 0 : i32
    return %c0_i32, %c0_i32_0 : i32, i32
  }
  func.func @transform_17(%arg0: i32) -> (i32, i32) {
    %c0_i32 = arith.constant 0 : i32
    %c0_i32_0 = arith.constant 0 : i32
    %c0_i32_1 = arith.constant 0 : i32
    return %c0_i32, %c0_i32_0 : i32, i32
  }
  func.func @transform_18(%arg0: i32) -> (i32, i32) {
    %c0_i32 = arith.constant 0 : i32
    %c0_i32_0 = arith.constant 0 : i32
    %c0_i32_1 = arith.constant 0 : i32
    return %c0_i32, %c0_i32_0 : i32, i32
  }
  func.func @transform_19(%arg0: i32) -> (i32, i32) {
    %c0_i32 = arith.constant 0 : i32
    %c0_i32_0 = arith.constant 0 : i32
    %c0_i32_1 = arith.constant 0 : i32
    return %c0_i32, %c0_i32_0 : i32, i32
  }
  func.func @transform_20(%arg0: i32) -> (i32, i32, i32) {
    %c0_i32 = arith.constant 0 : i32
    %c0_i32_0 = arith.constant 0 : i32
    %c0_i32_1 = arith.constant 0 : i32
    %c0_i32_2 = arith.constant 0 : i32
    return %c0_i32, %c0_i32_0, %c0_i32_1 : i32, i32, i32
  }
  func.func @transform_21(%arg0: i32) -> (i32, i32) {
    %c0_i32 = arith.constant 0 : i32
    %c0_i32_0 = arith.constant 0 : i32
    %c0_i32_1 = arith.constant 0 : i32
    return %c0_i32, %c0_i32_0 : i32, i32
  }
  func.func @transform_22(%arg0: i32) -> (i32, i32) {
    %c0_i32 = arith.constant 0 : i32
    %c0_i32_0 = arith.constant 0 : i32
    %c0_i32_1 = arith.constant 0 : i32
    return %c0_i32, %c0_i32_0 : i32, i32
  }
  func.func @transform_23(%arg0: i32) -> (i32, i32, i32) {
    %c0_i32 = arith.constant 0 : i32
    %c0_i32_0 = arith.constant 0 : i32
    %c0_i32_1 = arith.constant 0 : i32
    %c0_i32_2 = arith.constant 0 : i32
    return %c0_i32, %c0_i32_0, %c0_i32_1 : i32, i32, i32
  }
  func.func @transform_24(%arg0: i32) -> (i32, i32) {
    %c0_i32 = arith.constant 0 : i32
    %c0_i32_0 = arith.constant 0 : i32
    %c0_i32_1 = arith.constant 0 : i32
    return %c0_i32, %c0_i32_0 : i32, i32
  }
  func.func @transform_25(%arg0: i32) -> (i32, i32) {
    %c0_i32 = arith.constant 0 : i32
    %c0_i32_0 = arith.constant 0 : i32
    %c0_i32_1 = arith.constant 0 : i32
    return %c0_i32, %c0_i32_0 : i32, i32
  }
  func.func @transform_26(%arg0: i32) -> (i32, i32) {
    %c0_i32 = arith.constant 0 : i32
    %c0_i32_0 = arith.constant 0 : i32
    %c0_i32_1 = arith.constant 0 : i32
    return %c0_i32, %c0_i32_0 : i32, i32
  }
  func.func @transform_27(%arg0: i32) -> (i32, i32) {
    %c0_i32 = arith.constant 0 : i32
    %c0_i32_0 = arith.constant 0 : i32
    %c0_i32_1 = arith.constant 0 : i32
    return %c0_i32, %c0_i32_0 : i32, i32
  }
  func.func @transform_28(%arg0: i32) -> (i32, i32, i32) {
    %c0_i32 = arith.constant 0 : i32
    %c0_i32_0 = arith.constant 0 : i32
    %c0_i32_1 = arith.constant 0 : i32
    %c0_i32_2 = arith.constant 0 : i32
    return %c0_i32, %c0_i32_0, %c0_i32_1 : i32, i32, i32
  }
  func.func @transform_29(%arg0: i32) -> (i32, i32) {
    %c0_i32 = arith.constant 0 : i32
    %c0_i32_0 = arith.constant 0 : i32
    %c0_i32_1 = arith.constant 0 : i32
    return %c0_i32, %c0_i32_0 : i32, i32
  }
  func.func @transform_30(%arg0: i32) -> (i32, i32) {
    %c0_i32 = arith.constant 0 : i32
    %c0_i32_0 = arith.constant 0 : i32
    %c0_i32_1 = arith.constant 0 : i32
    return %c0_i32, %c0_i32_0 : i32, i32
  }
  func.func @transform_31(%arg0: i32) -> (i32, i32, i32) {
    %c0_i32 = arith.constant 0 : i32
    %c0_i32_0 = arith.constant 0 : i32
    %c0_i32_1 = arith.constant 0 : i32
    %c0_i32_2 = arith.constant 0 : i32
    return %c0_i32, %c0_i32_0, %c0_i32_1 : i32, i32, i32
  }
  func.func @transform_32(%arg0: i32) -> (i32, i32) {
    %c0_i32 = arith.constant 0 : i32
    %c0_i32_0 = arith.constant 0 : i32
    %c0_i32_1 = arith.constant 0 : i32
    return %c0_i32, %c0_i32_0 : i32, i32
  }
  func.func @transform_33(%arg0: i32) -> (i32, i32) {
    %c0_i32 = arith.constant 0 : i32
    %c0_i32_0 = arith.constant 0 : i32
    %c0_i32_1 = arith.constant 0 : i32
    return %c0_i32, %c0_i32_0 : i32, i32
  }
  func.func @transform_34(%arg0: i32) -> (i32, i32) {
    %c0_i32 = arith.constant 0 : i32
    %c0_i32_0 = arith.constant 0 : i32
    %c0_i32_1 = arith.constant 0 : i32
    return %c0_i32, %c0_i32_0 : i32, i32
  }
  func.func @transform_35(%arg0: i32) -> (i32, i32) {
    %c0_i32 = arith.constant 0 : i32
    %c0_i32_0 = arith.constant 0 : i32
    %c0_i32_1 = arith.constant 0 : i32
    return %c0_i32, %c0_i32_0 : i32, i32
  }
  func.func @transform_36(%arg0: i32) -> (i32, i32, i32) {
    %c0_i32 = arith.constant 0 : i32
    %c0_i32_0 = arith.constant 0 : i32
    %c0_i32_1 = arith.constant 0 : i32
    return %arg0, %c0_i32, %c0_i32_0 : i32, i32, i32
  }
}

</mosaic_0001>

<bundles_post_ra>
// kernel: unet_decoder_forward.1
= control target key start
LH: loop header
LB: loop body
LE: loop exit
PB: predicated region body
PF: predicated region fallthrough
CT: control target
= control target key end

     0   :  { %s18115_s6 = smov 1   ;;  %s18116_s10 = smov 2   ;;  %s20915_s0 = inlined_call_operand.smem [shape: u32[37], index: -1, kind: input, shape index: {}] }
   0x1   :  { %s18162_s5 = sld [smem:[%s20915_s0]]   ;;  %s18117_s14 = smov 3  }
   0x2   :  { %s18167_s9 = sld [smem:[%s20915_s0 + %s18115_s6]]   ;;  %s18118_s18 = smov 4  }
   0x3   :  { %s18172_s13 = sld [smem:[%s20915_s0 + %s18116_s10]]   ;;  %s18119_s22 = smov 5  }
   0x4   :  { %s18177_s17 = sld [smem:[%s20915_s0 + %s18117_s14]]   ;;  %s18120_s26 = smov 6  }
   0x5   :  { %s18182_s21 = sld [smem:[%s20915_s0 + %s18118_s18]]   ;;  %s18121_s30 = smov 7  }
   0x6   :  { %s18187_s25 = sld [smem:[%s20915_s0 + %s18119_s22]]   ;;  %s18122_s4 = smov 8  }
   0x7   :  { %s18192_s29 = sld [smem:[%s20915_s0 + %s18120_s26]]   ;;  %s18123_s10 = smov 9  }
   0x8   :  { %s18197_s3 = sld [smem:[%s20915_s0 + %s18121_s30]]   ;;  %s18124_s15 = smov 10  }
   0x9   :  { %s18202_s8 = sld [smem:[%s20915_s0 + %s18122_s4]]   ;;  %s18125_s20 = smov 11  }
   0xa   :  { %s18207_s14 = sld [smem:[%s20915_s0 + %s18123_s10]]   ;;  %s18126_s26 = smov 12  }
   0xb   :  { %s18212_s19 = sld [smem:[%s20915_s0 + %s18124_s15]]   ;;  %s18127_s1 = smov 13  }
   0xc   :  { %s18217_s24 = sld [smem:[%s20915_s0 + %s18125_s20]]   ;;  %s18128_s7 = smov 14  }
   0xd   :  { %s18222_s30 = sld [smem:[%s20915_s0 + %s18126_s26]]   ;;  %s18129_s15 = smov 15  }
   0xe   :  { %s18227_s6 = sld [smem:[%s20915_s0 + %s18127_s1]]   ;;  %s18130_s22 = smov 16  }
   0xf   :  { %s18232_s12 = sld [smem:[%s20915_s0 + %s18128_s7]]   ;;  %s18131_s28 = smov 17  }
  0x10   :  { %s18237_s20 = sld [smem:[%s20915_s0 + %s18129_s15]]   ;;  %s18132_s7 = smov 18  }
  0x11   :  { %s18242_s27 = sld [smem:[%s20915_s0 + %s18130_s22]]   ;;  %s18133_s15 = smov 19  }
  0x12   :  { %s18247_s4 = sld [smem:[%s20915_s0 + %s18131_s28]]   ;;  %s18134_s22 = smov 20  }
  0x13   :  { %20924 = sst [smem:[#allocation12_spill]] %s18222_s30  ;;  %s18135_s28 = smov 21  }
  0x14   :  { %20925 = sst [smem:[#allocation13_spill]] %s18227_s6 }
  0x15   :  { %20926 = sst [smem:[#allocation14_spill]] %s18232_s12 }
  0x16   :  { %20927 = sst [smem:[#allocation15_spill]] %s18237_s20 }
  0x17   :  { %s18252_s6 = sld [smem:[%s20915_s0 + %s18132_s7]]   ;;  %s18136_s7 = smov 22  }
  0x18   :  { %20928 = sst [smem:[#allocation16_spill]] %s18247_s4 }
  0x19   :  { %s18257_s20 = sld [smem:[%s20915_s0 + %s18133_s15]]   ;;  %s18137_s15 = smov 23  }
  0x1a   :  { %s18262_s30 = sld [smem:[%s20915_s0 + %s18134_s22]]   ;;  %s18138_s22 = smov 24  }
  0x1b   :  { %s18267_s4 = sld [smem:[%s20915_s0 + %s18135_s28]]   ;;  %s18139_s28 = smov 25  }
  0x1c   :  { %s18272_s12 = sld [smem:[%s20915_s0 + %s18136_s7]]   ;;  %s18140_s7 = smov 26  }
  0x1f   :  { %20929 = sst [smem:[#allocation17_spill]] %s18257_s20 }
  0x20   :  { %20930 = sst [smem:[#allocation18_spill]] %s18262_s30 }
  0x21   :  { %20931 = sst [smem:[#allocation19_spill]] %s18267_s4 }
  0x22   :  { %20932 = sst [smem:[#allocation20_spill]] %s18272_s12 }
  0x23   :  { %s18277_s20 = sld [smem:[%s20915_s0 + %s18137_s15]]   ;;  %s18141_s15 = smov 27  }
  0x24   :  { %s18282_s30 = sld [smem:[%s20915_s0 + %s18138_s22]]   ;;  %s18142_s22 = smov 28  }
  0x25   :  { %s18287_s4 = sld [smem:[%s20915_s0 + %s18139_s28]]   ;;  %s18143_s28 = smov 29  }
  0x26   :  { %s18292_s12 = sld [smem:[%s20915_s0 + %s18140_s7]]   ;;  %s18144_s7 = smov 30  }
  0x29   :  { %20933 = sst [smem:[#allocation21_spill]] %s18277_s20 }
  0x2a   :  { %20934 = sst [smem:[#allocation22_spill]] %s18282_s30 }
  0x2b   :  { %20935 = sst [smem:[#allocation23_spill]] %s18287_s4 }
  0x2c   :  { %20936 = sst [smem:[#allocation24_spill]] %s18292_s12 }
  0x2d   :  { %s18297_s20 = sld [smem:[%s20915_s0 + %s18141_s15]]   ;;  %s18145_s15 = smov 31  }
  0x2e   :  { %s18302_s30 = sld [smem:[%s20915_s0 + %s18142_s22]]   ;;  %s18146_s22 = smov 32  }
  0x2f   :  { %s18307_s4 = sld [smem:[%s20915_s0 + %s18143_s28]]   ;;  %s18147_s28 = smov 33  }
  0x30   :  { %s18312_s12 = sld [smem:[%s20915_s0 + %s18144_s7]]   ;;  %s18148_s7 = smov 34  }
  0x33   :  { %20937 = sst [smem:[#allocation25_spill]] %s18297_s20 }
  0x34   :  { %20938 = sst [smem:[#allocation26_spill]] %s18302_s30 }
  0x35   :  { %20939 = sst [smem:[#allocation27_spill]] %s18307_s4 }
  0x36   :  { %20940 = sst [smem:[#allocation28_spill]] %s18312_s12 }
  0x37   :  { %s18317_s20 = sld [smem:[%s20915_s0 + %s18145_s15]]   ;;  %s18149_s15 = smov 35  }
  0x38   :  { %s18322_s30 = sld [smem:[%s20915_s0 + %s18146_s22]]   ;;  %s18150_s22 = smov 36  }
  0x39   :  { %s18327_s4 = sld [smem:[%s20915_s0 + %s18147_s28]]   ;;  %s18344_s28 = smov 0  }
  0x3a   :  { %s18332_s12 = sld [smem:[%s20915_s0 + %s18148_s7]]  }
  0x3d   :  { %20941 = sst [smem:[#allocation29_spill]] %s18317_s20 }
  0x3e   :  { %20942 = sst [smem:[#allocation30_spill]] %s18322_s30 }
  0x3f   :  { %s18337_s20 = sld [smem:[%s20915_s0 + %s18149_s15]]  }
  0x40   :  { %s18342_s30 = sld [smem:[%s20915_s0 + %s18150_s22]]  }
  0x41 LB: > { %s13842_s1 = sadd.s32 4294967295, %s18113_s28   ;;  %p13846_p0 = scmp.ge.s32.totalorder %s18113_s28, 1  ;;  %s18113_s28 = sphi %s18344_s28, %s83_s28  }
  0x42   : > { %p999_p1 = scmp.lt.s32.totalorder %s18113_s28, 3 }
  0x44   : > { %p1000_p2 = pnand %p13846_p0, %p999_p1 }
  0x46   : > { %1003 = sbr.rel (%p1000_p2) target bundleno = 4015 (0xfaf), region = 164 }
  0x4d   : > { %v18353_v0 = vld [vmem:[%s18167_s9 + $0x8] sm:$0xff]  ;;  %vm1353_vm0 = vcmask 1043456   ;;  %v18356_v1 = vld [vmem:[%s18167_s9] sm:$0xff]  ;;  %vm1100_vm1 = vcmask 31744   ;;  %vm1102_vm2 = vcmask 25600   ;;  %v18151_v3 = vmov 0.0  }
  0x4e   : > { %v1328_v2 = vcombine.high %v18353_v0, %v18353_v0  ;;  %1422 = vmatprep.mubr.f32.mxu0 %v18151_v3  ;;  %1186 = vst [vmem:[#allocation6] sm:$0xff] %v18151_v3  ;;  %1187 = vst [vmem:[#allocation6 + $0x8] sm:$0x3] %v18151_v3  ;;  %v1472_v4 = vcombine.high %v18356_v1, %v18356_v1  ;;  %p1089_p3 = scmp.lt.s32.totalorder %s13842_s1, 1  ;;  %v13872_v5 = vld [vmem:[%s18167_s9 + $0x10] sm:$0xff]  ;;  %v13883_v23 = vld [vmem:[%s18167_s9 + $0x18] sm:$0xff] }
  0x4f   : > { %1188 = vst [vmem:[#allocation6 + $0x10] sm:$0xff] %v18151_v3  ;;  %1189 = vst [vmem:[#allocation6 + $0x18] sm:$0x3] %v18151_v3  ;;  %v1625_v9 = vcombine.high %v13872_v5, %v13872_v5  ;;  %v1794_v25 = vcombine.high %v13883_v23, %v13883_v23  ;;  %v13894_v33 = vld [vmem:[%s18167_s9 + $0x20] sm:$0xff]  ;;  %v13905_v43 = vld [vmem:[%s18167_s9 + $0x28] sm:$0xff]  ;;  %vm1122_vm3 = vcmask 523264  }
  0x50   : > { %1190 = vst [vmem:[#allocation6 + $0x20] sm:$0xff] %v18151_v3  ;;  %1191 = vst [vmem:[#allocation6 + $0x28] sm:$0x3] %v18151_v3  ;;  %13852 = vmatprep.subr.msk.mxu0 %vm1353_vm0, %v1328_v2  ;;  %s20967_s1 = smov (!%p1089_p3, %s13842_s1), 1  ;;  %v1963_v35 = vcombine.high %v13894_v33, %v13894_v33  ;;  %v2132_v44 = vcombine.high %v13905_v43, %v13905_v43  ;;  %v13916_v47 = vld [vmem:[%s18167_s9 + $0x30] sm:$0xff]  ;;  %v13927_v50 = vld [vmem:[%s18167_s9 + $0x38] sm:$0xff] }
  0x51   : > { %1192 = vst [vmem:[#allocation6 + $0x30] sm:$0xff] %v18151_v3  ;;  %1193 = vst [vmem:[#allocation6 + $0x38] sm:$0x3] %v18151_v3  ;;  %13853 = vmatpush1.msk.msra.mxu0 %vm1353_vm0, %v18353_v0  ;;  %s15236_s0 = sshll.u32 %s20967_s1, 6  ;;  %v2302_v48 = vcombine.high %v13916_v47, %v13916_v47  ;;  %v2471_v51 = vcombine.high %v13927_v50, %v13927_v50  ;;  %v13938_v53 = vld [vmem:[%s18167_s9 + $0x40] sm:$0xff]  ;;  %vm1124_vm4 = vcmask 517120  }
  0x52   : > { %1194 = vst [vmem:[#allocation6 + $0x40] sm:$0xff] %v18151_v3  ;;  %1195 = vst [vmem:[#allocation6 + $0x48] sm:$0x3] %v18151_v3  ;;  %13862 = vmatprep.subr.msk.mxu0 %vm1353_vm0, %v1472_v4  ;;  %s1093_s2 = scalar_lea.vmem %s18162_s5, %s15236_s0  ;;  %v2640_v54 = vcombine.high %v13938_v53, %v13938_v53  ;;  %s18152_s7 = smov 64   ;;  %vm1164_vm5 = vcmask 261120   ;;  %vm1166_vm6 = vcmask 254976  }
  0x53   : > { %1196 = vst [vmem:[#allocation6 + $0x50] sm:$0xff] %v18151_v3  ;;  %1197 = vst [vmem:[#allocation6 + $0x58] sm:$0x3] %v18151_v3  ;;  %v1288_v6 = vld [vmem:[%s1093_s2] sm:$0xff]  ;;  %v1289_v7 = vld [vmem:[%s1093_s2 + $0x8] sm:$0xff]  ;;  %s20945_s10 = sld [smem:[#allocation14_spill]] }
  0x54   : > { %1198 = vst [vmem:[#allocation6 + $0x60] sm:$0xff] %v18151_v3  ;;  %1199 = vst [vmem:[#allocation6 + $0x68] sm:$0x3] %v18151_v3  ;;  %v1290_v8 = vld [vmem:[%s1093_s2 + $0x10] sm:$0xff]  ;;  %v1291_v11 = vld [vmem:[%s1093_s2 + $0x18] sm:$0xff]  ;;  %s20946_s11 = sld [smem:[#allocation18_spill]] }
  0x55   : > { %1200 = vst [vmem:[#allocation6 + $0x70] sm:$0xff] %v18151_v3  ;;  %1201 = vst [vmem:[#allocation6 + $0x78] sm:$0x3] %v18151_v3  ;;  %v1292_v12 = vld [vmem:[%s1093_s2 + $0x20] sm:$0xff]  ;;  %v1293_v13 = vld [vmem:[%s1093_s2 + $0x28] sm:$0xff]  ;;  %s20947_s15 = sld [smem:[#allocation12_spill]] }
  0x56   : > { %1202 = vst [vmem:[#allocation6 + $0x80] sm:$0xff] %v18151_v3  ;;  %1203 = vst [vmem:[#allocation6 + $0x88] sm:$0x3] %v18151_v3  ;;  %v1294_v14 = vld [vmem:[%s1093_s2 + $0x30] sm:$0xff]  ;;  %v1295_v15 = vld [vmem:[%s1093_s2 + $0x38] sm:$0xff]  ;;  %s20948_s16 = sld [smem:[#allocation13_spill]] }
  0x57   : > { %1204 = vst [vmem:[#allocation6 + $0x90] sm:$0xff] %v18151_v3  ;;  %1205 = vst [vmem:[#allocation6 + $0x98] sm:$0x3] %v18151_v3  ;;  %v18596_v45 = vld [vmem:[#allocation6] sm:$0xff]  ;;  %s20949_s18 = sld [smem:[#allocation16_spill]]  ;;  %s20950_s22 = sld [smem:[#allocation15_spill]] }
  0x58   : > { %1226 = vst [vmem:[#allocation8] sm:$0xff] %v18151_v3  ;;  %1227 = vst [vmem:[#allocation8 + $0x8] sm:$0xff] %v18151_v3  ;;  %s20951_s23 = sld [smem:[#allocation21_spill]]  ;;  %s20953_s26 = sld [smem:[#allocation19_spill]]  ;;  %vm9765_vm7 = vcmask 1046528   ;;  %vm10257_vm8 = vcmask 1045504  }
  0x59   : > { %1228 = vst [vmem:[#allocation8 + $0x10] sm:$0x3] %v18151_v3  ;;  %1229 = vst [vmem:[#allocation8 + $0x18] sm:$0x3] %v18151_v3  ;;  %s20954_s0 = sld [smem:[#allocation20_spill]]  ;;  %s20955_s2 = sld [smem:[#allocation24_spill]] }
  0x5a   : > { %1230 = vst [vmem:[#allocation8 + $0x20] sm:$0xff] %v18151_v3  ;;  %1231 = vst [vmem:[#allocation8 + $0x28] sm:$0xff] %v18151_v3  ;;  %vm1266_vm9 = vcmask 392192   ;;  %vm1268_vm10 = vcmask 386048  }
  0x5b   : > { %1232 = vst [vmem:[#allocation8 + $0x30] sm:$0x3] %v18151_v3  ;;  %1233 = vst [vmem:[#allocation8 + $0x38] sm:$0x3] %v18151_v3 }
  0x5c   : > { %1234 = vst [vmem:[#allocation8 + $0x40] sm:$0xff] %v18151_v3  ;;  %1235 = vst [vmem:[#allocation8 + $0x48] sm:$0xff] %v18151_v3 }
  0x5d   : > { %1236 = vst [vmem:[#allocation8 + $0x50] sm:$0x3] %v18151_v3  ;;  %1237 = vst [vmem:[#allocation8 + $0x58] sm:$0x3] %v18151_v3 }
  0x5e   : > { %1238 = vst [vmem:[#allocation8 + $0x60] sm:$0xff] %v18151_v3  ;;  %1239 = vst [vmem:[#allocation8 + $0x68] sm:$0xff] %v18151_v3 }
  0x5f   : > { %1240 = vst [vmem:[#allocation8 + $0x70] sm:$0x3] %v18151_v3  ;;  %1241 = vst [vmem:[#allocation8 + $0x78] sm:$0x3] %v18151_v3 }
  0x60   : > { %1242 = vst [vmem:[#allocation8 + $0x80] sm:$0xff] %v18151_v3  ;;  %1243 = vst [vmem:[#allocation8 + $0x88] sm:$0xff] %v18151_v3 }
  0x61   : > { %1244 = vst [vmem:[#allocation8 + $0x90] sm:$0x3] %v18151_v3  ;;  %1245 = vst [vmem:[#allocation8 + $0x98] sm:$0x3] %v18151_v3 }
  0x62   : > { %1246 = vst [vmem:[#allocation8 + $0xa0] sm:$0xff] %v18151_v3  ;;  %1247 = vst [vmem:[#allocation8 + $0xa8] sm:$0xff] %v18151_v3 }
  0x63   : > { %1248 = vst [vmem:[#allocation8 + $0xb0] sm:$0x3] %v18151_v3  ;;  %1249 = vst [vmem:[#allocation8 + $0xb8] sm:$0x3] %v18151_v3 }
  0x64   : > { %1250 = vst [vmem:[#allocation8 + $0xc0] sm:$0xff] %v18151_v3  ;;  %1251 = vst [vmem:[#allocation8 + $0xc8] sm:$0xff] %v18151_v3 }
  0x65   : > { %1252 = vst [vmem:[#allocation8 + $0xd0] sm:$0x3] %v18151_v3  ;;  %1253 = vst [vmem:[#allocation8 + $0xd8] sm:$0x3] %v18151_v3 }
  0x66   : > { %1254 = vst [vmem:[#allocation8 + $0xe0] sm:$0xff] %v18151_v3  ;;  %1255 = vst [vmem:[#allocation8 + $0xe8] sm:$0xff] %v18151_v3 }
  0x67   : > { %1256 = vst [vmem:[#allocation8 + $0xf0] sm:$0x3] %v18151_v3  ;;  %1257 = vst [vmem:[#allocation8 + $0xf8] sm:$0x3] %v18151_v3 }
  0x68   : > { %1258 = vst [vmem:[#allocation8 + $0x100] sm:$0xff] %v18151_v3  ;;  %1259 = vst [vmem:[#allocation8 + $0x108] sm:$0xff] %v18151_v3 }
  0x69   : > { %1260 = vst [vmem:[#allocation8 + $0x110] sm:$0x3] %v18151_v3  ;;  %1261 = vst [vmem:[#allocation8 + $0x118] sm:$0x3] %v18151_v3 }
  0x6a   : > { %1262 = vst [vmem:[#allocation8 + $0x120] sm:$0xff] %v18151_v3  ;;  %1263 = vst [vmem:[#allocation8 + $0x128] sm:$0xff] %v18151_v3 }
  0x6b   : > { %1264 = vst [vmem:[#allocation8 + $0x130] sm:$0x3] %v18151_v3  ;;  %1265 = vst [vmem:[#allocation8 + $0x138] sm:$0x3] %v18151_v3 }
  0x6c   : > { %1101 = vst.msk [vmem:[#allocation2] sm:$0xff] %vm1100_vm1, %v18151_v3  ;;  %1104 = vst.msk [vmem:[#allocation2 + $0x10] sm:$0xff] %vm1100_vm1, %v18151_v3 }
  0x6d   : > { %1103 = vst.msk [vmem:[#allocation2 + $0x8] sm:$0x3] %vm1102_vm2, %v18151_v3  ;;  %1105 = vst.msk [vmem:[#allocation2 + $0x18] sm:$0x3] %vm1102_vm2, %v18151_v3 }
  0x6e   : > { %1106 = vst.msk [vmem:[#allocation2 + $0x20] sm:$0xff] %vm1100_vm1, %v18151_v3  ;;  %1108 = vst.msk [vmem:[#allocation2 + $0x30] sm:$0xff] %vm1100_vm1, %v18151_v3 }
  0x6f   : > { %1107 = vst.msk [vmem:[#allocation2 + $0x28] sm:$0x3] %vm1102_vm2, %v18151_v3  ;;  %1109 = vst.msk [vmem:[#allocation2 + $0x38] sm:$0x3] %vm1102_vm2, %v18151_v3 }
  0x70   : > { %1110 = vst.msk [vmem:[#allocation2 + $0x40] sm:$0xff] %vm1100_vm1, %v18151_v3  ;;  %1112 = vst.msk [vmem:[#allocation2 + $0x50] sm:$0xff] %vm1100_vm1, %v18151_v3 }
  0x71   : > { %1111 = vst.msk [vmem:[#allocation2 + $0x48] sm:$0x3] %vm1102_vm2, %v18151_v3  ;;  %1113 = vst.msk [vmem:[#allocation2 + $0x58] sm:$0x3] %vm1102_vm2, %v18151_v3 }
  0x72   : > { %1114 = vst.msk [vmem:[#allocation2 + $0x60] sm:$0xff] %vm1100_vm1, %v18151_v3  ;;  %1116 = vst.msk [vmem:[#allocation2 + $0x70] sm:$0xff] %vm1100_vm1, %v18151_v3 }
  0x73   : > { %1115 = vst.msk [vmem:[#allocation2 + $0x68] sm:$0x3] %vm1102_vm2, %v18151_v3  ;;  %1117 = vst.msk [vmem:[#allocation2 + $0x78] sm:$0x3] %vm1102_vm2, %v18151_v3  ;;  %v1308_v24 = vld [vmem:[#allocation2] sm:$0xff] }
  0x74   : > { %1118 = vst.msk [vmem:[#allocation2 + $0x80] sm:$0xff] %vm1100_vm1, %v18151_v3  ;;  %1120 = vst.msk [vmem:[#allocation2 + $0x90] sm:$0xff] %vm1100_vm1, %v18151_v3  ;;  %v1317_v10 = vld [vmem:[#allocation2 + $0x1] sm:$0xff] }
  0x75   : > { %1119 = vst.msk [vmem:[#allocation2 + $0x88] sm:$0x3] %vm1102_vm2, %v18151_v3  ;;  %1121 = vst.msk [vmem:[#allocation2 + $0x98] sm:$0x3] %vm1102_vm2, %v18151_v3  ;;  %13854 = vmatmul.mubr.msk.f32.vlgmr.msra.gmra.mrb[0].mxu0 %vm1100_vm1, %v1317_v10  ;;  %v1614_v34 = vld [vmem:[#allocation2 + $0x2] sm:$0xff] }
  0x76   : > { %1297 = vst.msk [vmem:[#allocation2 + $0x11] sm:$0xff] %vm1100_vm1, %v1288_v6  ;;  %1298 = vst.msk [vmem:[#allocation2 + $0x21] sm:$0xff] %vm1100_vm1, %v1289_v7  ;;  %13863 = vmatpush1.msk.msra.mxu0 %vm1353_vm0, %v18356_v1  ;;  %1428 = vmatprep.mubr.f32.mxu0 %v18151_v3 }
  0x77   : > { %1299 = vst.msk [vmem:[#allocation2 + $0x31] sm:$0xff] %vm1100_vm1, %v1290_v8  ;;  %1300 = vst.msk [vmem:[#allocation2 + $0x41] sm:$0xff] %vm1100_vm1, %v1291_v11  ;;  %13873 = vmatprep.subr.msk.mxu0 %vm1353_vm0, %v1625_v9 }
  0x78   : > { %1301 = vst.msk [vmem:[#allocation2 + $0x51] sm:$0xff] %vm1100_vm1, %v1292_v12  ;;  %1302 = vst.msk [vmem:[#allocation2 + $0x61] sm:$0xff] %vm1100_vm1, %v1293_v13  ;;  %v18725_v13 = vld [vmem:[%s18242_s27] sm:$0xff]  }
  0x79   : > { %1303 = vst.msk [vmem:[#allocation2 + $0x71] sm:$0xff] %vm1100_vm1, %v1294_v14  ;;  %1304 = vst.msk [vmem:[#allocation2 + $0x81] sm:$0xff] %vm1100_vm1, %v1295_v15  ;;  %v17612_v14 = vld [vmem:[%s18187_s25 + $0x20] sm:$0xff]   ;;  %v17613_v15 = vld [vmem:[%s18242_s27 + $0x8] sm:$0xff]  }
  0x7a   : > { %16069 = vmatprep.subr.bf16.mxu1 %v17612_v14 }
  0x7b   : > { %v2298_v61 = vld [vmem:[#allocation2 + $0x90] sm:$0xff]  ;;  %16070 = vmatpush3.bf16.msra.mxu1 %v17612_v14 }
  0x7c   : > { %v2467_v4 = vld [vmem:[#allocation2 + $0x91] sm:$0xff] }
  0x7d   : > { %v18492_v16 = vld [vmem:[#allocation2 + $0x11] sm:$0xff]  ;;  %v18497_v17 = vld [vmem:[#allocation2 + $0x21] sm:$0xff] }
  0x7e   : > { %13855 = vmatmul.mubr.msk.f32.gmra.mrb[2].mxu0 %vm1100_vm1, %v18492_v16  ;;  %v18502_v18 = vld [vmem:[#allocation2 + $0x31] sm:$0xff]  ;;  %v18504_v19 = vld [vmem:[#allocation2 + $0x41] sm:$0xff] }
  0x7f   : > { %1434 = vmatprep.mubr.f32.mxu0 %v18151_v3  ;;  %v18509_v20 = vld [vmem:[#allocation2 + $0x51] sm:$0xff]  ;;  %v18514_v21 = vld [vmem:[#allocation2 + $0x61] sm:$0xff] }
  0x80   : > { %v18522_v22 = vld [vmem:[#allocation2 + $0x71] sm:$0xff]  ;;  %v1310_v27 = vld [vmem:[#allocation2 + $0x20] sm:$0xff] }
  0x81   : > { %v1309_v26 = vld [vmem:[#allocation2 + $0x10] sm:$0xff]  ;;  %v1312_v29 = vld [vmem:[#allocation2 + $0x40] sm:$0xff] }
  0x82   : > { %13856 = vmatmul.mubr.msk.f32.gmra.mrb[4].mxu0 %vm1100_vm1, %v18497_v17  ;;  %v1311_v28 = vld [vmem:[#allocation2 + $0x30] sm:$0xff]  ;;  %v1314_v31 = vld [vmem:[#allocation2 + $0x60] sm:$0xff] }
  0x83   : > { %1440 = vmatprep.mubr.f32.mxu0 %v18151_v3  ;;  %v1313_v30 = vld [vmem:[#allocation2 + $0x50] sm:$0xff]  ;;  %v18553_v37 = vld [vmem:[#allocation2 + $0x22] sm:$0xff] }
  0x84   : > { %v1315_v32 = vld [vmem:[#allocation2 + $0x70] sm:$0xff]  ;;  %v18563_v39 = vld [vmem:[#allocation2 + $0x42] sm:$0xff] }
  0x85   : > { %v18547_v36 = vld [vmem:[#allocation2 + $0x12] sm:$0xff]  ;;  %v18573_v41 = vld [vmem:[#allocation2 + $0x62] sm:$0xff] }
  0x86   : > { %13857 = vmatmul.mubr.msk.f32.gmra.mrb[6].mxu0 %vm1100_vm1, %v18502_v18  ;;  %v18558_v38 = vld [vmem:[#allocation2 + $0x32] sm:$0xff]  ;;  %v18603_v46 = vld [vmem:[#allocation2 + $0x80] sm:$0xff] }
  0x87   : > { %1446 = vmatprep.mubr.f32.mxu0 %v18151_v3  ;;  %v18568_v40 = vld [vmem:[#allocation2 + $0x52] sm:$0xff]  ;;  %v18631_v49 = vld [vmem:[#allocation2 + $0x81] sm:$0xff] }
  0x88   : > { %v18581_v42 = vld [vmem:[#allocation2 + $0x72] sm:$0xff]  ;;  %v18660_v52 = vld [vmem:[#allocation2 + $0x82] sm:$0xff] }
  0x89   : > { %v18084_v55 = vld [vmem:[#allocation2 + $0x20] sm:$0xff]  ;;  %v18085_v56 = vld [vmem:[#allocation2 + $0x30] sm:$0xff] }
  0x8a   : > { %13858 = vmatmul.mubr.msk.f32.gmra.mrb[8].mxu0 %vm1100_vm1, %v18504_v19  ;;  %v18086_v57 = vld [vmem:[#allocation2 + $0x40] sm:$0xff]  ;;  %v18087_v58 = vld [vmem:[#allocation2 + $0x50] sm:$0xff] }
  0x8b   : > { %1452 = vmatprep.mubr.f32.mxu0 %v18151_v3  ;;  %v18088_v59 = vld [vmem:[#allocation2 + $0x60] sm:$0xff]  ;;  %v18089_v60 = vld [vmem:[#allocation2 + $0x70] sm:$0xff] }
  0x8c   : > { %v18090_v62 = vld [vmem:[#allocation2 + $0x21] sm:$0xff]  ;;  %v18091_v63 = vld [vmem:[#allocation2 + $0x31] sm:$0xff] }
  0x8d   : > { %v18092_v0 = vld [vmem:[#allocation2 + $0x41] sm:$0xff]  ;;  %v18093_v1 = vld [vmem:[#allocation2 + $0x51] sm:$0xff] }
  0x8e   : > { %13859 = vmatmul.mubr.msk.f32.gmra.mrb[10].mxu0 %vm1100_vm1, %v18509_v20  ;;  %v18094_v2 = vld [vmem:[#allocation2 + $0x61] sm:$0xff]  ;;  %v18098_v7 = vld [vmem:[#allocation2 + $0x32] sm:$0xff] }
  0x8f   : > { %1458 = vmatprep.mubr.f32.mxu0 %v18151_v3  ;;  %v18097_v6 = vld [vmem:[#allocation2 + $0x22] sm:$0xff]  ;;  %v18100_v9 = vld [vmem:[#allocation2 + $0x52] sm:$0xff] }
  0x90   : > { %v18099_v8 = vld [vmem:[#allocation2 + $0x42] sm:$0xff]  ;;  %v18102_v11 = vld [vmem:[#allocation2 + $0x72] sm:$0xff] }
  0x91   : > { %v18101_v10 = vld [vmem:[#allocation2 + $0x62] sm:$0xff]  ;;  %v2636_v12 = vld [vmem:[#allocation2 + $0x92] sm:$0xff] }
  0x92   : > { %13860 = vmatmul.mubr.msk.f32.gmra.mrb[12].mxu0 %vm1100_vm1, %v18514_v21 }
  0x93   : > { %1464 = vmatprep.mubr.f32.mxu0 %v18151_v3 }
  0x96   : > { %13861 = vmatmul.mubr.msk.f32.gmra.mrb[14].mxu0 %vm1100_vm1, %v18522_v22 }
  0x97   : > { %1565 = vmatprep.mubr.f32.mxu0 %v18151_v3 }
  0x9a   : > { %13864 = vmatmul.mubr.msk.f32.vlgmr.msra.gmra.mrb[0].mxu0 %vm1100_vm1, %v1308_v24 }
  0x9b   : > { %13874 = vmatpush1.msk.msra.mxu0 %vm1353_vm0, %v13872_v5  ;;  %1571 = vmatprep.mubr.f32.mxu0 %v18151_v3  ;;  %v18705_v5 = vld [vmem:[#allocation6] sm:$0xff] }
  0x9c   : > { %13884 = vmatprep.subr.msk.mxu0 %vm1353_vm0, %v1794_v25  ;;  %1126 = vst.msk [vmem:[#allocation3 + $0x10] sm:$0xff] %vm1122_vm3, %v18705_v5  ;;  %1123 = vst.msk [vmem:[#allocation3] sm:$0xff] %vm1122_vm3, %v18705_v5  ;;  %v1305_v25 = vld [vmem:[%s18172_s13] sm:$0x3] }
  0x9d   : > { %1127 = vst.msk [vmem:[#allocation3 + $0x18] sm:$0x3] %vm1124_vm4, %v18705_v5  ;;  %1125 = vst.msk [vmem:[#allocation3 + $0x8] sm:$0x3] %vm1124_vm4, %v18705_v5 }
  0x9e   : > { %13865 = vmatmul.mubr.msk.f32.gmra.mrb[2].mxu0 %vm1100_vm1, %v1309_v26  ;;  %1128 = vst.msk [vmem:[#allocation3 + $0x20] sm:$0xff] %vm1122_vm3, %v18705_v5  ;;  %1130 = vst.msk [vmem:[#allocation3 + $0x30] sm:$0xff] %vm1122_vm3, %v18705_v5 }
  0x9f   : > { %1577 = vmatprep.mubr.f32.mxu0 %v18151_v3  ;;  %1129 = vst.msk [vmem:[#allocation3 + $0x28] sm:$0x3] %vm1124_vm4, %v18705_v5  ;;  %1131 = vst.msk [vmem:[#allocation3 + $0x38] sm:$0x3] %vm1124_vm4, %v18705_v5 }
  0xa0   : > { %1132 = vst.msk [vmem:[#allocation3 + $0x40] sm:$0xff] %vm1122_vm3, %v18705_v5  ;;  %1134 = vst.msk [vmem:[#allocation3 + $0x50] sm:$0xff] %vm1122_vm3, %v18705_v5 }
  0xa1   : > { %1133 = vst.msk [vmem:[#allocation3 + $0x48] sm:$0x3] %vm1124_vm4, %v18705_v5  ;;  %1135 = vst.msk [vmem:[#allocation3 + $0x58] sm:$0x3] %vm1124_vm4, %v18705_v5 }
  0xa2   : > { %13866 = vmatmul.mubr.msk.f32.gmra.mrb[4].mxu0 %vm1100_vm1, %v1310_v27  ;;  %1136 = vst.msk [vmem:[#allocation3 + $0x60] sm:$0xff] %vm1122_vm3, %v18705_v5  ;;  %1138 = vst.msk [vmem:[#allocation3 + $0x70] sm:$0xff] %vm1122_vm3, %v18705_v5 }
  0xa3   : > { %1583 = vmatprep.mubr.f32.mxu0 %v18151_v3  ;;  %1137 = vst.msk [vmem:[#allocation3 + $0x68] sm:$0x3] %vm1124_vm4, %v18705_v5  ;;  %1139 = vst.msk [vmem:[#allocation3 + $0x78] sm:$0x3] %vm1124_vm4, %v18705_v5 }
  0xa4   : > { %1140 = vst.msk [vmem:[#allocation3 + $0x80] sm:$0xff] %vm1122_vm3, %v18705_v5  ;;  %1142 = vst.msk [vmem:[#allocation3 + $0x90] sm:$0xff] %vm1122_vm3, %v18705_v5 }
  0xa5   : > { %1141 = vst.msk [vmem:[#allocation3 + $0x88] sm:$0x3] %vm1124_vm4, %v18705_v5  ;;  %1143 = vst.msk [vmem:[#allocation3 + $0x98] sm:$0x3] %vm1124_vm4, %v18705_v5 }
  0xa6   : > { %13867 = vmatmul.mubr.msk.f32.gmra.mrb[6].mxu0 %vm1100_vm1, %v1311_v28  ;;  %1144 = vst.msk [vmem:[#allocation4] sm:$0xff] %vm1122_vm3, %v18705_v5  ;;  %1146 = vst.msk [vmem:[#allocation4 + $0x10] sm:$0xff] %vm1122_vm3, %v18705_v5 }
  0xa7   : > { %1589 = vmatprep.mubr.f32.mxu0 %v18151_v3  ;;  %1145 = vst.msk [vmem:[#allocation4 + $0x8] sm:$0x3] %vm1124_vm4, %v18705_v5  ;;  %1147 = vst.msk [vmem:[#allocation4 + $0x18] sm:$0x3] %vm1124_vm4, %v18705_v5 }
  0xa8   : > { %1148 = vst.msk [vmem:[#allocation4 + $0x20] sm:$0xff] %vm1122_vm3, %v18705_v5  ;;  %1150 = vst.msk [vmem:[#allocation4 + $0x30] sm:$0xff] %vm1122_vm3, %v18705_v5 }
  0xa9   : > { %1149 = vst.msk [vmem:[#allocation4 + $0x28] sm:$0x3] %vm1124_vm4, %v18705_v5  ;;  %1151 = vst.msk [vmem:[#allocation4 + $0x38] sm:$0x3] %vm1124_vm4, %v18705_v5 }
  0xaa   : > { %13868 = vmatmul.mubr.msk.f32.gmra.mrb[8].mxu0 %vm1100_vm1, %v1312_v29  ;;  %1152 = vst.msk [vmem:[#allocation4 + $0x40] sm:$0xff] %vm1122_vm3, %v18705_v5  ;;  %1154 = vst.msk [vmem:[#allocation4 + $0x50] sm:$0xff] %vm1122_vm3, %v18705_v5 }
  0xab   : > { %1595 = vmatprep.mubr.f32.mxu0 %v18151_v3  ;;  %1153 = vst.msk [vmem:[#allocation4 + $0x48] sm:$0x3] %vm1124_vm4, %v18705_v5  ;;  %1155 = vst.msk [vmem:[#allocation4 + $0x58] sm:$0x3] %vm1124_vm4, %v18705_v5 }
  0xac   : > { %1156 = vst.msk [vmem:[#allocation4 + $0x60] sm:$0xff] %vm1122_vm3, %v18705_v5  ;;  %1158 = vst.msk [vmem:[#allocation4 + $0x70] sm:$0xff] %vm1122_vm3, %v18705_v5 }
  0xad   : > { %1157 = vst.msk [vmem:[#allocation4 + $0x68] sm:$0x3] %vm1124_vm4, %v18705_v5  ;;  %1159 = vst.msk [vmem:[#allocation4 + $0x78] sm:$0x3] %vm1124_vm4, %v18705_v5 }
  0xae   : > { %13869 = vmatmul.mubr.msk.f32.gmra.mrb[10].mxu0 %vm1100_vm1, %v1313_v30  ;;  %1160 = vst.msk [vmem:[#allocation4 + $0x80] sm:$0xff] %vm1122_vm3, %v18705_v5  ;;  %1162 = vst.msk [vmem:[#allocation4 + $0x90] sm:$0xff] %vm1122_vm3, %v18705_v5 }
  0xaf   : > { %1601 = vmatprep.mubr.f32.mxu0 %v18151_v3  ;;  %1161 = vst.msk [vmem:[#allocation4 + $0x88] sm:$0x3] %vm1124_vm4, %v18705_v5  ;;  %1163 = vst.msk [vmem:[#allocation4 + $0x98] sm:$0x3] %vm1124_vm4, %v18705_v5 }
  0xb0   : > { %1206 = vst.msk [vmem:[#allocation7] sm:$0xff] %vm1122_vm3, %v18705_v5  ;;  %1208 = vst.msk [vmem:[#allocation7 + $0x10] sm:$0xff] %vm1122_vm3, %v18705_v5 }
  0xb1   : > { %1207 = vst.msk [vmem:[#allocation7 + $0x8] sm:$0x3] %vm1124_vm4, %v18705_v5  ;;  %1209 = vst.msk [vmem:[#allocation7 + $0x18] sm:$0x3] %vm1124_vm4, %v18705_v5 }
  0xb2   : > { %13870 = vmatmul.mubr.msk.f32.gmra.mrb[12].mxu0 %vm1100_vm1, %v1314_v31  ;;  %1210 = vst.msk [vmem:[#allocation7 + $0x20] sm:$0xff] %vm1122_vm3, %v18705_v5  ;;  %1212 = vst.msk [vmem:[#allocation7 + $0x30] sm:$0xff] %vm1122_vm3, %v18705_v5 }
  0xb3   : > { %1607 = vmatprep.mubr.f32.mxu0 %v18151_v3  ;;  %1211 = vst.msk [vmem:[#allocation7 + $0x28] sm:$0x3] %vm1124_vm4, %v18705_v5  ;;  %1213 = vst.msk [vmem:[#allocation7 + $0x38] sm:$0x3] %vm1124_vm4, %v18705_v5 }
  0xb4   : > { %1214 = vst.msk [vmem:[#allocation7 + $0x40] sm:$0xff] %vm1122_vm3, %v18705_v5  ;;  %1216 = vst.msk [vmem:[#allocation7 + $0x50] sm:$0xff] %vm1122_vm3, %v18705_v5 }
  0xb5   : > { %1215 = vst.msk [vmem:[#allocation7 + $0x48] sm:$0x3] %vm1124_vm4, %v18705_v5  ;;  %1217 = vst.msk [vmem:[#allocation7 + $0x58] sm:$0x3] %vm1124_vm4, %v18705_v5 }
  0xb6   : > { %13871 = vmatmul.mubr.msk.f32.gmra.mrb[14].mxu0 %vm1100_vm1, %v1315_v32  ;;  %1218 = vst.msk [vmem:[#allocation7 + $0x60] sm:$0xff] %vm1122_vm3, %v18705_v5  ;;  %1220 = vst.msk [vmem:[#allocation7 + $0x70] sm:$0xff] %vm1122_vm3, %v18705_v5 }
  0xb7   : > { %1718 = vmatprep.mubr.f32.mxu0 %v18151_v3  ;;  %1219 = vst.msk [vmem:[#allocation7 + $0x68] sm:$0x3] %vm1124_vm4, %v18705_v5  ;;  %1221 = vst.msk [vmem:[#allocation7 + $0x78] sm:$0x3] %vm1124_vm4, %v18705_v5 }
  0xb8   : > { %1222 = vst.msk [vmem:[#allocation7 + $0x80] sm:$0xff] %vm1122_vm3, %v18705_v5  ;;  %1224 = vst.msk [vmem:[#allocation7 + $0x90] sm:$0xff] %vm1122_vm3, %v18705_v5 }
  0xb9   : > { %1223 = vst.msk [vmem:[#allocation7 + $0x88] sm:$0x3] %vm1124_vm4, %v18705_v5  ;;  %1225 = vst.msk [vmem:[#allocation7 + $0x98] sm:$0x3] %vm1124_vm4, %v18705_v5 }
  0xba   : > { %13875 = vmatmul.mubr.msk.f32.vlgmr.msra.gmra.mrb[0].mxu0 %vm1100_vm1, %v1614_v34 }
  0xbb   : > { %13885 = vmatpush1.msk.msra.mxu0 %vm1353_vm0, %v13883_v23  ;;  %1724 = vmatprep.mubr.f32.mxu0 %v18151_v3 }
  0xbc   : > { %13895 = vmatprep.subr.msk.mxu0 %vm1353_vm0, %v1963_v35 }
  0xbe   : > { %13876 = vmatmul.mubr.msk.f32.gmra.mrb[2].mxu0 %vm1100_vm1, %v18547_v36 }
  0xbf   : > { %1730 = vmatprep.mubr.f32.mxu0 %v18151_v3 }
  0xc2   : > { %13877 = vmatmul.mubr.msk.f32.gmra.mrb[4].mxu0 %vm1100_vm1, %v18553_v37 }
  0xc3   : > { %1736 = vmatprep.mubr.f32.mxu0 %v18151_v3 }
  0xc6   : > { %13878 = vmatmul.mubr.msk.f32.gmra.mrb[6].mxu0 %vm1100_vm1, %v18558_v38 }
  0xc7   : > { %1742 = vmatprep.mubr.f32.mxu0 %v18151_v3 }
  0xca   : > { %13879 = vmatmul.mubr.msk.f32.gmra.mrb[8].mxu0 %vm1100_vm1, %v18563_v39 }
  0xcb   : > { %1748 = vmatprep.mubr.f32.mxu0 %v18151_v3 }
  0xce   : > { %13880 = vmatmul.mubr.msk.f32.gmra.mrb[10].mxu0 %vm1100_vm1, %v18568_v40 }
  0xcf   : > { %1754 = vmatprep.mubr.f32.mxu0 %v18151_v3 }
  0xd2   : > { %13881 = vmatmul.mubr.msk.f32.gmra.mrb[12].mxu0 %vm1100_vm1, %v18573_v41 }
  0xd3   : > { %1760 = vmatprep.mubr.f32.mxu0 %v18151_v3 }
  0xd6   : > { %13882 = vmatmul.mubr.msk.f32.gmra.mrb[14].mxu0 %vm1100_vm1, %v18581_v42 }
  0xd7   : > { %1887 = vmatprep.mubr.f32.mxu0 %v18151_v3 }
  0xda   : > { %13886 = vmatmul.mubr.msk.f32.vlgmr.msra.gmra.mrb[0].mxu0 %vm1100_vm1, %v1309_v26 }
  0xdb   : > { %13896 = vmatpush1.msk.msra.mxu0 %vm1353_vm0, %v13894_v33  ;;  %1893 = vmatprep.mubr.f32.mxu0 %v18151_v3 }
  0xdc   : > { %13906 = vmatprep.subr.msk.mxu0 %vm1353_vm0, %v2132_v44 }
  0xde   : > { %13887 = vmatmul.mubr.msk.f32.gmra.mrb[2].mxu0 %vm1100_vm1, %v1310_v27  ;;  %v1306_v27 = vld [vmem:[%s18177_s17] sm:$0x3] }
  0xdf   : > { %1899 = vmatprep.mubr.f32.mxu0 %v18151_v3 }
  0xe2   : > { %13888 = vmatmul.mubr.msk.f32.gmra.mrb[4].mxu0 %vm1100_vm1, %v1311_v28 }
  0xe3   : > { %1905 = vmatprep.mubr.f32.mxu0 %v18151_v3  ;;  %v18095_v3 = vld [vmem:[#allocation2 + $0x71] sm:$0xff] }
  0xe6   : > { %13889 = vmatmul.mubr.msk.f32.gmra.mrb[6].mxu0 %vm1100_vm1, %v1312_v29  ;;  %v1307_v29 = vld [vmem:[%s18182_s21] sm:$0x3] }
  0xe7   : > { %1911 = vmatprep.mubr.f32.mxu0 %v18596_v45 }
  0xea   : > { %13890 = vmatmul.mubr.msk.f32.gmra.mrb[8].mxu0 %vm1100_vm1, %v1313_v30 }
  0xeb   : > { %1917 = vmatprep.mubr.f32.mxu0 %v18596_v45 }
  0xee   : > { %13891 = vmatmul.mubr.msk.f32.gmra.mrb[10].mxu0 %vm1100_vm1, %v1314_v31 }
  0xef   : > { %1923 = vmatprep.mubr.f32.mxu0 %v18596_v45 }
  0xf2   : > { %13892 = vmatmul.mubr.msk.f32.gmra.mrb[12].mxu0 %vm1100_vm1, %v1315_v32 }
  0xf3   : > { %1929 = vmatprep.mubr.f32.mxu0 %v18596_v45 }
  0xf6   : > { %13893 = vmatmul.mubr.msk.f32.gmra.mrb[14].mxu0 %vm1100_vm1, %v18603_v46 }
  0xf7   : > { %2056 = vmatprep.mubr.f32.mxu0 %v18596_v45 }
  0xfa   : > { %13897 = vmatmul.mubr.msk.f32.vlgmr.msra.gmra.mrb[0].mxu0 %vm1100_vm1, %v18492_v16  ;;  %v17614_v16 = vld [vmem:[%s18187_s25 + $0x28] sm:$0xff]  }
  0xfb   : > { %13907 = vmatpush1.msk.msra.mxu0 %vm1353_vm0, %v13905_v43  ;;  %2062 = vmatprep.mubr.f32.mxu0 %v18596_v45  ;;  %v17647_v43 = vld [vmem:[%s18252_s6 + $0x4] ss:$8 sps:$4 sm:$0xff]  }
  0xfc   : > { %13917 = vmatprep.subr.msk.mxu0 %vm1353_vm0, %v2302_v48  ;;  %16071 = vmatprep.subr.bf16.mxu1 %v17614_v16 }
  0xfd   : > { %16072 = vmatpush3.bf16.msra.mxu1 %v17614_v16 }
  0xfe   : > { %13898 = vmatmul.mubr.msk.f32.gmra.mrb[2].mxu0 %vm1100_vm1, %v18497_v17  ;;  %v17615_v17 = vld [vmem:[%s18242_s27 + $0x10] sm:$0xff]  }
  0xff   : > { %2068 = vmatprep.mubr.f32.mxu0 %v18596_v45 }
 0x102   : > { %13899 = vmatmul.mubr.msk.f32.gmra.mrb[4].mxu0 %vm1100_vm1, %v18502_v18  ;;  %v17616_v18 = vld [vmem:[%s18187_s25 + $0x30] sm:$0xff]  }
 0x103   : > { %2074 = vmatprep.mubr.f32.mxu0 %v18596_v45  ;;  %16073 = vmatprep.subr.bf16.mxu1 %v17616_v18 }
 0x104   : > { %16074 = vmatpush3.bf16.msra.mxu1 %v17616_v18 }
 0x106   : > { %13900 = vmatmul.mubr.msk.f32.gmra.mrb[6].mxu0 %vm1100_vm1, %v18504_v19  ;;  %v17617_v19 = vld [vmem:[%s18242_s27 + $0x18] sm:$0xff]  }
 0x107   : > { %2080 = vmatprep.mubr.f32.mxu0 %v18596_v45 }
 0x10a   : > { %13901 = vmatmul.mubr.msk.f32.gmra.mrb[8].mxu0 %vm1100_vm1, %v18509_v20  ;;  %v17618_v20 = vld [vmem:[%s18187_s25 + $0x38] sm:$0xff]  }
 0x10b   : > { %2086 = vmatprep.mubr.f32.mxu0 %v18596_v45  ;;  %16075 = vmatprep.subr.bf16.mxu1 %v17618_v20 }
 0x10c   : > { %16076 = vmatpush3.bf16.msra.mxu1 %v17618_v20 }
 0x10e   : > { %13902 = vmatmul.mubr.msk.f32.gmra.mrb[10].mxu0 %vm1100_vm1, %v18514_v21  ;;  %v18857_v21 = vld [vmem:[%s18187_s25] sm:$0xff]  }
 0x10f   : > { %2092 = vmatprep.mubr.f32.mxu0 %v18596_v45  ;;  %16085 = vmatprep.subr.bf16.mxu1 %v18857_v21 }
 0x112   : > { %13903 = vmatmul.mubr.msk.f32.gmra.mrb[12].mxu0 %vm1100_vm1, %v18522_v22  ;;  %v2799_v22 = vlaneseq }
 0x113   : > { %2098 = vmatprep.mubr.f32.mxu0 %v18596_v45 }
 0x114   : > { %v2800_v23 = vshrl.u32 %v2799_v22, 7  ;;  %v17651_v22 = vld [vmem:[%s18252_s6 + $0x14] ss:$8 sps:$4 sm:$0xff]  }
 0x116   : > { %13904 = vmatmul.mubr.msk.f32.gmra.mrb[14].mxu0 %vm1100_vm1, %v18631_v49  ;;  %v18860_v24 = vsub.s32 0, %v2800_v23  ;;  %v18863_v26 = vsub.s32 1, %v2800_v23 }
 0x117   : > { %2225 = vmatprep.mubr.f32.mxu0 %v18596_v45 }
 0x118   : > { %v18867_v28 = vrot.slane %v1305_v25, %v18860_v24  ;;  %v18871_v30 = vrot.slane %v1305_v25, %v18863_v26  ;;  %v18874_v31 = vrot.slane %v1306_v27, %v18860_v24  ;;  %v18878_v35 = vrot.slane %v1307_v29, %v18860_v24 }
 0x11a   : > { %13908 = vmatmul.mubr.msk.f32.vlgmr.msra.gmra.mrb[0].mxu0 %vm1100_vm1, %v18547_v36 }
 0x11b   : > { %13918 = vmatpush1.msk.msra.mxu0 %vm1353_vm0, %v13916_v47  ;;  %2231 = vmatprep.mubr.f32.mxu0 %v18596_v45 }
 0x11c   : > { %13928 = vmatprep.subr.msk.mxu0 %vm1353_vm0, %v2471_v51 }
 0x11e   : > { %13909 = vmatmul.mubr.msk.f32.gmra.mrb[2].mxu0 %vm1100_vm1, %v18553_v37  ;;  %v18882_v37 = vrot.slane %v1306_v27, %v18863_v26 }
 0x11f   : > { %2237 = vmatprep.mubr.f32.mxu0 %v18596_v45 }
 0x122   : > { %13910 = vmatmul.mubr.msk.f32.gmra.mrb[4].mxu0 %vm1100_vm1, %v18558_v38 }
 0x123   : > { %2243 = vmatprep.mubr.f32.mxu0 %v18596_v45 }
 0x126   : > { %13911 = vmatmul.mubr.msk.f32.gmra.mrb[6].mxu0 %vm1100_vm1, %v18563_v39 }
 0x127   : > { %2249 = vmatprep.mubr.f32.mxu0 %v18596_v45 }
 0x12a   : > { %13912 = vmatmul.mubr.msk.f32.gmra.mrb[8].mxu0 %vm1100_vm1, %v18568_v40 }
 0x12b   : > { %2255 = vmatprep.mubr.f32.mxu0 %v18596_v45 }
 0x12e   : > { %13913 = vmatmul.mubr.msk.f32.gmra.mrb[10].mxu0 %vm1100_vm1, %v18573_v41 }
 0x12f   : > { %2261 = vmatprep.mubr.f32.mxu0 %v18596_v45 }
 0x132   : > { %13914 = vmatmul.mubr.msk.f32.gmra.mrb[12].mxu0 %vm1100_vm1, %v18581_v42 }
 0x133   : > { %2267 = vmatprep.mubr.f32.mxu0 %v18596_v45 }
 0x136   : > { %13915 = vmatmul.mubr.msk.f32.gmra.mrb[14].mxu0 %vm1100_vm1, %v18660_v52 }
 0x137   : > { %2395 = vmatprep.mubr.f32.mxu0 %v18596_v45 }
 0x13a   : > { %13919 = vmatmul.mubr.msk.f32.vlgmr.msra.gmra.mrb[0].mxu0 %vm1100_vm1, %v18084_v55 }
 0x13b   : > { %13929 = vmatpush1.msk.msra.mxu0 %vm1353_vm0, %v13927_v50  ;;  %2401 = vmatprep.mubr.f32.mxu0 %v18596_v45 }
 0x13c   : > { %13939 = vmatprep.subr.msk.mxu0 %vm1353_vm0, %v2640_v54 }
 0x13e   : > { %13920 = vmatmul.mubr.msk.f32.gmra.mrb[2].mxu0 %vm1100_vm1, %v18085_v56 }
 0x13f   : > { %2407 = vmatprep.mubr.f32.mxu0 %v18596_v45 }
 0x142   : > { %13921 = vmatmul.mubr.msk.f32.gmra.mrb[4].mxu0 %vm1100_vm1, %v18086_v57 }
 0x143   : > { %2413 = vmatprep.mubr.f32.mxu0 %v18596_v45 }
 0x146   : > { %13922 = vmatmul.mubr.msk.f32.gmra.mrb[6].mxu0 %vm1100_vm1, %v18087_v58 }
 0x147   : > { %2419 = vmatprep.mubr.f32.mxu0 %v18596_v45 }
 0x14a   : > { %13923 = vmatmul.mubr.msk.f32.gmra.mrb[8].mxu0 %vm1100_vm1, %v18088_v59  ;;  %v3211_v59 = vld [vmem:[#allocation3 + $0x1] sm:$0xff] }
 0x14b   : > { %2425 = vmatprep.mubr.f32.mxu0 %v18596_v45 }
 0x14e   : > { %13924 = vmatmul.mubr.msk.f32.gmra.mrb[10].mxu0 %vm1100_vm1, %v18089_v60 }
 0x14f   : > { %2431 = vmatprep.mubr.f32.mxu0 %v18596_v45 }
 0x152   : > { %13925 = vmatmul.mubr.msk.f32.gmra.mrb[12].mxu0 %vm1100_vm1, %v18603_v46 }
 0x153   : > { %2437 = vmatprep.mubr.f32.mxu0 %v18596_v45 }
 0x156   : > { %13926 = vmatmul.mubr.msk.f32.gmra.mrb[14].mxu0 %vm1100_vm1, %v2298_v61 }
 0x157   : > { %2564 = vmatprep.mubr.f32.mxu0 %v18596_v45 }
 0x15a   : > { %13930 = vmatmul.mubr.msk.f32.vlgmr.msra.gmra.mrb[0].mxu0 %vm1100_vm1, %v18090_v62 }
 0x15b   : > { %13940 = vmatpush1.msk.msra.mxu0 %vm1353_vm0, %v13938_v53  ;;  %2570 = vmatprep.mubr.f32.mxu0 %v18596_v45 }
 0x15c   : > { %16053 = vmatprep.subr.bf16.mxu0 %v18725_v13 }
 0x15e   : > { %13931 = vmatmul.mubr.msk.f32.gmra.mrb[2].mxu0 %vm1100_vm1, %v18091_v63 }
 0x15f   : > { %2576 = vmatprep.mubr.f32.mxu0 %v18596_v45 }
 0x162   : > { %13932 = vmatmul.mubr.msk.f32.gmra.mrb[4].mxu0 %vm1100_vm1, %v18092_v0 }
 0x163   : > { %2582 = vmatprep.mubr.f32.mxu0 %v18596_v45 }
 0x166   : > { %13933 = vmatmul.mubr.msk.f32.gmra.mrb[6].mxu0 %vm1100_vm1, %v18093_v1 }
 0x167   : > { %2588 = vmatprep.mubr.f32.mxu0 %v18596_v45 }
 0x16a   : > { %13934 = vmatmul.mubr.msk.f32.gmra.mrb[8].mxu0 %vm1100_vm1, %v18094_v2 }
 0x16b   : > { %2594 = vmatprep.mubr.f32.mxu0 %v18596_v45 }
 0x16e   : > { %13935 = vmatmul.mubr.msk.f32.gmra.mrb[10].mxu0 %vm1100_vm1, %v18095_v3 }
 0x16f   : > { %2600 = vmatprep.mubr.f32.mxu0 %v18596_v45 }
 0x172   : > { %13936 = vmatmul.mubr.msk.f32.gmra.mrb[12].mxu0 %vm1100_vm1, %v18631_v49 }
 0x173   : > { %2606 = vmatprep.mubr.f32.mxu0 %v18596_v45  ;;  %v18890_v45 = vrot.slane %v1307_v29, %v18863_v26 }
 0x176   : > { %13937 = vmatmul.mubr.msk.f32.gmra.mrb[14].mxu0 %vm1100_vm1, %v2467_v4 }
 0x177   : > { %2733 = vmatprep.mubr.f32.mxu0 %v18705_v5 }
 0x17a   : > { %13941 = vmatmul.mubr.msk.f32.vlgmr.msra.gmra.mrb[0].mxu0 %vm1100_vm1, %v18097_v6 }
 0x17b   : > { %2739 = vmatprep.mubr.f32.mxu0 %v18705_v5  ;;  %16054 = vmatpush3.bf16.msra.mxu0 %v18725_v13 }
 0x17c   : > { %16055 = vmatprep.subr.bf16.mxu0 %v17613_v15 }
 0x17e   : > { %13942 = vmatmul.mubr.msk.f32.gmra.mrb[2].mxu0 %vm1100_vm1, %v18098_v7 }
 0x17f   : > { %2745 = vmatprep.mubr.f32.mxu0 %v18705_v5  ;;  %16056 = vmatpush3.bf16.msra.mxu0 %v17613_v15 }
 0x180   : > { %16057 = vmatprep.subr.bf16.mxu0 %v17615_v17 }
 0x182   : > { %13943 = vmatmul.mubr.msk.f32.gmra.mrb[4].mxu0 %vm1100_vm1, %v18099_v8 }
 0x183   : > { %2751 = vmatprep.mubr.f32.mxu0 %v18705_v5  ;;  %16058 = vmatpush3.bf16.msra.mxu0 %v17615_v17  ;;  %v17645_v17 = vld [vmem:[%s18252_s6] ss:$8 sps:$4 sm:$0xff]  }
 0x184   : > { %16059 = vmatprep.subr.bf16.mxu0 %v17617_v19 }
 0x186   : > { %13944 = vmatmul.mubr.msk.f32.gmra.mrb[6].mxu0 %vm1100_vm1, %v18100_v9 }
 0x187   : > { %2757 = vmatprep.mubr.f32.mxu0 %v18705_v5  ;;  %16060 = vmatpush3.bf16.msra.mxu0 %v17617_v19 }
 0x188   : > { %3091 = vmatprep.subr.bf16.mxu0 %v17647_v43 }
 0x18a   : > { %13945 = vmatmul.mubr.msk.f32.gmra.mrb[8].mxu0 %vm1100_vm1, %v18101_v10 }
 0x18b   : > { %2763 = vmatprep.mubr.f32.mxu0 %v18705_v5 }
 0x18e   : > { %13946 = vmatmul.mubr.msk.f32.gmra.mrb[10].mxu0 %vm1100_vm1, %v18102_v11 }
 0x18f   : > { %2769 = vmatprep.mubr.f32.mxu0 %v18705_v5 }
 0x192   : > { %13947 = vmatmul.mubr.msk.f32.gmra.mrb[12].mxu0 %vm1100_vm1, %v18660_v52 }
 0x193   : > { %2775 = vmatprep.mubr.f32.mxu0 %v18705_v5 }
 0x196   : > { %13948 = vmatmul.mubr.msk.f32.gmra.mrb[14].mxu0 %vm1100_vm1, %v2636_v12 }
 0x24d   : > { %v2735_v32 = vpop.f32.mrb[0].mxu0 }
 0x24e   : > { %v2809_v33 = vmul.f32 %v18867_v28, %v2735_v32  ;;  %v2737_v34 = vpop.f32.mrb[1].mxu0 }
 0x24f   : > { %v2810_v36 = vmul.f32 %v18871_v30, %v2737_v34 }
 0x250   : > { %v2836_v38 = vadd.f32 %v18874_v31, %v2809_v33  ;;  %v17620_v33 = vld [vmem:[%s18187_s25 + $0x8] sm:$0xff]  }
 0x251   : > { %v2741_v39 = vpop.f32.mrb[2].mxu0  ;;  %v2837_v44 = vadd.f32 %v18882_v37, %v2810_v36 }
 0x252   : > { %v2811_v40 = vmul.f32 %v18867_v28, %v2741_v39  ;;  %v2743_v41 = vpop.f32.mrb[3].mxu0  ;;  %v2863_v42 = vmax.f32 %v2836_v38, %v18878_v35  ;;  %v17649_v38 = vld [vmem:[%s18252_s6 + $0x10] ss:$8 sps:$4 sm:$0xff]  }
 0x253   : > { %v2812_v46 = vmul.f32 %v18871_v30, %v2743_v41  ;;  %v2864_v53 = vmax.f32 %v2837_v44, %v18890_v45 }
 0x254   : > { %v2838_v47 = vadd.f32 %v18874_v31, %v2811_v40  ;;  %4389 = vrot.lane.b32.xlu0 %v2863_v42, %s18152_s7  ;;  %3181 = vst.msk [vmem:[#allocation3 + $0x11] sm:$0xff] %vm1122_vm3, %v2863_v42  ;;  %v17655_v42 = vld [vmem:[%s18252_s6 + $0x24] ss:$8 sps:$4 sm:$0xff]  }
 0x255   : > { %v2839_v48 = vadd.f32 %v18882_v37, %v2812_v46  ;;  %v2747_v49 = vpop.f32.mrb[4].mxu0 }
 0x256   : > { %v2813_v50 = vmul.f32 %v18867_v28, %v2747_v49  ;;  %v2749_v51 = vpop.f32.mrb[5].mxu0  ;;  %v2865_v52 = vmax.f32 %v2838_v47, %v18878_v35  ;;  %v17621_v49 = vld [vmem:[%s18187_s25 + $0x10] sm:$0xff]  }
 0x257   : > { %v2866_v54 = vmax.f32 %v2839_v48, %v18890_v45  ;;  %v2814_v55 = vmul.f32 %v18871_v30, %v2749_v51 }
 0x258   : > { %v2840_v56 = vadd.f32 %v18874_v31, %v2813_v50  ;;  %4391 = vrot.lane.b32.xlu0 %v2865_v52, %s18152_s7  ;;  %3182 = vst.msk [vmem:[#allocation3 + $0x21] sm:$0xff] %vm1122_vm3, %v2865_v52 }
 0x259   : > { %v18905_v57 = vpack.c.bf16 %v2866_v54, %v2864_v53  ;;  %v2753_v58 = vpop.f32.mrb[6].mxu0  ;;  %v2841_v63 = vadd.f32 %v18882_v37, %v2814_v55  ;;  %v17653_v53 = vld [vmem:[%s18252_s6 + $0x20] ss:$8 sps:$4 sm:$0xff]  }
 0x25a   : > { %v2815_v60 = vmul.f32 %v18867_v28, %v2753_v58  ;;  %v2755_v61 = vpop.f32.mrb[7].mxu0  ;;  %v2867_v62 = vmax.f32 %v2840_v56, %v18878_v35  ;;  %v17659_v56 = vld [vmem:[%s18252_s6 + $0x34] ss:$8 sps:$4 sm:$0xff]  }
 0x25b   : > { %v2816_v0 = vmul.f32 %v18871_v30, %v2755_v61  ;;  %16061 = vmatprep.mubr.msk.bf16.mxu0 %vm1122_vm3, %v18905_v57  ;;  %v18913_v1 = vld [vmem:[#allocation3 + $0x11] sm:$0xff]  ;;  %v2868_v9 = vmax.f32 %v2841_v63, %v18890_v45  ;;  %v17657_v63 = vld [vmem:[%s18252_s6 + $0x30] ss:$8 sps:$4 sm:$0xff]  }
 0x25c   : > { %v2842_v2 = vadd.f32 %v18874_v31, %v2815_v60  ;;  %4393 = vrot.lane.b32.xlu1 %v2867_v62, %s18152_s7  ;;  %3183 = vst.msk [vmem:[#allocation3 + $0x31] sm:$0xff] %vm1122_vm3, %v2867_v62  ;;  %v3219_v3 = vpack.c.bf16 %v18913_v1, %v3211_v59 }
 0x25d   : > { %v2843_v4 = vadd.f32 %v18882_v37, %v2816_v0  ;;  %v2759_v5 = vpop.f32.mrb[8].mxu0 }
 0x25e   : > { %v2817_v6 = vmul.f32 %v18867_v28, %v2759_v5  ;;  %v2761_v7 = vpop.f32.mrb[9].mxu0  ;;  %16077 = vmatprep.mubr.msk.bf16.mxu1 %vm1122_vm3, %v3219_v3  ;;  %v2869_v8 = vmax.f32 %v2842_v2, %v18878_v35  ;;  %v17623_v3 = vld [vmem:[%s18187_s25 + $0x40] sm:$0xff]  }
 0x25f   : > { %v2870_v10 = vmax.f32 %v2843_v4, %v18890_v45  ;;  %v2818_v11 = vmul.f32 %v18871_v30, %v2761_v7  ;;  %v18926_v12 = vld [vmem:[#allocation3 + $0x21] sm:$0xff]  ;;  %v19001_v5 = vld [vmem:[#allocation3 + $0x10] sm:$0xff]  ;;  %v20922_v7 = vmov 0  }
 0x260   : > { %v2844_v13 = vadd.f32 %v18874_v31, %v2817_v6  ;;  %4395 = vrot.lane.b32.xlu1 %v2869_v8, %s18152_s7  ;;  %3184 = vst.msk [vmem:[#allocation3 + $0x41] sm:$0xff] %vm1122_vm3, %v2869_v8  ;;  %v3702_v14 = vpack.c.bf16 %v18926_v12, %v18913_v1  ;;  %v3191_v4 = vld [vmem:[#allocation3] sm:$0xff] }
 0x261   : > { %v18933_v15 = vpack.c.bf16 %v2870_v10, %v2868_v9  ;;  %v2765_v16 = vpop.f32.mrb[10].mxu0  ;;  %v2845_v23 = vadd.f32 %v18882_v37, %v2818_v11  ;;  %v3199_v6 = vpack.c.bf16 %v19001_v5, %v3191_v4  ;;  %v3193_v10 = vld [vmem:[#allocation3 + $0x20] sm:$0xff]  ;;  %v17643_v4 = vld [vmem:[%s18187_s25 + $0xe0] sm:$0xff]  }
 0x262   : > { %v2819_v18 = vmul.f32 %v18867_v28, %v2765_v16  ;;  %v2767_v19 = vpop.f32.mrb[11].mxu0  ;;  %v2871_v20 = vmax.f32 %v2844_v13, %v18878_v35  ;;  %v17637_v1 = vld [vmem:[%s18187_s25 + $0xb0] sm:$0xff]  }
 0x263   : > { %v2820_v25 = vmul.f32 %v18871_v30, %v2767_v19  ;;  %16062 = vmatmul.mubr.msk.bf16.vlgmr.msra.gmra.mrb[16].mxu0 %vm1122_vm3, %v18933_v15  ;;  %v18943_v27 = vld [vmem:[#allocation3 + $0x31] sm:$0xff]  ;;  %v2872_v43 = vmax.f32 %v2845_v23, %v18890_v45  ;;  %v3434_v19 = vld [vmem:[#allocation3 + $0x2] sm:$0xff] }
 0x264   : > { %v2846_v29 = vadd.f32 %v18874_v31, %v2819_v18  ;;  %4397 = vrot.lane.b32.xlu0 %v2871_v20, %s18152_s7  ;;  %3185 = vst.msk [vmem:[#allocation3 + $0x51] sm:$0xff] %vm1122_vm3, %v2871_v20  ;;  %v18950_v32 = vpack.c.bf16 %v18943_v27, %v18926_v12  ;;  %3092 = vmatpush1.bf16.msra.mxu0 %v17645_v17  ;;  %v3194_v8 = vld [vmem:[#allocation3 + $0x30] sm:$0xff]  ;;  %v17625_v17 = vld [vmem:[%s18187_s25 + $0x50] sm:$0xff]  }
 0x265   : > { %v2847_v34 = vadd.f32 %v18882_v37, %v2820_v25  ;;  %v2771_v36 = vpop.f32.mrb[12].mxu0  ;;  %3093 = vmatprep.subr.bf16.mxu0 %v17651_v22  ;;  %v19021_v11 = vpack.c.bf16 %v3194_v8, %v3193_v10  ;;  %v19031_v20 = vld [vmem:[#allocation3 + $0x12] sm:$0xff]  ;;  %v17626_v25 = vld [vmem:[%s18187_s25 + $0x58] sm:$0xff]  }
 0x266   : > { %v2821_v39 = vmul.f32 %v18867_v28, %v2771_v36  ;;  %v2773_v40 = vpop.f32.mrb[13].mxu0  ;;  %16078 = vmatmul.mubr.msk.bf16.vlgmr.msra.gmra.mrb[0].mxu1 %vm1122_vm3, %v18950_v32  ;;  %v2873_v41 = vmax.f32 %v2846_v29, %v18878_v35  ;;  %v3442_v29 = vpack.c.bf16 %v19031_v20, %v3434_v19  ;;  %v17661_v19 = vld [vmem:[%s18187_s25 + $0x110] sm:$0xff]  }
 0x267   : > { %v2874_v44 = vmax.f32 %v2847_v34, %v18890_v45  ;;  %v2822_v46 = vmul.f32 %v18871_v30, %v2773_v40  ;;  %v18963_v47 = vld [vmem:[#allocation3 + $0x41] sm:$0xff]  ;;  %16086 = vmatpush3.bf16.msra.mxu1 %v18857_v21  ;;  %v19041_v34 = vld [vmem:[#allocation3 + $0x32] sm:$0xff] }
 0x268   : > { %v2848_v48 = vadd.f32 %v18874_v31, %v2821_v39  ;;  %4399 = vrot.lane.b32.xlu1 %v2873_v41, %s18152_s7  ;;  %3186 = vst.msk [vmem:[#allocation3 + $0x61] sm:$0xff] %vm1122_vm3, %v2873_v41  ;;  %16087 = vmatprep.subr.bf16.mxu1 %v17620_v33  ;;  %v3703_v50 = vpack.c.bf16 %v18963_v47, %v18943_v27  ;;  %v3195_v13 = vld [vmem:[#allocation3 + $0x40] sm:$0xff]  ;;  %v17628_v41 = vld [vmem:[%s18187_s25 + $0x68] sm:$0xff]  }
 0x269   : > { %v2881_v51 = vpack.c.bf16 %v2874_v44, %v2872_v43  ;;  %v2777_v52 = vpop.f32.mrb[14].mxu0  ;;  %3094 = vmatpush1.bf16.msra.mxu0 %v17649_v38  ;;  %v2849_v58 = vadd.f32 %v18882_v37, %v2822_v46  ;;  %v3436_v38 = vld [vmem:[#allocation3 + $0x22] sm:$0xff] }
 0x26a   : > { %v2823_v54 = vmul.f32 %v18867_v28, %v2777_v52  ;;  %v2779_v55 = vpop.f32.mrb[15].mxu0  ;;  %v2875_v21 = vmax.f32 %v2848_v48, %v18878_v35  ;;  %3095 = vmatprep.subr.bf16.mxu0 %v17655_v42  ;;  %v19046_v39 = vpack.c.bf16 %v19041_v34, %v3436_v38  ;;  %v19048_v40 = vld [vmem:[#allocation3 + $0x42] sm:$0xff]  ;;  %v17631_v52 = vld [vmem:[%s18187_s25 + $0x80] sm:$0xff]   ;;  %v3832_v27 = vpack.c.bf16 %v3436_v38, %v19031_v20 }
 0x26b   : > { %v2824_v59 = vmul.f32 %v18871_v30, %v2779_v55  ;;  %16065 = vmatprep.mubr.msk.bf16.mxu0 %vm1122_vm3, %v2881_v51  ;;  %v18979_v60 = vld [vmem:[#allocation3 + $0x51] sm:$0xff]  ;;  %16088 = vmatpush3.bf16.msra.mxu1 %v17620_v33  ;;  %v17622_v30 = vld [vmem:[%s18187_s25 + $0x18] sm:$0xff]   ;;  %v2876_v0 = vmax.f32 %v2849_v58, %v18890_v45  ;;  %v17629_v43 = vld [vmem:[%s18187_s25 + $0x70] sm:$0xff]  }
 0x26c   : > { %v2850_v61 = vadd.f32 %v18874_v31, %v2823_v54  ;;  %4401 = vrot.lane.b32.xlu0 %v2875_v21, %s18152_s7  ;;  %3187 = vst.msk [vmem:[#allocation3 + $0x71] sm:$0xff] %vm1122_vm3, %v2875_v21  ;;  %v18986_v28 = vpack.c.bf16 %v18979_v60, %v18963_v47  ;;  %16089 = vmatprep.subr.bf16.mxu1 %v17621_v49  ;;  %v3196_v9 = vld [vmem:[#allocation3 + $0x50] sm:$0xff]  ;;  %v17632_v54 = vld [vmem:[%s18187_s25 + $0x88] sm:$0xff]   ;;  %v17633_v21 = vld [vmem:[%s18187_s25 + $0x90] sm:$0xff]  }
 0x26d   : > { %v2851_v62 = vadd.f32 %v18882_v37, %v2824_v59  ;;  %3096 = vmatpush1.bf16.msra.mxu0 %v17653_v53  ;;  %v19024_v16 = vpack.c.bf16 %v3196_v9, %v3195_v13  ;;  %v17627_v33 = vld [vmem:[%s18187_s25 + $0x60] sm:$0xff]   ;;  %v3573_v53 = vpack.c.bf16 %v3195_v13, %v3194_v8  ;;  %v17634_v59 = vld [vmem:[%s18187_s25 + $0x98] sm:$0xff]  }
 0x26e   : > { %16081 = vmatprep.mubr.msk.bf16.mxu1 %vm1122_vm3, %v18986_v28  ;;  %v2877_v31 = vmax.f32 %v2850_v61, %v18878_v35  ;;  %3097 = vmatprep.subr.bf16.mxu0 %v17659_v56  ;;  %v19043_v36 = vld [vmem:[#allocation3 + $0x52] sm:$0xff] }
 0x26f   : > { %v2878_v2 = vmax.f32 %v2851_v62, %v18890_v45  ;;  %16090 = vmatpush3.bf16.msra.mxu1 %v17621_v49  ;;  %v19004_v35 = vld [vmem:[#allocation3 + $0x61] sm:$0xff]  ;;  %v19053_v42 = vpack.c.bf16 %v19043_v36, %v19048_v40  ;;  %v17635_v61 = vld [vmem:[%s18187_s25 + $0xa0] sm:$0xff]   ;;  %v17636_v62 = vld [vmem:[%s18187_s25 + $0xa8] sm:$0xff]  }
 0x270   : > { %3031 = vrot.lane.b32.xlu0 %v18905_v57, %s18152_s7  ;;  %4403 = vrot.lane.b32.xlu1 %v2877_v31, %s18152_s7  ;;  %3188 = vst.msk [vmem:[#allocation3 + $0x81] sm:$0xff] %vm1122_vm3, %v2877_v31  ;;  %v3197_v22 = vld [vmem:[#allocation3 + $0x60] sm:$0xff]  ;;  %v17630_v49 = vld [vmem:[%s18187_s25 + $0x78] sm:$0xff]   ;;  %v17639_v47 = vld [vmem:[%s18187_s25 + $0xc0] sm:$0xff]  }
 0x271   : > { %v2882_v37 = vpack.c.bf16 %v2878_v2, %v2876_v0  ;;  %16091 = vmatprep.subr.bf16.mxu1 %v17622_v30  ;;  %3098 = vmatpush1.bf16.msra.mxu0 %v17657_v63  ;;  %v3440_v46 = vld [vmem:[#allocation3 + $0x62] sm:$0xff]  ;;  %v3574_v55 = vpack.c.bf16 %v3197_v22, %v3196_v9  ;;  %v17640_v63 = vld [vmem:[%s18187_s25 + $0xc8] sm:$0xff]   ;;  %v17656_v13 = vld [vmem:[%s18187_s25 + $0x100] sm:$0xff]  }
 0x272   : > { %v3834_v31 = vpack.c.bf16 %v3440_v46, %v19043_v36  ;;  %v17641_v0 = vld [vmem:[%s18187_s25 + $0xd0] sm:$0xff]   ;;  %v17652_v9 = vld [vmem:[%s18187_s25 + $0xf8] sm:$0xff]   ;;  %v4092_v20 = vld [vmem:[#allocation3 + $0x91] sm:$0xff] }
 0x273   : > { %16066 = vmatmul.mubr.msk.bf16.gmra.mrb[20].mxu0 %vm1122_vm3, %v2882_v37  ;;  %v19006_v45 = vld [vmem:[#allocation3 + $0x71] sm:$0xff]  ;;  %16092 = vmatpush3.bf16.msra.mxu1 %v17622_v30  ;;  %v3704_v30 = vpack.c.bf16 %v19004_v35, %v18979_v60  ;;  %v17638_v60 = vld [vmem:[%s18187_s25 + $0xb8] sm:$0xff]  }
 0x274   : > { %3035 = vrot.lane.b32.xlu0 %v2881_v51, %s18152_s7  ;;  %3033 = vrot.lane.b32.xlu1 %v18933_v15, %s18152_s7  ;;  %v19013_v57 = vpack.c.bf16 %v19006_v45, %v19004_v35  ;;  %v17624_v15 = vld [vmem:[%s18187_s25 + $0x48] sm:$0xff]   ;;  %v3198_v18 = vld [vmem:[#allocation3 + $0x70] sm:$0xff]  ;;  %v3572_v51 = vpack.c.bf16 %v3193_v10, %v19001_v5 }
 0x275   : > { %16101 = vmatprep.subr.bf16.mxu1 %v17623_v3  ;;  %3123 = vmatprep.mubr.bf16.mxu0 %v20922_v7  ;;  %v19033_v23 = vpack.c.bf16 %v3198_v18, %v3197_v22  ;;  %v19060_v44 = vld [vmem:[#allocation3 + $0x72] sm:$0xff] }
 0x276   : > { %16082 = vmatmul.mubr.msk.bf16.gmra.mrb[4].mxu1 %vm1122_vm3, %v19013_v57  ;;  %v19063_v48 = vpack.c.bf16 %v19060_v44, %v3440_v46  ;;  %v17644_v5 = vld [vmem:[%s18187_s25 + $0xe8] sm:$0xff]  }
 0x277   : > { %16093 = vmatprep.mubr.msk.bf16.mxu1 %vm1122_vm3, %v3199_v6  ;;  %v19075_v56 = vld [vmem:[#allocation3 + $0x80] sm:$0xff]  ;;  %v3962_v6 = vld [vmem:[#allocation3 + $0x90] sm:$0xff] }
 0x278   : > { %3037 = vrot.lane.b32.xlu1 %v2882_v37, %s18152_s7  ;;  %v3575_v58 = vpack.c.bf16 %v19075_v56, %v3198_v18  ;;  %v19094_v12 = vld [vmem:[#allocation3 + $0x81] sm:$0xff]  ;;  %v3966_v8 = vpack.c.bf16 %v3962_v6, %v19075_v56  ;;  %s20956_s7 = sld [smem:[#allocation26_spill]] }
 0x279   : > { %v19110_v2 = vld [vmem:[#allocation3 + $0x82] sm:$0xff] }
 0x27a   : > { %v3835_v37 = vpack.c.bf16 %v19110_v2, %v19060_v44  ;;  %v19211_v56 = vld [vmem:[%s18202_s8 + $0x118] sm:$0xff]  }
 0x27e   : > { %16094 = vmatmul.mubr.msk.bf16.vlgmr.msra.gmra.mrb[0].mxu1 %vm1122_vm3, %v19021_v11 }
 0x27f   : > { %16102 = vmatpush3.bf16.msra.mxu1 %v17623_v3  ;;  %16097 = vmatprep.mubr.msk.bf16.mxu1 %vm1122_vm3, %v19024_v16  ;;  %v17642_v3 = vld [vmem:[%s18187_s25 + $0xd8] sm:$0xff]  }
 0x280   : > { %16103 = vmatprep.subr.bf16.mxu1 %v17624_v15 }
 0x283   : > { %16104 = vmatpush3.bf16.msra.mxu1 %v17624_v15 }
 0x284   : > { %16105 = vmatprep.subr.bf16.mxu1 %v17625_v17 }
 0x286   : > { %16098 = vmatmul.mubr.msk.bf16.gmra.mrb[4].mxu1 %vm1122_vm3, %v19033_v23 }
 0x287   : > { %16106 = vmatpush3.bf16.msra.mxu1 %v17625_v17  ;;  %16109 = vmatprep.mubr.msk.bf16.mxu1 %vm1122_vm3, %v3442_v29  ;;  %v17660_v17 = vld [vmem:[%s18187_s25 + $0x108] sm:$0xff]   ;;  %v17662_v29 = vld [vmem:[%s18187_s25 + $0x118] sm:$0xff]  }
 0x288   : > { %16107 = vmatprep.subr.bf16.mxu1 %v17626_v25 }
 0x28b   : > { %16108 = vmatpush3.bf16.msra.mxu1 %v17626_v25  ;;  %v4096_v25 = vpack.c.bf16 %v4092_v20, %v19094_v12 }
 0x28c   : > { %16117 = vmatprep.subr.bf16.mxu1 %v17627_v33 }
 0x28e   : > { %16110 = vmatmul.mubr.msk.bf16.vlgmr.msra.gmra.mrb[0].mxu1 %vm1122_vm3, %v19046_v39 }
 0x28f   : > { %16118 = vmatpush3.bf16.msra.mxu1 %v17627_v33  ;;  %16113 = vmatprep.mubr.msk.bf16.mxu1 %vm1122_vm3, %v19053_v42 }
 0x290   : > { %16119 = vmatprep.subr.bf16.mxu1 %v17628_v41 }
 0x293   : > { %16120 = vmatpush3.bf16.msra.mxu1 %v17628_v41 }
 0x294   : > { %16121 = vmatprep.subr.bf16.mxu1 %v17629_v43 }
 0x296   : > { %16114 = vmatmul.mubr.msk.bf16.gmra.mrb[4].mxu1 %vm1122_vm3, %v19063_v48 }
 0x297   : > { %16122 = vmatpush3.bf16.msra.mxu1 %v17629_v43  ;;  %16125 = vmatprep.mubr.msk.bf16.mxu1 %vm1122_vm3, %v3572_v51  ;;  %v17663_v43 = vld [vmem:[%s18202_s8 + $0x20] sm:$0xff]  }
 0x298   : > { %16123 = vmatprep.subr.bf16.mxu1 %v17630_v49  ;;  %v19190_v51 = vld [vmem:[%s18202_s8 + $0x100] sm:$0xff]  }
 0x299   : > { %16341 = vmatprep.subr.bf16.mxu0 %v19190_v51 }
 0x29b   : > { %16124 = vmatpush3.bf16.msra.mxu1 %v17630_v49  ;;  %v17664_v49 = vld [vmem:[%s18202_s8 + $0x28] sm:$0xff]  }
 0x29c   : > { %16133 = vmatprep.subr.bf16.mxu1 %v17631_v52 }
 0x29e   : > { %16126 = vmatmul.mubr.msk.bf16.vlgmr.msra.gmra.mrb[0].mxu1 %vm1122_vm3, %v3573_v53  ;;  %v19196_v53 = vld [vmem:[%s18202_s8 + $0x108] sm:$0xff]  }
 0x29f   : > { %16134 = vmatpush3.bf16.msra.mxu1 %v17631_v52  ;;  %16129 = vmatprep.mubr.msk.bf16.mxu1 %vm1122_vm3, %v3574_v55  ;;  %v17666_v52 = vld [vmem:[%s18202_s8 + $0x30] sm:$0xff]  }
 0x2a0   : > { %16135 = vmatprep.subr.bf16.mxu1 %v17632_v54  ;;  %v19202_v55 = vld [vmem:[%s18202_s8 + $0x110] sm:$0xff]  }
 0x2a3   : > { %16136 = vmatpush3.bf16.msra.mxu1 %v17632_v54  ;;  %v17668_v54 = vld [vmem:[%s18202_s8 + $0x38] sm:$0xff]  }
 0x2a4   : > { %16137 = vmatprep.subr.bf16.mxu1 %v17633_v21 }
 0x2a6   : > { %16130 = vmatmul.mubr.msk.bf16.gmra.mrb[4].mxu1 %vm1122_vm3, %v3575_v58 }
 0x2a7   : > { %16138 = vmatpush3.bf16.msra.mxu1 %v17633_v21  ;;  %16141 = vmatprep.mubr.msk.bf16.mxu1 %vm1122_vm3, %v3702_v14  ;;  %v3705_v14 = vpack.c.bf16 %v19094_v12, %v19006_v45  ;;  %v17648_v45 = vld [vmem:[%s18187_s25 + $0xf0] sm:$0xff]   ;;  %v19205_v21 = vld [vmem:[%s18202_s8] sm:$0xff]  }
 0x2a8   : > { %16139 = vmatprep.subr.bf16.mxu1 %v17634_v59  ;;  %v14106_v12 = vld [vmem:[%s18192_s29] ss:$0 sm:$0xff] }
 0x2ab   : > { %16140 = vmatpush3.bf16.msra.mxu1 %v17634_v59 }
 0x2ac   : > { %16149 = vmatprep.subr.bf16.mxu1 %v17635_v61 }
 0x2ae   : > { %16142 = vmatmul.mubr.msk.bf16.vlgmr.msra.gmra.mrb[0].mxu1 %vm1122_vm3, %v3703_v50  ;;  %v3833_v50 = vpack.c.bf16 %v19048_v40, %v19041_v34 }
 0x2af   : > { %16150 = vmatpush3.bf16.msra.mxu1 %v17635_v61  ;;  %16145 = vmatprep.mubr.msk.bf16.mxu1 %vm1122_vm3, %v3704_v30 }
 0x2b0   : > { %16151 = vmatprep.subr.bf16.mxu1 %v17636_v62 }
 0x2b3   : > { %16152 = vmatpush3.bf16.msra.mxu1 %v17636_v62 }
 0x2b4   : > { %16153 = vmatprep.subr.bf16.mxu1 %v17637_v1 }
 0x2b6   : > { %16146 = vmatmul.mubr.msk.bf16.gmra.mrb[4].mxu1 %vm1122_vm3, %v3705_v14 }
 0x2b7   : > { %16154 = vmatpush3.bf16.msra.mxu1 %v17637_v1  ;;  %16157 = vmatprep.mubr.msk.bf16.mxu1 %vm1122_vm3, %v3832_v27  ;;  %v14107_v27 = vld [vmem:[%s18197_s3] ss:$0 sm:$0xff] }
 0x2b8   : > { %16155 = vmatprep.subr.bf16.mxu1 %v17638_v60 }
 0x2bb   : > { %16156 = vmatpush3.bf16.msra.mxu1 %v17638_v60 }
 0x2bc   : > { %16165 = vmatprep.subr.bf16.mxu1 %v17639_v47 }
 0x2be   : > { %16158 = vmatmul.mubr.msk.bf16.vlgmr.msra.gmra.mrb[0].mxu1 %vm1122_vm3, %v3833_v50 }
 0x2bf   : > { %16166 = vmatpush3.bf16.msra.mxu1 %v17639_v47  ;;  %16161 = vmatprep.mubr.msk.bf16.mxu1 %vm1122_vm3, %v3834_v31 }
 0x2c0   : > { %16167 = vmatprep.subr.bf16.mxu1 %v17640_v63 }
 0x2c3   : > { %16168 = vmatpush3.bf16.msra.mxu1 %v17640_v63 }
 0x2c4   : > { %16169 = vmatprep.subr.bf16.mxu1 %v17641_v0 }
 0x2c6   : > { %16162 = vmatmul.mubr.msk.bf16.gmra.mrb[4].mxu1 %vm1122_vm3, %v3835_v37  ;;  %v19124_v35 = vpop.permute.xlu0 %4389 }
 0x2c7   : > { %16170 = vmatpush3.bf16.msra.mxu1 %v17641_v0  ;;  %16173 = vmatprep.mubr.msk.bf16.mxu1 %vm1122_vm3, %v19021_v11 }
 0x2c8   : > { %16171 = vmatprep.subr.bf16.mxu1 %v17642_v3 }
 0x2ca   : > { %v19129_v10 = vpop.permute.xlu0 %4391 }
 0x2cb   : > { %16172 = vmatpush3.bf16.msra.mxu1 %v17642_v3 }
 0x2cc   : > { %16181 = vmatprep.subr.bf16.mxu1 %v17643_v4 }
 0x2ce   : > { %16174 = vmatmul.mubr.msk.bf16.vlgmr.msra.gmra.mrb[0].mxu1 %vm1122_vm3, %v19024_v16  ;;  %v19131_v11 = vpop.permute.xlu1 %4393 }
 0x2cf   : > { %16182 = vmatpush3.bf16.msra.mxu1 %v17643_v4  ;;  %16177 = vmatprep.mubr.msk.bf16.mxu1 %vm1122_vm3, %v19033_v23 }
 0x2d0   : > { %16183 = vmatprep.subr.bf16.mxu1 %v17644_v5 }
 0x2d2   : > { %v19139_v16 = vpop.permute.xlu1 %4395 }
 0x2d3   : > { %16184 = vmatpush3.bf16.msra.mxu1 %v17644_v5 }
 0x2d4   : > { %16185 = vmatprep.subr.bf16.mxu1 %v17648_v45 }
 0x2d6   : > { %16178 = vmatmul.mubr.msk.bf16.gmra.mrb[4].mxu1 %vm1122_vm3, %v3966_v8  ;;  %v19137_v15 = vpop.permute.xlu0 %4397 }
 0x2d7   : > { %16186 = vmatpush3.bf16.msra.mxu1 %v17648_v45  ;;  %16189 = vmatprep.mubr.msk.bf16.mxu1 %vm1122_vm3, %v18950_v32 }
 0x2d8   : > { %16187 = vmatprep.subr.bf16.mxu1 %v17652_v9 }
 0x2da   : > { %v19148_v32 = vpop.permute.xlu1 %4399 }
 0x2db   : > { %16188 = vmatpush3.bf16.msra.mxu1 %v17652_v9 }
 0x2dc   : > { %16197 = vmatprep.subr.bf16.mxu1 %v17656_v13 }
 0x2de   : > { %v19142_v18 = vpop.permute.xlu0 %4401  ;;  %16190 = vmatmul.mubr.msk.bf16.vlgmr.msra.gmra.mrb[0].mxu1 %vm1122_vm3, %v18986_v28 }
 0x2df   : > { %16198 = vmatpush3.bf16.msra.mxu1 %v17656_v13  ;;  %16193 = vmatprep.mubr.msk.bf16.mxu1 %vm1122_vm3, %v19013_v57  ;;  %v4222_v57 = vld [vmem:[#allocation3 + $0x92] sm:$0xff] }
 0x2e0   : > { %16199 = vmatprep.subr.bf16.mxu1 %v17660_v17  ;;  %v4226_v34 = vpack.c.bf16 %v4222_v57, %v19110_v2 }
 0x2e2   : > { %v3032_v22 = vpop.permute.xlu0 %3031  ;;  %v19152_v23 = vpop.permute.xlu1 %4403 }
 0x2e3   : > { %16200 = vmatpush3.bf16.msra.mxu1 %v17660_v17  ;;  %13966 = vmatmul.mubr.msk.bf16.vlgmr.msra.gmra.mrb[24].mxu0 %vm1122_vm3, %v3032_v22 }
 0x2e4   : > { %16201 = vmatprep.subr.bf16.mxu1 %v17661_v19  ;;  %3133 = vmatprep.mubr.bf16.mxu0 %v20922_v7 }
 0x2e5   : > { %16342 = vmatpush3.bf16.msra.mxu0 %v19190_v51 }
 0x2e6   : > { %16194 = vmatmul.mubr.msk.bf16.gmra.mrb[4].mxu1 %vm1122_vm3, %v4096_v25  ;;  %v3034_v28 = vpop.permute.xlu1 %3033  ;;  %v3036_v33 = vpop.permute.xlu0 %3035  ;;  %16343 = vmatprep.subr.bf16.mxu0 %v19196_v53 }
 0x2e7   : > { %16202 = vmatpush3.bf16.msra.mxu1 %v17661_v19  ;;  %16205 = vmatprep.mubr.msk.bf16.mxu1 %vm1122_vm3, %v19046_v39 }
 0x2e8   : > { %16203 = vmatprep.subr.bf16.mxu1 %v17662_v29 }
 0x2e9   : > { %16344 = vmatpush3.bf16.msra.mxu0 %v19196_v53 }
 0x2ea   : > { %v3038_v36 = vpop.permute.xlu1 %3037  ;;  %16345 = vmatprep.subr.bf16.mxu0 %v19202_v55 }
 0x2eb   : > { %16204 = vmatpush3.bf16.msra.mxu1 %v17662_v29  ;;  %13967 = vmatmul.mubr.msk.bf16.gmra.mrb[28].mxu0 %vm1122_vm3, %v3034_v28 }
 0x2ec   : > { %3143 = vmatprep.mubr.bf16.mxu0 %v20922_v7  ;;  %16213 = vmatprep.subr.bf16.mxu1 %v17663_v43 }
 0x2ed   : > { %16346 = vmatpush3.bf16.msra.mxu0 %v19202_v55 }
 0x2ee   : > { %16206 = vmatmul.mubr.msk.bf16.vlgmr.msra.gmra.mrb[0].mxu1 %vm1122_vm3, %v19053_v42  ;;  %16347 = vmatprep.subr.bf16.mxu0 %v19211_v56 }
 0x2ef   : > { %16209 = vmatprep.mubr.msk.bf16.mxu1 %vm1122_vm3, %v19063_v48  ;;  %16214 = vmatpush3.bf16.msra.mxu1 %v17663_v43 }
 0x2f0   : > { %16215 = vmatprep.subr.bf16.mxu1 %v17664_v49 }
 0x2f1   : > { %16348 = vmatpush3.bf16.msra.mxu0 %v19211_v56 }
 0x2f3   : > { %13968 = vmatmul.mubr.msk.bf16.gmra.mrb[32].mxu0 %vm1122_vm3, %v3036_v33  ;;  %16216 = vmatpush3.bf16.msra.mxu1 %v17664_v49 }
 0x2f4   : > { %3153 = vmatprep.mubr.bf16.mxu0 %v20922_v7  ;;  %16217 = vmatprep.subr.bf16.mxu1 %v17666_v52  ;;  %v17679_v7 = vld [vmem:[%s18202_s8 + $0x60] sm:$0xff]  }
 0x2f6   : > { %16210 = vmatmul.mubr.msk.bf16.gmra.mrb[4].mxu1 %vm1122_vm3, %v4226_v34 }
 0x2f7   : > { %16218 = vmatpush3.bf16.msra.mxu1 %v17666_v52 }
 0x2f8   : > { %16219 = vmatprep.subr.bf16.mxu1 %v17668_v54 }
 0x2fb   : > { %13969 = vmatmul.mubr.msk.bf16.gmra.mrb[36].mxu0 %vm1122_vm3, %v3038_v36  ;;  %16220 = vmatpush3.bf16.msra.mxu1 %v17668_v54 }
 0x2fc   : > { %16229 = vmatprep.subr.bf16.mxu1 %v19205_v21 }
 0x336   : > { %v19171_v38 = vpop.f32.mrb[16].mxu0 }
 0x337   : > { %v19173_v39 = vpop.f32.mrb[17].mxu0 }
 0x338   : > { %v19175_v40 = vpop.f32.mrb[18].mxu0 }
 0x339   : > { %v19177_v41 = vpop.f32.mrb[19].mxu0 }
 0x346   : > { %v19179_v42 = vpop.f32.mrb[20].mxu0 }
 0x347   : > { %v19182_v44 = vpop.f32.mrb[21].mxu0 }
 0x348   : > { %v19184_v46 = vpop.f32.mrb[22].mxu0 }
 0x349   : > { %v19186_v48 = vpop.f32.mrb[23].mxu0 }
 0x3b6   : > { %v19215_v58 = vpop.f32.mrb[24].mxu0 }
 0x3b7   : > { %v19217_v59 = vpop.f32.mrb[25].mxu0 }
 0x3b8   : > { %v19219_v61 = vpop.f32.mrb[26].mxu0 }
 0x3b9   : > { %v19221_v62 = vpop.f32.mrb[27].mxu0 }
 0x3be   : > { %v19223_v30 = vpop.f32.mrb[28].mxu0 }
 0x3bf   : > { %v19225_v1 = vpop.f32.mrb[29].mxu0 }
 0x3c0   : > { %v19228_v14 = vpop.f32.mrb[30].mxu0 }
 0x3c1   : > { %v19230_v60 = vpop.f32.mrb[31].mxu0  ;;  %v16207_v47 = vpop.f32.mrb[0].mxu1 }
 0x3c2   : > { %v4353_v50 = vmul.f32 %v16207_v47, %v14106_v12  ;;  %v4306_v63 = vpop.f32.mrb[1].mxu1 }
 0x3c3   : > { %v4351_v31 = vmul.f32 %v14106_v12, %v4306_v63  ;;  %v16208_v0 = vpop.f32.mrb[2].mxu1 }
 0x3c4   : > { %v4367_v2 = vadd.f32 %v14107_v27, %v4353_v50  ;;  %v4354_v37 = vmul.f32 %v16208_v0, %v14106_v12  ;;  %v4309_v3 = vpop.f32.mrb[3].mxu1 }
 0x3c5   : > { %v4365_v4 = vadd.f32 %v14107_v27, %v4351_v31  ;;  %v4352_v5 = vmul.f32 %v14106_v12, %v4309_v3 }
 0x3c6   : > { %v4375_v45 = vmax.f32 %v4367_v2, 0.0  ;;  %v4368_v6 = vadd.f32 %v14107_v27, %v4354_v37  ;;  %v19233_v8 = vpop.f32.mrb[32].mxu0 }
 0x3c7   : > { %v4373_v9 = vmax.f32 %v4365_v4, 0.0  ;;  %v4366_v13 = vadd.f32 %v14107_v27, %v4352_v5  ;;  %v19235_v17 = vpop.f32.mrb[33].mxu0  ;;  %v4452_v5 = vld [vmem:[#allocation4 + $0x1] sm:$0xff] }
 0x3c8   : > { %v4415_v19 = vadd.f32 %v19131_v11, %v4375_v45  ;;  %v4376_v20 = vmax.f32 %v4368_v6, 0.0  ;;  %v19238_v22 = vpop.f32.mrb[34].mxu0 }
 0x3c9   : > { %v4413_v25 = vadd.f32 %v19124_v35, %v4373_v9  ;;  %v4374_v29 = vmax.f32 %v4366_v13, 0.0  ;;  %v19241_v28 = vpop.f32.mrb[35].mxu0  ;;  %v16211_v57 = vpop.f32.mrb[4].mxu1 }
 0x3ca   : > { %4424 = vst.msk [vmem:[#allocation4 + $0x31] sm:$0xff] %vm1122_vm3, %v4415_v19  ;;  %v4416_v33 = vadd.f32 %v19139_v16, %v4376_v20  ;;  %v4357_v34 = vmul.f32 %v16211_v57, %v14106_v12  ;;  %v4322_v36 = vpop.f32.mrb[5].mxu1 }
 0x3cb   : > { %4422 = vst.msk [vmem:[#allocation4 + $0x11] sm:$0xff] %vm1122_vm3, %v4413_v25  ;;  %v4414_v43 = vadd.f32 %v19129_v10, %v4374_v29  ;;  %v4355_v11 = vmul.f32 %v14106_v12, %v4322_v36  ;;  %v16212_v49 = vpop.f32.mrb[6].mxu1 }
 0x3cc   : > { %4425 = vst.msk [vmem:[#allocation4 + $0x41] sm:$0xff] %vm1122_vm3, %v4416_v33  ;;  %v4371_v52 = vadd.f32 %v14107_v27, %v4357_v34  ;;  %v4358_v35 = vmul.f32 %v16212_v49, %v14106_v12  ;;  %v4325_v54 = vpop.f32.mrb[7].mxu1  ;;  %v17672_v33 = vld [vmem:[%s18202_s8 + $0x8] sm:$0xff]   ;;  %v17673_v34 = vld [vmem:[%s18202_s8 + $0x10] sm:$0xff]  }
 0x3cd   : > { %4423 = vst.msk [vmem:[#allocation4 + $0x21] sm:$0xff] %vm1122_vm3, %v4414_v43  ;;  %v4369_v47 = vadd.f32 %v14107_v27, %v4355_v11  ;;  %v4356_v50 = vmul.f32 %v14106_v12, %v4325_v54 }
 0x3ce   : > { %v4379_v63 = vmax.f32 %v4371_v52, 0.0  ;;  %v4372_v31 = vadd.f32 %v14107_v27, %v4358_v35  ;;  %v19249_v16 = vpop.f32.mrb[36].mxu0  ;;  %v4432_v35 = vld [vmem:[#allocation4] sm:$0xff] }
 0x3cf   : > { %v4377_v0 = vmax.f32 %v4369_v47, 0.0  ;;  %v4370_v2 = vadd.f32 %v14107_v27, %v4356_v50  ;;  %v19251_v37 = vpop.f32.mrb[37].mxu0 }
 0x3d0   : > { %v4419_v10 = vadd.f32 %v19142_v18, %v4379_v63  ;;  %v4380_v3 = vmax.f32 %v4372_v31, 0.0  ;;  %v19254_v4 = vpop.f32.mrb[38].mxu0  ;;  %v17674_v63 = vld [vmem:[%s18202_s8 + $0x18] sm:$0xff]  }
 0x3d1   : > { %v4417_v45 = vadd.f32 %v19137_v15, %v4377_v0  ;;  %v4378_v6 = vmax.f32 %v4370_v2, 0.0  ;;  %v19257_v9 = vpop.f32.mrb[39].mxu0  ;;  %v19266_v19 = vld [vmem:[#allocation4 + $0x32] sm:$0xff] }
 0x3d2   : > { %20943 = vst [vmem:[#allocation31_spill] sm:$0xff] %v19257_v9  ;;  %4428 = vst.msk [vmem:[#allocation4 + $0x71] sm:$0xff] %vm1122_vm3, %v4419_v10  ;;  %v4420_v12 = vadd.f32 %v19152_v23, %v4380_v3  ;;  %v19261_v13 = vld [vmem:[#allocation4 + $0x11] sm:$0xff] }
 0x3d3   : > { %4426 = vst.msk [vmem:[#allocation4 + $0x51] sm:$0xff] %vm1122_vm3, %v4417_v45  ;;  %v4418_v18 = vadd.f32 %v19148_v32, %v4378_v6  ;;  %v4460_v27 = vpack.c.bf16 %v19261_v13, %v4452_v5  ;;  %v19268_v15 = vld [vmem:[#allocation4 + $0x42] sm:$0xff]  ;;  %v19273_v25 = vld [vmem:[#allocation4 + $0x31] sm:$0xff] }
 0x3d4   : > { %4429 = vst.msk [vmem:[#allocation4 + $0x81] sm:$0xff] %vm1122_vm3, %v4420_v12  ;;  %v19271_v20 = vld [vmem:[#allocation4 + $0x21] sm:$0xff]  ;;  %v4433_v54 = vld [vmem:[#allocation4 + $0x10] sm:$0xff]  ;;  %v17676_v6 = vld [vmem:[%s18202_s8 + $0x48] sm:$0xff]  }
 0x3d5   : > { %v19275_v23 = vld [vmem:[#allocation4 + $0x22] sm:$0xff]  ;;  %4427 = vst.msk [vmem:[#allocation4 + $0x61] sm:$0xff] %vm1122_vm3, %v4418_v18  ;;  %16221 = vmatprep.mubr.msk.bf16.mxu1 %vm1122_vm3, %v4460_v27  ;;  %v19283_v32 = vpack.c.bf16 %v19273_v25, %v19271_v20  ;;  %v4440_v31 = vpack.c.bf16 %v4433_v54, %v4432_v35  ;;  %v17675_v0 = vld [vmem:[%s18202_s8 + $0x40] sm:$0xff]  }
 0x3d6   : > { %v5464_v57 = vpack.c.bf16 %v19266_v19, %v19275_v23  ;;  %v19293_v36 = vld [vmem:[#allocation4 + $0x41] sm:$0xff]  ;;  %v4435_v3 = vld [vmem:[#allocation4 + $0x30] sm:$0xff] }
 0x3d7   : > { %16222 = vmatmul.mubr.msk.bf16.vlgmr.msra.gmra.mrb[8].mxu1 %vm1122_vm3, %v19283_v32  ;;  %v4434_v2 = vld [vmem:[#allocation4 + $0x20] sm:$0xff] }
 0x3d8   : > { %16349 = vmatprep.mubr.msk.bf16.mxu0 %vm1122_vm3, %v5464_v57  ;;  %16230 = vmatpush3.bf16.msra.mxu1 %v19205_v21  ;;  %v19321_v5 = vpack.c.bf16 %v4435_v3, %v4434_v2  ;;  %v4436_v45 = vld [vmem:[#allocation4 + $0x40] sm:$0xff]  ;;  %v4813_v9 = vpack.c.bf16 %v4434_v2, %v4433_v54 }
 0x3d9   : > { %16231 = vmatprep.subr.bf16.mxu1 %v17672_v33  ;;  %v19307_v47 = vld [vmem:[#allocation4 + $0x71] sm:$0xff]  ;;  %v17677_v18 = vld [vmem:[%s18202_s8 + $0x50] sm:$0xff]  }
 0x3da   : > { %v19295_v43 = vld [vmem:[#allocation4 + $0x51] sm:$0xff]  ;;  %v17685_v54 = vld [vmem:[%s18202_s8 + $0x90] sm:$0xff]  }
 0x3db   : > { %v19297_v11 = vld [vmem:[#allocation4 + $0x52] sm:$0xff]  ;;  %v19301_v49 = vpack.c.bf16 %v19295_v43, %v19293_v36  ;;  %v19359_v2 = vld [vmem:[#allocation4 + $0x80] sm:$0xff] }
 0x3dc   : > { %v5465_v52 = vpack.c.bf16 %v19297_v11, %v19268_v15  ;;  %16232 = vmatpush3.bf16.msra.mxu1 %v17672_v33  ;;  %v19305_v21 = vld [vmem:[#allocation4 + $0x61] sm:$0xff]  ;;  %v4437_v10 = vld [vmem:[#allocation4 + $0x50] sm:$0xff] }
 0x3dd   : > { %16225 = vmatprep.mubr.msk.bf16.mxu1 %vm1122_vm3, %v19301_v49  ;;  %v19314_v50 = vpack.c.bf16 %v19307_v47, %v19305_v21  ;;  %16233 = vmatprep.subr.bf16.mxu1 %v17673_v34  ;;  %v19324_v12 = vpack.c.bf16 %v4437_v10, %v4436_v45  ;;  %v4438_v27 = vld [vmem:[#allocation4 + $0x60] sm:$0xff]  ;;  %v4439_v35 = vld [vmem:[#allocation4 + $0x70] sm:$0xff] }
 0x3de   : > { %16350 = vmatmul.mubr.msk.bf16.vlgmr.msra.gmra.mrb[40].mxu0 %vm1122_vm3, %v5465_v52  ;;  %v4675_v33 = vld [vmem:[#allocation4 + $0x2] sm:$0xff] }
 0x3df   : > { %16226 = vmatmul.mubr.msk.bf16.gmra.mrb[12].mxu1 %vm1122_vm3, %v19314_v50  ;;  %v4681_v29 = vld [vmem:[#allocation4 + $0x62] sm:$0xff] }
 0x3e0   : > { %16234 = vmatpush3.bf16.msra.mxu1 %v17673_v34  ;;  %16237 = vmatprep.mubr.msk.bf16.mxu1 %vm1122_vm3, %v4440_v31  ;;  %v19331_v34 = vld [vmem:[#allocation4 + $0x12] sm:$0xff]  ;;  %v17678_v31 = vld [vmem:[%s18202_s8 + $0x58] sm:$0xff]  }
 0x3e1   : > { %16235 = vmatprep.subr.bf16.mxu1 %v17674_v63 }
 0x3e4   : > { %16236 = vmatpush3.bf16.msra.mxu1 %v17674_v63  ;;  %v19333_v63 = vpack.c.bf16 %v4439_v35, %v4438_v27 }
 0x3e5   : > { %16245 = vmatprep.subr.bf16.mxu1 %v17675_v0 }
 0x3e7   : > { %16238 = vmatmul.mubr.msk.bf16.vlgmr.msra.gmra.mrb[8].mxu1 %vm1122_vm3, %v19321_v5 }
 0x3e8   : > { %16246 = vmatpush3.bf16.msra.mxu1 %v17675_v0  ;;  %16241 = vmatprep.mubr.msk.bf16.mxu1 %vm1122_vm3, %v19324_v12  ;;  %v4683_v0 = vpack.c.bf16 %v19331_v34, %v4675_v33  ;;  %v17681_v33 = vld [vmem:[%s18202_s8 + $0x70] sm:$0xff]  }
 0x3e9   : > { %16247 = vmatprep.subr.bf16.mxu1 %v17676_v6 }
 0x3ec   : > { %16248 = vmatpush3.bf16.msra.mxu1 %v17676_v6  ;;  %v17680_v6 = vld [vmem:[%s18202_s8 + $0x68] sm:$0xff]  }
 0x3ed   : > { %16249 = vmatprep.subr.bf16.mxu1 %v17677_v18 }
 0x3ef   : > { %16242 = vmatmul.mubr.msk.bf16.gmra.mrb[12].mxu1 %vm1122_vm3, %v19333_v63 }
 0x3f0   : > { %16250 = vmatpush3.bf16.msra.mxu1 %v17677_v18  ;;  %16253 = vmatprep.mubr.msk.bf16.mxu1 %vm1122_vm3, %v4683_v0  ;;  %v19345_v18 = vld [vmem:[#allocation4 + $0x72] sm:$0xff] }
 0x3f1   : > { %16251 = vmatprep.subr.bf16.mxu1 %v17678_v31  ;;  %v19348_v0 = vpack.c.bf16 %v19345_v18, %v4681_v29 }
 0x3f4   : > { %16252 = vmatpush3.bf16.msra.mxu1 %v17678_v31  ;;  %v17682_v31 = vld [vmem:[%s18202_s8 + $0x78] sm:$0xff]  }
 0x3f5   : > { %16261 = vmatprep.subr.bf16.mxu1 %v17679_v7 }
 0x3f7   : > { %16254 = vmatmul.mubr.msk.bf16.vlgmr.msra.gmra.mrb[8].mxu1 %vm1122_vm3, %v5464_v57  ;;  %v4814_v57 = vpack.c.bf16 %v4436_v45, %v4435_v3  ;;  %v17687_v3 = vld [vmem:[%s18202_s8 + $0xa0] sm:$0xff]   ;;  %v4944_v45 = vpack.c.bf16 %v19293_v36, %v19273_v25  ;;  %v17690_v36 = vld [vmem:[%s18202_s8 + $0xb8] sm:$0xff]  }
 0x3f8   : > { %16262 = vmatpush3.bf16.msra.mxu1 %v17679_v7  ;;  %16257 = vmatprep.mubr.msk.bf16.mxu1 %vm1122_vm3, %v5465_v52  ;;  %v17683_v7 = vld [vmem:[%s18202_s8 + $0x80] sm:$0xff]   ;;  %v17684_v52 = vld [vmem:[%s18202_s8 + $0x88] sm:$0xff]  }
 0x3f9   : > { %16263 = vmatprep.subr.bf16.mxu1 %v17680_v6 }
 0x3fc   : > { %16264 = vmatpush3.bf16.msra.mxu1 %v17680_v6  ;;  %v4815_v6 = vpack.c.bf16 %v4438_v27, %v4437_v10  ;;  %v4943_v10 = vpack.c.bf16 %v19271_v20, %v19261_v13  ;;  %v17688_v27 = vld [vmem:[%s18202_s8 + $0xa8] sm:$0xff]   ;;  %v17689_v13 = vld [vmem:[%s18202_s8 + $0xb0] sm:$0xff]  }
 0x3fd   : > { %16265 = vmatprep.subr.bf16.mxu1 %v17681_v33  ;;  %v19376_v20 = vld [vmem:[#allocation4 + $0x81] sm:$0xff] }
 0x3fe   : > { %v4946_v25 = vpack.c.bf16 %v19376_v20, %v19307_v47  ;;  %v20944_v47 = vpack.c.bf16 %v19268_v15, %v19266_v19  ;;  %v17695_v19 = vld [vmem:[%s18202_s8 + $0xe0] sm:$0xff]   ;;  %v19403_v15 = vld [vmem:[#allocation6] sm:$0xff] }
 0x3ff   : > { %16258 = vmatmul.mubr.msk.bf16.gmra.mrb[12].mxu1 %vm1122_vm3, %v19348_v0  ;;  %1172 = vst.msk [vmem:[#allocation5 + $0x30] sm:$0xff] %vm1164_vm5, %v19403_v15  ;;  %1165 = vst.msk [vmem:[#allocation5] sm:$0xff] %vm1164_vm5, %v19403_v15 }
 0x400   : > { %16266 = vmatpush3.bf16.msra.mxu1 %v17681_v33  ;;  %16269 = vmatprep.mubr.msk.bf16.mxu1 %vm1122_vm3, %v4813_v9  ;;  %v4816_v9 = vpack.c.bf16 %v19359_v2, %v4439_v35  ;;  %v17686_v33 = vld [vmem:[%s18202_s8 + $0x98] sm:$0xff]   ;;  %v4945_v35 = vpack.c.bf16 %v19305_v21, %v19295_v43  ;;  %v5073_v43 = vpack.c.bf16 %v19275_v23, %v19331_v34  ;;  %v17691_v21 = vld [vmem:[%s18202_s8 + $0xc0] sm:$0xff]   ;;  %v17693_v23 = vld [vmem:[%s18202_s8 + $0xd0] sm:$0xff]  }
 0x401   : > { %16267 = vmatprep.subr.bf16.mxu1 %v17682_v31  ;;  %v19394_v34 = vld [vmem:[#allocation4 + $0x82] sm:$0xff]  ;;  %1173 = vst.msk [vmem:[#allocation5 + $0x38] sm:$0x3] %vm1166_vm6, %v19403_v15  ;;  %1167 = vst.msk [vmem:[#allocation5 + $0x8] sm:$0x3] %vm1166_vm6, %v19403_v15 }
 0x402   : > { %1168 = vst.msk [vmem:[#allocation5 + $0x10] sm:$0xff] %vm1164_vm5, %v19403_v15  ;;  %1170 = vst.msk [vmem:[#allocation5 + $0x20] sm:$0xff] %vm1164_vm5, %v19403_v15 }
 0x403   : > { %1169 = vst.msk [vmem:[#allocation5 + $0x18] sm:$0x3] %vm1166_vm6, %v19403_v15  ;;  %1171 = vst.msk [vmem:[#allocation5 + $0x28] sm:$0x3] %vm1166_vm6, %v19403_v15 }
 0x404   : > { %16268 = vmatpush3.bf16.msra.mxu1 %v17682_v31  ;;  %v17692_v31 = vld [vmem:[%s18202_s8 + $0xc8] sm:$0xff]   ;;  %1174 = vst.msk [vmem:[#allocation5 + $0x40] sm:$0xff] %vm1164_vm5, %v19403_v15  ;;  %1176 = vst.msk [vmem:[#allocation5 + $0x50] sm:$0xff] %vm1164_vm5, %v19403_v15 }
 0x405   : > { %16277 = vmatprep.subr.bf16.mxu1 %v17683_v7  ;;  %1175 = vst.msk [vmem:[#allocation5 + $0x48] sm:$0x3] %vm1166_vm6, %v19403_v15  ;;  %1177 = vst.msk [vmem:[#allocation5 + $0x58] sm:$0x3] %vm1166_vm6, %v19403_v15 }
 0x406   : > { %1178 = vst.msk [vmem:[#allocation5 + $0x60] sm:$0xff] %vm1164_vm5, %v19403_v15  ;;  %1180 = vst.msk [vmem:[#allocation5 + $0x70] sm:$0xff] %vm1164_vm5, %v19403_v15 }
 0x407   : > { %16270 = vmatmul.mubr.msk.bf16.vlgmr.msra.gmra.mrb[8].mxu1 %vm1122_vm3, %v4814_v57  ;;  %v5076_v57 = vpack.c.bf16 %v19394_v34, %v19345_v18  ;;  %1179 = vst.msk [vmem:[#allocation5 + $0x68] sm:$0x3] %vm1166_vm6, %v19403_v15  ;;  %1181 = vst.msk [vmem:[#allocation5 + $0x78] sm:$0x3] %vm1166_vm6, %v19403_v15 }
 0x408   : > { %16278 = vmatpush3.bf16.msra.mxu1 %v17683_v7  ;;  %16273 = vmatprep.mubr.msk.bf16.mxu1 %vm1122_vm3, %v4815_v6  ;;  %v5075_v7 = vpack.c.bf16 %v4681_v29, %v19297_v11  ;;  %1182 = vst.msk [vmem:[#allocation5 + $0x80] sm:$0xff] %vm1164_vm5, %v19403_v15  ;;  %1184 = vst.msk [vmem:[#allocation5 + $0x90] sm:$0xff] %vm1164_vm5, %v19403_v15  ;;  %v17696_v29 = vld [vmem:[%s18202_s8 + $0xe8] sm:$0xff]   ;;  %v17697_v11 = vld [vmem:[%s18202_s8 + $0xf0] sm:$0xff]  }
 0x409   : > { %16279 = vmatprep.subr.bf16.mxu1 %v17684_v52  ;;  %1183 = vst.msk [vmem:[#allocation5 + $0x88] sm:$0x3] %vm1166_vm6, %v19403_v15  ;;  %1185 = vst.msk [vmem:[#allocation5 + $0x98] sm:$0x3] %vm1166_vm6, %v19403_v15  ;;  %v17698_v6 = vld [vmem:[%s18202_s8 + $0xf8] sm:$0xff]  }
 0x40c   : > { %16280 = vmatpush3.bf16.msra.mxu1 %v17684_v52  ;;  %v17694_v52 = vld [vmem:[%s18202_s8 + $0xd8] sm:$0xff]  }
 0x40d   : > { %16281 = vmatprep.subr.bf16.mxu1 %v17685_v54 }
 0x40f   : > { %16274 = vmatmul.mubr.msk.bf16.gmra.mrb[12].mxu1 %vm1122_vm3, %v4816_v9 }
 0x410   : > { %16282 = vmatpush3.bf16.msra.mxu1 %v17685_v54  ;;  %16285 = vmatprep.mubr.msk.bf16.mxu1 %vm1122_vm3, %v4943_v10 }
 0x411   : > { %16283 = vmatprep.subr.bf16.mxu1 %v17686_v33 }
 0x414   : > { %16284 = vmatpush3.bf16.msra.mxu1 %v17686_v33 }
 0x415   : > { %16293 = vmatprep.subr.bf16.mxu1 %v17687_v3 }
 0x417   : > { %16286 = vmatmul.mubr.msk.bf16.vlgmr.msra.gmra.mrb[8].mxu1 %vm1122_vm3, %v4944_v45 }
 0x418   : > { %16294 = vmatpush3.bf16.msra.mxu1 %v17687_v3  ;;  %16289 = vmatprep.mubr.msk.bf16.mxu1 %vm1122_vm3, %v4945_v35  ;;  %v14245_v3 = vld [vmem:[%s18212_s19] ss:$0 sm:$0xff] }
 0x419   : > { %16295 = vmatprep.subr.bf16.mxu1 %v17688_v27 }
 0x41c   : > { %16296 = vmatpush3.bf16.msra.mxu1 %v17688_v27 }
 0x41d   : > { %16297 = vmatprep.subr.bf16.mxu1 %v17689_v13 }
 0x41f   : > { %16290 = vmatmul.mubr.msk.bf16.gmra.mrb[12].mxu1 %vm1122_vm3, %v4946_v25 }
 0x420   : > { %16298 = vmatpush3.bf16.msra.mxu1 %v17689_v13  ;;  %16301 = vmatprep.mubr.msk.bf16.mxu1 %vm1122_vm3, %v5073_v43 }
 0x421   : > { %16299 = vmatprep.subr.bf16.mxu1 %v17690_v36 }
 0x424   : > { %16300 = vmatpush3.bf16.msra.mxu1 %v17690_v36 }
 0x425   : > { %16309 = vmatprep.subr.bf16.mxu1 %v17691_v21 }
 0x427   : > { %16302 = vmatmul.mubr.msk.bf16.vlgmr.msra.gmra.mrb[8].mxu1 %vm1122_vm3, %v20944_v47 }
 0x428   : > { %16310 = vmatpush3.bf16.msra.mxu1 %v17691_v21  ;;  %16305 = vmatprep.mubr.msk.bf16.mxu1 %vm1122_vm3, %v5075_v7 }
 0x429   : > { %16311 = vmatprep.subr.bf16.mxu1 %v17692_v31 }
 0x42c   : > { %16312 = vmatpush3.bf16.msra.mxu1 %v17692_v31 }
 0x42d   : > { %16313 = vmatprep.subr.bf16.mxu1 %v17693_v23 }
 0x42f   : > { %16306 = vmatmul.mubr.msk.bf16.gmra.mrb[12].mxu1 %vm1122_vm3, %v5076_v57 }
 0x430   : > { %16314 = vmatpush3.bf16.msra.mxu1 %v17693_v23  ;;  %16317 = vmatprep.mubr.msk.bf16.mxu1 %vm1122_vm3, %v19321_v5  ;;  %v5203_v5 = vld [vmem:[#allocation4 + $0x90] sm:$0xff] }
 0x431   : > { %16315 = vmatprep.subr.bf16.mxu1 %v17694_v52  ;;  %v5207_v18 = vpack.c.bf16 %v5203_v5, %v19359_v2  ;;  %v17701_v2 = vld [vmem:[%s18217_s24] sm:$0xff]  }
 0x434   : > { %16316 = vmatpush3.bf16.msra.mxu1 %v17694_v52 }
 0x435   : > { %16325 = vmatprep.subr.bf16.mxu1 %v17695_v19 }
 0x437   : > { %16318 = vmatmul.mubr.msk.bf16.vlgmr.msra.gmra.mrb[8].mxu1 %vm1122_vm3, %v19324_v12  ;;  %v5333_v12 = vld [vmem:[#allocation4 + $0x91] sm:$0xff] }
 0x438   : > { %16326 = vmatpush3.bf16.msra.mxu1 %v17695_v19  ;;  %16321 = vmatprep.mubr.msk.bf16.mxu1 %vm1122_vm3, %v19333_v63 }
 0x439   : > { %16327 = vmatprep.subr.bf16.mxu1 %v17696_v29 }
 0x43c   : > { %16328 = vmatpush3.bf16.msra.mxu1 %v17696_v29  ;;  %v5649_v29 = vld [vmem:[#allocation5 + $0x1] sm:$0xff] }
 0x43d   : > { %16329 = vmatprep.subr.bf16.mxu1 %v17697_v11 }
 0x43f   : > { %16322 = vmatmul.mubr.msk.bf16.gmra.mrb[12].mxu1 %vm1122_vm3, %v5207_v18 }
 0x440   : > { %16330 = vmatpush3.bf16.msra.mxu1 %v17697_v11  ;;  %16333 = vmatprep.mubr.msk.bf16.mxu1 %vm1122_vm3, %v19283_v32  ;;  %v5337_v32 = vpack.c.bf16 %v5333_v12, %v19376_v20 }
 0x441   : > { %16331 = vmatprep.subr.bf16.mxu1 %v17698_v6 }
 0x444   : > { %16332 = vmatpush3.bf16.msra.mxu1 %v17698_v6 }
 0x445   : > { %16963 = vmatprep.subr.bf16.mxu1 %v19190_v51 }
 0x447   : > { %16334 = vmatmul.mubr.msk.bf16.vlgmr.msra.gmra.mrb[8].mxu1 %vm1122_vm3, %v19301_v49  ;;  %v17699_v49 = vld [vmem:[%s18217_s24 + $0x10] sm:$0xff]  }
 0x448   : > { %16967 = vmatpush3.bf16.msra.mxu1 %v19190_v51  ;;  %16337 = vmatprep.mubr.msk.bf16.mxu1 %vm1122_vm3, %v19314_v50  ;;  %v5463_v51 = vld [vmem:[#allocation4 + $0x92] sm:$0xff]  ;;  %v17700_v50 = vld [vmem:[%s18217_s24 + $0x18] sm:$0xff]  }
 0x449   : > { %16964 = vmatprep.subr.bf16.mxu1 %v19196_v53  ;;  %16357 = vmatprep.subr.bf16.mxu0 %v17699_v49 }
 0x44a   : > { %16358 = vmatpush3.bf16.msra.mxu0 %v17699_v49 }
 0x44b   : > { %16359 = vmatprep.subr.bf16.mxu0 %v17700_v50 }
 0x44c   : > { %16968 = vmatpush3.bf16.msra.mxu1 %v19196_v53  ;;  %v5467_v53 = vpack.c.bf16 %v5463_v51, %v19394_v34  ;;  %v17702_v51 = vld [vmem:[%s18217_s24 + $0x8] sm:$0xff]  }
 0x44d   : > { %16965 = vmatprep.subr.bf16.mxu1 %v19202_v55 }
 0x44e   : > { %16360 = vmatpush3.bf16.msra.mxu0 %v17700_v50 }
 0x44f   : > { %16338 = vmatmul.mubr.msk.bf16.gmra.mrb[12].mxu1 %vm1122_vm3, %v5337_v32  ;;  %16369 = vmatprep.subr.bf16.mxu0 %v17701_v2 }
 0x450   : > { %16353 = vmatprep.mubr.msk.bf16.mxu1 %vm1122_vm3, %v19348_v0  ;;  %16969 = vmatpush3.bf16.msra.mxu1 %v19202_v55 }
 0x451   : > { %16966 = vmatprep.subr.bf16.mxu1 %v19211_v56 }
 0x454   : > { %16970 = vmatpush3.bf16.msra.mxu1 %v19211_v56  ;;  %v14244_v56 = vld [vmem:[%s18207_s14] ss:$0 sm:$0xff] }
 0x45b   : > { %16354 = vmatmul.mubr.msk.bf16.vlgmr.msra.gmra.mrb[12].mxu1 %vm1122_vm3, %v5467_v53 }
 0x4b1   : > { %v16351_v63 = vpop.f32.mrb[40].mxu0 }
 0x4b2   : > { %v5547_v55 = vpop.f32.mrb[41].mxu0 }
 0x4b3   : > { %v16352_v0 = vpop.f32.mrb[42].mxu0 }
 0x4b4   : > { %v5550_v54 = vpop.f32.mrb[43].mxu0 }
 0x51a   : > { %v16335_v9 = vpop.f32.mrb[8].mxu1 }
 0x51b   : > { %v17043_v33 = vadd.f32 %v16351_v63, %v16335_v9  ;;  %v5417_v10 = vpop.f32.mrb[9].mxu1 }
 0x51c   : > { %v17044_v45 = vadd.f32 %v5547_v55, %v5417_v10  ;;  %v16336_v27 = vpop.f32.mrb[10].mxu1 }
 0x51d   : > { %v5594_v35 = vmul.f32 %v17043_v33, %v14244_v56  ;;  %v17045_v13 = vadd.f32 %v16352_v0, %v16336_v27  ;;  %v5420_v20 = vpop.f32.mrb[11].mxu1 }
 0x51e   : > { %v5592_v25 = vmul.f32 %v17044_v45, %v14244_v56  ;;  %v17046_v36 = vadd.f32 %v5550_v54, %v5420_v20  ;;  %v17703_v45 = vld [vmem:[%s18217_s24 + $0x20] sm:$0xff]  }
 0x51f   : > { %v5608_v43 = vadd.f32 %v14245_v3, %v5594_v35  ;;  %v5595_v21 = vmul.f32 %v17045_v13, %v14244_v56 }
 0x520   : > { %v5606_v31 = vadd.f32 %v14245_v3, %v5592_v25  ;;  %v5593_v7 = vmul.f32 %v17046_v36, %v14244_v56 }
 0x521   : > { %v5616_v47 = vmax.f32 %v5608_v43, 0.0  ;;  %v5609_v23 = vadd.f32 %v14245_v3, %v5595_v21  ;;  %v5633_v43 = vld [vmem:[#allocation5] sm:$0xff] }
 0x522   : > { %v5614_v34 = vmax.f32 %v5606_v31, 0.0  ;;  %v5607_v57 = vadd.f32 %v14245_v3, %v5593_v7 }
 0x523   : > { %5625 = vst.msk [vmem:[#allocation5 + $0x31] sm:$0xff] %vm1164_vm5, %v5616_v47  ;;  %v5617_v52 = vmax.f32 %v5609_v23, 0.0 }
 0x524   : > { %5623 = vst.msk [vmem:[#allocation5 + $0x11] sm:$0xff] %vm1164_vm5, %v5614_v34  ;;  %v5615_v19 = vmax.f32 %v5607_v57, 0.0 }
 0x525   : > { %5626 = vst.msk [vmem:[#allocation5 + $0x41] sm:$0xff] %vm1164_vm5, %v5617_v52 }
 0x526   : > { %5624 = vst.msk [vmem:[#allocation5 + $0x21] sm:$0xff] %vm1164_vm5, %v5615_v19 }
 0x52a   : > { %v19488_v6 = vld [vmem:[#allocation5 + $0x31] sm:$0xff] }
 0x52b   : > { %v19483_v11 = vld [vmem:[#allocation5 + $0x11] sm:$0xff] }
 0x52c   : > { %v5657_v5 = vpack.c.bf16 %v19483_v11, %v5649_v29  ;;  %v5634_v21 = vld [vmem:[#allocation5 + $0x10] sm:$0xff]  ;;  %v5637_v29 = vld [vmem:[#allocation5 + $0x40] sm:$0xff] }
 0x52d   : > { %v19486_v18 = vld [vmem:[#allocation5 + $0x21] sm:$0xff]  ;;  %v5641_v23 = vpack.c.bf16 %v5634_v21, %v5633_v43  ;;  %v5636_v52 = vld [vmem:[#allocation5 + $0x30] sm:$0xff] }
 0x52e   : > { %v16355_v12 = vpop.f32.mrb[12].mxu1  ;;  %16361 = vmatprep.mubr.msk.bf16.mxu0 %vm1164_vm5, %v5657_v5  ;;  %v19493_v32 = vpack.c.bf16 %v19488_v6, %v19486_v18  ;;  %v6080_v50 = vpack.c.bf16 %v19486_v18, %v19483_v11  ;;  %v5635_v34 = vld [vmem:[#allocation5 + $0x20] sm:$0xff]  ;;  %v17704_v5 = vld [vmem:[%s18217_s24 + $0x28] sm:$0xff]  }
 0x52f   : > { %v5598_v53 = vmul.f32 %v16355_v12, %v14244_v56  ;;  %v5563_v49 = vpop.f32.mrb[13].mxu1  ;;  %v19526_v19 = vpack.c.bf16 %v5636_v52, %v5635_v34 }
 0x530   : > { %v5596_v63 = vmul.f32 %v14244_v56, %v5563_v49  ;;  %v16356_v55 = vpop.f32.mrb[14].mxu1  ;;  %16362 = vmatmul.mubr.msk.bf16.vlgmr.msra.gmra.mrb[44].mxu0 %vm1164_vm5, %v19493_v32  ;;  %v5844_v49 = vld [vmem:[#allocation5 + $0x2] sm:$0xff] }
 0x531   : > { %v5612_v0 = vadd.f32 %v14245_v3, %v5598_v53  ;;  %v5599_v54 = vmul.f32 %v16356_v55, %v14244_v56  ;;  %v5566_v9 = vpop.f32.mrb[15].mxu1  ;;  %16370 = vmatpush3.bf16.msra.mxu0 %v17701_v2  ;;  %v19505_v2 = vld [vmem:[#allocation5 + $0x41] sm:$0xff] }
 0x532   : > { %v5610_v33 = vadd.f32 %v14245_v3, %v5596_v63  ;;  %v5597_v10 = vmul.f32 %v14244_v56, %v5566_v9  ;;  %16371 = vmatprep.subr.bf16.mxu0 %v17702_v51  ;;  %v5845_v63 = vld [vmem:[#allocation5 + $0x12] sm:$0xff]  ;;  %v5846_v9 = vld [vmem:[#allocation5 + $0x22] sm:$0xff] }
 0x533   : > { %v5620_v27 = vmax.f32 %v5612_v0, 0.0  ;;  %v5613_v35 = vadd.f32 %v14245_v3, %v5599_v54  ;;  %v5852_v54 = vpack.c.bf16 %v5845_v63, %v5844_v49  ;;  %v6194_v18 = vpack.c.bf16 %v5846_v9, %v5845_v63  ;;  %v17714_v63 = vld [vmem:[%s18217_s24 + $0x78] sm:$0xff]  }
 0x534   : > { %v5618_v13 = vmax.f32 %v5610_v33, 0.0  ;;  %v5611_v20 = vadd.f32 %v14245_v3, %v5597_v10  ;;  %v5847_v10 = vld [vmem:[#allocation5 + $0x32] sm:$0xff] }
 0x535   : > { %5629 = vst.msk [vmem:[#allocation5 + $0x71] sm:$0xff] %vm1164_vm5, %v5620_v27  ;;  %v5621_v25 = vmax.f32 %v5613_v35, 0.0  ;;  %16372 = vmatpush3.bf16.msra.mxu0 %v17702_v51  ;;  %v17705_v51 = vld [vmem:[%s18217_s24 + $0x30] sm:$0xff]   ;;  %v17706_v35 = vld [vmem:[%s18217_s24 + $0x38] sm:$0xff]  }
 0x536   : > { %5627 = vst.msk [vmem:[#allocation5 + $0x51] sm:$0xff] %vm1164_vm5, %v5618_v13  ;;  %v5619_v36 = vmax.f32 %v5611_v20, 0.0  ;;  %16381 = vmatprep.subr.bf16.mxu0 %v17703_v45  ;;  %v5848_v27 = vld [vmem:[#allocation5 + $0x42] sm:$0xff]  ;;  %v17707_v20 = vld [vmem:[%s18217_s24 + $0x40] sm:$0xff]  }
 0x537   : > { %5630 = vst.msk [vmem:[#allocation5 + $0x81] sm:$0xff] %vm1164_vm5, %v5621_v25 }
 0x538   : > { %5628 = vst.msk [vmem:[#allocation5 + $0x61] sm:$0xff] %vm1164_vm5, %v5619_v36 }
 0x53c   : > { %v19515_v7 = vld [vmem:[#allocation5 + $0x71] sm:$0xff] }
 0x53d   : > { %v19507_v56 = vld [vmem:[#allocation5 + $0x51] sm:$0xff] }
 0x53e   : > { %v19511_v3 = vpack.c.bf16 %v19507_v56, %v19505_v2  ;;  %v5638_v57 = vld [vmem:[#allocation5 + $0x50] sm:$0xff] }
 0x53f   : > { %v19513_v31 = vld [vmem:[#allocation5 + $0x61] sm:$0xff]  ;;  %v19529_v12 = vpack.c.bf16 %v5638_v57, %v5637_v29  ;;  %v5640_v55 = vld [vmem:[#allocation5 + $0x70] sm:$0xff] }
 0x540   : > { %16365 = vmatprep.mubr.msk.bf16.mxu0 %vm1164_vm5, %v19511_v3  ;;  %v19521_v47 = vpack.c.bf16 %v19515_v7, %v19513_v31  ;;  %v5639_v53 = vld [vmem:[#allocation5 + $0x60] sm:$0xff]  ;;  %v5849_v33 = vld [vmem:[#allocation5 + $0x52] sm:$0xff] }
 0x541   : > { %v19536_v0 = vpack.c.bf16 %v5640_v55, %v5639_v53  ;;  %v19544_v13 = vpack.c.bf16 %v5849_v33, %v5848_v27  ;;  %v5850_v25 = vld [vmem:[#allocation5 + $0x62] sm:$0xff]  ;;  %v5851_v36 = vld [vmem:[#allocation5 + $0x72] sm:$0xff]  ;;  %v5968_v49 = vpack.c.bf16 %v5639_v53, %v5638_v57 }
 0x542   : > { %16366 = vmatmul.mubr.msk.bf16.gmra.mrb[48].mxu0 %vm1164_vm5, %v19521_v47  ;;  %v19551_v43 = vpack.c.bf16 %v5851_v36, %v5850_v25  ;;  %v17710_v57 = vld [vmem:[%s18217_s24 + $0x58] sm:$0xff]  }
 0x543   : > { %16373 = vmatprep.mubr.msk.bf16.mxu0 %vm1164_vm5, %v5641_v23  ;;  %v5966_v23 = vpack.c.bf16 %v5635_v34, %v5634_v21  ;;  %v6081_v34 = vpack.c.bf16 %v19505_v2, %v19488_v6  ;;  %v6079_v53 = vld [vmem:[#allocation5 + $0x81] sm:$0xff]  ;;  %v6195_v6 = vpack.c.bf16 %v5848_v27, %v5847_v10  ;;  %v6196_v2 = vpack.c.bf16 %v5850_v25, %v5849_v33  ;;  %v17719_v27 = vld [vmem:[%s20946_s11 + $0x40] sm:$0xff]  }
 0x544   : > { %v6083_v11 = vpack.c.bf16 %v6079_v53, %v19515_v7 }
 0x54a   : > { %16374 = vmatmul.mubr.msk.bf16.vlgmr.msra.gmra.mrb[44].mxu0 %vm1164_vm5, %v19526_v19 }
 0x54b   : > { %16382 = vmatpush3.bf16.msra.mxu0 %v17703_v45  ;;  %16377 = vmatprep.mubr.msk.bf16.mxu0 %vm1164_vm5, %v19529_v12  ;;  %v19541_v45 = vpack.c.bf16 %v5847_v10, %v5846_v9  ;;  %v6308_v9 = vld [vmem:[#allocation5 + $0x90] sm:$0xff]  ;;  %v17718_v10 = vld [vmem:[%s20945_s10 + $0x8] sm:$0xff]  }
 0x54c   : > { %16383 = vmatprep.subr.bf16.mxu0 %v17704_v5 }
 0x54f   : > { %16384 = vmatpush3.bf16.msra.mxu0 %v17704_v5  ;;  %v5967_v5 = vpack.c.bf16 %v5637_v29, %v5636_v52  ;;  %v6082_v52 = vpack.c.bf16 %v19513_v31, %v19507_v56  ;;  %v17711_v29 = vld [vmem:[%s18217_s24 + $0x60] sm:$0xff]   ;;  %v17713_v56 = vld [vmem:[%s18217_s24 + $0x70] sm:$0xff]  }
 0x550   : > { %16393 = vmatprep.subr.bf16.mxu0 %v17705_v51  ;;  %v6193_v31 = vld [vmem:[#allocation5 + $0x82] sm:$0xff] }
 0x551   : > { %v6197_v7 = vpack.c.bf16 %v6193_v31, %v5851_v36 }
 0x552   : > { %16378 = vmatmul.mubr.msk.bf16.gmra.mrb[48].mxu0 %vm1164_vm5, %v19536_v0 }
 0x553   : > { %16385 = vmatprep.mubr.msk.bf16.mxu0 %vm1164_vm5, %v5852_v54  ;;  %v17709_v54 = vld [vmem:[%s18217_s24 + $0x50] sm:$0xff]  }
 0x55a   : > { %16386 = vmatmul.mubr.msk.bf16.vlgmr.msra.gmra.mrb[44].mxu0 %vm1164_vm5, %v19541_v45 }
 0x55b   : > { %16394 = vmatpush3.bf16.msra.mxu0 %v17705_v51  ;;  %16389 = vmatprep.mubr.msk.bf16.mxu0 %vm1164_vm5, %v19544_v13  ;;  %v17708_v51 = vld [vmem:[%s18217_s24 + $0x48] sm:$0xff]  }
 0x55c   : > { %16395 = vmatprep.subr.bf16.mxu0 %v17706_v35 }
 0x55f   : > { %16396 = vmatpush3.bf16.msra.mxu0 %v17706_v35  ;;  %v5965_v35 = vld [vmem:[#allocation5 + $0x80] sm:$0xff] }
 0x560   : > { %16405 = vmatprep.subr.bf16.mxu0 %v17707_v20  ;;  %v5969_v21 = vpack.c.bf16 %v5965_v35, %v5640_v55  ;;  %v17715_v55 = vld [vmem:[%s18217_s24 + $0x80] sm:$0xff]   ;;  %v6312_v33 = vpack.c.bf16 %v6308_v9, %v5965_v35  ;;  %v17720_v9 = vld [vmem:[%s20946_s11 + $0x48] sm:$0xff]  }
 0x562   : > { %16390 = vmatmul.mubr.msk.bf16.gmra.mrb[48].mxu0 %vm1164_vm5, %v19551_v43 }
 0x563   : > { %16397 = vmatprep.mubr.msk.bf16.mxu0 %vm1164_vm5, %v5966_v23 }
 0x56a   : > { %16398 = vmatmul.mubr.msk.bf16.vlgmr.msra.gmra.mrb[44].mxu0 %vm1164_vm5, %v5967_v5 }
 0x56b   : > { %16406 = vmatpush3.bf16.msra.mxu0 %v17707_v20  ;;  %16401 = vmatprep.mubr.msk.bf16.mxu0 %vm1164_vm5, %v5968_v49  ;;  %v14332_v20 = vld [vmem:[%s20947_s15] ss:$0 sm:$0xff]  ;;  %s20957_s15 = sld [smem:[#allocation22_spill]] }
 0x56c   : > { %16407 = vmatprep.subr.bf16.mxu0 %v17708_v51 }
 0x56f   : > { %16408 = vmatpush3.bf16.msra.mxu0 %v17708_v51 }
 0x570   : > { %16417 = vmatprep.subr.bf16.mxu0 %v17709_v54 }
 0x572   : > { %16402 = vmatmul.mubr.msk.bf16.gmra.mrb[48].mxu0 %vm1164_vm5, %v5969_v21 }
 0x573   : > { %16409 = vmatprep.mubr.msk.bf16.mxu0 %vm1164_vm5, %v6080_v50  ;;  %v17712_v50 = vld [vmem:[%s18217_s24 + $0x68] sm:$0xff]  }
 0x57a   : > { %16410 = vmatmul.mubr.msk.bf16.vlgmr.msra.gmra.mrb[44].mxu0 %vm1164_vm5, %v6081_v34 }
 0x57b   : > { %16418 = vmatpush3.bf16.msra.mxu0 %v17709_v54  ;;  %16413 = vmatprep.mubr.msk.bf16.mxu0 %vm1164_vm5, %v6082_v52 }
 0x57c   : > { %16419 = vmatprep.subr.bf16.mxu0 %v17710_v57 }
 0x57f   : > { %16420 = vmatpush3.bf16.msra.mxu0 %v17710_v57 }
 0x580   : > { %16429 = vmatprep.subr.bf16.mxu0 %v17711_v29 }
 0x582   : > { %16414 = vmatmul.mubr.msk.bf16.gmra.mrb[48].mxu0 %vm1164_vm5, %v6083_v11 }
 0x583   : > { %16421 = vmatprep.mubr.msk.bf16.mxu0 %vm1164_vm5, %v6194_v18 }
 0x58a   : > { %16422 = vmatmul.mubr.msk.bf16.vlgmr.msra.gmra.mrb[44].mxu0 %vm1164_vm5, %v6195_v6 }
 0x58b   : > { %16430 = vmatpush3.bf16.msra.mxu0 %v17711_v29  ;;  %16425 = vmatprep.mubr.msk.bf16.mxu0 %vm1164_vm5, %v6196_v2 }
 0x58c   : > { %16431 = vmatprep.subr.bf16.mxu0 %v17712_v50 }
 0x58f   : > { %16432 = vmatpush3.bf16.msra.mxu0 %v17712_v50 }
 0x590   : > { %16441 = vmatprep.subr.bf16.mxu0 %v17713_v56 }
 0x592   : > { %16426 = vmatmul.mubr.msk.bf16.gmra.mrb[48].mxu0 %vm1164_vm5, %v6197_v7 }
 0x593   : > { %16433 = vmatprep.mubr.msk.bf16.mxu0 %vm1164_vm5, %v19526_v19  ;;  %v17716_v19 = vld [vmem:[%s18217_s24 + $0x88] sm:$0xff]  }
 0x59a   : > { %16434 = vmatmul.mubr.msk.bf16.vlgmr.msra.gmra.mrb[44].mxu0 %vm1164_vm5, %v19529_v12  ;;  %v6422_v12 = vld [vmem:[#allocation5 + $0x91] sm:$0xff] }
 0x59b   : > { %16442 = vmatpush3.bf16.msra.mxu0 %v17713_v56  ;;  %16437 = vmatprep.mubr.msk.bf16.mxu0 %vm1164_vm5, %v19536_v0  ;;  %v6426_v0 = vpack.c.bf16 %v6422_v12, %v6079_v53 }
 0x59c   : > { %16443 = vmatprep.subr.bf16.mxu0 %v17714_v63 }
 0x59f   : > { %16444 = vmatpush3.bf16.msra.mxu0 %v17714_v63 }
 0x5a0   : > { %16453 = vmatprep.subr.bf16.mxu0 %v17715_v55 }
 0x5a2   : > { %16438 = vmatmul.mubr.msk.bf16.gmra.mrb[48].mxu0 %vm1164_vm5, %v6312_v33 }
 0x5a3   : > { %16445 = vmatprep.mubr.msk.bf16.mxu0 %vm1164_vm5, %v19493_v32  ;;  %v6536_v32 = vld [vmem:[#allocation5 + $0x92] sm:$0xff] }
 0x5aa   : > { %16446 = vmatmul.mubr.msk.bf16.vlgmr.msra.gmra.mrb[44].mxu0 %vm1164_vm5, %v19511_v3  ;;  %v6540_v3 = vpack.c.bf16 %v6536_v32, %v6193_v31 }
 0x5ab   : > { %16454 = vmatpush3.bf16.msra.mxu0 %v17715_v55  ;;  %16449 = vmatprep.mubr.msk.bf16.mxu0 %vm1164_vm5, %v19521_v47  ;;  %v17717_v47 = vld [vmem:[%s20945_s10] sm:$0xff]  }
 0x5ac   : > { %16455 = vmatprep.subr.bf16.mxu0 %v17716_v19  ;;  %16465 = vmatprep.subr.bf16.mxu1 %v17717_v47 }
 0x5ad   : > { %16466 = vmatpush3.bf16.msra.mxu1 %v17717_v47  ;;  %v17721_v47 = vld [vmem:[%s20946_s11 + $0x50] sm:$0xff]  }
 0x5ae   : > { %16467 = vmatprep.subr.bf16.mxu1 %v17718_v10 }
 0x5af   : > { %16456 = vmatpush3.bf16.msra.mxu0 %v17716_v19 }
 0x5b1   : > { %16468 = vmatpush3.bf16.msra.mxu1 %v17718_v10 }
 0x5b2   : > { %16450 = vmatmul.mubr.msk.bf16.gmra.mrb[48].mxu0 %vm1164_vm5, %v6426_v0  ;;  %16477 = vmatprep.subr.bf16.mxu1 %v17719_v27 }
 0x5b3   : > { %16457 = vmatprep.mubr.msk.bf16.mxu0 %vm1164_vm5, %v19541_v45  ;;  %v14333_v45 = vld [vmem:[%s20948_s16] ss:$0 sm:$0xff]  ;;  %s20958_s16 = sld [smem:[#allocation23_spill]] }
 0x5ba   : > { %16458 = vmatmul.mubr.msk.bf16.vlgmr.msra.gmra.mrb[44].mxu0 %vm1164_vm5, %v19544_v13 }
 0x5bb   : > { %16461 = vmatprep.mubr.msk.bf16.mxu0 %vm1164_vm5, %v19551_v43 }
 0x5c2   : > { %16462 = vmatmul.mubr.msk.bf16.gmra.mrb[48].mxu0 %vm1164_vm5, %v6540_v3 }
 0x68d   : > { %v16459_v25 = vpop.f32.mrb[44].mxu0 }
 0x68e   : > { %v6651_v36 = vmul.f32 %v16459_v25, %v14332_v20  ;;  %v6604_v13 = vpop.f32.mrb[45].mxu0 }
 0x68f   : > { %v6649_v23 = vmul.f32 %v14332_v20, %v6604_v13  ;;  %v16460_v5 = vpop.f32.mrb[46].mxu0 }
 0x690   : > { %v6665_v43 = vadd.f32 %v14333_v45, %v6651_v36  ;;  %v6652_v51 = vmul.f32 %v16460_v5, %v14332_v20  ;;  %v6607_v49 = vpop.f32.mrb[47].mxu0  ;;  %v17726_v5 = vld [vmem:[%s20946_s11 + $0x78] sm:$0xff]  }
 0x691   : > { %v6663_v54 = vadd.f32 %v14333_v45, %v6649_v23  ;;  %v6650_v35 = vmul.f32 %v14332_v20, %v6607_v49  ;;  %v17725_v23 = vld [vmem:[%s20946_s11 + $0x70] sm:$0xff]  }
 0x692   : > { %v6666_v21 = vadd.f32 %v14333_v45, %v6652_v51  ;;  %v6673_v57 = vmax.f32 %v6665_v43, 0.0  ;;  %v17727_v43 = vld [vmem:[%s20946_s11] sm:$0xff]  }
 0x693   : > { %v6664_v34 = vadd.f32 %v14333_v45, %v6650_v35  ;;  %v6671_v29 = vmax.f32 %v6663_v54, 0.0  ;;  %v13949_v51 = vld [vmem:[%s20949_s18] ss:$0 sm:$0xff]  ;;  %s20959_s18 = sld [smem:[#allocation17_spill]] }
 0x694   : > { %v6674_v52 = vmax.f32 %v6666_v21, 0.0  ;;  %v2980_v49 = vadd.f32 %v19175_v40, %v13949_v51  ;;  %v2972_v54 = vadd.f32 %v13949_v51, %v19177_v41  ;;  %v14334_v35 = vld [vmem:[%s20950_s22] ss:$0 sm:$0xff]  ;;  %v2977_v21 = vadd.f32 %v19171_v38, %v13949_v51  ;;  %v6838_v41 = vld [vmem:[#allocation6 + $0x1] sm:$0xff]  ;;  %s20960_s22 = sld [smem:[#allocation25_spill]] }
 0x695   : > { %v6672_v53 = vmax.f32 %v6664_v34, 0.0  ;;  %v16463_v11 = vpop.f32.mrb[48].mxu0  ;;  %v2969_v34 = vadd.f32 %v13949_v51, %v19173_v39  ;;  %v2985_v38 = vadd.f32 %v13949_v51, %v19182_v44 }
 0x696   : > { %v6680_v18 = vpack.c.bf16 %v6674_v52, %v6673_v57  ;;  %v6655_v6 = vmul.f32 %v16463_v11, %v14332_v20  ;;  %v6620_v50 = vpop.f32.mrb[49].mxu0 }
 0x697   : > { %v6679_v2 = vpack.c.bf16 %v6672_v53, %v6671_v29  ;;  %v6653_v56 = vmul.f32 %v14332_v20, %v6620_v50  ;;  %v16464_v31 = vpop.f32.mrb[50].mxu0  ;;  %v16978_v53 = vadd.f32 %v14334_v35, %v2980_v49  ;;  %v2993_v50 = vadd.f32 %v19179_v42, %v13949_v51 }
 0x698   : > { %v6669_v7 = vadd.f32 %v14333_v45, %v6655_v6  ;;  %v6656_v63 = vmul.f32 %v16464_v31, %v14332_v20  ;;  %v6623_v55 = vpop.f32.mrb[51].mxu0  ;;  %v16981_v6 = vadd.f32 %v14334_v35, %v2972_v54 }
 0x699   : > { %v6667_v33 = vadd.f32 %v14333_v45, %v6653_v56  ;;  %v6654_v19 = vmul.f32 %v14332_v20, %v6623_v55  ;;  %16469 = vmatprep.mubr.msk.bf16.mxu1 %vm1164_vm5, %v6679_v2  ;;  %v17722_v20 = vld [vmem:[%s20946_s11 + $0x58] sm:$0xff]  }
 0x69a   : > { %v6670_v12 = vadd.f32 %v14333_v45, %v6656_v63  ;;  %16470 = vmatmul.mubr.msk.bf16.vlgmr.msra.gmra.mrb[16].mxu1 %vm1164_vm5, %v6680_v18  ;;  %v6677_v32 = vmax.f32 %v6669_v7, 0.0  ;;  %v2996_v7 = vadd.f32 %v19184_v46, %v13949_v51  ;;  %v2988_v63 = vadd.f32 %v13949_v51, %v19186_v48 }
 0x69b   : > { %v6668_v0 = vadd.f32 %v14333_v45, %v6654_v19  ;;  %16478 = vmatpush3.bf16.msra.mxu1 %v17719_v27  ;;  %v6675_v10 = vmax.f32 %v6667_v33, 0.0  ;;  %v17723_v27 = vld [vmem:[%s20946_s11 + $0x60] sm:$0xff]   ;;  %v17724_v45 = vld [vmem:[%s20946_s11 + $0x68] sm:$0xff]  }
 0x69c   : > { %v6678_v3 = vmax.f32 %v6670_v12, 0.0  ;;  %16479 = vmatprep.subr.bf16.mxu1 %v17720_v9  ;;  %v17728_v33 = vld [vmem:[%s20946_s11 + $0x8] sm:$0xff]   ;;  %v16987_v12 = vadd.f32 %v14334_v35, %v2985_v38 }
 0x69d   : > { %v6676_v25 = vmax.f32 %v6668_v0, 0.0 }
 0x69e   : > { %v6682_v36 = vpack.c.bf16 %v6678_v3, %v6677_v32  ;;  %v16990_v32 = vadd.f32 %v14334_v35, %v2996_v7 }
 0x69f   : > { %v6681_v13 = vpack.c.bf16 %v6676_v25, %v6675_v10  ;;  %16480 = vmatpush3.bf16.msra.mxu1 %v17720_v9  ;;  %v16984_v9 = vadd.f32 %v14334_v35, %v2993_v50  ;;  %v16993_v10 = vadd.f32 %v14334_v35, %v2988_v63  ;;  %v17734_v50 = vld [vmem:[%s20946_s11 + $0x38] sm:$0xff]  }
 0x6a0   : > { %16481 = vmatprep.subr.bf16.mxu1 %v17721_v47 }
 0x6a1   : > { %16473 = vmatprep.mubr.msk.bf16.mxu1 %vm1164_vm5, %v6681_v13  ;;  %v17729_v13 = vld [vmem:[%s20946_s11 + $0x10] sm:$0xff]  }
 0x6a2   : > { %16474 = vmatmul.mubr.msk.bf16.gmra.mrb[20].mxu1 %vm1164_vm5, %v6682_v36 }
 0x6a3   : > { %16482 = vmatpush3.bf16.msra.mxu1 %v17721_v47 }
 0x6a4   : > { %16483 = vmatprep.subr.bf16.mxu1 %v17722_v20 }
 0x6a7   : > { %16484 = vmatpush3.bf16.msra.mxu1 %v17722_v20 }
 0x6a8   : > { %16485 = vmatprep.subr.bf16.mxu1 %v17723_v27 }
 0x6ab   : > { %16486 = vmatpush3.bf16.msra.mxu1 %v17723_v27 }
 0x6ac   : > { %16487 = vmatprep.subr.bf16.mxu1 %v17724_v45 }
 0x6af   : > { %16488 = vmatpush3.bf16.msra.mxu1 %v17724_v45 }
 0x6b0   : > { %16489 = vmatprep.subr.bf16.mxu1 %v17725_v23 }
 0x6b3   : > { %16490 = vmatpush3.bf16.msra.mxu1 %v17725_v23 }
 0x6b4   : > { %16491 = vmatprep.subr.bf16.mxu1 %v17726_v5 }
 0x6b7   : > { %16492 = vmatpush3.bf16.msra.mxu1 %v17726_v5 }
 0x6b8   : > { %16501 = vmatprep.subr.bf16.mxu1 %v17727_v43 }
 0x76d   : > { %v16471_v57 = vpop.f32.mrb[16].mxu1 }
 0x76e   : > { %v16972_v52 = vadd.f32 %v16471_v57, %v2977_v21  ;;  %v6752_v29 = vpop.f32.mrb[17].mxu1 }
 0x76f   : > { %v16975_v11 = vadd.f32 %v6752_v29, %v2969_v34  ;;  %v16472_v18 = vpop.f32.mrb[18].mxu1  ;;  %v17731_v29 = vld [vmem:[%s20946_s11 + $0x20] sm:$0xff]  }
 0x770   : > { %v19629_v2 = vadd.f32 %v16972_v52, %v14334_v35  ;;  %v19631_v56 = vadd.f32 %v16978_v53, %v16472_v18  ;;  %v6755_v40 = vpop.f32.mrb[19].mxu1  ;;  %v17732_v18 = vld [vmem:[%s20946_s11 + $0x28] sm:$0xff]  }
 0x771   : > { %v19634_v31 = vadd.f32 %v16975_v11, %v14334_v35  ;;  %v19636_v39 = vadd.f32 %v16981_v6, %v6755_v40  ;;  %v17730_v35 = vld [vmem:[%s20946_s11 + $0x18] sm:$0xff]   ;;  %v17733_v6 = vld [vmem:[%s20946_s11 + $0x30] sm:$0xff]   ;;  %v17735_v40 = vld [vmem:[%s20946_s11 + $0x80] sm:$0xff]  }
 0x772   : > { %6802 = vst [vmem:[#allocation6 + $0x31] sm:$0xff] %v19629_v2  ;;  %6803 = vst [vmem:[#allocation6 + $0x41] sm:$0xff] %v19631_v56  ;;  %v7402_v42 = vpack.c.bf16 %v19631_v56, %v19629_v2 }
 0x773   : > { %6800 = vst [vmem:[#allocation6 + $0x11] sm:$0xff] %v19634_v31  ;;  %6801 = vst [vmem:[#allocation6 + $0x21] sm:$0xff] %v19636_v39  ;;  %v6846_v44 = vpack.c.bf16 %v19634_v31, %v6838_v41  ;;  %v19649_v55 = vpack.c.bf16 %v19629_v2, %v19636_v39  ;;  %v7401_v46 = vpack.c.bf16 %v19636_v39, %v19634_v31  ;;  %v17760_v31 = vld [vmem:[%s20946_s11 + $0x148] sm:$0xff]   ;;  %v17761_v39 = vld [vmem:[%s20946_s11 + $0x150] sm:$0xff]  }
 0x774   : > { %v17763_v2 = vld [vmem:[%s20946_s11 + $0x160] sm:$0xff]  }
 0x775   : > { %v16475_v19 = vpop.f32.mrb[20].mxu1  ;;  %16493 = vmatprep.mubr.bf16.mxu1 %v6846_v44 }
 0x776   : > { %v19654_v48 = vadd.f32 %v16984_v9, %v16475_v19  ;;  %v6768_v0 = vpop.f32.mrb[21].mxu1  ;;  %16494 = vmatmul.mubr.bf16.vlgmr.msra.gmra.mrb[24].mxu1 %v19649_v55  ;;  %v17736_v9 = vld [vmem:[%s20946_s11 + $0x88] sm:$0xff]   ;;  %v17737_v19 = vld [vmem:[%s20946_s11 + $0x90] sm:$0xff]  }
 0x777   : > { %v19657_v3 = vadd.f32 %v16987_v12, %v6768_v0  ;;  %v16476_v47 = vpop.f32.mrb[22].mxu1  ;;  %16502 = vmatpush3.bf16.msra.mxu1 %v17727_v43  ;;  %v7093_v0 = vld [vmem:[#allocation6 + $0x2] sm:$0xff] }
 0x778   : > { %6806 = vst [vmem:[#allocation6 + $0x71] sm:$0xff] %v19654_v48  ;;  %v19660_v25 = vadd.f32 %v16990_v32, %v16476_v47  ;;  %v6771_v36 = vpop.f32.mrb[23].mxu1  ;;  %16503 = vmatprep.subr.bf16.mxu1 %v17728_v33 }
 0x779   : > { %6804 = vst [vmem:[#allocation6 + $0x51] sm:$0xff] %v19657_v3  ;;  %v19664_v20 = vadd.f32 %v16993_v10, %v6771_v36  ;;  %v19668_v27 = vpack.c.bf16 %v19657_v3, %v19631_v56  ;;  %v19675_v5 = vld [vmem:[#allocation6 + $0x32] sm:$0xff]  ;;  %v19687_v54 = vld [vmem:[#allocation6 + $0x42] sm:$0xff] }
 0x77a   : > { %6807 = vst [vmem:[#allocation6 + $0x81] sm:$0xff] %v19660_v25  ;;  %v19671_v45 = vld [vmem:[#allocation6 + $0x10] sm:$0xff]  ;;  %v7404_v43 = vpack.c.bf16 %v19660_v25, %v19654_v48  ;;  %v19685_v49 = vld [vmem:[#allocation6 + $0x22] sm:$0xff]  ;;  %v7552_v52 = vpack.c.bf16 %v19687_v54, %v19675_v5  ;;  %v17764_v56 = vld [vmem:[%s20946_s11 + $0x168] sm:$0xff]  }
 0x77b   : > { %v19673_v23 = vld [vmem:[#allocation6 + $0x12] sm:$0xff]  ;;  %6805 = vst [vmem:[#allocation6 + $0x61] sm:$0xff] %v19664_v20  ;;  %16504 = vmatpush3.bf16.msra.mxu1 %v17728_v33  ;;  %16497 = vmatprep.mubr.bf16.mxu1 %v19668_v27  ;;  %v19683_v51 = vpack.c.bf16 %v19654_v48, %v19664_v20  ;;  %v7403_v21 = vpack.c.bf16 %v19664_v20, %v19657_v3  ;;  %v6812_v41 = vld [vmem:[#allocation6 + $0x20] sm:$0xff]  ;;  %v17738_v10 = vld [vmem:[%s20946_s11 + $0x98] sm:$0xff]  }
 0x77c   : > { %16505 = vmatprep.subr.bf16.mxu1 %v17729_v13  ;;  %v6818_v34 = vpack.c.bf16 %v19671_v45, %v19403_v15  ;;  %v7551_v57 = vpack.c.bf16 %v19685_v49, %v19673_v23  ;;  %v19710_v38 = vld [vmem:[#allocation6 + $0x30] sm:$0xff]  ;;  %v19717_v44 = vld [vmem:[#allocation6 + $0x40] sm:$0xff]  ;;  %v7101_v36 = vpack.c.bf16 %v19673_v23, %v7093_v0  ;;  %v17766_v48 = vld [vmem:[%s20946_s11 + $0x178] sm:$0xff]  }
 0x77d   : > { %v19715_v63 = vpack.c.bf16 %v19710_v38, %v6812_v41  ;;  %v17767_v3 = vld [vmem:[%s20946_s11 + $0x180] sm:$0xff]   ;;  %v17768_v20 = vld [vmem:[%s20946_s11 + $0x188] sm:$0xff]   ;;  %v17769_v23 = vld [vmem:[%s20946_s11 + $0x190] sm:$0xff]  }
 0x77e   : > { %16498 = vmatmul.mubr.bf16.gmra.mrb[28].mxu1 %v19683_v51 }
 0x77f   : > { %16506 = vmatpush3.bf16.msra.mxu1 %v17729_v13  ;;  %16517 = vmatprep.mubr.bf16.mxu1 %v6818_v34  ;;  %v19729_v32 = vld [vmem:[#allocation6 + $0x70] sm:$0xff]  ;;  %v17741_v34 = vld [vmem:[%s20946_s11 + $0xb0] sm:$0xff]  }
 0x780   : > { %16507 = vmatprep.subr.bf16.mxu1 %v17730_v35  ;;  %v19700_v53 = vld [vmem:[#allocation6 + $0x52] sm:$0xff] }
 0x781   : > { %v19712_v7 = vld [vmem:[#allocation6 + $0x50] sm:$0xff] }
 0x782   : > { %v19702_v11 = vld [vmem:[#allocation6 + $0x62] sm:$0xff]  ;;  %v19722_v33 = vpack.c.bf16 %v19712_v7, %v19717_v44  ;;  %v17739_v13 = vld [vmem:[%s20946_s11 + $0xa0] sm:$0xff]  }
 0x783   : > { %16508 = vmatpush3.bf16.msra.mxu1 %v17730_v35  ;;  %v7553_v15 = vpack.c.bf16 %v19702_v11, %v19700_v53  ;;  %v19727_v12 = vld [vmem:[#allocation6 + $0x60] sm:$0xff]  ;;  %v17740_v35 = vld [vmem:[%s20946_s11 + $0xa8] sm:$0xff]  }
 0x784   : > { %16509 = vmatprep.subr.bf16.mxu1 %v17731_v29  ;;  %v19733_v47 = vpack.c.bf16 %v19729_v32, %v19727_v12 }
 0x787   : > { %16510 = vmatpush3.bf16.msra.mxu1 %v17731_v29  ;;  %v17742_v29 = vld [vmem:[%s20946_s11 + $0xb8] sm:$0xff]  }
 0x788   : > { %16511 = vmatprep.subr.bf16.mxu1 %v17732_v18 }
 0x78b   : > { %16512 = vmatpush3.bf16.msra.mxu1 %v17732_v18  ;;  %v17743_v18 = vld [vmem:[%s20946_s11 + $0xc0] sm:$0xff]  }
 0x78c   : > { %16513 = vmatprep.subr.bf16.mxu1 %v17733_v6 }
 0x78f   : > { %16514 = vmatpush3.bf16.msra.mxu1 %v17733_v6  ;;  %v19745_v6 = vpack.c.bf16 %v19675_v5, %v19685_v49  ;;  %v17771_v5 = vld [vmem:[%s20946_s11 + $0x1a0] sm:$0xff]  }
 0x790   : > { %16515 = vmatprep.subr.bf16.mxu1 %v17734_v50 }
 0x793   : > { %16516 = vmatpush3.bf16.msra.mxu1 %v17734_v50  ;;  %v17744_v50 = vld [vmem:[%s20946_s11 + $0xc8] sm:$0xff]  }
 0x794   : > { %16525 = vmatprep.subr.bf16.mxu1 %v17735_v40 }
 0x796   : > { %16518 = vmatmul.mubr.bf16.vlgmr.msra.gmra.mrb[24].mxu1 %v19715_v63 }
 0x797   : > { %16521 = vmatprep.mubr.bf16.mxu1 %v19722_v33  ;;  %16526 = vmatpush3.bf16.msra.mxu1 %v17735_v40  ;;  %v19750_v40 = vpack.c.bf16 %v19700_v53, %v19687_v54  ;;  %v17772_v54 = vld [vmem:[%s20946_s11 + $0x1a8] sm:$0xff]   ;;  %v17775_v53 = vld [vmem:[%s20946_s11 + $0x1c0] sm:$0xff]  }
 0x798   : > { %16527 = vmatprep.subr.bf16.mxu1 %v17736_v9 }
 0x79b   : > { %16528 = vmatpush3.bf16.msra.mxu1 %v17736_v9  ;;  %v17745_v9 = vld [vmem:[%s20946_s11 + $0xd0] sm:$0xff]  }
 0x79c   : > { %16529 = vmatprep.subr.bf16.mxu1 %v17737_v19 }
 0x79e   : > { %16522 = vmatmul.mubr.bf16.gmra.mrb[28].mxu1 %v19733_v47 }
 0x79f   : > { %16530 = vmatpush3.bf16.msra.mxu1 %v17737_v19  ;;  %16541 = vmatprep.mubr.bf16.mxu1 %v7101_v36  ;;  %v19755_v19 = vld [vmem:[#allocation6 + $0x72] sm:$0xff]  ;;  %v7251_v36 = vpack.c.bf16 %v6812_v41, %v19671_v45  ;;  %v7252_v41 = vpack.c.bf16 %v19717_v44, %v19710_v38  ;;  %v17754_v38 = vld [vmem:[%s20946_s11 + $0x118] sm:$0xff]  }
 0x7a0   : > { %16531 = vmatprep.subr.bf16.mxu1 %v17738_v10  ;;  %v19759_v0 = vpack.c.bf16 %v19755_v19, %v19702_v11  ;;  %v17751_v45 = vld [vmem:[%s20946_s11 + $0x100] sm:$0xff]   ;;  %v17756_v44 = vld [vmem:[%s20946_s11 + $0x128] sm:$0xff]  }
 0x7a1   : > { %v17776_v11 = vld [vmem:[%s20946_s11 + $0x1c8] sm:$0xff]  }
 0x7a3   : > { %16532 = vmatpush3.bf16.msra.mxu1 %v17738_v10  ;;  %v17746_v10 = vld [vmem:[%s20946_s11 + $0xd8] sm:$0xff]  }
 0x7a4   : > { %16533 = vmatprep.subr.bf16.mxu1 %v17739_v13 }
 0x7a7   : > { %16534 = vmatpush3.bf16.msra.mxu1 %v17739_v13  ;;  %v17747_v13 = vld [vmem:[%s20946_s11 + $0xe0] sm:$0xff]  }
 0x7a8   : > { %16535 = vmatprep.subr.bf16.mxu1 %v17740_v35 }
 0x7ab   : > { %16536 = vmatpush3.bf16.msra.mxu1 %v17740_v35  ;;  %v17748_v35 = vld [vmem:[%s20946_s11 + $0xe8] sm:$0xff]  }
 0x7ac   : > { %16537 = vmatprep.subr.bf16.mxu1 %v17741_v34 }
 0x7af   : > { %16538 = vmatpush3.bf16.msra.mxu1 %v17741_v34  ;;  %v17749_v34 = vld [vmem:[%s20946_s11 + $0xf0] sm:$0xff]  }
 0x7b0   : > { %16539 = vmatprep.subr.bf16.mxu1 %v17742_v29 }
 0x7b3   : > { %16540 = vmatpush3.bf16.msra.mxu1 %v17742_v29  ;;  %v17750_v29 = vld [vmem:[%s20946_s11 + $0xf8] sm:$0xff]  }
 0x7b4   : > { %16549 = vmatprep.subr.bf16.mxu1 %v17743_v18 }
 0x7b6   : > { %16542 = vmatmul.mubr.bf16.vlgmr.msra.gmra.mrb[24].mxu1 %v19745_v6 }
 0x7b7   : > { %16545 = vmatprep.mubr.bf16.mxu1 %v19750_v40  ;;  %16550 = vmatpush3.bf16.msra.mxu1 %v17743_v18  ;;  %v17752_v18 = vld [vmem:[%s20946_s11 + $0x108] sm:$0xff]  }
 0x7b8   : > { %16551 = vmatprep.subr.bf16.mxu1 %v17744_v50 }
 0x7bb   : > { %16552 = vmatpush3.bf16.msra.mxu1 %v17744_v50  ;;  %v7253_v50 = vpack.c.bf16 %v19727_v12, %v19712_v7  ;;  %v17755_v7 = vld [vmem:[%s20946_s11 + $0x120] sm:$0xff]   ;;  %v17757_v12 = vld [vmem:[%s20946_s11 + $0x130] sm:$0xff]  }
 0x7bc   : > { %16553 = vmatprep.subr.bf16.mxu1 %v17745_v9 }
 0x7be   : > { %16546 = vmatmul.mubr.bf16.gmra.mrb[28].mxu1 %v19759_v0 }
 0x7bf   : > { %16554 = vmatpush3.bf16.msra.mxu1 %v17745_v9  ;;  %16565 = vmatprep.mubr.bf16.mxu1 %v7251_v36  ;;  %v17753_v9 = vld [vmem:[%s20946_s11 + $0x110] sm:$0xff]  }
 0x7c0   : > { %16555 = vmatprep.subr.bf16.mxu1 %v17746_v10 }
 0x7c3   : > { %16556 = vmatpush3.bf16.msra.mxu1 %v17746_v10  ;;  %v19775_v10 = vld [vmem:[#allocation6 + $0x80] sm:$0xff] }
 0x7c4   : > { %16557 = vmatprep.subr.bf16.mxu1 %v17747_v13  ;;  %v7254_v36 = vpack.c.bf16 %v19775_v10, %v19729_v32  ;;  %v17758_v32 = vld [vmem:[%s20946_s11 + $0x138] sm:$0xff]  }
 0x7c7   : > { %16558 = vmatpush3.bf16.msra.mxu1 %v17747_v13  ;;  %v17759_v13 = vld [vmem:[%s20946_s11 + $0x140] sm:$0xff]  }
 0x7c8   : > { %16559 = vmatprep.subr.bf16.mxu1 %v17748_v35 }
 0x7cb   : > { %16560 = vmatpush3.bf16.msra.mxu1 %v17748_v35  ;;  %v17778_v35 = vld [vmem:[%s20946_s11 + $0x1d8] sm:$0xff]  }
 0x7cc   : > { %16561 = vmatprep.subr.bf16.mxu1 %v17749_v34 }
 0x7cf   : > { %16562 = vmatpush3.bf16.msra.mxu1 %v17749_v34  ;;  %v17781_v34 = vld [vmem:[%s20946_s11 + $0x1f0] sm:$0xff]  }
 0x7d0   : > { %16563 = vmatprep.subr.bf16.mxu1 %v17750_v29 }
 0x7d3   : > { %16564 = vmatpush3.bf16.msra.mxu1 %v17750_v29  ;;  %v17782_v29 = vld [vmem:[%s20946_s11 + $0x1f8] sm:$0xff]  }
 0x7d4   : > { %16573 = vmatprep.subr.bf16.mxu1 %v17751_v45 }
 0x7d6   : > { %16566 = vmatmul.mubr.bf16.vlgmr.msra.gmra.mrb[24].mxu1 %v7252_v41  ;;  %v17785_v41 = vld [vmem:[%s20946_s11 + $0x210] sm:$0xff]  }
 0x7d7   : > { %16569 = vmatprep.mubr.bf16.mxu1 %v7253_v50  ;;  %16574 = vmatpush3.bf16.msra.mxu1 %v17751_v45  ;;  %v17783_v45 = vld [vmem:[%s20946_s11 + $0x200] sm:$0xff]  }
 0x7d8   : > { %16575 = vmatprep.subr.bf16.mxu1 %v17752_v18 }
 0x7db   : > { %16576 = vmatpush3.bf16.msra.mxu1 %v17752_v18  ;;  %v7851_v18 = vld [vmem:[#allocation6 + $0x91] sm:$0xff] }
 0x7dc   : > { %16577 = vmatprep.subr.bf16.mxu1 %v17753_v9  ;;  %v7855_v50 = vpack.c.bf16 %v7851_v18, %v19660_v25  ;;  %v17790_v25 = vld [vmem:[%s20946_s11 + $0x238] sm:$0xff]  }
 0x7de   : > { %16570 = vmatmul.mubr.bf16.gmra.mrb[28].mxu1 %v7254_v36 }
 0x7df   : > { %16578 = vmatpush3.bf16.msra.mxu1 %v17753_v9  ;;  %16589 = vmatprep.mubr.bf16.mxu1 %v7401_v46  ;;  %v17762_v46 = vld [vmem:[%s20946_s11 + $0x158] sm:$0xff]  }
 0x7e0   : > { %16579 = vmatprep.subr.bf16.mxu1 %v17754_v38  ;;  %v17786_v9 = vld [vmem:[%s20946_s11 + $0x218] sm:$0xff]  }
 0x7e3   : > { %16580 = vmatpush3.bf16.msra.mxu1 %v17754_v38  ;;  %v20952_v38 = vmov 0  }
 0x7e4   : > { %16581 = vmatprep.subr.bf16.mxu1 %v17755_v7 }
 0x7e7   : > { %16582 = vmatpush3.bf16.msra.mxu1 %v17755_v7  ;;  %v17791_v7 = vld [vmem:[%s20951_s23 + $0x20] sm:$0xff]  }
 0x7e8   : > { %16583 = vmatprep.subr.bf16.mxu1 %v17756_v44  ;;  %16693 = vmatprep.subr.bf16.mxu0 %v17791_v7 }
 0x7e9   : > { %16694 = vmatpush3.bf16.msra.mxu0 %v17791_v7  ;;  %v17797_v7 = vld [vmem:[%s20951_s23 + $0x10] sm:$0xff]  }
 0x7eb   : > { %16584 = vmatpush3.bf16.msra.mxu1 %v17756_v44  ;;  %v17792_v44 = vld [vmem:[%s20951_s23 + $0x28] sm:$0xff]  }
 0x7ec   : > { %16585 = vmatprep.subr.bf16.mxu1 %v17757_v12  ;;  %16695 = vmatprep.subr.bf16.mxu0 %v17792_v44 }
 0x7ed   : > { %16696 = vmatpush3.bf16.msra.mxu0 %v17792_v44 }
 0x7ef   : > { %16586 = vmatpush3.bf16.msra.mxu1 %v17757_v12  ;;  %v17793_v12 = vld [vmem:[%s20951_s23 + $0x30] sm:$0xff]  }
 0x7f0   : > { %16587 = vmatprep.subr.bf16.mxu1 %v17758_v32  ;;  %16697 = vmatprep.subr.bf16.mxu0 %v17793_v12 }
 0x7f1   : > { %16698 = vmatpush3.bf16.msra.mxu0 %v17793_v12 }
 0x7f3   : > { %16588 = vmatpush3.bf16.msra.mxu1 %v17758_v32  ;;  %v14541_v32 = vld [vmem:[%s20953_s26] ss:$0 sm:$0xff]  ;;  %s20962_s26 = sld [smem:[#allocation29_spill]] }
 0x7f4   : > { %16597 = vmatprep.subr.bf16.mxu1 %v17759_v13 }
 0x7f6   : > { %16590 = vmatmul.mubr.bf16.vlgmr.msra.gmra.mrb[24].mxu1 %v7402_v42  ;;  %v17765_v42 = vld [vmem:[%s20946_s11 + $0x170] sm:$0xff]  }
 0x7f7   : > { %16593 = vmatprep.mubr.bf16.mxu1 %v7403_v21  ;;  %16598 = vmatpush3.bf16.msra.mxu1 %v17759_v13  ;;  %v17770_v21 = vld [vmem:[%s20946_s11 + $0x198] sm:$0xff]   ;;  %v14542_v13 = vld [vmem:[%s20954_s0] ss:$0 sm:$0xff]  ;;  %s20963_s0 = sld [smem:[#allocation27_spill]] }
 0x7f8   : > { %16599 = vmatprep.subr.bf16.mxu1 %v17760_v31 }
 0x7fb   : > { %16600 = vmatpush3.bf16.msra.mxu1 %v17760_v31 }
 0x7fc   : > { %16601 = vmatprep.subr.bf16.mxu1 %v17761_v39 }
 0x7fe   : > { %16594 = vmatmul.mubr.bf16.gmra.mrb[28].mxu1 %v7404_v43  ;;  %v19816_v43 = vld [vmem:[#allocation6 + $0x82] sm:$0xff] }
 0x7ff   : > { %16602 = vmatpush3.bf16.msra.mxu1 %v17761_v39  ;;  %16613 = vmatprep.mubr.bf16.mxu1 %v7551_v57  ;;  %v7554_v49 = vpack.c.bf16 %v19816_v43, %v19755_v19  ;;  %v17773_v57 = vld [vmem:[%s20946_s11 + $0x1b0] sm:$0xff]  }
 0x800   : > { %16603 = vmatprep.subr.bf16.mxu1 %v17762_v46 }
 0x803   : > { %16604 = vmatpush3.bf16.msra.mxu1 %v17762_v46 }
 0x804   : > { %16605 = vmatprep.subr.bf16.mxu1 %v17763_v2 }
 0x807   : > { %16606 = vmatpush3.bf16.msra.mxu1 %v17763_v2 }
 0x808   : > { %16607 = vmatprep.subr.bf16.mxu1 %v17764_v56 }
 0x80b   : > { %16608 = vmatpush3.bf16.msra.mxu1 %v17764_v56 }
 0x80c   : > { %16609 = vmatprep.subr.bf16.mxu1 %v17765_v42 }
 0x80f   : > { %16610 = vmatpush3.bf16.msra.mxu1 %v17765_v42 }
 0x810   : > { %16611 = vmatprep.subr.bf16.mxu1 %v17766_v48 }
 0x813   : > { %16612 = vmatpush3.bf16.msra.mxu1 %v17766_v48 }
 0x814   : > { %16621 = vmatprep.subr.bf16.mxu1 %v17767_v3 }
 0x816   : > { %16614 = vmatmul.mubr.bf16.vlgmr.msra.gmra.mrb[24].mxu1 %v7552_v52  ;;  %v17774_v52 = vld [vmem:[%s20946_s11 + $0x1b8] sm:$0xff]  }
 0x817   : > { %16617 = vmatprep.mubr.bf16.mxu1 %v7553_v15  ;;  %16622 = vmatpush3.bf16.msra.mxu1 %v17767_v3  ;;  %v17777_v15 = vld [vmem:[%s20946_s11 + $0x1d0] sm:$0xff]  }
 0x818   : > { %16623 = vmatprep.subr.bf16.mxu1 %v17768_v20 }
 0x81b   : > { %16624 = vmatpush3.bf16.msra.mxu1 %v17768_v20 }
 0x81c   : > { %16625 = vmatprep.subr.bf16.mxu1 %v17769_v23 }
 0x81e   : > { %16618 = vmatmul.mubr.bf16.gmra.mrb[28].mxu1 %v7554_v49 }
 0x81f   : > { %16626 = vmatpush3.bf16.msra.mxu1 %v17769_v23  ;;  %16637 = vmatprep.mubr.bf16.mxu1 %v19715_v63  ;;  %v18104_v63 = vld [vmem:[#allocation6] sm:$0xff] }
 0x820   : > { %16627 = vmatprep.subr.bf16.mxu1 %v17770_v21  ;;  %v7705_v19 = vpack.c.bf16 %v18104_v63, %v19775_v10  ;;  %v17789_v10 = vld [vmem:[%s20946_s11 + $0x230] sm:$0xff]  }
 0x823   : > { %16628 = vmatpush3.bf16.msra.mxu1 %v17770_v21 }
 0x824   : > { %16629 = vmatprep.subr.bf16.mxu1 %v17771_v5 }
 0x827   : > { %16630 = vmatpush3.bf16.msra.mxu1 %v17771_v5 }
 0x828   : > { %16631 = vmatprep.subr.bf16.mxu1 %v17772_v54 }
 0x82b   : > { %16632 = vmatpush3.bf16.msra.mxu1 %v17772_v54 }
 0x82c   : > { %16633 = vmatprep.subr.bf16.mxu1 %v17773_v57 }
 0x82f   : > { %16634 = vmatpush3.bf16.msra.mxu1 %v17773_v57 }
 0x830   : > { %16635 = vmatprep.subr.bf16.mxu1 %v17774_v52 }
 0x833   : > { %16636 = vmatpush3.bf16.msra.mxu1 %v17774_v52 }
 0x834   : > { %16645 = vmatprep.subr.bf16.mxu1 %v17775_v53 }
 0x836   : > { %16638 = vmatmul.mubr.bf16.vlgmr.msra.gmra.mrb[24].mxu1 %v19722_v33  ;;  %v17779_v33 = vld [vmem:[%s20946_s11 + $0x1e0] sm:$0xff]  }
 0x837   : > { %16641 = vmatprep.mubr.bf16.mxu1 %v19733_v47  ;;  %16646 = vmatpush3.bf16.msra.mxu1 %v17775_v53  ;;  %v17780_v47 = vld [vmem:[%s20946_s11 + $0x1e8] sm:$0xff]  }
 0x838   : > { %16647 = vmatprep.subr.bf16.mxu1 %v17776_v11 }
 0x83b   : > { %16648 = vmatpush3.bf16.msra.mxu1 %v17776_v11 }
 0x83c   : > { %16649 = vmatprep.subr.bf16.mxu1 %v17777_v15 }
 0x83e   : > { %16642 = vmatmul.mubr.bf16.gmra.mrb[28].mxu1 %v7705_v19 }
 0x83f   : > { %16650 = vmatpush3.bf16.msra.mxu1 %v17777_v15  ;;  %16661 = vmatprep.mubr.bf16.mxu1 %v19649_v55  ;;  %v17784_v55 = vld [vmem:[%s20946_s11 + $0x208] sm:$0xff]  }
 0x840   : > { %16651 = vmatprep.subr.bf16.mxu1 %v17778_v35 }
 0x843   : > { %16652 = vmatpush3.bf16.msra.mxu1 %v17778_v35 }
 0x844   : > { %16653 = vmatprep.subr.bf16.mxu1 %v17779_v33 }
 0x847   : > { %16654 = vmatpush3.bf16.msra.mxu1 %v17779_v33 }
 0x848   : > { %16655 = vmatprep.subr.bf16.mxu1 %v17780_v47 }
 0x84b   : > { %16656 = vmatpush3.bf16.msra.mxu1 %v17780_v47 }
 0x84c   : > { %16657 = vmatprep.subr.bf16.mxu1 %v17781_v34 }
 0x84f   : > { %16658 = vmatpush3.bf16.msra.mxu1 %v17781_v34 }
 0x850   : > { %16659 = vmatprep.subr.bf16.mxu1 %v17782_v29 }
 0x853   : > { %16660 = vmatpush3.bf16.msra.mxu1 %v17782_v29 }
 0x854   : > { %16669 = vmatprep.subr.bf16.mxu1 %v17783_v45 }
 0x856   : > { %16662 = vmatmul.mubr.bf16.vlgmr.msra.gmra.mrb[24].mxu1 %v19668_v27  ;;  %v17787_v27 = vld [vmem:[%s20946_s11 + $0x220] sm:$0xff]  }
 0x857   : > { %16665 = vmatprep.mubr.bf16.mxu1 %v19683_v51  ;;  %16670 = vmatpush3.bf16.msra.mxu1 %v17783_v45  ;;  %v17788_v51 = vld [vmem:[%s20946_s11 + $0x228] sm:$0xff]  }
 0x858   : > { %16671 = vmatprep.subr.bf16.mxu1 %v17784_v55 }
 0x85b   : > { %16672 = vmatpush3.bf16.msra.mxu1 %v17784_v55  ;;  %v8211_v55 = vld [vmem:[#allocation7 + $0x1] sm:$0xff] }
 0x85c   : > { %16673 = vmatprep.subr.bf16.mxu1 %v17785_v41 }
 0x85e   : > { %16666 = vmatmul.mubr.bf16.gmra.mrb[28].mxu1 %v7855_v50 }
 0x85f   : > { %16674 = vmatpush3.bf16.msra.mxu1 %v17785_v41  ;;  %16685 = vmatprep.mubr.bf16.mxu1 %v19745_v6  ;;  %v8001_v6 = vld [vmem:[#allocation6 + $0x92] sm:$0xff] }
 0x860   : > { %16675 = vmatprep.subr.bf16.mxu1 %v17786_v9  ;;  %v8005_v36 = vpack.c.bf16 %v8001_v6, %v19816_v43 }
 0x863   : > { %16676 = vmatpush3.bf16.msra.mxu1 %v17786_v9 }
 0x864   : > { %16677 = vmatprep.subr.bf16.mxu1 %v17787_v27 }
 0x867   : > { %16678 = vmatpush3.bf16.msra.mxu1 %v17787_v27 }
 0x868   : > { %16679 = vmatprep.subr.bf16.mxu1 %v17788_v51 }
 0x86b   : > { %16680 = vmatpush3.bf16.msra.mxu1 %v17788_v51 }
 0x86c   : > { %16681 = vmatprep.subr.bf16.mxu1 %v17789_v10 }
 0x86f   : > { %16682 = vmatpush3.bf16.msra.mxu1 %v17789_v10 }
 0x870   : > { %16683 = vmatprep.subr.bf16.mxu1 %v17790_v25 }
 0x873   : > { %16684 = vmatpush3.bf16.msra.mxu1 %v17790_v25 }
 0x876   : > { %16686 = vmatmul.mubr.bf16.vlgmr.msra.gmra.mrb[24].mxu1 %v19750_v40  ;;  %v17794_v40 = vld [vmem:[%s20951_s23 + $0x38] sm:$0xff]  }
 0x877   : > { %16689 = vmatprep.mubr.bf16.mxu1 %v19759_v0  ;;  %16699 = vmatprep.subr.bf16.mxu0 %v17794_v40  ;;  %v17795_v0 = vld [vmem:[%s20951_s23] sm:$0xff]  }
 0x878   : > { %16700 = vmatpush3.bf16.msra.mxu0 %v17794_v40 }
 0x879   : > { %16709 = vmatprep.subr.bf16.mxu0 %v17795_v0 }
 0x87e   : > { %16690 = vmatmul.mubr.bf16.gmra.mrb[28].mxu1 %v8005_v36  ;;  %v17796_v36 = vld [vmem:[%s20951_s23 + $0x8] sm:$0xff]  }
 0x87f   : > { %9489 = vmatprep.mubr.bf16.mxu1 %v20952_v38 }
 0x949   : > { %v16687_v31 = vpop.f32.mrb[24].mxu1 }
 0x94a   : > { %v8152_v39 = vmul.f32 %v16687_v31, %v14541_v32  ;;  %v8105_v46 = vpop.f32.mrb[25].mxu1 }
 0x94b   : > { %v8150_v2 = vmul.f32 %v14541_v32, %v8105_v46  ;;  %v16688_v56 = vpop.f32.mrb[26].mxu1  ;;  %v17798_v46 = vld [vmem:[%s20951_s23 + $0x18] sm:$0xff]  }
 0x94c   : > { %v8166_v42 = vadd.f32 %v14542_v13, %v8152_v39  ;;  %v8153_v48 = vmul.f32 %v16688_v56, %v14541_v32  ;;  %v8108_v3 = vpop.f32.mrb[27].mxu1  ;;  %v17827_v56 = vld [vmem:[%s20955_s2] ss:$8 sps:$4 sm:$0xff]  }
 0x94d   : > { %v8164_v20 = vadd.f32 %v14542_v13, %v8150_v2  ;;  %v8151_v23 = vmul.f32 %v14541_v32, %v8108_v3  ;;  %v17799_v3 = vld [vmem:[%s20951_s23 + $0x40] sm:$0xff]  }
 0x94e   : > { %v8174_v43 = vmax.f32 %v8166_v42, 0.0  ;;  %v8167_v49 = vadd.f32 %v14542_v13, %v8153_v48  ;;  %v17829_v42 = vld [vmem:[%s20955_s2 + $0x4] ss:$8 sps:$4 sm:$0xff]   ;;  %v17832_v48 = vld [vmem:[%s20955_s2 + $0x14] ss:$8 sps:$4 sm:$0xff]  }
 0x94f   : > { %v8172_v21 = vmax.f32 %v8164_v20, 0.0  ;;  %v8165_v5 = vadd.f32 %v14542_v13, %v8151_v23  ;;  %9457 = vmatprep.subr.bf16.mxu1 %v17829_v42  ;;  %v17830_v23 = vld [vmem:[%s20955_s2 + $0x10] ss:$8 sps:$4 sm:$0xff]   ;;  %v17808_v42 = vld [vmem:[%s20951_s23 + $0x88] sm:$0xff]  }
 0x950   : > { %8183 = vst.msk [vmem:[#allocation7 + $0x31] sm:$0xff] %vm1122_vm3, %v8174_v43  ;;  %v8175_v54 = vmax.f32 %v8167_v49, 0.0  ;;  %9458 = vmatpush1.bf16.msra.mxu1 %v17827_v56 }
 0x951   : > { %8181 = vst.msk [vmem:[#allocation7 + $0x11] sm:$0xff] %vm1122_vm3, %v8172_v21  ;;  %v8173_v57 = vmax.f32 %v8165_v5, 0.0  ;;  %v16691_v52 = vpop.f32.mrb[28].mxu1  ;;  %9459 = vmatprep.subr.bf16.mxu1 %v17832_v48 }
 0x952   : > { %8184 = vst.msk [vmem:[#allocation7 + $0x41] sm:$0xff] %vm1122_vm3, %v8175_v54  ;;  %v8156_v53 = vmul.f32 %v16691_v52, %v14541_v32  ;;  %v8121_v11 = vpop.f32.mrb[29].mxu1  ;;  %v17800_v54 = vld [vmem:[%s20951_s23 + $0x48] sm:$0xff]   ;;  %v17801_v52 = vld [vmem:[%s20951_s23 + $0x50] sm:$0xff]  }
 0x953   : > { %8182 = vst.msk [vmem:[#allocation7 + $0x21] sm:$0xff] %vm1122_vm3, %v8173_v57  ;;  %v8154_v15 = vmul.f32 %v14541_v32, %v8121_v11  ;;  %v16692_v63 = vpop.f32.mrb[30].mxu1  ;;  %v8434_v11 = vld [vmem:[#allocation7 + $0x2] sm:$0xff] }
 0x954   : > { %v8170_v19 = vadd.f32 %v14542_v13, %v8156_v53  ;;  %v8157_v35 = vmul.f32 %v16692_v63, %v14541_v32  ;;  %v8124_v33 = vpop.f32.mrb[31].mxu1  ;;  %9460 = vmatpush1.bf16.msra.mxu1 %v17830_v23  ;;  %v17810_v23 = vld [vmem:[%s20951_s23 + $0x98] sm:$0xff]  }
 0x955   : > { %v8168_v47 = vadd.f32 %v14542_v13, %v8154_v15  ;;  %v8155_v34 = vmul.f32 %v14541_v32, %v8124_v33  ;;  %v8191_v32 = vld [vmem:[#allocation7] sm:$0xff] }
 0x956   : > { %v8178_v29 = vmax.f32 %v8170_v19, 0.0  ;;  %v8171_v45 = vadd.f32 %v14542_v13, %v8157_v35  ;;  %v17802_v35 = vld [vmem:[%s20951_s23 + $0x58] sm:$0xff]  }
 0x957   : > { %v8176_v41 = vmax.f32 %v8168_v47, 0.0  ;;  %v8169_v18 = vadd.f32 %v14542_v13, %v8155_v34  ;;  %v19873_v25 = vld [vmem:[#allocation7 + $0x31] sm:$0xff] }
 0x958   : > { %8187 = vst.msk [vmem:[#allocation7 + $0x71] sm:$0xff] %vm1122_vm3, %v8178_v29  ;;  %v8179_v50 = vmax.f32 %v8171_v45, 0.0  ;;  %v19866_v9 = vld [vmem:[#allocation7 + $0x11] sm:$0xff] }
 0x959   : > { %8185 = vst.msk [vmem:[#allocation7 + $0x51] sm:$0xff] %vm1122_vm3, %v8176_v41  ;;  %v8177_v27 = vmax.f32 %v8169_v18, 0.0  ;;  %v8219_v51 = vpack.c.bf16 %v19866_v9, %v8211_v55  ;;  %v19885_v44 = vld [vmem:[#allocation7 + $0x41] sm:$0xff]  ;;  %v19893_v13 = vld [vmem:[#allocation7 + $0x10] sm:$0xff]  ;;  %v17804_v18 = vld [vmem:[%s20951_s23 + $0x68] sm:$0xff]  }
 0x95a   : > { %8188 = vst.msk [vmem:[#allocation7 + $0x81] sm:$0xff] %vm1122_vm3, %v8179_v50  ;;  %v19871_v10 = vld [vmem:[#allocation7 + $0x21] sm:$0xff]  ;;  %v8199_v2 = vpack.c.bf16 %v19893_v13, %v8191_v32  ;;  %v8194_v49 = vld [vmem:[#allocation7 + $0x30] sm:$0xff] }
 0x95b   : > { %8186 = vst.msk [vmem:[#allocation7 + $0x61] sm:$0xff] %vm1122_vm3, %v8177_v27  ;;  %16701 = vmatprep.mubr.msk.bf16.mxu0 %vm1122_vm3, %v8219_v51  ;;  %v19879_v6 = vpack.c.bf16 %v19873_v25, %v19871_v10  ;;  %v8193_v20 = vld [vmem:[#allocation7 + $0x20] sm:$0xff]  ;;  %v19928_v15 = vld [vmem:[#allocation7 + $0x12] sm:$0xff]  ;;  %v17806_v32 = vld [vmem:[%s20951_s23 + $0x78] sm:$0xff]  }
 0x95c   : > { %v19917_v21 = vpack.c.bf16 %v8194_v49, %v8193_v20  ;;  %v8195_v5 = vld [vmem:[#allocation7 + $0x40] sm:$0xff]  ;;  %v8442_v33 = vpack.c.bf16 %v19928_v15, %v8434_v11  ;;  %v17803_v47 = vld [vmem:[%s20951_s23 + $0x60] sm:$0xff]   ;;  %v17816_v11 = vld [vmem:[%s20951_s23 + $0xc8] sm:$0xff]  }
 0x95d   : > { %16702 = vmatmul.mubr.msk.bf16.vlgmr.msra.gmra.mrb[52].mxu0 %vm1122_vm3, %v19879_v6  ;;  %v19938_v34 = vld [vmem:[#allocation7 + $0x22] sm:$0xff]  ;;  %v19942_v45 = vld [vmem:[#allocation7 + $0x32] sm:$0xff]  ;;  %v8573_v56 = vpack.c.bf16 %v8195_v5, %v8194_v49 }
 0x95e   : > { %16710 = vmatpush3.bf16.msra.mxu0 %v17795_v0  ;;  %v19946_v55 = vpack.c.bf16 %v19942_v45, %v19938_v34  ;;  %v19948_v41 = vld [vmem:[#allocation7 + $0x42] sm:$0xff]  ;;  %v17811_v49 = vld [vmem:[%s20951_s23 + $0xa0] sm:$0xff]  }
 0x95f   : > { %16711 = vmatprep.subr.bf16.mxu0 %v17796_v36  ;;  %v19897_v0 = vld [vmem:[#allocation7 + $0x71] sm:$0xff]  ;;  %v17805_v27 = vld [vmem:[%s20951_s23 + $0x70] sm:$0xff]  }
 0x960   : > { %v19887_v12 = vld [vmem:[#allocation7 + $0x51] sm:$0xff] }
 0x961   : > { %v19891_v40 = vpack.c.bf16 %v19887_v12, %v19885_v44  ;;  %v19915_v43 = vld [vmem:[#allocation7 + $0x50] sm:$0xff] }
 0x962   : > { %16712 = vmatpush3.bf16.msra.mxu0 %v17796_v36  ;;  %v19895_v31 = vld [vmem:[#allocation7 + $0x61] sm:$0xff]  ;;  %v19921_v57 = vpack.c.bf16 %v19915_v43, %v8195_v5  ;;  %v8198_v63 = vld [vmem:[#allocation7 + $0x70] sm:$0xff]  ;;  %v8703_v5 = vpack.c.bf16 %v19885_v44, %v19873_v25 }
 0x963   : > { %16705 = vmatprep.mubr.msk.bf16.mxu0 %vm1122_vm3, %v19891_v40  ;;  %16713 = vmatprep.subr.bf16.mxu0 %v17797_v7  ;;  %v19903_v39 = vpack.c.bf16 %v19897_v0, %v19895_v31  ;;  %v8197_v53 = vld [vmem:[#allocation7 + $0x60] sm:$0xff]  ;;  %v19940_v29 = vld [vmem:[#allocation7 + $0x52] sm:$0xff]  ;;  %v17814_v44 = vld [vmem:[%s20951_s23 + $0xb8] sm:$0xff]  }
 0x964   : > { %v19930_v19 = vpack.c.bf16 %v8198_v63, %v8197_v53  ;;  %v19953_v50 = vpack.c.bf16 %v19940_v29, %v19948_v41  ;;  %v8440_v51 = vld [vmem:[#allocation7 + $0x62] sm:$0xff]  ;;  %v19960_v36 = vld [vmem:[#allocation7 + $0x72] sm:$0xff]  ;;  %v8574_v48 = vpack.c.bf16 %v8197_v53, %v19915_v43  ;;  %v8702_v43 = vpack.c.bf16 %v19871_v10, %v19866_v9 }
 0x965   : > { %16706 = vmatmul.mubr.msk.bf16.gmra.mrb[56].mxu0 %vm1122_vm3, %v19903_v39  ;;  %v17813_v9 = vld [vmem:[%s20951_s23 + $0xb0] sm:$0xff]   ;;  %v8833_v53 = vpack.c.bf16 %v19948_v41, %v19942_v45  ;;  %v8962_v45 = vld [vmem:[#allocation7 + $0x90] sm:$0xff]  ;;  %v17822_v41 = vld [vmem:[%s20951_s23 + $0xf8] sm:$0xff]  }
 0x966   : > { %16714 = vmatpush3.bf16.msra.mxu0 %v17797_v7  ;;  %16717 = vmatprep.mubr.msk.bf16.mxu0 %vm1122_vm3, %v8199_v2  ;;  %v19963_v7 = vpack.c.bf16 %v19960_v36, %v8440_v51  ;;  %v17807_v2 = vld [vmem:[%s20951_s23 + $0x80] sm:$0xff]   ;;  %v19993_v10 = vld [vmem:[#allocation7 + $0x81] sm:$0xff] }
 0x967   : > { %16715 = vmatprep.subr.bf16.mxu0 %v17798_v46  ;;  %v8705_v25 = vpack.c.bf16 %v19993_v10, %v19897_v0  ;;  %v8834_v0 = vpack.c.bf16 %v8440_v51, %v19940_v29  ;;  %v17821_v29 = vld [vmem:[%s20951_s23 + $0xf0] sm:$0xff]   ;;  %v17826_v51 = vld [vmem:[%s20951_s23 + $0x118] sm:$0xff]  }
 0x96a   : > { %16716 = vmatpush3.bf16.msra.mxu0 %v17798_v46  ;;  %v8572_v46 = vpack.c.bf16 %v8193_v20, %v19893_v13  ;;  %v17809_v13 = vld [vmem:[%s20951_s23 + $0x90] sm:$0xff]  }
 0x96b   : > { %16725 = vmatprep.subr.bf16.mxu0 %v17799_v3 }
 0x96d   : > { %16718 = vmatmul.mubr.msk.bf16.vlgmr.msra.gmra.mrb[52].mxu0 %vm1122_vm3, %v19917_v21 }
 0x96e   : > { %16726 = vmatpush3.bf16.msra.mxu0 %v17799_v3  ;;  %16721 = vmatprep.mubr.msk.bf16.mxu0 %vm1122_vm3, %v19921_v57  ;;  %v19976_v3 = vld [vmem:[#allocation7 + $0x80] sm:$0xff] }
 0x96f   : > { %16727 = vmatprep.subr.bf16.mxu0 %v17800_v54  ;;  %v8575_v20 = vpack.c.bf16 %v19976_v3, %v8198_v63  ;;  %v8831_v63 = vld [vmem:[#allocation7 + $0x82] sm:$0xff] }
 0x972   : > { %16728 = vmatpush3.bf16.msra.mxu0 %v17800_v54  ;;  %v17812_v54 = vld [vmem:[%s20951_s23 + $0xa8] sm:$0xff]  }
 0x973   : > { %16729 = vmatprep.subr.bf16.mxu0 %v17801_v52 }
 0x975   : > { %16722 = vmatmul.mubr.msk.bf16.gmra.mrb[56].mxu0 %vm1122_vm3, %v19930_v19 }
 0x976   : > { %16730 = vmatpush3.bf16.msra.mxu0 %v17801_v52  ;;  %16733 = vmatprep.mubr.msk.bf16.mxu0 %vm1122_vm3, %v8442_v33  ;;  %v8704_v52 = vpack.c.bf16 %v19895_v31, %v19887_v12  ;;  %v8832_v12 = vpack.c.bf16 %v19938_v34, %v19928_v15  ;;  %v17815_v31 = vld [vmem:[%s20951_s23 + $0xc0] sm:$0xff]   ;;  %v17817_v15 = vld [vmem:[%s20951_s23 + $0xd0] sm:$0xff]   ;;  %v17818_v33 = vld [vmem:[%s20951_s23 + $0xd8] sm:$0xff]  }
 0x977   : > { %16731 = vmatprep.subr.bf16.mxu0 %v17802_v35  ;;  %v17820_v34 = vld [vmem:[%s20951_s23 + $0xe8] sm:$0xff]  }
 0x97a   : > { %16732 = vmatpush3.bf16.msra.mxu0 %v17802_v35  ;;  %v8835_v35 = vpack.c.bf16 %v8831_v63, %v19960_v36  ;;  %v17835_v36 = vld [vmem:[%s20955_s2 + $0x24] ss:$8 sps:$4 sm:$0xff]  }
 0x97b   : > { %16741 = vmatprep.subr.bf16.mxu0 %v17803_v47  ;;  %9461 = vmatprep.subr.bf16.mxu1 %v17835_v36 }
 0x97d   : > { %16734 = vmatmul.mubr.msk.bf16.vlgmr.msra.gmra.mrb[52].mxu0 %vm1122_vm3, %v19946_v55 }
 0x97e   : > { %16742 = vmatpush3.bf16.msra.mxu0 %v17803_v47  ;;  %16737 = vmatprep.mubr.msk.bf16.mxu0 %vm1122_vm3, %v19953_v50  ;;  %v17819_v47 = vld [vmem:[%s20951_s23 + $0xe0] sm:$0xff]  }
 0x97f   : > { %16743 = vmatprep.subr.bf16.mxu0 %v17804_v18 }
 0x982   : > { %16744 = vmatpush3.bf16.msra.mxu0 %v17804_v18  ;;  %v17825_v18 = vld [vmem:[%s20951_s23 + $0x110] sm:$0xff]  }
 0x983   : > { %16745 = vmatprep.subr.bf16.mxu0 %v17805_v27 }
 0x985   : > { %16738 = vmatmul.mubr.msk.bf16.gmra.mrb[56].mxu0 %vm1122_vm3, %v19963_v7 }
 0x986   : > { %16746 = vmatpush3.bf16.msra.mxu0 %v17805_v27  ;;  %16749 = vmatprep.mubr.msk.bf16.mxu0 %vm1122_vm3, %v8572_v46  ;;  %v9092_v27 = vld [vmem:[#allocation7 + $0x91] sm:$0xff]  ;;  %v17836_v46 = vld [vmem:[%s20955_s2 + $0x30] ss:$8 sps:$4 sm:$0xff]  }
 0x987   : > { %16747 = vmatprep.subr.bf16.mxu0 %v17806_v32 }
 0x98a   : > { %16748 = vmatpush3.bf16.msra.mxu0 %v17806_v32  ;;  %v17833_v32 = vld [vmem:[%s20955_s2 + $0x20] ss:$8 sps:$4 sm:$0xff]  }
 0x98b   : > { %16757 = vmatprep.subr.bf16.mxu0 %v17807_v2  ;;  %9462 = vmatpush1.bf16.msra.mxu1 %v17833_v32  ;;  %v17848_v32 = vld [vmem:[%s20956_s7 + $0x1d0] sm:$0xff]  }
 0x98d   : > { %16750 = vmatmul.mubr.msk.bf16.vlgmr.msra.gmra.mrb[52].mxu0 %vm1122_vm3, %v8573_v56  ;;  %v17843_v56 = vld [vmem:[%s20956_s7 + $0xc8] sm:$0xff]  }
 0x98e   : > { %16758 = vmatpush3.bf16.msra.mxu0 %v17807_v2  ;;  %16753 = vmatprep.mubr.msk.bf16.mxu0 %vm1122_vm3, %v8574_v48  ;;  %v17840_v2 = vld [vmem:[%s20956_s7 + $0x1c0] sm:$0xff]   ;;  %v17847_v48 = vld [vmem:[%s20956_s7 + $0xd0] sm:$0xff]  }
 0x98f   : > { %16759 = vmatprep.subr.bf16.mxu0 %v17808_v42 }
 0x992   : > { %16760 = vmatpush3.bf16.msra.mxu0 %v17808_v42  ;;  %v17845_v42 = vld [vmem:[%s20956_s7 + $0x88] sm:$0xff]  }
 0x993   : > { %16761 = vmatprep.subr.bf16.mxu0 %v17809_v13 }
 0x995   : > { %16754 = vmatmul.mubr.msk.bf16.gmra.mrb[56].mxu0 %vm1122_vm3, %v8575_v20  ;;  %v14679_v20 = vld [vmem:[%s20957_s15] ss:$0 sm:$0xff]  ;;  %s20964_s15 = sld [smem:[#allocation28_spill]] }
 0x996   : > { %16762 = vmatpush3.bf16.msra.mxu0 %v17809_v13  ;;  %16765 = vmatprep.mubr.msk.bf16.mxu0 %vm1122_vm3, %v8702_v43  ;;  %v17849_v13 = vld [vmem:[%s20956_s7 + $0x90] sm:$0xff]  }
 0x997   : > { %16763 = vmatprep.subr.bf16.mxu0 %v17810_v23 }
 0x99a   : > { %16764 = vmatpush3.bf16.msra.mxu0 %v17810_v23  ;;  %v14680_v23 = vld [vmem:[%s20958_s16] ss:$0 sm:$0xff]  ;;  %s20965_s16 = sld [smem:[#allocation30_spill]] }
 0x99b   : > { %16773 = vmatprep.subr.bf16.mxu0 %v17811_v49 }
 0x99d   : > { %16766 = vmatmul.mubr.msk.bf16.vlgmr.msra.gmra.mrb[52].mxu0 %vm1122_vm3, %v8703_v5 }
 0x99e   : > { %16774 = vmatpush3.bf16.msra.mxu0 %v17811_v49  ;;  %16769 = vmatprep.mubr.msk.bf16.mxu0 %vm1122_vm3, %v8704_v52 }
 0x99f   : > { %16775 = vmatprep.subr.bf16.mxu0 %v17812_v54 }
 0x9a2   : > { %16776 = vmatpush3.bf16.msra.mxu0 %v17812_v54 }
 0x9a3   : > { %16777 = vmatprep.subr.bf16.mxu0 %v17813_v9 }
 0x9a5   : > { %16770 = vmatmul.mubr.msk.bf16.gmra.mrb[56].mxu0 %vm1122_vm3, %v8705_v25 }
 0x9a6   : > { %16778 = vmatpush3.bf16.msra.mxu0 %v17813_v9  ;;  %16781 = vmatprep.mubr.msk.bf16.mxu0 %vm1122_vm3, %v8832_v12 }
 0x9a7   : > { %16779 = vmatprep.subr.bf16.mxu0 %v17814_v44 }
 0x9aa   : > { %16780 = vmatpush3.bf16.msra.mxu0 %v17814_v44 }
 0x9ab   : > { %16789 = vmatprep.subr.bf16.mxu0 %v17815_v31 }
 0x9ad   : > { %16782 = vmatmul.mubr.msk.bf16.vlgmr.msra.gmra.mrb[52].mxu0 %vm1122_vm3, %v8833_v53 }
 0x9ae   : > { %16790 = vmatpush3.bf16.msra.mxu0 %v17815_v31  ;;  %16785 = vmatprep.mubr.msk.bf16.mxu0 %vm1122_vm3, %v8834_v0 }
 0x9af   : > { %16791 = vmatprep.subr.bf16.mxu0 %v17816_v11 }
 0x9b2   : > { %16792 = vmatpush3.bf16.msra.mxu0 %v17816_v11 }
 0x9b3   : > { %16793 = vmatprep.subr.bf16.mxu0 %v17817_v15 }
 0x9b5   : > { %16786 = vmatmul.mubr.msk.bf16.gmra.mrb[56].mxu0 %vm1122_vm3, %v8835_v35 }
 0x9b6   : > { %16794 = vmatpush3.bf16.msra.mxu0 %v17817_v15  ;;  %16797 = vmatprep.mubr.msk.bf16.mxu0 %vm1122_vm3, %v19917_v21  ;;  %v8966_v21 = vpack.c.bf16 %v8962_v45, %v19976_v3  ;;  %v17851_v3 = vld [vmem:[%s20956_s7 + $0xd8] sm:$0xff]  }
 0x9b7   : > { %16795 = vmatprep.subr.bf16.mxu0 %v17818_v33 }
 0x9ba   : > { %16796 = vmatpush3.bf16.msra.mxu0 %v17818_v33 }
 0x9bb   : > { %16805 = vmatprep.subr.bf16.mxu0 %v17819_v47 }
 0x9bd   : > { %16798 = vmatmul.mubr.msk.bf16.vlgmr.msra.gmra.mrb[52].mxu0 %vm1122_vm3, %v19921_v57  ;;  %v17823_v57 = vld [vmem:[%s20951_s23 + $0x100] sm:$0xff]  }
 0x9be   : > { %16806 = vmatpush3.bf16.msra.mxu0 %v17819_v47  ;;  %16801 = vmatprep.mubr.msk.bf16.mxu0 %vm1122_vm3, %v19930_v19  ;;  %v17824_v19 = vld [vmem:[%s20951_s23 + $0x108] sm:$0xff]  }
 0x9bf   : > { %16807 = vmatprep.subr.bf16.mxu0 %v17820_v34 }
 0x9c2   : > { %16808 = vmatpush3.bf16.msra.mxu0 %v17820_v34 }
 0x9c3   : > { %16809 = vmatprep.subr.bf16.mxu0 %v17821_v29 }
 0x9c5   : > { %16802 = vmatmul.mubr.msk.bf16.gmra.mrb[56].mxu0 %vm1122_vm3, %v8966_v21 }
 0x9c6   : > { %16810 = vmatpush3.bf16.msra.mxu0 %v17821_v29  ;;  %16813 = vmatprep.mubr.msk.bf16.mxu0 %vm1122_vm3, %v19879_v6  ;;  %v9096_v6 = vpack.c.bf16 %v9092_v27, %v19993_v10  ;;  %v17842_v29 = vld [vmem:[%s20956_s7 + $0x180] sm:$0xff]  }
 0x9c7   : > { %16811 = vmatprep.subr.bf16.mxu0 %v17822_v41 }
 0x9ca   : > { %16812 = vmatpush3.bf16.msra.mxu0 %v17822_v41 }
 0x9cb   : > { %16821 = vmatprep.subr.bf16.mxu0 %v17823_v57 }
 0x9cd   : > { %16814 = vmatmul.mubr.msk.bf16.vlgmr.msra.gmra.mrb[52].mxu0 %vm1122_vm3, %v19891_v40  ;;  %v9222_v40 = vld [vmem:[#allocation7 + $0x92] sm:$0xff] }
 0x9ce   : > { %16822 = vmatpush3.bf16.msra.mxu0 %v17823_v57  ;;  %16817 = vmatprep.mubr.msk.bf16.mxu0 %vm1122_vm3, %v19903_v39  ;;  %v9226_v39 = vpack.c.bf16 %v9222_v40, %v8831_v63  ;;  %v17844_v57 = vld [vmem:[%s20956_s7 + $0x1c8] sm:$0xff]  }
 0x9cf   : > { %16823 = vmatprep.subr.bf16.mxu0 %v17824_v19 }
 0x9d2   : > { %16824 = vmatpush3.bf16.msra.mxu0 %v17824_v19 }
 0x9d3   : > { %16825 = vmatprep.subr.bf16.mxu0 %v17825_v18 }
 0x9d5   : > { %16818 = vmatmul.mubr.msk.bf16.gmra.mrb[56].mxu0 %vm1122_vm3, %v9096_v6 }
 0x9d6   : > { %16826 = vmatpush3.bf16.msra.mxu0 %v17825_v18  ;;  %16829 = vmatprep.mubr.msk.bf16.mxu0 %vm1122_vm3, %v19946_v55  ;;  %v17838_v55 = vld [vmem:[%s20955_s2 + $0x34] ss:$8 sps:$4 sm:$0xff]  }
 0x9d7   : > { %16827 = vmatprep.subr.bf16.mxu0 %v17826_v51  ;;  %9463 = vmatprep.subr.bf16.mxu1 %v17838_v55 }
 0x9d8   : > { %9464 = vmatpush1.bf16.msra.mxu1 %v17836_v46 }
 0x9d9   : > { %15750 = vmatprep.subr.bf16.mxu1 %v17840_v2 }
 0x9da   : > { %16828 = vmatpush3.bf16.msra.mxu0 %v17826_v51 }
 0x9dd   : > { %16830 = vmatmul.mubr.msk.bf16.vlgmr.msra.gmra.mrb[52].mxu0 %vm1122_vm3, %v19953_v50  ;;  %v17839_v50 = vld [vmem:[%s20956_s7 + $0xc0] sm:$0xff]  }
 0x9de   : > { %16833 = vmatprep.mubr.msk.bf16.mxu0 %vm1122_vm3, %v19963_v7  ;;  %v17841_v7 = vld [vmem:[%s20956_s7 + $0x80] sm:$0xff]   ;;  %15630 = vmatprep.subr.bf16.mxu0 %v17839_v50 }
 0x9df   : > { %15631 = vmatpush3.bf16.msra.mxu0 %v17841_v7 }
 0x9e0   : > { %15632 = vmatprep.subr.bf16.mxu0 %v17843_v56  ;;  %v17850_v56 = vld [vmem:[%s20956_s7 + $0x190] sm:$0xff]  }
 0x9e3   : > { %15633 = vmatpush3.bf16.msra.mxu0 %v17845_v42 }
 0x9e4   : > { %15634 = vmatprep.subr.bf16.mxu0 %v17847_v48  ;;  %v17852_v48 = vld [vmem:[%s20956_s7 + $0x1d8] sm:$0xff]  }
 0x9e5   : > { %16834 = vmatmul.mubr.msk.bf16.gmra.mrb[56].mxu0 %vm1122_vm3, %v9226_v39  ;;  %v17846_v39 = vld [vmem:[%s20956_s7 + $0x188] sm:$0xff]  }
 0x9e7   : > { %15635 = vmatpush3.bf16.msra.mxu0 %v17849_v13  ;;  %v17854_v13 = vld [vmem:[%s20956_s7 + $0x198] sm:$0xff]  }
 0x9e8   : > { %15636 = vmatprep.subr.bf16.mxu0 %v17851_v3  ;;  %v17853_v3 = vld [vmem:[%s20956_s7 + $0x98] sm:$0xff]  }
 0x9eb   : > { %15637 = vmatpush3.bf16.msra.mxu0 %v17853_v3 }
 0xab0   : > { %v16831_v43 = vpop.f32.mrb[52].mxu0 }
 0xab1   : > { %v9353_v49 = vmul.f32 %v16831_v43, %v14679_v20  ;;  %v9306_v5 = vpop.f32.mrb[53].mxu0  ;;  %v17858_v43 = vld [vmem:[%s20956_s7 + $0x1a0] sm:$0xff]  }
 0xab2   : > { %v9351_v54 = vmul.f32 %v14679_v20, %v9306_v5  ;;  %v16832_v52 = vpop.f32.mrb[54].mxu0  ;;  %v17859_v5 = vld [vmem:[%s20956_s7 + $0xe8] sm:$0xff]  }
 0xab3   : > { %v9367_v9 = vadd.f32 %v14680_v23, %v9353_v49  ;;  %v9354_v10 = vmul.f32 %v16832_v52, %v14679_v20  ;;  %v9309_v25 = vpop.f32.mrb[55].mxu0  ;;  %v17857_v49 = vld [vmem:[%s20956_s7 + $0xa0] sm:$0xff]   ;;  %v17862_v52 = vld [vmem:[%s20956_s7 + $0x1a8] sm:$0xff]  }
 0xab4   : > { %v9365_v44 = vadd.f32 %v14680_v23, %v9351_v54  ;;  %v9352_v12 = vmul.f32 %v14679_v20, %v9309_v25  ;;  %v17860_v54 = vld [vmem:[%s20956_s7 + $0x1e8] sm:$0xff]   ;;  %v17863_v25 = vld [vmem:[%s20956_s7 + $0xf0] sm:$0xff]  }
 0xab5   : > { %v9368_v31 = vadd.f32 %v14680_v23, %v9354_v10  ;;  %v9375_v11 = vmax.f32 %v9367_v9, 0.0  ;;  %v17861_v9 = vld [vmem:[%s20956_s7 + $0xa8] sm:$0xff]   ;;  %v17864_v10 = vld [vmem:[%s20956_s7 + $0x1f0] sm:$0xff]  }
 0xab6   : > { %v9366_v53 = vadd.f32 %v14680_v23, %v9352_v12  ;;  %v9373_v15 = vmax.f32 %v9365_v44, 0.0  ;;  %v17866_v44 = vld [vmem:[%s20956_s7 + $0x1b0] sm:$0xff]  }
 0xab7   : > { %v9376_v0 = vmax.f32 %v9368_v31, 0.0  ;;  %v17865_v12 = vld [vmem:[%s20956_s7 + $0xb0] sm:$0xff]   ;;  %v17867_v31 = vld [vmem:[%s20956_s7 + $0xf8] sm:$0xff]  }
 0xab8   : > { %v9374_v63 = vmax.f32 %v9366_v53, 0.0  ;;  %v16835_v35 = vpop.f32.mrb[56].mxu0  ;;  %v17868_v53 = vld [vmem:[%s20956_s7 + $0x1f8] sm:$0xff]  }
 0xab9   : > { %v9382_v33 = vpack.c.bf16 %v9376_v0, %v9375_v11  ;;  %v9357_v47 = vmul.f32 %v16835_v35, %v14679_v20  ;;  %v9322_v34 = vpop.f32.mrb[57].mxu0  ;;  %v17870_v11 = vld [vmem:[%s20956_s7 + $0x1b8] sm:$0xff]   ;;  %v3015_v35 = vld [vmem:[%s20959_s18] sm:$0x3]  ;;  %s15237_s18 = sshll.u32 %s20967_s1, 7 }
 0xaba   : > { %v9381_v45 = vpack.c.bf16 %v9374_v63, %v9373_v15  ;;  %v9355_v21 = vmul.f32 %v14679_v20, %v9322_v34  ;;  %v16836_v41 = vpop.f32.mrb[58].mxu0  ;;  %v17869_v0 = vld [vmem:[%s20956_s7 + $0xb8] sm:$0xff]   ;;  %v17872_v15 = vld [vmem:[%s20956_s7 + $0x2c0] sm:$0xff]  }
 0xabb   : > { %v9371_v19 = vadd.f32 %v14680_v23, %v9357_v47  ;;  %v9358_v18 = vmul.f32 %v16836_v41, %v14679_v20  ;;  %v9325_v27 = vpop.f32.mrb[59].mxu0  ;;  %v17871_v63 = vld [vmem:[%s20956_s7 + $0x40] sm:$0xff]   ;;  %v20096_v47 = vrot.slane %v3015_v35, %v18863_v26 }
 0xabc   : > { %v9369_v6 = vadd.f32 %v14680_v23, %v9355_v21  ;;  %v9356_v51 = vmul.f32 %v14679_v20, %v9325_v27  ;;  %14689 = vmatmul.mubr.msk.bf16.vlgmr.msra.gmra.mrb[32].mxu1 %vm1122_vm3, %v9381_v45  ;;  %v17856_v20 = vld [vmem:[%s20956_s7 + $0x1e0] sm:$0xff]  }
 0xabd   : > { %v9372_v40 = vadd.f32 %v14680_v23, %v9358_v18  ;;  %9499 = vmatprep.mubr.bf16.mxu1 %v20952_v38  ;;  %15751 = vmatpush3.bf16.msra.mxu1 %v17842_v29  ;;  %v9379_v55 = vmax.f32 %v9371_v19, 0.0  ;;  %v9393_v34 = vld [vmem:[%s20960_s22] sm:$0x3]  ;;  %v3128_v21 = vadd.f32 %v19217_v59, %v20096_v47  ;;  %v3132_v19 = vadd.f32 %v19221_v62, %v20096_v47  ;;  %s20883_s22 = scalar_lea.vmem %s18342_s30, %s15237_s18 }
 0xabe   : > { %v9370_v36 = vadd.f32 %v14680_v23, %v9356_v51  ;;  %15752 = vmatprep.subr.bf16.mxu1 %v17844_v57  ;;  %v9377_v50 = vmax.f32 %v9369_v6, 0.0  ;;  %v17855_v23 = vld [vmem:[%s20956_s7 + $0xe0] sm:$0xff]   ;;  %v20102_v45 = vrot.slane %v9393_v34, %v18860_v24  ;;  %v20107_v41 = vrot.slane %v9393_v34, %v18863_v26 }
 0xabf   : > { %v9380_v46 = vmax.f32 %v9372_v40, 0.0  ;;  %15638 = vmatprep.subr.bf16.mxu0 %v17855_v23 }
 0xac0   : > { %v9378_v2 = vmax.f32 %v9370_v36, 0.0  ;;  %15639 = vmatpush3.bf16.msra.mxu0 %v17857_v49  ;;  %v17005_v36 = vadd.f32 %v20107_v41, %v3132_v19  ;;  %v9703_v49 = vld [vmem:[#allocation8 + $0x10] sm:$0x1] }
 0xac1   : > { %v9384_v7 = vpack.c.bf16 %v9380_v46, %v9379_v55  ;;  %15753 = vmatpush3.bf16.msra.mxu1 %v17846_v39  ;;  %15640 = vmatprep.subr.bf16.mxu0 %v17859_v5  ;;  %v3148_v5 = vadd.f32 %v19235_v17, %v20096_v47 }
 0xac2   : > { %v9383_v42 = vpack.c.bf16 %v9378_v2, %v9377_v50  ;;  %15754 = vmatprep.subr.bf16.mxu1 %v17848_v32  ;;  %v3142_v2 = vadd.f32 %v19230_v60, %v20096_v47 }
 0xac4   : > { %14690 = vmatmul.mubr.msk.bf16.gmra.mrb[36].mxu1 %vm1122_vm3, %v9382_v33  ;;  %15641 = vmatpush3.bf16.msra.mxu0 %v17861_v9  ;;  %v20093_v33 = vrot.slane %v3015_v35, %v18860_v24  ;;  %v17017_v23 = vadd.f32 %v20107_v41, %v3142_v2 }
 0xac5   : > { %9509 = vmatprep.mubr.bf16.mxu1 %v20952_v38  ;;  %15755 = vmatpush3.bf16.msra.mxu1 %v17850_v56 }
 0xac6   : > { %15756 = vmatprep.subr.bf16.mxu1 %v17852_v48  ;;  %15642 = vmatprep.subr.bf16.mxu0 %v17863_v25  ;;  %v3126_v29 = vadd.f32 %v19215_v58, %v20093_v33  ;;  %v3130_v57 = vadd.f32 %v19219_v61, %v20093_v33  ;;  %v16999_v58 = vadd.f32 %v20107_v41, %v3128_v21  ;;  %v9702_v48 = vld [vmem:[#allocation8 + $0x8] sm:$0xfe] }
 0xac7   : > { %v3136_v32 = vadd.f32 %v19223_v30, %v20093_v33  ;;  %v3138_v61 = vadd.f32 %v19225_v1, %v20096_v47  ;;  %v3140_v50 = vadd.f32 %v19228_v14, %v20093_v33  ;;  %v3146_v14 = vadd.f32 %v19233_v8, %v20093_v33 }
 0xac8   : > { %15643 = vmatpush3.bf16.msra.mxu0 %v17865_v12  ;;  %v16996_v18 = vadd.f32 %v20102_v45, %v3126_v29  ;;  %v17002_v40 = vadd.f32 %v20102_v45, %v3130_v57  ;;  %v9769_v9 = vrot.slane %v9702_v48, 1  ;;  %v3150_v8 = vadd.f32 %v19238_v22, %v20093_v33 }
 0xac9   : > { %15757 = vmatpush3.bf16.msra.mxu1 %v17854_v13  ;;  %15644 = vmatprep.subr.bf16.mxu0 %v17867_v31  ;;  %v9704_v13 = vld [vmem:[#allocation8 + $0x18] sm:$0x1]  ;;  %v17008_v1 = vadd.f32 %v20102_v45, %v3136_v32  ;;  %v17011_v3 = vadd.f32 %v20107_v41, %v3138_v61  ;;  %v3152_v25 = vadd.f32 %v19241_v28, %v20096_v47 }
 0xaca   : > { %15758 = vmatprep.subr.bf16.mxu1 %v17856_v20  ;;  %v17014_v20 = vadd.f32 %v20102_v45, %v3140_v50  ;;  %v17020_v22 = vadd.f32 %v20102_v45, %v3146_v14  ;;  %v17023_v28 = vadd.f32 %v20107_v41, %v3148_v5  ;;  %v3158_v50 = vadd.f32 %v19251_v37, %v20096_v47 }
 0xacb   : > { %v17029_v32 = vadd.f32 %v20107_v41, %v3152_v25 }
 0xacc   : > { %14691 = vmatmul.mubr.msk.bf16.gmra.mrb[40].mxu1 %vm1122_vm3, %v9383_v42  ;;  %15645 = vmatpush3.bf16.msra.mxu0 %v17869_v0 }
 0xacd   : > { %9519 = vmatprep.mubr.bf16.mxu1 %v20952_v38  ;;  %15759 = vmatpush3.bf16.msra.mxu1 %v17858_v43  ;;  %v9701_v43 = vld [vmem:[#allocation8] sm:$0xfe] }
 0xace   : > { %15760 = vmatprep.subr.bf16.mxu1 %v17860_v54  ;;  %15670 = vmatprep.subr.bf16.mxu0 %v17871_v63  ;;  %v9766_v0 = vrot.slane %v9701_v43, 1 }
 0xad1   : > { %15761 = vmatpush3.bf16.msra.mxu1 %v17862_v52 }
 0xad2   : > { %15762 = vmatprep.subr.bf16.mxu1 %v17864_v10  ;;  %v9770_v10 = vrot.slane %v9704_v13, 1 }
 0xad4   : > { %14692 = vmatmul.mubr.msk.bf16.gmra.mrb[44].mxu1 %vm1122_vm3, %v9384_v7  ;;  %v9771_v19 = vsel %vm9765_vm7, %v9769_v9, %v9770_v10 }
 0xad5   : > { %15763 = vmatpush3.bf16.msra.mxu1 %v17866_v44 }
 0xad6   : > { %15764 = vmatprep.subr.bf16.mxu1 %v17868_v53 }
 0xad9   : > { %15765 = vmatpush3.bf16.msra.mxu1 %v17870_v11 }
 0xada   : > { %15830 = vmatprep.subr.bf16.mxu1 %v17872_v15  ;;  %v9767_v15 = vrot.slane %v9703_v49, 1 }
 0xadc   : > { %v9768_v61 = vsel %vm9765_vm7, %v9766_v0, %v9767_v15 }
 0xb8f   : > { %v9491_v27 = vpop.f32.mrb[32].mxu1 }
 0xb90   : > { %v16997_v6 = vadd.f32 %v16996_v18, %v9491_v27  ;;  %v9493_v51 = vpop.f32.mrb[33].mxu1 }
 0xb91   : > { %v17000_v39 = vadd.f32 %v16999_v58, %v9493_v51  ;;  %v9495_v59 = vpop.f32.mrb[34].mxu1 }
 0xb92   : > { %v9578_v62 = vrot.slane %v16997_v6, 7  ;;  %v17003_v55 = vadd.f32 %v17002_v40, %v9495_v59  ;;  %v9497_v46 = vpop.f32.mrb[35].mxu1  ;;  %v17874_v40 = vld [vmem:[%s20956_s7 + $0x280] sm:$0xff]  }
 0xb93   : > { %v9579_v7 = vrot.slane %v17000_v39, 7  ;;  %v17006_v56 = vadd.f32 %v17005_v36, %v9497_v46  ;;  %v17026_v39 = vadd.f32 %v20102_v45, %v3150_v8  ;;  %v3156_v46 = vadd.f32 %v19249_v16, %v20093_v33 }
 0xb94   : > { %9611 = vst [vmem:[#allocation8 + $0x20] sm:$0xfe] %v9578_v62  ;;  %9613 = vst [vmem:[#allocation8 + $0x30] sm:$0x1] %v9578_v62  ;;  %v9580_v42 = vrot.slane %v17003_v55, 7 }
 0xb95   : > { %9612 = vst [vmem:[#allocation8 + $0x28] sm:$0xfe] %v9579_v7  ;;  %9614 = vst [vmem:[#allocation8 + $0x38] sm:$0x1] %v9579_v7  ;;  %v9581_v30 = vrot.slane %v17006_v56, 7 }
 0xb96   : > { %9615 = vst [vmem:[#allocation8 + $0x40] sm:$0xfe] %v9580_v42  ;;  %9617 = vst [vmem:[#allocation8 + $0x50] sm:$0x1] %v9580_v42 }
 0xb97   : > { %9616 = vst [vmem:[#allocation8 + $0x48] sm:$0xfe] %v9581_v30  ;;  %9618 = vst [vmem:[#allocation8 + $0x58] sm:$0x1] %v9581_v30  ;;  %v9501_v60 = vpop.f32.mrb[36].mxu1 }
 0xb98   : > { %v17009_v54 = vadd.f32 %v17008_v1, %v9501_v60  ;;  %v9503_v52 = vpop.f32.mrb[37].mxu1  ;;  %v17873_v60 = vld [vmem:[%s20956_s7] sm:$0xff]  }
 0xb99   : > { %v17012_v44 = vadd.f32 %v17011_v3, %v9503_v52  ;;  %v9505_v12 = vpop.f32.mrb[38].mxu1  ;;  %v17876_v3 = vld [vmem:[%s20956_s7 + $0x2c8] sm:$0xff]  }
 0xb9a   : > { %v9582_v31 = vrot.slane %v17009_v54, 7  ;;  %v17015_v53 = vadd.f32 %v17014_v20, %v9505_v12  ;;  %v9507_v11 = vpop.f32.mrb[39].mxu1  ;;  %v17875_v54 = vld [vmem:[%s20956_s7 + $0x48] sm:$0xff]  }
 0xb9b   : > { %v9583_v63 = vrot.slane %v17012_v44, 7  ;;  %v17018_v17 = vadd.f32 %v17017_v23, %v9507_v11  ;;  %v9705_v35 = vld [vmem:[#allocation8 + $0x20] sm:$0xfe]  ;;  %v9707_v34 = vld [vmem:[#allocation8 + $0x30] sm:$0x1]  ;;  %v3160_v23 = vadd.f32 %v19254_v4, %v20093_v33  ;;  %v17878_v52 = vld [vmem:[%s20956_s7 + $0x288] sm:$0xff]  }
 0xb9c   : > { %9619 = vst [vmem:[#allocation8 + $0x60] sm:$0xfe] %v9582_v31  ;;  %9621 = vst [vmem:[#allocation8 + $0x70] sm:$0x1] %v9582_v31  ;;  %v9584_v29 = vrot.slane %v17015_v53, 7  ;;  %v9772_v51 = vrot.slane %v9705_v35, 1 }
 0xb9d   : > { %v9706_v21 = vld [vmem:[#allocation8 + $0x28] sm:$0xfe]  ;;  %v9708_v57 = vld [vmem:[#allocation8 + $0x38] sm:$0x1]  ;;  %9620 = vst [vmem:[#allocation8 + $0x68] sm:$0xfe] %v9583_v63 }
 0xb9e   : > { %9622 = vst [vmem:[#allocation8 + $0x78] sm:$0x1] %v9583_v63  ;;  %v9585_v18 = vrot.slane %v17018_v17, 7  ;;  %v9775_v27 = vrot.slane %v9706_v21, 1  ;;  %v9776_v58 = vrot.slane %v9708_v57, 1  ;;  %v20140_v6 = vld [vmem:[#allocation8 + $0x40] sm:$0xff] }
 0xb9f   : > { %9623 = vst [vmem:[#allocation8 + $0x80] sm:$0xfe] %v9584_v29  ;;  %9625 = vst [vmem:[#allocation8 + $0x90] sm:$0x1] %v9584_v29  ;;  %v20144_v59 = vld [vmem:[#allocation8 + $0x28] sm:$0xff]  ;;  %v9773_v62 = vrot.slane %v9707_v34, 1  ;;  %v17032_v34 = vadd.f32 %v20102_v45, %v3156_v46 }
 0xba0   : > { %v20146_v36 = vld [vmem:[#allocation8 + $0x48] sm:$0xff]  ;;  %9624 = vst [vmem:[#allocation8 + $0x88] sm:$0xfe] %v9585_v18  ;;  %9626 = vst [vmem:[#allocation8 + $0x98] sm:$0x1] %v9585_v18  ;;  %v9511_v2 = vpop.f32.mrb[40].mxu1  ;;  %v9777_v56 = vsel %vm9765_vm7, %v9775_v27, %v9776_v58  ;;  %v17035_v58 = vadd.f32 %v20107_v41, %v3158_v50 }
 0xba1   : > { %v20150_v55 = vld [vmem:[#allocation8 + $0x48] sm:$0xfe]  ;;  %v10549_v7 = vpack.c.bf16 %v20146_v36, %v20144_v59  ;;  %v20159_v42 = vld [vmem:[#allocation8 + $0x20] sm:$0xff]  ;;  %v9712_v30 = vld [vmem:[#allocation8 + $0x58] sm:$0x1]  ;;  %v17021_v16 = vadd.f32 %v17020_v22, %v9511_v2  ;;  %v9513_v13 = vpop.f32.mrb[41].mxu1  ;;  %v9831_v1 = vpack.c.bf16 %v9777_v56, %v9771_v19  ;;  %v9774_v14 = vsel %vm9765_vm7, %v9772_v51, %v9773_v62 }
 0xba2   : > { %v20161_v48 = vld [vmem:[#allocation8 + $0x40] sm:$0xfe]  ;;  %v10548_v37 = vpack.c.bf16 %v20140_v6, %v20159_v42  ;;  %v9711_v20 = vld [vmem:[#allocation8 + $0x50] sm:$0x1]  ;;  %v17024_v43 = vadd.f32 %v17023_v28, %v9513_v13  ;;  %v9515_v49 = vpop.f32.mrb[42].mxu1  ;;  %v9830_v5 = vpack.c.bf16 %v9774_v14, %v9768_v61  ;;  %v9781_v9 = vrot.slane %v20150_v55, 1 }
 0xba3   : > { %10717 = vmatprep.mubr.bf16.mxu1 %v10549_v7  ;;  %v9586_v10 = vrot.slane %v17021_v16, 7  ;;  %v17027_v8 = vadd.f32 %v17026_v39, %v9515_v49  ;;  %v9517_v25 = vpop.f32.mrb[43].mxu1  ;;  %9999 = vmatprep.mubr.bf16.mxu0 %v9831_v1  ;;  %v17877_v44 = vld [vmem:[%s20956_s7 + $0x8] sm:$0xff]   ;;  %v9782_v12 = vrot.slane %v9712_v30, 1  ;;  %v17880_v31 = vld [vmem:[%s20956_s7 + $0x2d0] sm:$0xff]   ;;  %v9778_v53 = vrot.slane %v20161_v48, 1 }
 0xba4   : > { %10718 = vmatmul.mubr.bf16.vlgmr.msra.gmra.mrb[48].mxu1 %v10548_v37  ;;  %v9587_v11 = vrot.slane %v17024_v43, 7  ;;  %v17030_v4 = vadd.f32 %v17029_v32, %v9517_v25  ;;  %10000 = vmatmul.mubr.bf16.vlgmr.msra.gmra.mrb[60].mxu0 %v9830_v5  ;;  %v9713_v33 = vld [vmem:[#allocation8 + $0x60] sm:$0xfe]  ;;  %v9715_v0 = vld [vmem:[#allocation8 + $0x70] sm:$0x1]  ;;  %v9779_v15 = vrot.slane %v9711_v20, 1  ;;  %v17038_v51 = vadd.f32 %v20102_v45, %v3160_v23 }
 0xba5   : > { %15831 = vmatpush3.bf16.msra.mxu1 %v17874_v40  ;;  %v20961_v63 = vld [vmem:[#allocation31_spill] sm:$0xff]  ;;  %9627 = vst [vmem:[#allocation8 + $0xa0] sm:$0xfe] %v9586_v10  ;;  %9629 = vst [vmem:[#allocation8 + $0xb0] sm:$0x1] %v9586_v10  ;;  %v9588_v35 = vrot.slane %v17027_v8, 7  ;;  %15671 = vmatpush3.bf16.msra.mxu0 %v17873_v60  ;;  %v9783_v32 = vsel %vm9765_vm7, %v9781_v9, %v9782_v12 }
 0xba6   : > { %v3162_v17 = vadd.f32 %v20961_v63, %v20096_v47  ;;  %15832 = vmatprep.subr.bf16.mxu1 %v17876_v3  ;;  %v9714_v29 = vld [vmem:[#allocation8 + $0x68] sm:$0xfe]  ;;  %v9716_v22 = vld [vmem:[#allocation8 + $0x78] sm:$0x1]  ;;  %v17879_v28 = vld [vmem:[%s20956_s7 + $0x50] sm:$0xff]   ;;  %v9589_v21 = vrot.slane %v17030_v4, 7  ;;  %15672 = vmatprep.subr.bf16.mxu0 %v17875_v54  ;;  %v9780_v2 = vsel %vm9765_vm7, %v9778_v53, %v9779_v15 }
 0xba7   : > { %9628 = vst [vmem:[#allocation8 + $0xa8] sm:$0xfe] %v9587_v11  ;;  %9630 = vst [vmem:[#allocation8 + $0xb8] sm:$0x1] %v9587_v11  ;;  %v9787_v57 = vrot.slane %v9714_v29, 1  ;;  %v9788_v19 = vrot.slane %v9716_v22, 1 }
 0xba8   : > { %v20180_v18 = vld [vmem:[#allocation8 + $0x60] sm:$0xff]  ;;  %v9784_v47 = vrot.slane %v9713_v33, 1  ;;  %9631 = vst [vmem:[#allocation8 + $0xc0] sm:$0xfe] %v9588_v35  ;;  %9633 = vst [vmem:[#allocation8 + $0xd0] sm:$0x1] %v9588_v35  ;;  %v17041_v23 = vadd.f32 %v20107_v41, %v3162_v17 }
 0xba9   : > { %v20182_v27 = vld [vmem:[#allocation8 + $0x80] sm:$0xff]  ;;  %v20186_v40 = vld [vmem:[#allocation8 + $0x68] sm:$0xff]  ;;  %v9785_v61 = vrot.slane %v9715_v0, 1  ;;  %9632 = vst [vmem:[#allocation8 + $0xc8] sm:$0xfe] %v9589_v21  ;;  %v9521_v55 = vpop.f32.mrb[44].mxu1  ;;  %15833 = vmatpush3.bf16.msra.mxu1 %v17878_v52  ;;  %v9789_v45 = vsel %vm9765_vm7, %v9787_v57, %v9788_v19  ;;  %15673 = vmatpush3.bf16.msra.mxu0 %v17877_v44 }
 0xbaa   : > { %v20188_v39 = vld [vmem:[#allocation8 + $0x88] sm:$0xff]  ;;  %9634 = vst [vmem:[#allocation8 + $0xd8] sm:$0x1] %v9589_v21  ;;  %v10550_v50 = vpack.c.bf16 %v20182_v27, %v20180_v18  ;;  %v17882_v7 = vld [vmem:[%s20956_s7 + $0x290] sm:$0xff]   ;;  %v20200_v56 = vld [vmem:[#allocation8 + $0x98] sm:$0x1]  ;;  %v17033_v48 = vadd.f32 %v17032_v34, %v9521_v55  ;;  %v9833_v13 = vpack.c.bf16 %v9789_v45, %v9783_v32  ;;  %15834 = vmatprep.subr.bf16.mxu1 %v17880_v31 }
 0xbab   : > { %v20191_v62 = vld [vmem:[#allocation8 + $0x88] sm:$0xfe]  ;;  %v10551_v46 = vpack.c.bf16 %v20188_v39, %v20186_v40  ;;  %v20202_v30 = vld [vmem:[#allocation8 + $0x80] sm:$0xfe]  ;;  %v9523_v16 = vpop.f32.mrb[45].mxu1  ;;  %v9786_v1 = vsel %vm9765_vm7, %v9784_v47, %v9785_v61  ;;  %15674 = vmatprep.subr.bf16.mxu0 %v17879_v28  ;;  %v9794_v25 = vrot.slane %v20200_v56, 1 }
 0xbac   : > { %v17881_v37 = vld [vmem:[%s20956_s7 + $0x10] sm:$0xff]   ;;  %v17884_v14 = vld [vmem:[%s20956_s7 + $0x2d8] sm:$0xff]   ;;  %v9719_v60 = vld [vmem:[#allocation8 + $0x90] sm:$0x1]  ;;  %v17036_v3 = vadd.f32 %v17035_v58, %v9523_v16  ;;  %v9525_v20 = vpop.f32.mrb[46].mxu1  ;;  %v9832_v43 = vpack.c.bf16 %v9786_v1, %v9780_v2  ;;  %v9793_v5 = vrot.slane %v20191_v62, 1  ;;  %10007 = vmatprep.mubr.bf16.mxu0 %v9833_v13 }
 0xbad   : > { %10725 = vmatprep.mubr.bf16.mxu1 %v10551_v46  ;;  %v17883_v49 = vld [vmem:[%s20956_s7 + $0x58] sm:$0xff]   ;;  %v9590_v54 = vrot.slane %v17033_v48, 7  ;;  %v17039_v52 = vadd.f32 %v17038_v51, %v9525_v20  ;;  %v9527_v9 = vpop.f32.mrb[47].mxu1  ;;  %v9790_v44 = vrot.slane %v20202_v30, 1  ;;  %15835 = vmatpush3.bf16.msra.mxu1 %v17882_v7  ;;  %v17887_v31 = vld [vmem:[%s20956_s7 + $0x60] sm:$0xff]   ;;  %v9791_v4 = vrot.slane %v9719_v60, 1 }
 0xbae   : > { %10726 = vmatmul.mubr.bf16.gmra.mrb[52].mxu1 %v10550_v50  ;;  %v17885_v10 = vld [vmem:[%s20956_s7 + $0x18] sm:$0xff]   ;;  %v9591_v12 = vrot.slane %v17036_v3, 7  ;;  %v17042_v41 = vadd.f32 %v17041_v23, %v9527_v9  ;;  %10008 = vmatmul.mubr.bf16.gmra.mrb[64].mxu0 %v9832_v43  ;;  %v9721_v53 = vld [vmem:[#allocation8 + $0xa0] sm:$0xfe]  ;;  %v9723_v11 = vld [vmem:[#allocation8 + $0xb0] sm:$0x1]  ;;  %v9795_v62 = vsel %vm9765_vm7, %v9793_v5, %v9794_v25 }
 0xbaf   : > { %v17886_v8 = vld [vmem:[%s20956_s7 + $0x298] sm:$0xff]   ;;  %9635 = vst [vmem:[#allocation8 + $0xe0] sm:$0xfe] %v9590_v54  ;;  %9637 = vst [vmem:[#allocation8 + $0xf0] sm:$0x1] %v9590_v54  ;;  %v9592_v33 = vrot.slane %v17039_v52, 7  ;;  %15675 = vmatpush3.bf16.msra.mxu0 %v17881_v37  ;;  %15836 = vmatprep.subr.bf16.mxu1 %v17884_v14  ;;  %v9792_v45 = vsel %vm9765_vm7, %v9790_v44, %v9791_v4 }
 0xbb0   : > { %v9722_v0 = vld [vmem:[#allocation8 + $0xa8] sm:$0xfe]  ;;  %v9724_v15 = vld [vmem:[#allocation8 + $0xb8] sm:$0x1]  ;;  %v17888_v63 = vld [vmem:[%s20956_s7 + $0x2e0] sm:$0xff]   ;;  %v9593_v35 = vrot.slane %v17042_v41, 7  ;;  %15676 = vmatprep.subr.bf16.mxu0 %v17883_v49 }
 0xbb1   : > { %v20216_v17 = vld [vmem:[#allocation8 + $0x28] sm:$0xfc]  ;;  %9636 = vst [vmem:[#allocation8 + $0xe8] sm:$0xfe] %v9591_v12  ;;  %9638 = vst [vmem:[#allocation8 + $0xf8] sm:$0x1] %v9591_v12  ;;  %15837 = vmatpush3.bf16.msra.mxu1 %v17886_v8 }
 0xbb2   : > { %v9799_v34 = vrot.slane %v9722_v0, 1  ;;  %v9800_v29 = vrot.slane %v9724_v15, 1  ;;  %v20218_v22 = vld [vmem:[#allocation8 + $0xc0] sm:$0xff]  ;;  %v9796_v28 = vrot.slane %v9721_v53, 1  ;;  %v17890_v21 = vld [vmem:[%s20956_s7 + $0x2a0] sm:$0xff]   ;;  %v20223_v19 = vld [vmem:[#allocation8 + $0xa8] sm:$0xff]  ;;  %15838 = vmatprep.subr.bf16.mxu1 %v17888_v63 }
 0xbb3   : > { %v20221_v57 = vld [vmem:[#allocation8 + $0x38] sm:$0x3]  ;;  %9639 = vst [vmem:[#allocation8 + $0x100] sm:$0xfe] %v9592_v33  ;;  %9641 = vst [vmem:[#allocation8 + $0x110] sm:$0x1] %v9592_v33  ;;  %15677 = vmatpush3.bf16.msra.mxu0 %v17885_v10 }
 0xbb4   : > { %v20225_v47 = vld [vmem:[#allocation8 + $0xc8] sm:$0xff]  ;;  %v9797_v58 = vrot.slane %v9723_v11, 1  ;;  %v17889_v51 = vld [vmem:[%s20956_s7 + $0x20] sm:$0xff]   ;;  %9640 = vst [vmem:[#allocation8 + $0x108] sm:$0xfe] %v9593_v35  ;;  %v9801_v55 = vsel %vm9765_vm7, %v9799_v34, %v9800_v29  ;;  %v20232_v46 = vld [vmem:[#allocation8 + $0xa0] sm:$0xff]  ;;  %15678 = vmatprep.subr.bf16.mxu0 %v17887_v31 }
 0xbb5   : > { %v11101_v32 = vld [vmem:[#allocation8 + $0x48] sm:$0xfc]  ;;  %9642 = vst [vmem:[#allocation8 + $0x118] sm:$0x1] %v9593_v35  ;;  %v10553_v61 = vpack.c.bf16 %v20225_v47, %v20223_v19  ;;  %v11103_v2 = vld [vmem:[#allocation8 + $0x58] sm:$0x3]  ;;  %v9835_v7 = vpack.c.bf16 %v9801_v55, %v9795_v62  ;;  %v10552_v56 = vpack.c.bf16 %v20218_v22, %v20232_v46  ;;  %15839 = vmatpush3.bf16.msra.mxu1 %v17890_v21 }
 0xbb6   : > { %v9726_v50 = vld [vmem:[#allocation8 + $0xc8] sm:$0xfe]  ;;  %v9798_v30 = vsel %vm9765_vm7, %v9796_v28, %v9797_v58  ;;  %v17892_v48 = vld [vmem:[%s20956_s7 + $0x2e8] sm:$0xff]   ;;  %v9725_v13 = vld [vmem:[#allocation8 + $0xc0] sm:$0xfe]  ;;  %v11163_v60 = vrot.slane %v20216_v17, 2 }
 0xbb7   : > { %v9728_v16 = vld [vmem:[#allocation8 + $0xd8] sm:$0x1]  ;;  %10733 = vmatprep.mubr.bf16.mxu1 %v10553_v61  ;;  %v9834_v1 = vpack.c.bf16 %v9798_v30, %v9792_v45  ;;  %v9727_v14 = vld [vmem:[#allocation8 + $0xd0] sm:$0x1]  ;;  %10015 = vmatprep.mubr.bf16.mxu0 %v9835_v7  ;;  %v9805_v23 = vrot.slane %v9726_v50, 1  ;;  %v17896_v43 = vld [vmem:[%s20956_s7 + $0x2f0] sm:$0xff]  }
 0xbb8   : > { %v17891_v37 = vld [vmem:[%s20956_s7 + $0x68] sm:$0xff]   ;;  %10734 = vmatmul.mubr.bf16.gmra.mrb[56].mxu1 %v10552_v56  ;;  %v11164_v49 = vrot.slane %v20221_v57, 2  ;;  %v11169_v5 = vrot.slane %v11101_v32, 2  ;;  %v11170_v54 = vrot.slane %v11103_v2, 2  ;;  %v9806_v52 = vrot.slane %v9728_v16, 1  ;;  %v17895_v9 = vld [vmem:[%s20956_s7 + $0x70] sm:$0xff]   ;;  %15679 = vmatpush3.bf16.msra.mxu0 %v17889_v51 }
 0xbb9   : > { %v17893_v3 = vld [vmem:[%s20956_s7 + $0x28] sm:$0xff]   ;;  %10016 = vmatmul.mubr.bf16.gmra.mrb[68].mxu0 %v9834_v1  ;;  %v9729_v10 = vld [vmem:[#allocation8 + $0xe0] sm:$0xfe]  ;;  %v9731_v8 = vld [vmem:[#allocation8 + $0xf0] sm:$0x1]  ;;  %v9802_v25 = vrot.slane %v9725_v13, 1  ;;  %15840 = vmatprep.subr.bf16.mxu1 %v17892_v48 }
 0xbba   : > { %v17894_v20 = vld [vmem:[%s20956_s7 + $0x2a8] sm:$0xff]   ;;  %v9730_v44 = vld [vmem:[#allocation8 + $0xe8] sm:$0xfe]  ;;  %v9803_v41 = vrot.slane %v9727_v14, 1  ;;  %v9808_v31 = vrot.slane %v9729_v10, 1  ;;  %15680 = vmatprep.subr.bf16.mxu0 %v17891_v37  ;;  %v10546_v4 = vld [vmem:[#allocation8 + $0x100] sm:$0xff]  ;;  %v11171_v34 = vsel %vm10257_vm8, %v11169_v5, %v11170_v54  ;;  %v9807_v21 = vsel %vm9765_vm7, %v9805_v23, %v9806_v52 }
 0xbbb   : > { %v9732_v12 = vld [vmem:[#allocation8 + $0xf8] sm:$0x1]  ;;  %v9811_v53 = vrot.slane %v9730_v44, 1  ;;  %v9809_v33 = vrot.slane %v9731_v8, 1  ;;  %v17898_v0 = vld [vmem:[%s20956_s7 + $0x2b0] sm:$0xff]   ;;  %v20247_v63 = vld [vmem:[#allocation8 + $0xe8] sm:$0xff]  ;;  %15841 = vmatpush3.bf16.msra.mxu1 %v17894_v20  ;;  %v11165_v30 = vsel %vm10257_vm8, %v11163_v60, %v11164_v49 }
 0xbbc   : > { %v9812_v11 = vrot.slane %v9732_v12, 1  ;;  %v11100_v15 = vld [vmem:[#allocation8 + $0x40] sm:$0xfc]  ;;  %v10547_v17 = vld [vmem:[#allocation8 + $0x108] sm:$0xff]  ;;  %v11102_v29 = vld [vmem:[#allocation8 + $0x50] sm:$0x3]  ;;  %15681 = vmatpush3.bf16.msra.mxu0 %v17893_v3  ;;  %15842 = vmatprep.subr.bf16.mxu1 %v17896_v43  ;;  %v9804_v45 = vsel %vm9765_vm7, %v9802_v25, %v9803_v41  ;;  %v11225_v37 = vpack.c.bf16 %v11171_v34, %v11165_v30 }
 0xbbd   : > { %v17897_v35 = vld [vmem:[%s20956_s7 + $0x30] sm:$0xff]   ;;  %v10555_v28 = vpack.c.bf16 %v10547_v17, %v20247_v63  ;;  %v9810_v51 = vsel %vm9765_vm7, %v9808_v31, %v9809_v33  ;;  %v11109_v32 = vld [vmem:[#allocation8 + $0x88] sm:$0xfc]  ;;  %v11111_v61 = vld [vmem:[#allocation8 + $0x98] sm:$0x3]  ;;  %15682 = vmatprep.subr.bf16.mxu0 %v17895_v9  ;;  %v11166_v48 = vrot.slane %v11100_v15, 2 }
 0xbbe   : > { %v9813_v57 = vsel %vm9765_vm7, %v9811_v53, %v9812_v11  ;;  %v20254_v58 = vld [vmem:[#allocation8 + $0xe0] sm:$0xff]  ;;  %v17899_v50 = vld [vmem:[%s20956_s7 + $0x78] sm:$0xff]   ;;  %v11098_v7 = vld [vmem:[#allocation8 + $0x30] sm:$0x3]  ;;  %v9836_v56 = vpack.c.bf16 %v9810_v51, %v9804_v45  ;;  %v11167_v16 = vrot.slane %v11102_v29, 2  ;;  %v11181_v3 = vrot.slane %v11109_v32, 2 }
 0xbbf   : > { %v9837_v62 = vpack.c.bf16 %v9813_v57, %v9807_v21  ;;  %v10554_v55 = vpack.c.bf16 %v10546_v4, %v20254_v58  ;;  %v11096_v2 = vld [vmem:[#allocation8 + $0x20] sm:$0xfc]  ;;  %10741 = vmatprep.mubr.bf16.mxu1 %v10555_v28  ;;  %v11105_v13 = vld [vmem:[#allocation8 + $0x68] sm:$0xfc]  ;;  %v11107_v1 = vld [vmem:[#allocation8 + $0x78] sm:$0x3]  ;;  %15843 = vmatpush3.bf16.msra.mxu1 %v17898_v0 }
 0xbc0   : > { %v17900_v14 = vld [vmem:[%s20956_s7 + $0x2f8] sm:$0xff]   ;;  %v11182_v20 = vrot.slane %v11111_v61, 2  ;;  %v18105_v23 = vld [vmem:[#allocation6] sm:$0xff]  ;;  %v11160_v49 = vrot.slane %v11096_v2, 2  ;;  %v11161_v5 = vrot.slane %v11098_v7, 2  ;;  %15683 = vmatpush3.bf16.msra.mxu0 %v17897_v35  ;;  %v17904_v52 = vld [vmem:[%s20956_s7 + $0x3c0] sm:$0xff]   ;;  %v11168_v25 = vsel %vm10257_vm8, %v11166_v48, %v11167_v16 }
 0xbc1   : > { %10023 = vmatprep.mubr.bf16.mxu0 %v9837_v62  ;;  %10742 = vmatmul.mubr.bf16.gmra.mrb[60].mxu1 %v10554_v55  ;;  %v9662_v43 = vpack.c.bf16 %v20144_v59, %v18105_v23  ;;  %v17902_v60 = vld [vmem:[%s20956_s7 + $0x2b8] sm:$0xff]   ;;  %v11175_v9 = vrot.slane %v11105_v13, 2  ;;  %v11176_v10 = vrot.slane %v11107_v1, 2  ;;  %v17903_v8 = vld [vmem:[%s20956_s7 + $0x140] sm:$0xff]   ;;  %v11108_v12 = vld [vmem:[#allocation8 + $0x80] sm:$0xfc]  ;;  %v9661_v34 = vpack.c.bf16 %v20159_v42, %v18105_v23 }
 0xbc2   : > { %10024 = vmatmul.mubr.bf16.gmra.mrb[72].mxu0 %v9836_v56  ;;  %11393 = vmatprep.mubr.bf16.mxu1 %v11225_v37  ;;  %v17901_v54 = vld [vmem:[%s20956_s7 + $0x38] sm:$0xff]   ;;  %v17905_v44 = vld [vmem:[%s20956_s7 + $0x100] sm:$0xff]   ;;  %v11183_v59 = vsel %vm10257_vm8, %v11181_v3, %v11182_v20  ;;  %v11162_v31 = vsel %vm10257_vm8, %v11160_v49, %v11161_v5  ;;  %v11119_v4 = vld [vmem:[#allocation8 + $0xd8] sm:$0x3]  ;;  %v11178_v28 = vrot.slane %v11108_v12, 2  ;;  %v9664_v55 = vpack.c.bf16 %v20186_v40, %v20146_v36 }
 0xbc3   : > { %10160 = vmatprep.mubr.bf16.mxu0 %v9662_v43  ;;  %15684 = vmatprep.subr.bf16.mxu0 %v17899_v50  ;;  %v11110_v41 = vld [vmem:[#allocation8 + $0x90] sm:$0x3]  ;;  %v11117_v11 = vld [vmem:[#allocation8 + $0xc8] sm:$0xfc]  ;;  %v11224_v33 = vpack.c.bf16 %v11168_v25, %v11162_v31  ;;  %v11177_v0 = vsel %vm10257_vm8, %v11175_v9, %v11176_v10  ;;  %v17907_v15 = vld [vmem:[%s20956_s7 + $0x148] sm:$0xff]   ;;  %v11194_v62 = vrot.slane %v11119_v4, 2  ;;  %v9663_v10 = vpack.c.bf16 %v20180_v18, %v20140_v6 }
 0xbc4   : > { %15844 = vmatprep.subr.bf16.mxu1 %v17900_v14  ;;  %v17906_v53 = vld [vmem:[%s20956_s7 + $0x380] sm:$0xff]   ;;  %15685 = vmatpush3.bf16.msra.mxu0 %v17901_v54  ;;  %v11104_v17 = vld [vmem:[#allocation8 + $0x60] sm:$0xfc]  ;;  %v11227_v29 = vpack.c.bf16 %v11183_v59, %v11177_v0  ;;  %v11179_v21 = vrot.slane %v11110_v41, 2  ;;  %v11113_v57 = vld [vmem:[#allocation8 + $0xa8] sm:$0xfc]  ;;  %v9666_v4 = vpack.c.bf16 %v20223_v19, %v20188_v39 }
 0xbc5   : > { %15845 = vmatpush3.bf16.msra.mxu1 %v17902_v60  ;;  %v11106_v35 = vld [vmem:[#allocation8 + $0x70] sm:$0x3]  ;;  %15710 = vmatprep.subr.bf16.mxu0 %v17903_v8  ;;  %v11115_v51 = vld [vmem:[#allocation8 + $0xb8] sm:$0x3]  ;;  %v11193_v61 = vrot.slane %v11117_v11, 2  ;;  %v11172_v45 = vrot.slane %v11104_v17, 2 }
 0xbc6   : > { %15910 = vmatprep.subr.bf16.mxu1 %v17904_v52  ;;  %v17908_v32 = vld [vmem:[%s20956_s7 + $0x3c8] sm:$0xff]   ;;  %v11173_v42 = vrot.slane %v11106_v35, 2  ;;  %v17911_v7 = vld [vmem:[%s20956_s7 + $0x150] sm:$0xff]   ;;  %v11187_v56 = vrot.slane %v11113_v57, 2  ;;  %v11188_v30 = vrot.slane %v11115_v51, 2  ;;  %v11180_v48 = vsel %vm10257_vm8, %v11178_v28, %v11179_v21  ;;  %v17915_v25 = vld [vmem:[%s20956_s7 + $0x158] sm:$0xff]  }
 0xbc7   : > { %v17909_v50 = vld [vmem:[%s20956_s7 + $0x108] sm:$0xff]   ;;  %v17912_v16 = vld [vmem:[%s20956_s7 + $0x3d0] sm:$0xff]   ;;  %v11118_v1 = vld [vmem:[#allocation8 + $0xd0] sm:$0x3]  ;;  %v11195_v36 = vsel %vm10257_vm8, %v11193_v61, %v11194_v62 }
 0xbc8   : > { %v17910_v2 = vld [vmem:[%s20956_s7 + $0x388] sm:$0xff]   ;;  %v11116_v13 = vld [vmem:[#allocation8 + $0xc0] sm:$0xfc]  ;;  %v20284_v37 = vld [vmem:[#allocation8 + $0x8] sm:$0xfc]  ;;  %v11174_v14 = vsel %vm10257_vm8, %v11172_v45, %v11173_v42  ;;  %v11189_v49 = vsel %vm10257_vm8, %v11187_v56, %v11188_v30  ;;  %v11191_v52 = vrot.slane %v11118_v1, 2  ;;  %v9665_v45 = vpack.c.bf16 %v20232_v46, %v20182_v27 }
 0xbc9   : > { %11394 = vmatmul.mubr.bf16.vlgmr.msra.gmra.mrb[64].mxu1 %v11224_v33  ;;  %v11112_v40 = vld [vmem:[#allocation8 + $0xa0] sm:$0xfc]  ;;  %v11114_v3 = vld [vmem:[#allocation8 + $0xb0] sm:$0x3]  ;;  %v11125_v20 = vld [vmem:[#allocation8 + $0x108] sm:$0xfc]  ;;  %v11226_v43 = vpack.c.bf16 %v11180_v48, %v11174_v14  ;;  %v11229_v8 = vpack.c.bf16 %v11195_v36, %v11189_v49 }
 0xbca   : > { %10161 = vmatmul.mubr.bf16.vlgmr.msra.gmra.mrb[76].mxu0 %v9661_v34  ;;  %11401 = vmatprep.mubr.bf16.mxu1 %v11227_v29  ;;  %v11127_v23 = vld [vmem:[#allocation8 + $0x118] sm:$0x3]  ;;  %v17913_v60 = vld [vmem:[%s20956_s7 + $0x110] sm:$0xff]   ;;  %v11190_v54 = vrot.slane %v11116_v13, 2  ;;  %v17916_v12 = vld [vmem:[%s20956_s7 + $0x3d8] sm:$0xff]   ;;  %v11184_v41 = vrot.slane %v11112_v40, 2 }
 0xbcb   : > { %15711 = vmatpush3.bf16.msra.mxu0 %v17905_v44  ;;  %15911 = vmatpush3.bf16.msra.mxu1 %v17906_v53  ;;  %v17914_v5 = vld [vmem:[%s20956_s7 + $0x390] sm:$0xff]   ;;  %v20290_v9 = vld [vmem:[#allocation8 + $0x18] sm:$0x3]  ;;  %v11121_v44 = vld [vmem:[#allocation8 + $0xe8] sm:$0xfc]  ;;  %v11185_v31 = vrot.slane %v11114_v3, 2 }
 0xbcc   : > { %10168 = vmatprep.mubr.bf16.mxu0 %v9664_v55  ;;  %15712 = vmatprep.subr.bf16.mxu0 %v17907_v15  ;;  %v11123_v59 = vld [vmem:[#allocation8 + $0xf8] sm:$0x3]  ;;  %v11205_v53 = vrot.slane %v11125_v20, 2  ;;  %v11206_v11 = vrot.slane %v11127_v23, 2  ;;  %v17917_v33 = vld [vmem:[%s20956_s7 + $0x118] sm:$0xff]   ;;  %v10261_v6 = vrot.slane %v20284_v37, 2  ;;  %v11192_v17 = vsel %vm10257_vm8, %v11190_v54, %v11191_v52 }
 0xbcd   : > { %15912 = vmatprep.subr.bf16.mxu1 %v17908_v32  ;;  %v17918_v0 = vld [vmem:[%s20956_s7 + $0x398] sm:$0xff]   ;;  %v10262_v18 = vrot.slane %v20290_v9, 2  ;;  %v17919_v15 = vld [vmem:[%s20956_s7 + $0x160] sm:$0xff]   ;;  %v11199_v34 = vrot.slane %v11121_v44, 2  ;;  %v11200_v29 = vrot.slane %v11123_v59, 2  ;;  %v11186_v57 = vsel %vm10257_vm8, %v11184_v41, %v11185_v31  ;;  %v17923_v36 = vld [vmem:[%s20956_s7 + $0x168] sm:$0xff]  }
 0xbce   : > { %v17920_v35 = vld [vmem:[%s20956_s7 + $0x3e0] sm:$0xff]   ;;  %v20305_v28 = vld [vmem:[#allocation8 + $0xe0] sm:$0xfc]  ;;  %v11207_v51 = vsel %vm10257_vm8, %v11205_v53, %v11206_v11  ;;  %v20309_v32 = vld [vmem:[#allocation8 + $0x48] sm:$0xfe]  ;;  %v11228_v55 = vpack.c.bf16 %v11192_v17, %v11186_v57  ;;  %v9668_v52 = vpack.c.bf16 %v20247_v63, %v20225_v47 }
 0xbcf   : > { %15713 = vmatpush3.bf16.msra.mxu0 %v17909_v50  ;;  %15913 = vmatpush3.bf16.msra.mxu1 %v17910_v2  ;;  %v11122_v21 = vld [vmem:[#allocation8 + $0xf0] sm:$0x3]  ;;  %v11124_v39 = vld [vmem:[#allocation8 + $0x100] sm:$0xfc]  ;;  %v20311_v61 = vld [vmem:[#allocation8 + $0x58] sm:$0x1]  ;;  %v11201_v56 = vsel %vm10257_vm8, %v11199_v34, %v11200_v29  ;;  %v10263_v63 = vsel %vm10257_vm8, %v10261_v6, %v10262_v18 }
 0xbd0   : > { %15714 = vmatprep.subr.bf16.mxu0 %v17911_v7  ;;  %15914 = vmatprep.subr.bf16.mxu1 %v17912_v16  ;;  %v11126_v19 = vld [vmem:[#allocation8 + $0x110] sm:$0x3]  ;;  %v11666_v62 = vld [vmem:[#allocation8 + $0x68] sm:$0xfe]  ;;  %v11668_v42 = vld [vmem:[#allocation8 + $0x78] sm:$0x1]  ;;  %v11231_v1 = vpack.c.bf16 %v11207_v51, %v11201_v56 }
 0xbd1   : > { %11402 = vmatmul.mubr.bf16.gmra.mrb[68].mxu1 %v11226_v43  ;;  %v20315_v50 = vld [vmem:[#allocation8 + $0x28] sm:$0xfc]  ;;  %v20317_v2 = vld [vmem:[#allocation8 + $0x38] sm:$0x3]  ;;  %v17921_v7 = vld [vmem:[%s20956_s7 + $0x120] sm:$0xff]   ;;  %v11196_v48 = vrot.slane %v20305_v28, 2 }
 0xbd2   : > { %10169 = vmatmul.mubr.bf16.gmra.mrb[80].mxu0 %v9663_v10  ;;  %11409 = vmatprep.mubr.bf16.mxu1 %v11229_v8  ;;  %v17922_v30 = vld [vmem:[%s20956_s7 + $0x3a0] sm:$0xff]   ;;  %v11197_v16 = vrot.slane %v11122_v21, 2  ;;  %v11202_v13 = vrot.slane %v11124_v39, 2  ;;  %v20323_v27 = vld [vmem:[#allocation8] sm:$0xfc]  ;;  %v17924_v40 = vld [vmem:[%s20956_s7 + $0x3e8] sm:$0xff]  }
 0xbd3   : > { %15715 = vmatpush3.bf16.msra.mxu0 %v17913_v60  ;;  %15915 = vmatpush3.bf16.msra.mxu1 %v17914_v5  ;;  %v20325_v46 = vld [vmem:[#allocation8 + $0x10] sm:$0x3]  ;;  %v11203_v14 = vrot.slane %v11126_v19, 2  ;;  %v11728_v3 = vrot.slane %v20309_v32, 1  ;;  %v11729_v20 = vrot.slane %v20311_v61, 1  ;;  %v17925_v23 = vld [vmem:[%s20956_s7 + $0x128] sm:$0xff]  }
 0xbd4   : > { %10176 = vmatprep.mubr.bf16.mxu0 %v9666_v4  ;;  %15716 = vmatprep.subr.bf16.mxu0 %v17915_v25  ;;  %v17926_v43 = vld [vmem:[%s20956_s7 + $0x3a8] sm:$0xff]   ;;  %v11734_v60 = vrot.slane %v11666_v62, 1  ;;  %v11735_v49 = vrot.slane %v11668_v42, 1  ;;  %v10267_v5 = vrot.slane %v20315_v50, 2  ;;  %v10268_v54 = vrot.slane %v20317_v2, 2  ;;  %v17927_v41 = vld [vmem:[%s20956_s7 + $0x170] sm:$0xff]  }
 0xbd5   : > { %15916 = vmatprep.subr.bf16.mxu1 %v17916_v12  ;;  %v20337_v10 = vld [vmem:[#allocation8 + $0x40] sm:$0xfe]  ;;  %v20339_v8 = vld [vmem:[#allocation8 + $0x50] sm:$0x1]  ;;  %v11204_v31 = vsel %vm10257_vm8, %v11202_v13, %v11203_v14  ;;  %v10258_v53 = vrot.slane %v20323_v27, 2  ;;  %v10259_v11 = vrot.slane %v20325_v46, 2  ;;  %v11198_v4 = vsel %vm10257_vm8, %v11196_v48, %v11197_v16 }
 0xbd6   : > { %v20341_v25 = vld [vmem:[#allocation8 + $0x60] sm:$0xfe]  ;;  %v11667_v44 = vld [vmem:[#allocation8 + $0x70] sm:$0x1]  ;;  %v11726_v17 = vrot.slane %v20339_v8, 1  ;;  %v17931_v34 = vld [vmem:[%s20956_s7 + $0x178] sm:$0xff]   ;;  %v11230_v21 = vpack.c.bf16 %v11204_v31, %v11198_v4  ;;  %v11730_v39 = vsel %vm9765_vm7, %v11728_v3, %v11729_v20  ;;  %v10269_v19 = vsel %vm10257_vm8, %v10267_v5, %v10268_v54 }
 0xbd7   : > { %15717 = vmatpush3.bf16.msra.mxu0 %v17917_v33  ;;  %15917 = vmatpush3.bf16.msra.mxu1 %v17918_v0  ;;  %v10197_v59 = vld [vmem:[#allocation8 + $0x20] sm:$0xfc]  ;;  %v10199_v12 = vld [vmem:[#allocation8 + $0x30] sm:$0x3]  ;;  %v11736_v0 = vsel %vm9765_vm7, %v11734_v60, %v11735_v49  ;;  %v11674_v9 = vld [vmem:[#allocation8 + $0xa8] sm:$0xfe]  ;;  %v9667_v62 = vpack.c.bf16 %v20254_v58, %v20218_v22  ;;  %v10323_v48 = vpack.c.bf16 %v10269_v19, %v10263_v63 }
 0xbd8   : > { %15718 = vmatprep.subr.bf16.mxu0 %v17919_v15  ;;  %15918 = vmatprep.subr.bf16.mxu1 %v17920_v35  ;;  %v17928_v47 = vld [vmem:[%s20956_s7 + $0x3f0] sm:$0xff]   ;;  %v11725_v15 = vrot.slane %v20337_v10, 1  ;;  %v11676_v35 = vld [vmem:[#allocation8 + $0xb8] sm:$0x1]  ;;  %v11731_v6 = vrot.slane %v20341_v25, 1  ;;  %v11732_v18 = vrot.slane %v11667_v44, 1  ;;  %v10260_v16 = vsel %vm10257_vm8, %v10258_v53, %v10259_v11 }
 0xbd9   : > { %11410 = vmatmul.mubr.bf16.gmra.mrb[72].mxu1 %v11228_v55  ;;  %v17929_v33 = vld [vmem:[%s20956_s7 + $0x130] sm:$0xff]   ;;  %v10264_v29 = vrot.slane %v10197_v59, 2  ;;  %v10265_v28 = vrot.slane %v10199_v12, 2  ;;  %v17932_v57 = vld [vmem:[%s20956_s7 + $0x3f8] sm:$0xff]   ;;  %v10208_v61 = vld [vmem:[#allocation8 + $0x78] sm:$0x3]  ;;  %v11790_v55 = vpack.c.bf16 %v11736_v0, %v11730_v39 }
 0xbda   : > { %10177 = vmatmul.mubr.bf16.gmra.mrb[84].mxu0 %v9665_v45  ;;  %11417 = vmatprep.mubr.bf16.mxu1 %v11231_v1  ;;  %v17930_v37 = vld [vmem:[%s20956_s7 + $0x3b0] sm:$0xff]   ;;  %v11670_v51 = vld [vmem:[#allocation8 + $0x88] sm:$0xfe]  ;;  %v11672_v45 = vld [vmem:[#allocation8 + $0x98] sm:$0x1]  ;;  %v11746_v42 = vrot.slane %v11674_v9, 1  ;;  %v11727_v25 = vsel %vm9765_vm7, %v11725_v15, %v11726_v17 }
 0xbdb   : > { %15719 = vmatpush3.bf16.msra.mxu0 %v17921_v7  ;;  %15919 = vmatpush3.bf16.msra.mxu1 %v17922_v30  ;;  %v10206_v32 = vld [vmem:[#allocation8 + $0x68] sm:$0xfc]  ;;  %v11747_v50 = vrot.slane %v11676_v35, 1  ;;  %v10204_v7 = vld [vmem:[#allocation8 + $0x58] sm:$0x3]  ;;  %v10280_v58 = vrot.slane %v10208_v61, 2 }
 0xbdc   : > { %10184 = vmatprep.mubr.bf16.mxu0 %v9668_v52  ;;  %15720 = vmatprep.subr.bf16.mxu0 %v17923_v36  ;;  %v10202_v2 = vld [vmem:[#allocation8 + $0x48] sm:$0xfc]  ;;  %v20366_v56 = vld [vmem:[#allocation8 + $0x80] sm:$0xfe]  ;;  %v20368_v30 = vld [vmem:[#allocation8 + $0x90] sm:$0x1]  ;;  %v11733_v36 = vsel %vm9765_vm7, %v11731_v6, %v11732_v18 }
 0xbdd   : > { %15920 = vmatprep.subr.bf16.mxu1 %v17924_v40  ;;  %v10279_v22 = vrot.slane %v10206_v32, 2  ;;  %v20371_v13 = vld [vmem:[#allocation8 + $0xa0] sm:$0xfe]  ;;  %v20373_v27 = vld [vmem:[#allocation8 + $0xb0] sm:$0x1]  ;;  %v17933_v46 = vld [vmem:[%s20956_s7 + $0x138] sm:$0xff]   ;;  %v10266_v40 = vsel %vm10257_vm8, %v10264_v29, %v10265_v28  ;;  %v11748_v44 = vsel %vm9765_vm7, %v11746_v42, %v11747_v50  ;;  %v11789_v63 = vpack.c.bf16 %v11733_v36, %v11727_v25 }
 0xbde   : > { %v17934_v1 = vld [vmem:[%s20956_s7 + $0x3b8] sm:$0xff]   ;;  %v11740_v14 = vrot.slane %v11670_v51, 1  ;;  %v11741_v3 = vrot.slane %v11672_v45, 1  ;;  %v17935_v20 = vld [vmem:[%s20956_s7 + $0x240] sm:$0xff]   ;;  %v11737_v60 = vrot.slane %v20366_v56, 1  ;;  %v11738_v49 = vrot.slane %v20368_v30, 1 }
 0xbdf   : > { %15721 = vmatpush3.bf16.msra.mxu0 %v17925_v23  ;;  %15921 = vmatpush3.bf16.msra.mxu1 %v17926_v43  ;;  %v10273_v23 = vrot.slane %v10202_v2, 2  ;;  %v10274_v43 = vrot.slane %v10204_v7, 2  ;;  %v17936_v5 = vld [vmem:[%s20956_s7 + $0x200] sm:$0xff]   ;;  %v11743_v54 = vrot.slane %v20371_v13, 1  ;;  %v11744_v52 = vrot.slane %v20373_v27, 1  ;;  %v17937_v12 = vld [vmem:[%s20956_s7 + $0x248] sm:$0xff]  }
 0xbe0   : > { %15722 = vmatprep.subr.bf16.mxu0 %v17927_v41  ;;  %15922 = vmatprep.subr.bf16.mxu1 %v17928_v47  ;;  %v10205_v10 = vld [vmem:[#allocation8 + $0x60] sm:$0xfc]  ;;  %v10207_v8 = vld [vmem:[#allocation8 + $0x70] sm:$0x3]  ;;  %v10281_v59 = vsel %vm10257_vm8, %v10279_v22, %v10280_v58  ;;  %v11682_v31 = vld [vmem:[#allocation8 + $0xe8] sm:$0xfe]  ;;  %v10322_v53 = vpack.c.bf16 %v10266_v40, %v10260_v16  ;;  %v11742_v15 = vsel %vm9765_vm7, %v11740_v14, %v11741_v3 }
 0xbe1   : > { %11418 = vmatmul.mubr.bf16.gmra.mrb[76].mxu1 %v11230_v21  ;;  %v10201_v41 = vld [vmem:[#allocation8 + $0x40] sm:$0xfc]  ;;  %v11684_v47 = vld [vmem:[#allocation8 + $0xf8] sm:$0x1]  ;;  %v10203_v11 = vld [vmem:[#allocation8 + $0x50] sm:$0x3]  ;;  %v10275_v17 = vsel %vm10257_vm8, %v10273_v23, %v10274_v43  ;;  %v11792_v6 = vpack.c.bf16 %v11748_v44, %v11742_v15  ;;  %v11745_v22 = vsel %vm9765_vm7, %v11743_v54, %v11744_v52  ;;  %v11739_v43 = vsel %vm9765_vm7, %v11737_v60, %v11738_v49 }
 0xbe2   : > { %10185 = vmatmul.mubr.bf16.gmra.mrb[88].mxu0 %v9667_v62  ;;  %11958 = vmatprep.mubr.bf16.mxu1 %v11790_v55  ;;  %v11678_v4 = vld [vmem:[#allocation8 + $0xc8] sm:$0xfe]  ;;  %v10276_v9 = vrot.slane %v10205_v10, 2  ;;  %v10277_v35 = vrot.slane %v10207_v8, 2  ;;  %v10325_v18 = vpack.c.bf16 %v10281_v59, %v10275_v17  ;;  %v17938_v29 = vld [vmem:[%s20956_s7 + $0x208] sm:$0xff]   ;;  %v11758_v28 = vrot.slane %v11682_v31, 1 }
 0xbe3   : > { %15723 = vmatpush3.bf16.msra.mxu0 %v17929_v33  ;;  %15923 = vmatpush3.bf16.msra.mxu1 %v17930_v37  ;;  %v11680_v33 = vld [vmem:[#allocation8 + $0xd8] sm:$0x1]  ;;  %v20389_v0 = vld [vmem:[#allocation8 + $0x128] sm:$0xfe]  ;;  %v11759_v21 = vrot.slane %v11684_v47, 1  ;;  %v10271_v51 = vrot.slane %v10203_v11, 2  ;;  %v11791_v44 = vpack.c.bf16 %v11745_v22, %v11739_v43 }
 0xbe4   : > { %10491 = vmatprep.mubr.bf16.mxu0 %v10323_v48  ;;  %15724 = vmatprep.subr.bf16.mxu0 %v17931_v34  ;;  %v10214_v37 = vld [vmem:[#allocation8 + $0xa8] sm:$0xfc]  ;;  %v10216_v34 = vld [vmem:[#allocation8 + $0xb8] sm:$0x3]  ;;  %v11752_v32 = vrot.slane %v11678_v4, 1  ;;  %v11753_v61 = vrot.slane %v11680_v33, 1  ;;  %v10278_v58 = vsel %vm10257_vm8, %v10276_v9, %v10277_v35 }
 0xbe5   : > { %15924 = vmatprep.subr.bf16.mxu1 %v17932_v57  ;;  %v10210_v39 = vld [vmem:[#allocation8 + $0x88] sm:$0xfc]  ;;  %v10212_v19 = vld [vmem:[#allocation8 + $0x98] sm:$0x3]  ;;  %v10270_v57 = vrot.slane %v10201_v41, 2  ;;  %v10291_v55 = vrot.slane %v10214_v37, 2  ;;  %v11760_v27 = vsel %vm9765_vm7, %v11758_v28, %v11759_v21 }
 0xbe6   : > { %v20394_v62 = vld [vmem:[#allocation8 + $0x138] sm:$0x1]  ;;  %v10292_v45 = vrot.slane %v10216_v34, 2  ;;  %v20396_v42 = vld [vmem:[#allocation8 + $0xc0] sm:$0xfe]  ;;  %v10285_v7 = vrot.slane %v10210_v39, 2  ;;  %v11754_v54 = vsel %vm9765_vm7, %v11752_v32, %v11753_v61 }
 0xbe7   : > { %15725 = vmatpush3.bf16.msra.mxu0 %v17933_v46  ;;  %15925 = vmatpush3.bf16.msra.mxu1 %v17934_v1  ;;  %v20398_v50 = vld [vmem:[#allocation8 + $0xd0] sm:$0x1]  ;;  %v17939_v2 = vld [vmem:[%s20956_s7 + $0x250] sm:$0xff]   ;;  %v10286_v48 = vrot.slane %v10212_v19, 2  ;;  %v11770_v16 = vrot.slane %v20389_v0, 1  ;;  %v11771_v36 = vrot.slane %v20394_v62, 1 }
 0xbe8   : > { %15790 = vmatprep.subr.bf16.mxu0 %v17935_v20  ;;  %v17940_v13 = vld [vmem:[%s20956_s7 + $0x210] sm:$0xff]   ;;  %v11683_v1 = vld [vmem:[#allocation8 + $0xf0] sm:$0x1]  ;;  %v17941_v40 = vld [vmem:[%s20956_s7 + $0x258] sm:$0xff]   ;;  %v11749_v14 = vrot.slane %v20396_v42, 1  ;;  %v11750_v3 = vrot.slane %v20398_v50, 1  ;;  %v10293_v52 = vsel %vm10257_vm8, %v10291_v55, %v10292_v45 }
 0xbe9   : > { %v11681_v46 = vld [vmem:[#allocation8 + $0xe0] sm:$0xfe]  ;;  %v10215_v23 = vld [vmem:[#allocation8 + $0xb0] sm:$0x3]  ;;  %v11686_v8 = vld [vmem:[#allocation8 + $0x108] sm:$0xfe]  ;;  %v10287_v41 = vsel %vm10257_vm8, %v10285_v7, %v10286_v48  ;;  %v11772_v61 = vsel %vm9765_vm7, %v11770_v16, %v11771_v36 }
 0xbea   : > { %11959 = vmatmul.mubr.bf16.vlgmr.msra.gmra.mrb[80].mxu1 %v11789_v63  ;;  %10492 = vmatmul.mubr.bf16.vlgmr.msra.gmra.mrb[92].mxu0 %v10322_v53  ;;  %v10213_v20 = vld [vmem:[#allocation8 + $0xa0] sm:$0xfc]  ;;  %v11688_v25 = vld [vmem:[#allocation8 + $0x118] sm:$0x1]  ;;  %v10211_v30 = vld [vmem:[#allocation8 + $0x90] sm:$0x3]  ;;  %v10327_v11 = vpack.c.bf16 %v10293_v52, %v10287_v41  ;;  %v11751_v42 = vsel %vm9765_vm7, %v11749_v14, %v11750_v3 }
 0xbeb   : > { %15791 = vmatpush3.bf16.msra.mxu0 %v17936_v5  ;;  %11966 = vmatprep.mubr.bf16.mxu1 %v11792_v6  ;;  %v10272_v5 = vsel %vm10257_vm8, %v10270_v57, %v10271_v51  ;;  %v10209_v10 = vld [vmem:[#allocation8 + $0x80] sm:$0xfc]  ;;  %v10222_v31 = vld [vmem:[#allocation8 + $0xe8] sm:$0xfc]  ;;  %v10224_v56 = vld [vmem:[#allocation8 + $0xf8] sm:$0x3] }
 0xbec   : > { %10499 = vmatprep.mubr.bf16.mxu0 %v10325_v18  ;;  %15792 = vmatprep.subr.bf16.mxu0 %v17937_v12  ;;  %v10324_v59 = vpack.c.bf16 %v10278_v58, %v10272_v5  ;;  %v11794_v12 = vpack.c.bf16 %v11760_v27, %v11754_v54  ;;  %v11755_v60 = vrot.slane %v11681_v46, 1  ;;  %v11756_v49 = vrot.slane %v11683_v1, 1  ;;  %v20419_v53 = vld [vmem:[#allocation8 + $0x120] sm:$0xfe]  ;;  %v10218_v0 = vld [vmem:[#allocation8 + $0xc8] sm:$0xfc] }
 0xbed   : > { %v10288_v47 = vrot.slane %v10213_v20, 2  ;;  %v10289_v63 = vrot.slane %v10215_v23, 2  ;;  %v11764_v4 = vrot.slane %v11686_v8, 1  ;;  %v11765_v33 = vrot.slane %v11688_v25, 1  ;;  %v10220_v15 = vld [vmem:[#allocation8 + $0xd8] sm:$0x3] }
 0xbee   : > { %v17942_v17 = vld [vmem:[%s20956_s7 + $0x218] sm:$0xff]   ;;  %v10282_v9 = vrot.slane %v10209_v10, 2  ;;  %v10283_v35 = vrot.slane %v10211_v30, 2  ;;  %v10303_v37 = vrot.slane %v10222_v31, 2  ;;  %v10304_v34 = vrot.slane %v10224_v56, 2  ;;  %v17943_v6 = vld [vmem:[%s20956_s7 + $0x260] sm:$0xff]  }
 0xbef   : > { %15793 = vmatpush3.bf16.msra.mxu0 %v17938_v29  ;;  %v11691_v18 = vld [vmem:[#allocation8 + $0x130] sm:$0x1]  ;;  %v11757_v29 = vsel %vm9765_vm7, %v11755_v60, %v11756_v49  ;;  %v10290_v28 = vsel %vm10257_vm8, %v10288_v47, %v10289_v63  ;;  %v10297_v21 = vrot.slane %v10218_v0, 2  ;;  %v10298_v39 = vrot.slane %v10220_v15, 2  ;;  %v11685_v19 = vld [vmem:[#allocation8 + $0x100] sm:$0xfe] }
 0xbf0   : > { %15794 = vmatprep.subr.bf16.mxu0 %v17939_v2  ;;  %v11687_v57 = vld [vmem:[#allocation8 + $0x110] sm:$0x1]  ;;  %v11766_v32 = vsel %vm9765_vm7, %v11764_v4, %v11765_v33  ;;  %v11767_v62 = vrot.slane %v20419_v53, 1  ;;  %v10221_v55 = vld [vmem:[#allocation8 + $0xe0] sm:$0xfc]  ;;  %v10284_v50 = vsel %vm10257_vm8, %v10282_v9, %v10283_v35  ;;  %v10305_v2 = vsel %vm10257_vm8, %v10303_v37, %v10304_v34  ;;  %v17945_v7 = vld [vmem:[%s20956_s7 + $0x268] sm:$0xff]  }
 0xbf1   : > { %v17944_v51 = vld [vmem:[%s20956_s7 + $0x220] sm:$0xff]   ;;  %v11768_v48 = vrot.slane %v11691_v18, 1  ;;  %v10763_v22 = vld [vmem:[#allocation8 + $0x48] sm:$0xfe]  ;;  %v10765_v58 = vld [vmem:[#allocation8 + $0x58] sm:$0x1]  ;;  %v10326_v27 = vpack.c.bf16 %v10290_v28, %v10284_v50  ;;  %v10299_v20 = vsel %vm10257_vm8, %v10297_v21, %v10298_v39 }
 0xbf2   : > { %11967 = vmatmul.mubr.bf16.gmra.mrb[84].mxu1 %v11791_v44  ;;  %10500 = vmatmul.mubr.bf16.gmra.mrb[96].mxu0 %v10324_v59  ;;  %v10223_v45 = vld [vmem:[#allocation8 + $0xf0] sm:$0x3]  ;;  %v11761_v46 = vrot.slane %v11685_v19, 1  ;;  %v11762_v16 = vrot.slane %v11687_v57, 1  ;;  %v10217_v1 = vld [vmem:[#allocation8 + $0xc0] sm:$0xfc]  ;;  %v10329_v5 = vpack.c.bf16 %v10305_v2, %v10299_v20 }
 0xbf3   : > { %15795 = vmatpush3.bf16.msra.mxu0 %v17940_v13  ;;  %11974 = vmatprep.mubr.bf16.mxu1 %v11794_v12  ;;  %v11793_v13 = vpack.c.bf16 %v11757_v29, %v11751_v42  ;;  %v10219_v36 = vld [vmem:[#allocation8 + $0xd0] sm:$0x3]  ;;  %v10300_v14 = vrot.slane %v10221_v55, 2  ;;  %v10301_v3 = vrot.slane %v10223_v45, 2  ;;  %v10759_v23 = vld [vmem:[#allocation8 + $0x28] sm:$0xfe]  ;;  %v11769_v30 = vsel %vm9765_vm7, %v11767_v62, %v11768_v48 }
 0xbf4   : > { %10507 = vmatprep.mubr.bf16.mxu0 %v10327_v11  ;;  %15796 = vmatprep.subr.bf16.mxu0 %v17941_v40  ;;  %v11796_v40 = vpack.c.bf16 %v11772_v61, %v11766_v32  ;;  %v10761_v43 = vld [vmem:[#allocation8 + $0x38] sm:$0x1]  ;;  %v10831_v54 = vrot.slane %v10763_v22, 1  ;;  %v10832_v52 = vrot.slane %v10765_v58, 1  ;;  %v10294_v8 = vrot.slane %v10217_v1, 2  ;;  %v17947_v44 = vld [vmem:[%s20956_s7 + $0x270] sm:$0xff]  }
 0xbf5   : > { %v17946_v10 = vld [vmem:[%s20956_s7 + $0x228] sm:$0xff]   ;;  %v10295_v25 = vrot.slane %v10219_v36, 2  ;;  %v10825_v59 = vrot.slane %v10759_v23, 1  ;;  %v10826_v12 = vrot.slane %v10761_v43, 1  ;;  %v11763_v41 = vsel %vm9765_vm7, %v11761_v46, %v11762_v16  ;;  %v10762_v60 = vld [vmem:[#allocation8 + $0x40] sm:$0xfe] }
 0xbf6   : > { %v10302_v31 = vsel %vm10257_vm8, %v10300_v14, %v10301_v3  ;;  %v10833_v56 = vsel %vm9765_vm7, %v10831_v54, %v10832_v52  ;;  %v10764_v49 = vld [vmem:[#allocation8 + $0x50] sm:$0x1]  ;;  %v17948_v63 = vld [vmem:[%s20956_s7 + $0x230] sm:$0xff]   ;;  %v10771_v53 = vld [vmem:[#allocation8 + $0x88] sm:$0xfe]  ;;  %v11795_v4 = vpack.c.bf16 %v11769_v30, %v11763_v41  ;;  %v10828_v37 = vrot.slane %v10762_v60, 1 }
 0xbf7   : > { %15797 = vmatpush3.bf16.msra.mxu0 %v17942_v17  ;;  %v10296_v47 = vsel %vm10257_vm8, %v10294_v8, %v10295_v25  ;;  %v10773_v11 = vld [vmem:[#allocation8 + $0x98] sm:$0x1]  ;;  %v10827_v0 = vsel %vm9765_vm7, %v10825_v59, %v10826_v12  ;;  %v17949_v15 = vld [vmem:[%s20956_s7 + $0x278] sm:$0xff]   ;;  %v10758_v17 = vld [vmem:[#allocation8 + $0x20] sm:$0xfe]  ;;  %v10829_v34 = vrot.slane %v10764_v49, 1 }
 0xbf8   : > { %15798 = vmatprep.subr.bf16.mxu0 %v17943_v6  ;;  %v10328_v33 = vpack.c.bf16 %v10302_v31, %v10296_v47  ;;  %v10760_v9 = vld [vmem:[#allocation8 + $0x30] sm:$0x1]  ;;  %v10887_v35 = vpack.c.bf16 %v10833_v56, %v10827_v0  ;;  %v10767_v6 = vld [vmem:[#allocation8 + $0x68] sm:$0xfe]  ;;  %v10769_v18 = vld [vmem:[#allocation8 + $0x78] sm:$0x1] }
 0xbf9   : > { %v10843_v29 = vrot.slane %v10771_v53, 1  ;;  %v10844_v28 = vrot.slane %v10773_v11, 1  ;;  %v17950_v21 = vld [vmem:[%s20956_s7 + $0x238] sm:$0xff]   ;;  %v10822_v39 = vrot.slane %v10758_v17, 1  ;;  %v10823_v19 = vrot.slane %v10760_v9, 1  ;;  %v17951_v57 = vld [vmem:[%s20956_s7 + $0x340] sm:$0xff]  }
 0xbfa   : > { %11975 = vmatmul.mubr.bf16.gmra.mrb[88].mxu1 %v11793_v13  ;;  %10508 = vmatmul.mubr.bf16.gmra.mrb[100].mxu0 %v10326_v27  ;;  %v10838_v32 = vrot.slane %v10769_v18, 1  ;;  %v10830_v61 = vsel %vm9765_vm7, %v10828_v37, %v10829_v34  ;;  %v10770_v55 = vld [vmem:[#allocation8 + $0x80] sm:$0xfe]  ;;  %v10772_v45 = vld [vmem:[#allocation8 + $0x90] sm:$0x1]  ;;  %v17953_v58 = vld [vmem:[%s20956_s7 + $0x348] sm:$0xff]  }
 0xbfb   : > { %15799 = vmatpush3.bf16.msra.mxu0 %v17944_v51  ;;  %11982 = vmatprep.mubr.bf16.mxu1 %v11796_v40  ;;  %v10837_v51 = vrot.slane %v10767_v6, 1  ;;  %v10845_v62 = vsel %vm9765_vm7, %v10843_v29, %v10844_v28  ;;  %v10824_v42 = vsel %vm9765_vm7, %v10822_v39, %v10823_v19  ;;  %v17952_v50 = vld [vmem:[%s20956_s7 + $0x300] sm:$0xff]   ;;  %v10779_v2 = vld [vmem:[#allocation8 + $0xc8] sm:$0xfe]  ;;  %v10766_v13 = vld [vmem:[#allocation8 + $0x60] sm:$0xfe] }
 0xbfc   : > { %10515 = vmatprep.mubr.bf16.mxu0 %v10329_v5  ;;  %15800 = vmatprep.subr.bf16.mxu0 %v17945_v7  ;;  %v10781_v7 = vld [vmem:[#allocation8 + $0xd8] sm:$0x1]  ;;  %v10886_v48 = vpack.c.bf16 %v10830_v61, %v10824_v42  ;;  %v10768_v27 = vld [vmem:[#allocation8 + $0x70] sm:$0x1]  ;;  %v10840_v16 = vrot.slane %v10770_v55, 1  ;;  %v10841_v1 = vrot.slane %v10772_v45, 1 }
 0xbfd   : > { %v10839_v22 = vsel %vm9765_vm7, %v10837_v51, %v10838_v32  ;;  %v10775_v36 = vld [vmem:[#allocation8 + $0xa8] sm:$0xfe]  ;;  %v10777_v40 = vld [vmem:[#allocation8 + $0xb8] sm:$0x1]  ;;  %v10855_v20 = vrot.slane %v10779_v2, 1  ;;  %v10856_v14 = vrot.slane %v10781_v7, 1 }
 0xbfe   : > { %v10889_v46 = vpack.c.bf16 %v10845_v62, %v10839_v22  ;;  %v17954_v3 = vld [vmem:[%s20956_s7 + $0x308] sm:$0xff]   ;;  %v10834_v23 = vrot.slane %v10766_v13, 1  ;;  %v10835_v43 = vrot.slane %v10768_v27, 1  ;;  %v17955_v5 = vld [vmem:[%s20956_s7 + $0x350] sm:$0xff]   ;;  %v10849_v54 = vrot.slane %v10775_v36, 1  ;;  %v17957_v60 = vld [vmem:[%s20956_s7 + $0x358] sm:$0xff]  }
 0xbff   : > { %15801 = vmatpush3.bf16.msra.mxu0 %v17946_v10  ;;  %v10850_v52 = vrot.slane %v10777_v40, 1  ;;  %v10842_v10 = vsel %vm9765_vm7, %v10840_v16, %v10841_v1  ;;  %v10857_v8 = vsel %vm9765_vm7, %v10855_v20, %v10856_v14  ;;  %v10778_v25 = vld [vmem:[#allocation8 + $0xc0] sm:$0xfe]  ;;  %v10787_v41 = vld [vmem:[#allocation8 + $0x108] sm:$0xfe]  ;;  %v17959_v37 = vld [vmem:[%s20956_s7 + $0x360] sm:$0xff]  }
 0xc00   : > { %15802 = vmatprep.subr.bf16.mxu0 %v17947_v44  ;;  %v10780_v44 = vld [vmem:[#allocation8 + $0xd0] sm:$0x1]  ;;  %v10836_v59 = vsel %vm9765_vm7, %v10834_v23, %v10835_v43  ;;  %v17956_v12 = vld [vmem:[%s20956_s7 + $0x310] sm:$0xff]   ;;  %v10789_v30 = vld [vmem:[#allocation8 + $0x118] sm:$0x1]  ;;  %v10852_v53 = vrot.slane %v10778_v25, 1 }
 0xc01   : > { %v10888_v31 = vpack.c.bf16 %v10842_v10, %v10836_v59  ;;  %v10851_v56 = vsel %vm9765_vm7, %v10849_v54, %v10850_v52  ;;  %v10774_v49 = vld [vmem:[#allocation8 + $0xa0] sm:$0xfe]  ;;  %v10776_v47 = vld [vmem:[#allocation8 + $0xb0] sm:$0x1]  ;;  %v10853_v11 = vrot.slane %v10780_v44, 1  ;;  %v10867_v0 = vrot.slane %v10787_v41, 1 }
 0xc02   : > { %11983 = vmatmul.mubr.bf16.gmra.mrb[92].mxu1 %v11795_v4  ;;  %10516 = vmatmul.mubr.bf16.gmra.mrb[104].mxu0 %v10328_v33  ;;  %v10783_v4 = vld [vmem:[#allocation8 + $0xe8] sm:$0xfe]  ;;  %v10785_v33 = vld [vmem:[#allocation8 + $0xf8] sm:$0x1]  ;;  %v10846_v9 = vrot.slane %v10774_v49, 1  ;;  %v17960_v19 = vld [vmem:[%s20956_s7 + $0x320] sm:$0xff]  }
 0xc03   : > { %15803 = vmatpush3.bf16.msra.mxu0 %v17948_v63  ;;  %11055 = vmatprep.mubr.bf16.mxu0 %v10887_v35  ;;  %v10891_v63 = vpack.c.bf16 %v10857_v8, %v10851_v56  ;;  %v17958_v17 = vld [vmem:[%s20956_s7 + $0x318] sm:$0xff]   ;;  %v10847_v35 = vrot.slane %v10776_v47, 1  ;;  %v10861_v34 = vrot.slane %v10783_v4, 1  ;;  %v10862_v6 = vrot.slane %v10785_v33, 1  ;;  %v10786_v28 = vld [vmem:[#allocation8 + $0x100] sm:$0xfe] }
 0xc04   : > { %15804 = vmatprep.subr.bf16.mxu0 %v17949_v15  ;;  %v10868_v15 = vrot.slane %v10789_v30, 1  ;;  %v10854_v18 = vsel %vm9765_vm7, %v10852_v53, %v10853_v11  ;;  %v17961_v32 = vld [vmem:[%s20956_s7 + $0x368] sm:$0xff]   ;;  %v10782_v61 = vld [vmem:[#allocation8 + $0xe0] sm:$0xfe]  ;;  %v10784_v62 = vld [vmem:[#allocation8 + $0xf0] sm:$0x1] }
 0xc05   : > { %v10848_v39 = vsel %vm9765_vm7, %v10846_v9, %v10847_v35  ;;  %v10863_v51 = vsel %vm9765_vm7, %v10861_v34, %v10862_v6  ;;  %v10864_v45 = vrot.slane %v10786_v28, 1  ;;  %v10858_v2 = vrot.slane %v10782_v61, 1  ;;  %v17964_v27 = vld [vmem:[%s20956_s7 + $0x330] sm:$0xff]   ;;  %v11436_v16 = vld [vmem:[#allocation8 + $0x48] sm:$0xff]  ;;  %v17967_v20 = vld [vmem:[%s20956_s7 + $0x440] sm:$0xff]  }
 0xc06   : > { %v10869_v29 = vsel %vm9765_vm7, %v10867_v0, %v10868_v15  ;;  %v10859_v7 = vrot.slane %v10784_v62, 1  ;;  %v17965_v1 = vld [vmem:[%s20956_s7 + $0x378] sm:$0xff]   ;;  %v11437_v14 = vld [vmem:[#allocation8 + $0x60] sm:$0xff]  ;;  %v17968_v43 = vld [vmem:[%s20956_s7 + $0x400] sm:$0xff]  }
 0xc07   : > { %15805 = vmatpush3.bf16.msra.mxu0 %v17950_v21  ;;  %v10788_v21 = vld [vmem:[#allocation8 + $0x110] sm:$0x1]  ;;  %v10893_v55 = vpack.c.bf16 %v10869_v29, %v10863_v51  ;;  %v17966_v40 = vld [vmem:[%s20956_s7 + $0x338] sm:$0xff]   ;;  %v11435_v23 = vld [vmem:[#allocation8 + $0x40] sm:$0xff] }
 0xc08   : > { %15870 = vmatprep.subr.bf16.mxu0 %v17951_v57  ;;  %v10890_v57 = vpack.c.bf16 %v10854_v18, %v10848_v39  ;;  %v10865_v42 = vrot.slane %v10788_v21, 1  ;;  %v10860_v13 = vsel %vm9765_vm7, %v10858_v2, %v10859_v7  ;;  %v11440_v54 = vld [vmem:[#allocation8 + $0x88] sm:$0xff]  ;;  %v17969_v52 = vld [vmem:[%s20956_s7 + $0x448] sm:$0xff]   ;;  %v17971_v25 = vld [vmem:[%s20956_s7 + $0x450] sm:$0xff]  }
 0xc09   : > { %v17970_v8 = vld [vmem:[%s20956_s7 + $0x408] sm:$0xff]   ;;  %v11441_v44 = vld [vmem:[#allocation8 + $0xa0] sm:$0xff]  ;;  %v11446_v59 = vld [vmem:[#allocation8 + $0xe8] sm:$0xff] }
 0xc0a   : > { %11056 = vmatmul.mubr.bf16.vlgmr.msra.gmra.mrb[108].mxu0 %v10886_v48  ;;  %v17963_v48 = vld [vmem:[%s20956_s7 + $0x370] sm:$0xff]   ;;  %v10866_v22 = vsel %vm9765_vm7, %v10864_v45, %v10865_v42  ;;  %v17973_v56 = vld [vmem:[%s20956_s7 + $0x458] sm:$0xff]   ;;  %v17975_v47 = vld [vmem:[%s20956_s7 + $0x460] sm:$0xff]  }
 0xc0b   : > { %15871 = vmatpush3.bf16.msra.mxu0 %v17952_v50  ;;  %11063 = vmatprep.mubr.bf16.mxu0 %v10889_v46  ;;  %v17962_v50 = vld [vmem:[%s20956_s7 + $0x328] sm:$0xff]   ;;  %v10892_v46 = vpack.c.bf16 %v10866_v22, %v10860_v13  ;;  %v17972_v41 = vld [vmem:[%s20956_s7 + $0x410] sm:$0xff]   ;;  %v17974_v49 = vld [vmem:[%s20956_s7 + $0x418] sm:$0xff]  }
 0xc0c   : > { %15872 = vmatprep.subr.bf16.mxu0 %v17953_v58  ;;  %v11438_v58 = vld [vmem:[#allocation8 + $0x68] sm:$0xff]  ;;  %v11443_v53 = vld [vmem:[#allocation8 + $0xc0] sm:$0xff]  ;;  %v17976_v4 = vld [vmem:[%s20956_s7 + $0x420] sm:$0xff]  }
 0xc0d   : > { %v11452_v36 = vpack.c.bf16 %v11438_v58, %v11436_v16  ;;  %v11448_v11 = vld [vmem:[#allocation8 + $0x108] sm:$0xff]  ;;  %v12006_v0 = vld [vmem:[#allocation8 + $0x78] sm:$0x3]  ;;  %v20486_v9 = vld [vmem:[#allocation6] sm:$0xff] }
 0xc0e   : > { %v12004_v33 = vld [vmem:[#allocation8 + $0x68] sm:$0xfc]  ;;  %v11458_v35 = vpack.c.bf16 %v20486_v9, %v11448_v11  ;;  %v12002_v34 = vld [vmem:[#allocation8 + $0x58] sm:$0x3]  ;;  %v12073_v18 = vrot.slane %v12006_v0, 2  ;;  %v17979_v28 = vld [vmem:[%s20956_s7 + $0x470] sm:$0xff]  }
 0xc0f   : > { %15873 = vmatpush3.bf16.msra.mxu0 %v17954_v3  ;;  %v11442_v3 = vld [vmem:[#allocation8 + $0xa8] sm:$0xff]  ;;  %v12072_v6 = vrot.slane %v12004_v33, 2  ;;  %v17978_v29 = vld [vmem:[%s20956_s7 + $0x428] sm:$0xff]   ;;  %v12067_v39 = vrot.slane %v12002_v34, 2  ;;  %v12003_v51 = vld [vmem:[#allocation8 + $0x60] sm:$0xfc] }
 0xc10   : > { %15874 = vmatprep.subr.bf16.mxu0 %v17955_v5  ;;  %v11451_v5 = vpack.c.bf16 %v11437_v14, %v11435_v23  ;;  %v11454_v10 = vpack.c.bf16 %v11442_v3, %v11440_v54  ;;  %v17980_v61 = vld [vmem:[%s20956_s7 + $0x430] sm:$0xff]   ;;  %v12012_v62 = vld [vmem:[#allocation8 + $0xa8] sm:$0xfc]  ;;  %v12001_v7 = vld [vmem:[#allocation8 + $0x50] sm:$0x3]  ;;  %v12069_v22 = vrot.slane %v12003_v51, 2 }
 0xc11   : > { %v11999_v2 = vld [vmem:[#allocation8 + $0x40] sm:$0xfc]  ;;  %v12008_v13 = vld [vmem:[#allocation8 + $0x88] sm:$0xfc]  ;;  %v12026_v34 = vld [vmem:[#allocation8 + $0x118] sm:$0x3] }
 0xc12   : > { %11064 = vmatmul.mubr.bf16.gmra.mrb[112].mxu0 %v10888_v31  ;;  %v11444_v31 = vld [vmem:[#allocation8 + $0xc8] sm:$0xff]  ;;  %v12019_v0 = vld [vmem:[#allocation8 + $0xe0] sm:$0xfc]  ;;  %1270 = vst.msk [vmem:[#allocation9 + $0x10] sm:$0xff] %vm1266_vm9, %v20486_v9  ;;  %1267 = vst.msk [vmem:[#allocation9] sm:$0xff] %vm1266_vm9, %v20486_v9 }
 0xc13   : > { %15875 = vmatpush3.bf16.msra.mxu0 %v17956_v12  ;;  %11071 = vmatprep.mubr.bf16.mxu0 %v10891_v63  ;;  %v11439_v12 = vld [vmem:[#allocation8 + $0x80] sm:$0xff]  ;;  %1271 = vst.msk [vmem:[#allocation9 + $0x18] sm:$0x3] %vm1268_vm10, %v20486_v9  ;;  %1269 = vst.msk [vmem:[#allocation9 + $0x8] sm:$0x3] %vm1268_vm10, %v20486_v9 }
 0xc14   : > { %15876 = vmatprep.subr.bf16.mxu0 %v17957_v60  ;;  %v11453_v30 = vpack.c.bf16 %v11441_v44, %v11439_v12  ;;  %v11456_v60 = vpack.c.bf16 %v11446_v59, %v11444_v31  ;;  %v11445_v63 = vld [vmem:[#allocation8 + $0xe0] sm:$0xff]  ;;  %v12009_v59 = vld [vmem:[#allocation8 + $0x90] sm:$0x3]  ;;  %v12016_v31 = vld [vmem:[#allocation8 + $0xc8] sm:$0xfc]  ;;  %1272 = vst.msk [vmem:[#allocation9 + $0x20] sm:$0xff] %vm1266_vm9, %v20486_v9 }
 0xc15   : > { %v11455_v15 = vpack.c.bf16 %v11445_v63, %v11443_v53  ;;  %v12007_v44 = vld [vmem:[#allocation8 + $0x80] sm:$0xfc]  ;;  %v12076_v63 = vrot.slane %v12009_v59, 2  ;;  %v12090_v53 = vrot.slane %v12016_v31, 2  ;;  %1273 = vst.msk [vmem:[#allocation9 + $0x28] sm:$0x3] %vm1268_vm10, %v20486_v9 }
 0xc16   : > { %1274 = vst.msk [vmem:[#allocation9 + $0x30] sm:$0xff] %vm1266_vm9, %v20486_v9  ;;  %1276 = vst.msk [vmem:[#allocation9 + $0x40] sm:$0xff] %vm1266_vm9, %v20486_v9 }
 0xc17   : > { %15877 = vmatpush3.bf16.msra.mxu0 %v17958_v17  ;;  %v17977_v17 = vld [vmem:[%s20956_s7 + $0x468] sm:$0xff]   ;;  %1275 = vst.msk [vmem:[#allocation9 + $0x38] sm:$0x3] %vm1268_vm10, %v20486_v9  ;;  %1277 = vst.msk [vmem:[#allocation9 + $0x48] sm:$0x3] %vm1268_vm10, %v20486_v9 }
 0xc18   : > { %15878 = vmatprep.subr.bf16.mxu0 %v17959_v37  ;;  %v12000_v37 = vld [vmem:[#allocation8 + $0x48] sm:$0xfc]  ;;  %1278 = vst.msk [vmem:[#allocation9 + $0x50] sm:$0xff] %vm1266_vm9, %v20486_v9  ;;  %1280 = vst.msk [vmem:[#allocation9 + $0x60] sm:$0xff] %vm1266_vm9, %v20486_v9 }
 0xc19   : > { %v12066_v21 = vrot.slane %v12000_v37, 2  ;;  %v12024_v37 = vld [vmem:[#allocation8 + $0x108] sm:$0xfc]  ;;  %1279 = vst.msk [vmem:[#allocation9 + $0x58] sm:$0x3] %vm1268_vm10, %v20486_v9 }
 0xc1a   : > { %11072 = vmatmul.mubr.bf16.gmra.mrb[116].mxu0 %v10890_v57  ;;  %v12074_v57 = vsel %vm10257_vm8, %v12072_v6, %v12073_v18  ;;  %v12030_v6 = vld [vmem:[#allocation8 + $0x138] sm:$0x3]  ;;  %v12102_v51 = vrot.slane %v12024_v37, 2  ;;  %1281 = vst.msk [vmem:[#allocation9 + $0x68] sm:$0x3] %vm1268_vm10, %v20486_v9 }
 0xc1b   : > { %15879 = vmatpush3.bf16.msra.mxu0 %v17960_v19  ;;  %11079 = vmatprep.mubr.bf16.mxu0 %v10893_v55  ;;  %v11447_v19 = vld [vmem:[#allocation8 + $0x100] sm:$0xff]  ;;  %v12014_v55 = vld [vmem:[#allocation8 + $0xb8] sm:$0x3]  ;;  %v12068_v42 = vsel %vm10257_vm8, %v12066_v21, %v12067_v39  ;;  %v12017_v21 = vld [vmem:[#allocation8 + $0xd0] sm:$0x3]  ;;  %1282 = vst.msk [vmem:[#allocation9 + $0x70] sm:$0xff] %vm1266_vm9, %v20486_v9 }
 0xc1c   : > { %15880 = vmatprep.subr.bf16.mxu0 %v17961_v32  ;;  %v12005_v32 = vld [vmem:[#allocation8 + $0x70] sm:$0x3]  ;;  %v11457_v45 = vpack.c.bf16 %v20486_v9, %v11447_v19  ;;  %v12085_v16 = vrot.slane %v12014_v55, 2  ;;  %v12093_v19 = vrot.slane %v12019_v0, 2  ;;  %1283 = vst.msk [vmem:[#allocation9 + $0x78] sm:$0x3] %vm1268_vm10, %v20486_v9 }
 0xc1d   : > { %v12070_v58 = vrot.slane %v12005_v32, 2  ;;  %v12103_v32 = vrot.slane %v12026_v34, 2  ;;  %1284 = vst.msk [vmem:[#allocation9 + $0x80] sm:$0xff] %vm1266_vm9, %v20486_v9  ;;  %1286 = vst.msk [vmem:[#allocation9 + $0x90] sm:$0xff] %vm1266_vm9, %v20486_v9 }
 0xc1e   : > { %1285 = vst.msk [vmem:[#allocation9 + $0x88] sm:$0x3] %vm1268_vm10, %v20486_v9  ;;  %1287 = vst.msk [vmem:[#allocation9 + $0x98] sm:$0x3] %vm1268_vm10, %v20486_v9 }
 0xc1f   : > { %15881 = vmatpush3.bf16.msra.mxu0 %v17962_v50  ;;  %v17981_v50 = vld [vmem:[%s20956_s7 + $0x478] sm:$0xff]   ;;  %v12071_v3 = vsel %vm10257_vm8, %v12069_v22, %v12070_v58  ;;  %v12025_v22 = vld [vmem:[#allocation8 + $0x110] sm:$0x3] }
 0xc20   : > { %15882 = vmatprep.subr.bf16.mxu0 %v17963_v48  ;;  %v12128_v48 = vpack.c.bf16 %v12074_v57, %v12068_v42  ;;  %v12029_v58 = vld [vmem:[#allocation8 + $0x130] sm:$0x3] }
 0xc22   : > { %11080 = vmatmul.mubr.bf16.gmra.mrb[120].mxu0 %v10892_v46  ;;  %v12084_v46 = vrot.slane %v12012_v62, 2  ;;  %v12109_v62 = vrot.slane %v12030_v6, 2 }
 0xc23   : > { %15883 = vmatpush3.bf16.msra.mxu0 %v17964_v27  ;;  %11620 = vmatprep.mubr.bf16.mxu0 %v11452_v36  ;;  %v12010_v27 = vld [vmem:[#allocation8 + $0x98] sm:$0x3]  ;;  %v12063_v36 = vrot.slane %v11999_v2, 2  ;;  %v12104_v2 = vsel %vm10257_vm8, %v12102_v51, %v12103_v32 }
 0xc24   : > { %15884 = vmatprep.subr.bf16.mxu0 %v17965_v1  ;;  %v17982_v1 = vld [vmem:[%s20956_s7 + $0x438] sm:$0xff]   ;;  %v12079_v14 = vrot.slane %v12010_v27, 2  ;;  %v12086_v23 = vsel %vm10257_vm8, %v12084_v46, %v12085_v16 }
 0xc27   : > { %15885 = vmatpush3.bf16.msra.mxu0 %v17966_v40  ;;  %v12064_v40 = vrot.slane %v12001_v7, 2 }
 0xc28   : > { %15950 = vmatprep.subr.bf16.mxu0 %v17967_v20  ;;  %v12078_v20 = vrot.slane %v12008_v13, 2 }
 0xc29   : > { %v12065_v54 = vsel %vm10257_vm8, %v12063_v36, %v12064_v40  ;;  %v12100_v36 = vrot.slane %v12025_v22, 2  ;;  %v12106_v40 = vrot.slane %v12029_v58, 2 }
 0xc2a   : > { %11621 = vmatmul.mubr.bf16.vlgmr.msra.gmra.mrb[124].mxu0 %v11451_v5  ;;  %v12013_v5 = vld [vmem:[#allocation8 + $0xb0] sm:$0x3] }
 0xc2b   : > { %15951 = vmatpush3.bf16.msra.mxu0 %v17968_v43  ;;  %11628 = vmatprep.mubr.bf16.mxu0 %v11454_v10  ;;  %v12011_v43 = vld [vmem:[#allocation8 + $0xa0] sm:$0xfc]  ;;  %v12022_v10 = vld [vmem:[#allocation8 + $0xf8] sm:$0x3] }
 0xc2c   : > { %15952 = vmatprep.subr.bf16.mxu0 %v17969_v52  ;;  %v12020_v52 = vld [vmem:[#allocation8 + $0xe8] sm:$0xfc] }
 0xc2f   : > { %15953 = vmatpush3.bf16.msra.mxu0 %v17970_v8  ;;  %v12127_v8 = vpack.c.bf16 %v12071_v3, %v12065_v54 }
 0xc30   : > { %15954 = vmatprep.subr.bf16.mxu0 %v17971_v25  ;;  %v12080_v25 = vsel %vm10257_vm8, %v12078_v20, %v12079_v14 }
 0xc31   : > { %v12130_v12 = vpack.c.bf16 %v12086_v23, %v12080_v25 }
 0xc32   : > { %11629 = vmatmul.mubr.bf16.gmra.mrb[128].mxu0 %v11453_v30  ;;  %v12082_v30 = vrot.slane %v12013_v5, 2 }
 0xc33   : > { %15955 = vmatpush3.bf16.msra.mxu0 %v17972_v41  ;;  %11636 = vmatprep.mubr.bf16.mxu0 %v11456_v60  ;;  %v12081_v41 = vrot.slane %v12011_v43, 2  ;;  %v12096_v60 = vrot.slane %v12020_v52, 2 }
 0xc34   : > { %15956 = vmatprep.subr.bf16.mxu0 %v17973_v56  ;;  %v12018_v56 = vld [vmem:[#allocation8 + $0xd8] sm:$0x3] }
 0xc35   : > { %v12091_v11 = vrot.slane %v12018_v56, 2 }
 0xc37   : > { %15957 = vmatpush3.bf16.msra.mxu0 %v17974_v49  ;;  %v12097_v49 = vrot.slane %v12022_v10, 2 }
 0xc38   : > { %15958 = vmatprep.subr.bf16.mxu0 %v17975_v47  ;;  %v12075_v47 = vrot.slane %v12007_v44, 2 }
 0xc39   : > { %v12098_v33 = vsel %vm10257_vm8, %v12096_v60, %v12097_v49 }
 0xc3a   : > { %11637 = vmatmul.mubr.bf16.gmra.mrb[132].mxu0 %v11455_v15  ;;  %v12021_v15 = vld [vmem:[#allocation8 + $0xf0] sm:$0x3] }
 0xc3b   : > { %15959 = vmatpush3.bf16.msra.mxu0 %v17976_v4  ;;  %11644 = vmatprep.mubr.bf16.mxu0 %v11458_v35  ;;  %v12083_v4 = vsel %vm10257_vm8, %v12081_v41, %v12082_v30  ;;  %v12077_v35 = vsel %vm10257_vm8, %v12075_v47, %v12076_v63  ;;  %v12094_v57 = vrot.slane %v12021_v15, 2 }
 0xc3c   : > { %15960 = vmatprep.subr.bf16.mxu0 %v17977_v17  ;;  %v12028_v17 = vld [vmem:[#allocation8 + $0x128] sm:$0xfc]  ;;  %v12129_v18 = vpack.c.bf16 %v12083_v4, %v12077_v35 }
 0xc3d   : > { %v12095_v42 = vsel %vm10257_vm8, %v12093_v19, %v12094_v57 }
 0xc3f   : > { %15961 = vmatpush3.bf16.msra.mxu0 %v17978_v29  ;;  %v12092_v29 = vsel %vm10257_vm8, %v12090_v53, %v12091_v11 }
 0xc40   : > { %15962 = vmatprep.subr.bf16.mxu0 %v17979_v28  ;;  %v12015_v28 = vld [vmem:[#allocation8 + $0xc0] sm:$0xfc]  ;;  %v12132_v39 = vpack.c.bf16 %v12098_v33, %v12092_v29 }
 0xc41   : > { %v12087_v55 = vrot.slane %v12015_v28, 2 }
 0xc42   : > { %11645 = vmatmul.mubr.bf16.gmra.mrb[136].mxu0 %v11457_v45  ;;  %v12088_v45 = vrot.slane %v12017_v21, 2 }
 0xc43   : > { %15963 = vmatpush3.bf16.msra.mxu0 %v17980_v61  ;;  %12296 = vmatprep.mubr.bf16.mxu0 %v12128_v48  ;;  %v12108_v61 = vrot.slane %v12028_v17, 2  ;;  %v12023_v48 = vld [vmem:[#allocation8 + $0x100] sm:$0xfc] }
 0xc44   : > { %15964 = vmatprep.subr.bf16.mxu0 %v17981_v50  ;;  %v12027_v50 = vld [vmem:[#allocation8 + $0x120] sm:$0xfc]  ;;  %v12089_v13 = vsel %vm10257_vm8, %v12087_v55, %v12088_v45 }
 0xc45   : > { %v12110_v7 = vsel %vm10257_vm8, %v12108_v61, %v12109_v62  ;;  %v12131_v27 = vpack.c.bf16 %v12095_v42, %v12089_v13  ;;  %v12105_v46 = vrot.slane %v12027_v50, 2 }
 0xc46   : > { %v12134_v16 = vpack.c.bf16 %v12110_v7, %v12104_v2 }
 0xc47   : > { %15965 = vmatpush3.bf16.msra.mxu0 %v17982_v1  ;;  %v12099_v1 = vrot.slane %v12023_v48, 2  ;;  %v12107_v14 = vsel %vm10257_vm8, %v12105_v46, %v12106_v40 }
 0xc49   : > { %v12101_v20 = vsel %vm10257_vm8, %v12099_v1, %v12100_v36 }
 0xc4a   : > { %12297 = vmatmul.mubr.bf16.vlgmr.msra.gmra.mrb[140].mxu0 %v12127_v8  ;;  %v12133_v3 = vpack.c.bf16 %v12107_v14, %v12101_v20 }
 0xc4b   : > { %12304 = vmatprep.mubr.bf16.mxu0 %v12130_v12 }
 0xc52   : > { %12305 = vmatmul.mubr.bf16.gmra.mrb[144].mxu0 %v12129_v18 }
 0xc53   : > { %12312 = vmatprep.mubr.bf16.mxu0 %v12132_v39 }
 0xc5a   : > { %12313 = vmatmul.mubr.bf16.gmra.mrb[148].mxu0 %v12131_v27 }
 0xc5b   : > { %12320 = vmatprep.mubr.bf16.mxu0 %v12134_v16 }
 0xc62   : > { %12321 = vmatmul.mubr.bf16.gmra.mrb[152].mxu0 %v12133_v3 }
 0xc63   : > { %13598 = vmatprep.mubr.bf16.mxu0 %v20952_v38 }
 0xc77   : > { %v15766_v23 = vpop.f32.mrb[48].mxu1  ;;  %v15646_v43 = vpop.f32.mrb[60].mxu0 }
 0xc78   : > { %v15767_v5 = vpop.f32.mrb[49].mxu1  ;;  %v15647_v52 = vpop.f32.mrb[61].mxu0 }
 0xc79   : > { %v20512_v54 = vadd.f32 %v15767_v5, %v15766_v23  ;;  %v15769_v10 = vpop.f32.mrb[50].mxu1  ;;  %v20514_v8 = vadd.f32 %v15647_v52, %v15646_v43  ;;  %v15649_v25 = vpop.f32.mrb[62].mxu0 }
 0xc7a   : > { %v15770_v44 = vpop.f32.mrb[51].mxu1  ;;  %v15650_v12 = vpop.f32.mrb[63].mxu0 }
 0xc7b   : > { %v20516_v59 = vadd.f32 %v15770_v44, %v15769_v10  ;;  %v20518_v41 = vadd.f32 %v15650_v12, %v15649_v25 }
 0xc81   : > { %v15772_v30 = vpop.f32.mrb[52].mxu1  ;;  %v15652_v31 = vpop.f32.mrb[64].mxu0 }
 0xc82   : > { %v15773_v56 = vpop.f32.mrb[53].mxu1  ;;  %v15653_v49 = vpop.f32.mrb[65].mxu0 }
 0xc83   : > { %v20520_v60 = vadd.f32 %v15773_v56, %v15772_v30  ;;  %v15775_v47 = vpop.f32.mrb[54].mxu1  ;;  %v20522_v63 = vadd.f32 %v15653_v49, %v15652_v31  ;;  %v15655_v53 = vpop.f32.mrb[66].mxu0 }
 0xc84   : > { %v15776_v11 = vpop.f32.mrb[55].mxu1  ;;  %v15656_v33 = vpop.f32.mrb[67].mxu0 }
 0xc85   : > { %v20524_v4 = vadd.f32 %v15776_v11, %v15775_v47  ;;  %v20526_v0 = vadd.f32 %v15656_v33, %v15655_v53  ;;  %v17983_v53 = vld [vmem:[%s20962_s26 + $0x18] sm:$0xff]  }
 0xc86   : > { %16837 = vmatprep.subr.bf16.mxu1 %v17983_v53 }
 0xc87   : > { %16838 = vmatpush3.bf16.msra.mxu1 %v17983_v53 }
 0xc8b   : > { %v15778_v15 = vpop.f32.mrb[56].mxu1 }
 0xc8c   : > { %v15658_v17 = vpop.f32.mrb[68].mxu0  ;;  %v15779_v35 = vpop.f32.mrb[57].mxu1 }
 0xc8d   : > { %v20528_v37 = vadd.f32 %v15779_v35, %v15778_v15  ;;  %v15659_v34 = vpop.f32.mrb[69].mxu0  ;;  %v15781_v6 = vpop.f32.mrb[58].mxu1 }
 0xc8e   : > { %v20530_v18 = vadd.f32 %v15659_v34, %v15658_v17  ;;  %v15661_v29 = vpop.f32.mrb[70].mxu0  ;;  %v15782_v28 = vpop.f32.mrb[59].mxu1 }
 0xc8f   : > { %v20532_v21 = vadd.f32 %v15782_v28, %v15781_v6  ;;  %v15662_v39 = vpop.f32.mrb[71].mxu0 }
 0xc90   : > { %v20534_v19 = vadd.f32 %v15662_v39, %v15661_v29 }
 0xc94   : > { %v15784_v57 = vpop.f32.mrb[60].mxu1 }
 0xc95   : > { %v15664_v51 = vpop.f32.mrb[72].mxu0  ;;  %v15785_v32 = vpop.f32.mrb[61].mxu1 }
 0xc96   : > { %v20536_v61 = vadd.f32 %v15785_v32, %v15784_v57  ;;  %v15665_v62 = vpop.f32.mrb[73].mxu0  ;;  %v15787_v55 = vpop.f32.mrb[62].mxu1  ;;  %v17984_v32 = vld [vmem:[%s20962_s26 + $0x20] sm:$0xff]  }
 0xc97   : > { %v20538_v45 = vadd.f32 %v15665_v62, %v15664_v51  ;;  %v15667_v42 = vpop.f32.mrb[74].mxu0  ;;  %v15788_v50 = vpop.f32.mrb[63].mxu1  ;;  %16839 = vmatprep.subr.bf16.mxu1 %v17984_v32 }
 0xc98   : > { %v20540_v2 = vadd.f32 %v15788_v50, %v15787_v55  ;;  %v15668_v7 = vpop.f32.mrb[75].mxu0  ;;  %16840 = vmatpush3.bf16.msra.mxu1 %v17984_v32 }
 0xc99   : > { %v20542_v48 = vadd.f32 %v15668_v7, %v15667_v42 }
 0xc9c   : > { %v15846_v22 = vpop.f32.mrb[64].mxu1 }
 0xc9d   : > { %v15686_v58 = vpop.f32.mrb[76].mxu0  ;;  %v15847_v13 = vpop.f32.mrb[65].mxu1 }
 0xc9e   : > { %v20544_v27 = vadd.f32 %v15847_v13, %v15846_v22  ;;  %v15687_v46 = vpop.f32.mrb[77].mxu0  ;;  %v15849_v16 = vpop.f32.mrb[66].mxu1 }
 0xc9f   : > { %v15688_v1 = vadd.f32 %v15687_v46, %v15686_v58  ;;  %v15689_v36 = vpop.f32.mrb[78].mxu0  ;;  %v15850_v40 = vpop.f32.mrb[67].mxu1 }
 0xca0   : > { %v20586_v20 = vadd.f32 %v15850_v40, %v15849_v16  ;;  %v15690_v14 = vpop.f32.mrb[79].mxu0 }
 0xca1   : > { %v10163_v3 = vadd.f32 %v15688_v1, %v20514_v8  ;;  %v15691_v23 = vadd.f32 %v15690_v14, %v15689_v36 }
 0xca3   : > { %v20590_v43 = vadd.f32 %v15691_v23, %v20518_v41 }
 0xca4   : > { %v15852_v5 = vpop.f32.mrb[68].mxu1 }
 0xca5   : > { %v15692_v52 = vpop.f32.mrb[80].mxu0  ;;  %v15853_v10 = vpop.f32.mrb[69].mxu1 }
 0xca6   : > { %v20592_v25 = vadd.f32 %v15853_v10, %v15852_v5  ;;  %v15693_v44 = vpop.f32.mrb[81].mxu0  ;;  %v15855_v9 = vpop.f32.mrb[70].mxu1 }
 0xca7   : > { %v15694_v12 = vadd.f32 %v15693_v44, %v15692_v52  ;;  %v15695_v30 = vpop.f32.mrb[82].mxu0  ;;  %v15856_v31 = vpop.f32.mrb[71].mxu1 }
 0xca8   : > { %v20594_v56 = vadd.f32 %v15856_v31, %v15855_v9  ;;  %v15696_v49 = vpop.f32.mrb[83].mxu0 }
 0xca9   : > { %v20597_v8 = vadd.f32 %v15694_v12, %v20522_v63  ;;  %v15697_v47 = vadd.f32 %v15696_v49, %v15695_v30 }
 0xcab   : > { %v20600_v41 = vadd.f32 %v15697_v47, %v20526_v0  ;;  %v17985_v47 = vld [vmem:[%s20962_s26 + $0x28] sm:$0xff]  }
 0xcac   : > { %v15858_v11 = vpop.f32.mrb[72].mxu1  ;;  %16841 = vmatprep.subr.bf16.mxu1 %v17985_v47 }
 0xcad   : > { %v15698_v33 = vpop.f32.mrb[84].mxu0  ;;  %v15859_v15 = vpop.f32.mrb[73].mxu1  ;;  %16842 = vmatpush3.bf16.msra.mxu1 %v17985_v47 }
 0xcae   : > { %v20603_v17 = vadd.f32 %v15859_v15, %v15858_v11  ;;  %v15699_v35 = vpop.f32.mrb[85].mxu0  ;;  %v15861_v34 = vpop.f32.mrb[74].mxu1  ;;  %v20632_v11 = vld [vmem:[%s20962_s26] sm:$0xff]  }
 0xcaf   : > { %v15700_v6 = vadd.f32 %v15699_v35, %v15698_v33  ;;  %v15701_v29 = vpop.f32.mrb[86].mxu0  ;;  %v15862_v28 = vpop.f32.mrb[75].mxu1  ;;  %16851 = vmatprep.subr.bf16.mxu1 %v20632_v11 }
 0xcb0   : > { %v20605_v63 = vadd.f32 %v15862_v28, %v15861_v34  ;;  %v15702_v39 = vpop.f32.mrb[87].mxu0 }
 0xcb1   : > { %v20608_v0 = vadd.f32 %v15700_v6, %v20530_v18  ;;  %v15703_v57 = vadd.f32 %v15702_v39, %v15701_v29 }
 0xcb3   : > { %v20611_v51 = vadd.f32 %v15703_v57, %v20534_v19 }
 0xcb4   : > { %v15864_v62 = vpop.f32.mrb[76].mxu1 }
 0xcb5   : > { %v15704_v55 = vpop.f32.mrb[88].mxu0  ;;  %v15865_v42 = vpop.f32.mrb[77].mxu1 }
 0xcb6   : > { %v20614_v50 = vadd.f32 %v15865_v42, %v15864_v62  ;;  %v15705_v7 = vpop.f32.mrb[89].mxu0  ;;  %v15867_v22 = vpop.f32.mrb[78].mxu1 }
 0xcb7   : > { %v15706_v58 = vadd.f32 %v15705_v7, %v15704_v55  ;;  %v15707_v13 = vpop.f32.mrb[90].mxu0  ;;  %v15868_v46 = vpop.f32.mrb[79].mxu1 }
 0xcb8   : > { %v20616_v16 = vadd.f32 %v15868_v46, %v15867_v22  ;;  %v15708_v18 = vpop.f32.mrb[91].mxu0 }
 0xcb9   : > { %v20619_v1 = vadd.f32 %v15706_v58, %v20538_v45  ;;  %v15709_v19 = vadd.f32 %v15708_v18, %v15707_v13 }
 0xcbb   : > { %v20622_v36 = vadd.f32 %v15709_v19, %v20542_v48 }
 0xcbd   : > { %v15926_v40 = vpop.f32.mrb[80].mxu1  ;;  %v15726_v14 = vpop.f32.mrb[92].mxu0 }
 0xcbe   : > { %v15927_v23 = vpop.f32.mrb[81].mxu1  ;;  %v15727_v5 = vpop.f32.mrb[93].mxu0 }
 0xcbf   : > { %v20624_v52 = vadd.f32 %v15927_v23, %v15926_v40  ;;  %v15728_v10 = vadd.f32 %v15727_v5, %v15726_v14  ;;  %v15929_v44 = vpop.f32.mrb[82].mxu1  ;;  %v15729_v9 = vpop.f32.mrb[94].mxu0 }
 0xcc0   : > { %v15930_v12 = vpop.f32.mrb[83].mxu1  ;;  %v15730_v30 = vpop.f32.mrb[95].mxu0 }
 0xcc1   : > { %v10524_v31 = vadd.f32 %v15728_v10, %v10163_v3  ;;  %v20626_v45 = vadd.f32 %v15930_v12, %v15929_v44  ;;  %v15731_v49 = vadd.f32 %v15730_v30, %v15729_v9 }
 0xcc3   : > { %v10525_v48 = vadd.f32 %v15731_v49, %v20590_v43  ;;  %v10750_v53 = vadd.f32 %v20512_v54, %v10524_v31 }
 0xcc5   : > { %v15932_v33 = vpop.f32.mrb[84].mxu1  ;;  %v15732_v15 = vpop.f32.mrb[96].mxu0  ;;  %v10751_v35 = vadd.f32 %v20516_v59, %v10525_v48 }
 0xcc6   : > { %v15933_v34 = vpop.f32.mrb[85].mxu1  ;;  %v15733_v3 = vpop.f32.mrb[97].mxu0 }
 0xcc7   : > { %v20636_v6 = vadd.f32 %v15933_v34, %v15932_v33  ;;  %v15734_v29 = vadd.f32 %v15733_v3, %v15732_v15  ;;  %v15935_v28 = vpop.f32.mrb[86].mxu1  ;;  %v15735_v39 = vpop.f32.mrb[98].mxu0 }
 0xcc8   : > { %v15936_v43 = vpop.f32.mrb[87].mxu1  ;;  %v15736_v57 = vpop.f32.mrb[99].mxu0 }
 0xcc9   : > { %v10526_v54 = vadd.f32 %v15734_v29, %v20597_v8  ;;  %v20639_v32 = vadd.f32 %v15936_v43, %v15935_v28  ;;  %v15737_v62 = vadd.f32 %v15736_v57, %v15735_v39 }
 0xccb   : > { %v10527_v55 = vadd.f32 %v15737_v62, %v20600_v41  ;;  %v10752_v59 = vadd.f32 %v20520_v60, %v10526_v54 }
 0xccd   : > { %v15938_v42 = vpop.f32.mrb[88].mxu1  ;;  %v15738_v7 = vpop.f32.mrb[100].mxu0  ;;  %v10753_v22 = vadd.f32 %v20524_v4, %v10527_v55 }
 0xcce   : > { %v15939_v58 = vpop.f32.mrb[89].mxu1  ;;  %v15739_v13 = vpop.f32.mrb[101].mxu0 }
 0xccf   : > { %v20644_v46 = vadd.f32 %v15939_v58, %v15938_v42  ;;  %v15740_v18 = vadd.f32 %v15739_v13, %v15738_v7  ;;  %v15941_v19 = vpop.f32.mrb[90].mxu1  ;;  %v15741_v40 = vpop.f32.mrb[102].mxu0 }
 0xcd0   : > { %v15942_v14 = vpop.f32.mrb[91].mxu1  ;;  %v15742_v8 = vpop.f32.mrb[103].mxu0 }
 0xcd1   : > { %v10528_v23 = vadd.f32 %v15740_v18, %v20608_v0  ;;  %v20647_v5 = vadd.f32 %v15942_v14, %v15941_v19  ;;  %v15743_v41 = vadd.f32 %v15742_v8, %v15741_v40 }
 0xcd3   : > { %v10529_v60 = vadd.f32 %v15743_v41, %v20611_v51  ;;  %v10754_v10 = vadd.f32 %v20528_v37, %v10528_v23 }
 0xcd5   : > { %v15944_v44 = vpop.f32.mrb[92].mxu1  ;;  %v15744_v4 = vpop.f32.mrb[104].mxu0  ;;  %v10755_v9 = vadd.f32 %v20532_v21, %v10529_v60 }
 0xcd6   : > { %v15945_v12 = vpop.f32.mrb[93].mxu1  ;;  %v15745_v30 = vpop.f32.mrb[105].mxu0 }
 0xcd7   : > { %v20652_v31 = vadd.f32 %v15945_v12, %v15944_v44  ;;  %v15746_v49 = vadd.f32 %v15745_v30, %v15744_v4  ;;  %v15947_v47 = vpop.f32.mrb[94].mxu1  ;;  %v15747_v48 = vpop.f32.mrb[106].mxu0 }
 0xcd8   : > { %v15948_v33 = vpop.f32.mrb[95].mxu1  ;;  %v15748_v0 = vpop.f32.mrb[107].mxu0 }
 0xcd9   : > { %v10530_v15 = vadd.f32 %v15746_v49, %v20619_v1  ;;  %v20655_v34 = vadd.f32 %v15948_v33, %v15947_v47  ;;  %v15749_v51 = vadd.f32 %v15748_v0, %v15747_v48 }
 0xcdb   : > { %v10531_v37 = vadd.f32 %v15749_v51, %v20622_v36  ;;  %v10756_v3 = vadd.f32 %v20536_v61, %v10530_v15 }
 0xcdd   : > { %v15806_v29 = vpop.f32.mrb[108].mxu0  ;;  %v10757_v21 = vadd.f32 %v20540_v2, %v10531_v37 }
 0xcde   : > { %v15807_v28 = vpop.f32.mrb[109].mxu0 }
 0xcdf   : > { %v15808_v39 = vadd.f32 %v15807_v28, %v15806_v29  ;;  %v15809_v43 = vpop.f32.mrb[110].mxu0 }
 0xce0   : > { %v15810_v57 = vpop.f32.mrb[111].mxu0 }
 0xce1   : > { %v11088_v54 = vadd.f32 %v15808_v39, %v10750_v53  ;;  %v15811_v62 = vadd.f32 %v15810_v57, %v15809_v43 }
 0xce3   : > { %v11089_v55 = vadd.f32 %v15811_v62, %v10751_v35  ;;  %v11426_v42 = vadd.f32 %v20544_v27, %v11088_v54 }
 0xce5   : > { %v15812_v1 = vpop.f32.mrb[112].mxu0  ;;  %v11427_v7 = vadd.f32 %v20586_v20, %v11089_v55 }
 0xce6   : > { %v15813_v58 = vpop.f32.mrb[113].mxu0 }
 0xce7   : > { %v15814_v13 = vadd.f32 %v15813_v58, %v15812_v1  ;;  %v15815_v36 = vpop.f32.mrb[114].mxu0 }
 0xce8   : > { %v15816_v18 = vpop.f32.mrb[115].mxu0 }
 0xce9   : > { %v11090_v61 = vadd.f32 %v15814_v13, %v10752_v59  ;;  %v15817_v19 = vadd.f32 %v15816_v18, %v15815_v36 }
 0xceb   : > { %v11091_v40 = vadd.f32 %v15817_v19, %v10753_v22  ;;  %v11428_v2 = vadd.f32 %v20592_v25, %v11090_v61 }
 0xced   : > { %v15818_v14 = vpop.f32.mrb[116].mxu0  ;;  %v11429_v8 = vadd.f32 %v20594_v56, %v11091_v40 }
 0xcee   : > { %v15819_v53 = vpop.f32.mrb[117].mxu0 }
 0xcef   : > { %v15820_v23 = vadd.f32 %v15819_v53, %v15818_v14  ;;  %v15821_v35 = vpop.f32.mrb[118].mxu0 }
 0xcf0   : > { %v15822_v41 = vpop.f32.mrb[119].mxu0 }
 0xcf1   : > { %v11092_v27 = vadd.f32 %v15820_v23, %v10754_v10  ;;  %v15823_v60 = vadd.f32 %v15822_v41, %v15821_v35 }
 0xcf3   : > { %v11093_v44 = vadd.f32 %v15823_v60, %v10755_v9  ;;  %v11430_v20 = vadd.f32 %v20603_v17, %v11092_v27 }
 0xcf5   : > { %v15824_v4 = vpop.f32.mrb[120].mxu0  ;;  %v11431_v12 = vadd.f32 %v20605_v63, %v11093_v44  ;;  %v20681_v44 = vld [vmem:[%s20963_s0] ss:$0 sm:$0xff] }
 0xcf6   : > { %v15825_v59 = vpop.f32.mrb[121].mxu0 }
 0xcf7   : > { %v15826_v30 = vadd.f32 %v15825_v59, %v15824_v4  ;;  %v15827_v22 = vpop.f32.mrb[122].mxu0 }
 0xcf8   : > { %v15828_v49 = vpop.f32.mrb[123].mxu0 }
 0xcf9   : > { %v11094_v25 = vadd.f32 %v15826_v30, %v10756_v3  ;;  %v15829_v47 = vadd.f32 %v15828_v49, %v15827_v22 }
 0xcfb   : > { %v11095_v48 = vadd.f32 %v15829_v47, %v10757_v21  ;;  %v11432_v56 = vadd.f32 %v20614_v50, %v11094_v25 }
 0xcfd   : > { %v15886_v33 = vpop.f32.mrb[124].mxu0  ;;  %v11433_v0 = vadd.f32 %v20616_v16, %v11095_v48 }
 0xcfe   : > { %v15887_v10 = vpop.f32.mrb[125].mxu0 }
 0xcff   : > { %v15888_v15 = vadd.f32 %v15887_v10, %v15886_v33  ;;  %v15889_v9 = vpop.f32.mrb[126].mxu0 }
 0xd00   : > { %v15890_v51 = vpop.f32.mrb[127].mxu0 }
 0xd01   : > { %v11653_v17 = vadd.f32 %v15888_v15, %v11426_v42  ;;  %v15891_v37 = vadd.f32 %v15890_v51, %v15889_v9 }
 0xd03   : > { %v11654_v29 = vadd.f32 %v15891_v37, %v11427_v7  ;;  %v11991_v63 = vadd.f32 %v20624_v52, %v11653_v17 }
 0xd05   : > { %v15892_v28 = vpop.f32.mrb[128].mxu0  ;;  %v11992_v39 = vadd.f32 %v20626_v45, %v11654_v29 }
 0xd06   : > { %v15893_v3 = vpop.f32.mrb[129].mxu0 }
 0xd07   : > { %v15894_v43 = vadd.f32 %v15893_v3, %v15892_v28  ;;  %v15895_v21 = vpop.f32.mrb[130].mxu0  ;;  %v12402_v28 = vld [vmem:[#allocation9 + $0x1] sm:$0xff] }
 0xd08   : > { %v15896_v57 = vpop.f32.mrb[131].mxu0 }
 0xd09   : > { %v11655_v50 = vadd.f32 %v15894_v43, %v11428_v2  ;;  %v15897_v54 = vadd.f32 %v15896_v57, %v15895_v21 }
 0xd0b   : > { %v11656_v62 = vadd.f32 %v15897_v54, %v11429_v8  ;;  %v11993_v16 = vadd.f32 %v20636_v6, %v11655_v50 }
 0xd0d   : > { %v15898_v55 = vpop.f32.mrb[132].mxu0  ;;  %v11994_v1 = vadd.f32 %v20639_v32, %v11656_v62 }
 0xd0e   : > { %v15899_v42 = vpop.f32.mrb[133].mxu0 }
 0xd0f   : > { %v15900_v58 = vadd.f32 %v15899_v42, %v15898_v55  ;;  %v15901_v7 = vpop.f32.mrb[134].mxu0 }
 0xd10   : > { %v15902_v13 = vpop.f32.mrb[135].mxu0 }
 0xd11   : > { %v11657_v52 = vadd.f32 %v15900_v58, %v11430_v20  ;;  %v15903_v36 = vadd.f32 %v15902_v13, %v15901_v7 }
 0xd13   : > { %v11658_v18 = vadd.f32 %v15903_v36, %v11431_v12  ;;  %v11995_v45 = vadd.f32 %v20644_v46, %v11657_v52  ;;  %v20684_v12 = vld [vmem:[%s20964_s15] ss:$0 sm:$0xff] }
 0xd15   : > { %v15904_v61 = vpop.f32.mrb[136].mxu0  ;;  %v11996_v19 = vadd.f32 %v20647_v5, %v11658_v18 }
 0xd16   : > { %v15905_v40 = vpop.f32.mrb[137].mxu0 }
 0xd17   : > { %v15906_v2 = vadd.f32 %v15905_v40, %v15904_v61  ;;  %v15907_v6 = vpop.f32.mrb[138].mxu0 }
 0xd18   : > { %v15908_v14 = vpop.f32.mrb[139].mxu0 }
 0xd19   : > { %v11659_v8 = vadd.f32 %v15906_v2, %v11432_v56  ;;  %v15909_v32 = vadd.f32 %v15908_v14, %v15907_v6 }
 0xd1b   : > { %v11660_v53 = vadd.f32 %v15909_v32, %v11433_v0  ;;  %v20675_v23 = vadd.f32 %v20652_v31, %v11659_v8 }
 0xd1d   : > { %v15966_v35 = vpop.f32.mrb[140].mxu0  ;;  %v20678_v41 = vadd.f32 %v20655_v34, %v11660_v53 }
 0xd1e   : > { %v15967_v46 = vpop.f32.mrb[141].mxu0 }
 0xd1f   : > { %v15968_v27 = vadd.f32 %v15967_v46, %v15966_v35  ;;  %v15969_v60 = vpop.f32.mrb[142].mxu0  ;;  %v17987_v35 = vld [vmem:[%s20962_s26 + $0x8] sm:$0xff]  }
 0xd20   : > { %v15970_v5 = vpop.f32.mrb[143].mxu0 }
 0xd21   : > { %v12329_v20 = vadd.f32 %v15968_v27, %v11991_v63  ;;  %v15971_v4 = vadd.f32 %v15970_v5, %v15969_v60 }
 0xd23   : > { %v12343_v59 = vmul.f32 %v20681_v44, %v12329_v20  ;;  %v12330_v30 = vadd.f32 %v15971_v4, %v11992_v39  ;;  %v17988_v4 = vld [vmem:[%s20962_s26 + $0x10] sm:$0xff]  }
 0xd25   : > { %v12357_v31 = vadd.f32 %v20684_v12, %v12343_v59  ;;  %v12344_v22 = vmul.f32 %v20681_v44, %v12330_v30  ;;  %v15972_v49 = vpop.f32.mrb[144].mxu0 }
 0xd26   : > { %v15973_v34 = vpop.f32.mrb[145].mxu0 }
 0xd27   : > { %v12365_v25 = vmax.f32 %v12357_v31, 0.0  ;;  %v12358_v47 = vadd.f32 %v20684_v12, %v12344_v22  ;;  %v15974_v48 = vadd.f32 %v15973_v34, %v15972_v49  ;;  %v15975_v56 = vpop.f32.mrb[146].mxu0 }
 0xd28   : > { %v15976_v33 = vpop.f32.mrb[147].mxu0 }
 0xd29   : > { %12374 = vst.msk [vmem:[#allocation9 + $0x11] sm:$0xff] %vm1266_vm9, %v12365_v25  ;;  %v12366_v0 = vmax.f32 %v12358_v47, 0.0  ;;  %v12331_v10 = vadd.f32 %v15974_v48, %v11993_v16  ;;  %v15977_v15 = vadd.f32 %v15976_v33, %v15975_v56  ;;  %v18010_v48 = vld [vmem:[%s18332_s12] ss:$8 sps:$4 sm:$0xff]   ;;  %v18012_v56 = vld [vmem:[%s18332_s12 + $0x4] ss:$8 sps:$4 sm:$0xff]  }
 0xd2a   : > { %v18015_v33 = vld [vmem:[%s18332_s12 + $0x14] ss:$8 sps:$4 sm:$0xff]   ;;  %13566 = vmatprep.subr.bf16.mxu0 %v18012_v56 }
 0xd2b   : > { %12375 = vst.msk [vmem:[#allocation9 + $0x21] sm:$0xff] %vm1266_vm9, %v12366_v0  ;;  %v12345_v9 = vmul.f32 %v20681_v44, %v12331_v10  ;;  %v12332_v51 = vadd.f32 %v15977_v15, %v11994_v1  ;;  %13567 = vmatpush1.bf16.msra.mxu0 %v18010_v48  ;;  %v18013_v10 = vld [vmem:[%s18332_s12 + $0x10] ss:$8 sps:$4 sm:$0xff]   ;;  %v18008_v48 = vld [vmem:[%s20962_s26 + $0xc8] sm:$0xff]  }
 0xd2c   : > { %13568 = vmatprep.subr.bf16.mxu0 %v18015_v33  ;;  %v18009_v56 = vld [vmem:[%s20962_s26 + $0xd0] sm:$0xff]   ;;  %v13229_v33 = vld [vmem:[#allocation9 + $0x91] sm:$0xff] }
 0xd2d   : > { %v12359_v17 = vadd.f32 %v20684_v12, %v12345_v9  ;;  %v12346_v37 = vmul.f32 %v20681_v44, %v12332_v51  ;;  %v15978_v29 = vpop.f32.mrb[148].mxu0 }
 0xd2e   : > { %v15979_v63 = vpop.f32.mrb[149].mxu0 }
 0xd2f   : > { %v12367_v39 = vmax.f32 %v12359_v17, 0.0  ;;  %v12360_v3 = vadd.f32 %v20684_v12, %v12346_v37  ;;  %v15980_v43 = vadd.f32 %v15979_v63, %v15978_v29  ;;  %v15981_v21 = vpop.f32.mrb[150].mxu0  ;;  %v17990_v37 = vld [vmem:[%s20962_s26 + $0x38] sm:$0xff]   ;;  %13569 = vmatpush1.bf16.msra.mxu0 %v18013_v10  ;;  %v17991_v63 = vld [vmem:[%s20962_s26 + $0x40] sm:$0xff]  }
 0xd30   : > { %v15982_v57 = vpop.f32.mrb[151].mxu0  ;;  %v20696_v50 = vld [vmem:[#allocation9 + $0x11] sm:$0xff] }
 0xd31   : > { %12376 = vst.msk [vmem:[#allocation9 + $0x31] sm:$0xff] %vm1266_vm9, %v12367_v39  ;;  %v12368_v54 = vmax.f32 %v12360_v3, 0.0  ;;  %v12333_v62 = vadd.f32 %v15980_v43, %v11995_v45  ;;  %v15983_v16 = vadd.f32 %v15982_v57, %v15981_v21  ;;  %v12410_v55 = vpack.c.bf16 %v20696_v50, %v12402_v28  ;;  %v12385_v22 = vld [vmem:[#allocation9 + $0x10] sm:$0xff]  ;;  %v12611_v39 = vld [vmem:[#allocation9 + $0x2] sm:$0xff]  ;;  %v17992_v57 = vld [vmem:[%s20962_s26 + $0x48] sm:$0xff]  }
 0xd32   : > { %v20700_v1 = vld [vmem:[#allocation9 + $0x21] sm:$0xff]  ;;  %v20769_v3 = vld [vmem:[#allocation9 + $0x12] sm:$0xff] }
 0xd33   : > { %12377 = vst.msk [vmem:[#allocation9 + $0x41] sm:$0xff] %vm1266_vm9, %v12368_v54  ;;  %v12347_v42 = vmul.f32 %v20681_v44, %v12333_v62  ;;  %v12334_v58 = vadd.f32 %v15983_v16, %v11996_v19  ;;  %16843 = vmatprep.mubr.msk.bf16.mxu1 %vm1266_vm9, %v12410_v55  ;;  %v12863_v7 = vpack.c.bf16 %v20700_v1, %v20696_v50  ;;  %v12386_v9 = vld [vmem:[#allocation9 + $0x20] sm:$0xff]  ;;  %v18018_v10 = vld [vmem:[%s18332_s12 + $0x24] ss:$8 sps:$4 sm:$0xff]  }
 0xd34   : > { %v12619_v54 = vpack.c.bf16 %v20769_v3, %v12611_v39  ;;  %v12613_v55 = vld [vmem:[#allocation9 + $0x22] sm:$0xff]  ;;  %13570 = vmatprep.subr.bf16.mxu0 %v18018_v10 }
 0xd35   : > { %v12361_v13 = vadd.f32 %v20684_v12, %v12347_v42  ;;  %v12348_v52 = vmul.f32 %v20681_v44, %v12334_v58  ;;  %v15984_v36 = vpop.f32.mrb[152].mxu0 }
 0xd36   : > { %v15985_v18 = vpop.f32.mrb[153].mxu0 }
 0xd37   : > { %v12369_v45 = vmax.f32 %v12361_v13, 0.0  ;;  %v12362_v61 = vadd.f32 %v20684_v12, %v12348_v52  ;;  %v15986_v40 = vadd.f32 %v15985_v18, %v15984_v36  ;;  %v15987_v2 = vpop.f32.mrb[154].mxu0  ;;  %v17993_v13 = vld [vmem:[%s20962_s26 + $0x50] sm:$0xff]   ;;  %v17994_v36 = vld [vmem:[%s20962_s26 + $0x58] sm:$0xff]  }
 0xd38   : > { %v15988_v6 = vpop.f32.mrb[155].mxu0  ;;  %v20710_v14 = vld [vmem:[#allocation9 + $0x31] sm:$0xff] }
 0xd39   : > { %12378 = vst.msk [vmem:[#allocation9 + $0x51] sm:$0xff] %vm1266_vm9, %v12369_v45  ;;  %v12370_v19 = vmax.f32 %v12362_v61, 0.0  ;;  %v12335_v8 = vadd.f32 %v15986_v40, %v20675_v23  ;;  %v15989_v32 = vadd.f32 %v15988_v6, %v15987_v2  ;;  %v20716_v53 = vpack.c.bf16 %v20710_v14, %v20700_v1  ;;  %v12387_v0 = vld [vmem:[#allocation9 + $0x30] sm:$0xff] }
 0xd3a   : > { %v20719_v46 = vld [vmem:[#allocation9 + $0x41] sm:$0xff]  ;;  %v20759_v51 = vpack.c.bf16 %v12387_v0, %v12386_v9  ;;  %v12614_v62 = vld [vmem:[#allocation9 + $0x32] sm:$0xff]  ;;  %v12741_v2 = vpack.c.bf16 %v12386_v9, %v12385_v22  ;;  %v15207_v9 = vld [vmem:[%s18327_s4] ss:$0 sm:$0xff] }
 0xd3b   : > { %12379 = vst.msk [vmem:[#allocation9 + $0x61] sm:$0xff] %vm1266_vm9, %v12370_v19  ;;  %v12349_v27 = vmul.f32 %v20681_v44, %v12335_v8  ;;  %v12336_v60 = vadd.f32 %v15989_v32, %v20678_v41  ;;  %16844 = vmatmul.mubr.msk.bf16.vlgmr.msra.gmra.mrb[96].mxu1 %vm1266_vm9, %v20716_v53  ;;  %v12864_v23 = vpack.c.bf16 %v20719_v46, %v20710_v14  ;;  %v12388_v17 = vld [vmem:[#allocation9 + $0x40] sm:$0xff]  ;;  %v17995_v40 = vld [vmem:[%s20962_s26 + $0x60] sm:$0xff]   ;;  %v17996_v19 = vld [vmem:[%s20962_s26 + $0x68] sm:$0xff]  }
 0xd3c   : > { %16852 = vmatpush3.bf16.msra.mxu1 %v20632_v11  ;;  %v20778_v42 = vpack.c.bf16 %v12614_v62, %v12613_v55  ;;  %v12615_v58 = vld [vmem:[#allocation9 + $0x42] sm:$0xff]  ;;  %v12742_v6 = vpack.c.bf16 %v12388_v17, %v12387_v0 }
 0xd3d   : > { %v12363_v5 = vadd.f32 %v20684_v12, %v12349_v27  ;;  %v12350_v20 = vmul.f32 %v20681_v44, %v12336_v60  ;;  %16853 = vmatprep.subr.bf16.mxu1 %v17987_v35  ;;  %v17989_v44 = vld [vmem:[%s20962_s26 + $0x30] sm:$0xff]   ;;  %v17998_v60 = vld [vmem:[%s20962_s26 + $0x78] sm:$0xff]   ;;  %v12986_v14 = vpack.c.bf16 %v12615_v58, %v12614_v62 }
 0xd3e   : > { %v17997_v32 = vld [vmem:[%s20962_s26 + $0x70] sm:$0xff]  }
 0xd3f   : > { %v12371_v59 = vmax.f32 %v12363_v5, 0.0  ;;  %v12364_v30 = vadd.f32 %v20684_v12, %v12350_v20  ;;  %v12384_v12 = vld [vmem:[#allocation9] sm:$0xff]  ;;  %v17999_v5 = vld [vmem:[%s20962_s26 + $0x80] sm:$0xff]  }
 0xd40   : > { %v20733_v31 = vld [vmem:[#allocation9 + $0x51] sm:$0xff]  ;;  %16854 = vmatpush3.bf16.msra.mxu1 %v17987_v35  ;;  %v12392_v47 = vpack.c.bf16 %v12385_v22, %v12384_v12  ;;  %v18005_v12 = vld [vmem:[%s20962_s26 + $0xb0] sm:$0xff]   ;;  %v18006_v22 = vld [vmem:[%s20962_s26 + $0xb8] sm:$0xff]  }
 0xd41   : > { %12380 = vst.msk [vmem:[#allocation9 + $0x71] sm:$0xff] %vm1266_vm9, %v12371_v59  ;;  %v12372_v41 = vmax.f32 %v12364_v30, 0.0  ;;  %v20738_v11 = vpack.c.bf16 %v20733_v31, %v20719_v46  ;;  %16855 = vmatprep.subr.bf16.mxu1 %v17988_v4  ;;  %v12389_v15 = vld [vmem:[#allocation9 + $0x50] sm:$0xff]  ;;  %v12985_v59 = vpack.c.bf16 %v12613_v55, %v20769_v3  ;;  %v18002_v46 = vld [vmem:[%s20962_s26 + $0x98] sm:$0xff]  }
 0xd42   : > { %v20744_v49 = vld [vmem:[#allocation9 + $0x61] sm:$0xff]  ;;  %v20762_v29 = vpack.c.bf16 %v12389_v15, %v12388_v17  ;;  %v12616_v16 = vld [vmem:[#allocation9 + $0x52] sm:$0xff] }
 0xd43   : > { %12381 = vst.msk [vmem:[#allocation9 + $0x81] sm:$0xff] %vm1266_vm9, %v12372_v41  ;;  %16847 = vmatprep.mubr.msk.bf16.mxu1 %vm1266_vm9, %v20738_v11  ;;  %v12390_v43 = vld [vmem:[#allocation9 + $0x60] sm:$0xff]  ;;  %v20781_v52 = vpack.c.bf16 %v12616_v16, %v12615_v58  ;;  %v12865_v20 = vpack.c.bf16 %v20744_v49, %v20733_v31  ;;  %v18003_v30 = vld [vmem:[%s20962_s26 + $0xa0] sm:$0xff]  }
 0xd44   : > { %16856 = vmatpush3.bf16.msra.mxu1 %v17988_v4  ;;  %v12617_v45 = vld [vmem:[#allocation9 + $0x62] sm:$0xff]  ;;  %v12743_v8 = vpack.c.bf16 %v12390_v43, %v12389_v15  ;;  %v18000_v4 = vld [vmem:[%s20962_s26 + $0x88] sm:$0xff]   ;;  %v15206_v15 = vld [vmem:[%s20965_s16] ss:$0 sm:$0xff] }
 0xd45   : > { %16865 = vmatprep.subr.bf16.mxu1 %v17989_v44 }
 0xd48   : > { %v20746_v34 = vld [vmem:[#allocation9 + $0x71] sm:$0xff] }
 0xd49   : > { %v20750_v25 = vpack.c.bf16 %v20746_v34, %v20744_v49  ;;  %v12391_v28 = vld [vmem:[#allocation9 + $0x70] sm:$0xff] }
 0xd4a   : > { %v20771_v21 = vpack.c.bf16 %v12391_v28, %v12390_v43  ;;  %v12618_v18 = vld [vmem:[#allocation9 + $0x72] sm:$0xff]  ;;  %v12740_v35 = vld [vmem:[#allocation9 + $0x80] sm:$0xff] }
 0xd4b   : > { %16848 = vmatmul.mubr.msk.bf16.gmra.mrb[100].mxu1 %vm1266_vm9, %v20750_v25  ;;  %v20788_v61 = vpack.c.bf16 %v12618_v18, %v12617_v45  ;;  %v12744_v27 = vpack.c.bf16 %v12740_v35, %v12391_v28  ;;  %v12862_v50 = vld [vmem:[#allocation9 + $0x81] sm:$0xff]  ;;  %v13107_v49 = vld [vmem:[#allocation9 + $0x90] sm:$0xff] }
 0xd4c   : > { %16857 = vmatprep.mubr.msk.bf16.mxu1 %vm1266_vm9, %v12392_v47  ;;  %v12866_v1 = vpack.c.bf16 %v12862_v50, %v20746_v34  ;;  %v12984_v31 = vld [vmem:[#allocation9 + $0x82] sm:$0xff]  ;;  %v13111_v34 = vpack.c.bf16 %v13107_v49, %v12740_v35  ;;  %v18007_v47 = vld [vmem:[%s20962_s26 + $0xc0] sm:$0xff]   ;;  %v13233_v0 = vpack.c.bf16 %v13229_v33, %v12862_v50 }
 0xd4d   : > { %v12988_v41 = vpack.c.bf16 %v12984_v31, %v12618_v18 }
 0xd53   : > { %16858 = vmatmul.mubr.msk.bf16.vlgmr.msra.gmra.mrb[96].mxu1 %vm1266_vm9, %v20759_v51 }
 0xd54   : > { %16866 = vmatpush3.bf16.msra.mxu1 %v17989_v44  ;;  %16861 = vmatprep.mubr.msk.bf16.mxu1 %vm1266_vm9, %v20762_v29  ;;  %v18004_v44 = vld [vmem:[%s20962_s26 + $0xa8] sm:$0xff]  }
 0xd55   : > { %16867 = vmatprep.subr.bf16.mxu1 %v17990_v37 }
 0xd58   : > { %16868 = vmatpush3.bf16.msra.mxu1 %v17990_v37 }
 0xd59   : > { %16869 = vmatprep.subr.bf16.mxu1 %v17991_v63 }
 0xd5b   : > { %16862 = vmatmul.mubr.msk.bf16.gmra.mrb[100].mxu1 %vm1266_vm9, %v20771_v21 }
 0xd5c   : > { %16871 = vmatprep.mubr.msk.bf16.mxu1 %vm1266_vm9, %v12619_v54  ;;  %16870 = vmatpush3.bf16.msra.mxu1 %v17991_v63 }
 0xd5d   : > { %16879 = vmatprep.subr.bf16.mxu1 %v17992_v57 }
 0xd63   : > { %16872 = vmatmul.mubr.msk.bf16.vlgmr.msra.gmra.mrb[96].mxu1 %vm1266_vm9, %v20778_v42 }
 0xd64   : > { %16880 = vmatpush3.bf16.msra.mxu1 %v17992_v57  ;;  %16875 = vmatprep.mubr.msk.bf16.mxu1 %vm1266_vm9, %v20781_v52 }
 0xd65   : > { %16881 = vmatprep.subr.bf16.mxu1 %v17993_v13 }
 0xd68   : > { %16882 = vmatpush3.bf16.msra.mxu1 %v17993_v13 }
 0xd69   : > { %16883 = vmatprep.subr.bf16.mxu1 %v17994_v36 }
 0xd6b   : > { %16876 = vmatmul.mubr.msk.bf16.gmra.mrb[100].mxu1 %vm1266_vm9, %v20788_v61 }
 0xd6c   : > { %16885 = vmatprep.mubr.msk.bf16.mxu1 %vm1266_vm9, %v12741_v2  ;;  %16884 = vmatpush3.bf16.msra.mxu1 %v17994_v36 }
 0xd6d   : > { %16893 = vmatprep.subr.bf16.mxu1 %v17995_v40 }
 0xd73   : > { %16886 = vmatmul.mubr.msk.bf16.vlgmr.msra.gmra.mrb[96].mxu1 %vm1266_vm9, %v12742_v6 }
 0xd74   : > { %16894 = vmatpush3.bf16.msra.mxu1 %v17995_v40  ;;  %16889 = vmatprep.mubr.msk.bf16.mxu1 %vm1266_vm9, %v12743_v8 }
 0xd75   : > { %16895 = vmatprep.subr.bf16.mxu1 %v17996_v19 }
 0xd78   : > { %16896 = vmatpush3.bf16.msra.mxu1 %v17996_v19 }
 0xd79   : > { %16897 = vmatprep.subr.bf16.mxu1 %v17997_v32 }
 0xd7b   : > { %16890 = vmatmul.mubr.msk.bf16.gmra.mrb[100].mxu1 %vm1266_vm9, %v12744_v27 }
 0xd7c   : > { %16899 = vmatprep.mubr.msk.bf16.mxu1 %vm1266_vm9, %v12863_v7  ;;  %16898 = vmatpush3.bf16.msra.mxu1 %v17997_v32  ;;  %v18001_v7 = vld [vmem:[%s20962_s26 + $0x90] sm:$0xff]  }
 0xd7d   : > { %16907 = vmatprep.subr.bf16.mxu1 %v17998_v60 }
 0xd83   : > { %16900 = vmatmul.mubr.msk.bf16.vlgmr.msra.gmra.mrb[96].mxu1 %vm1266_vm9, %v12864_v23  ;;  %v12987_v23 = vpack.c.bf16 %v12617_v45, %v12616_v16 }
 0xd84   : > { %16908 = vmatpush3.bf16.msra.mxu1 %v17998_v60  ;;  %16903 = vmatprep.mubr.msk.bf16.mxu1 %vm1266_vm9, %v12865_v20 }
 0xd85   : > { %16909 = vmatprep.subr.bf16.mxu1 %v17999_v5 }
 0xd88   : > { %16910 = vmatpush3.bf16.msra.mxu1 %v17999_v5 }
 0xd89   : > { %16911 = vmatprep.subr.bf16.mxu1 %v18000_v4 }
 0xd8b   : > { %16904 = vmatmul.mubr.msk.bf16.gmra.mrb[100].mxu1 %vm1266_vm9, %v12866_v1  ;;  %v13512_v1 = vld [vmem:[%s18337_s20] sm:$0x3] }
 0xd8c   : > { %16913 = vmatprep.mubr.msk.bf16.mxu1 %vm1266_vm9, %v12985_v59  ;;  %16912 = vmatpush3.bf16.msra.mxu1 %v18000_v4  ;;  %v20866_v59 = vrot.slane %v13512_v1, %v18863_v26 }
 0xd8d   : > { %16921 = vmatprep.subr.bf16.mxu1 %v18001_v7 }
 0xd93   : > { %16914 = vmatmul.mubr.msk.bf16.vlgmr.msra.gmra.mrb[96].mxu1 %vm1266_vm9, %v12986_v14 }
 0xd94   : > { %16922 = vmatpush3.bf16.msra.mxu1 %v18001_v7  ;;  %16917 = vmatprep.mubr.msk.bf16.mxu1 %vm1266_vm9, %v12987_v23  ;;  %v20863_v7 = vrot.slane %v13512_v1, %v18860_v24 }
 0xd95   : > { %16923 = vmatprep.subr.bf16.mxu1 %v18002_v46 }
 0xd98   : > { %16924 = vmatpush3.bf16.msra.mxu1 %v18002_v46 }
 0xd99   : > { %16925 = vmatprep.subr.bf16.mxu1 %v18003_v30 }
 0xd9b   : > { %16918 = vmatmul.mubr.msk.bf16.gmra.mrb[100].mxu1 %vm1266_vm9, %v12988_v41 }
 0xd9c   : > { %16927 = vmatprep.mubr.msk.bf16.mxu1 %vm1266_vm9, %v20759_v51  ;;  %16926 = vmatpush3.bf16.msra.mxu1 %v18003_v30 }
 0xd9d   : > { %16935 = vmatprep.subr.bf16.mxu1 %v18004_v44 }
 0xda3   : > { %16928 = vmatmul.mubr.msk.bf16.vlgmr.msra.gmra.mrb[96].mxu1 %vm1266_vm9, %v20762_v29 }
 0xda4   : > { %16936 = vmatpush3.bf16.msra.mxu1 %v18004_v44  ;;  %16931 = vmatprep.mubr.msk.bf16.mxu1 %vm1266_vm9, %v20771_v21 }
 0xda5   : > { %16937 = vmatprep.subr.bf16.mxu1 %v18005_v12 }
 0xda8   : > { %16938 = vmatpush3.bf16.msra.mxu1 %v18005_v12 }
 0xda9   : > { %16939 = vmatprep.subr.bf16.mxu1 %v18006_v22 }
 0xdab   : > { %16932 = vmatmul.mubr.msk.bf16.gmra.mrb[100].mxu1 %vm1266_vm9, %v13111_v34 }
 0xdac   : > { %16941 = vmatprep.mubr.msk.bf16.mxu1 %vm1266_vm9, %v20716_v53  ;;  %16940 = vmatpush3.bf16.msra.mxu1 %v18006_v22  ;;  %v13351_v53 = vld [vmem:[#allocation9 + $0x92] sm:$0xff] }
 0xdad   : > { %16949 = vmatprep.subr.bf16.mxu1 %v18007_v47 }
 0xdb3   : > { %16942 = vmatmul.mubr.msk.bf16.vlgmr.msra.gmra.mrb[96].mxu1 %vm1266_vm9, %v20738_v11  ;;  %v13355_v11 = vpack.c.bf16 %v13351_v53, %v12984_v31 }
 0xdb4   : > { %16950 = vmatpush3.bf16.msra.mxu1 %v18007_v47  ;;  %16945 = vmatprep.mubr.msk.bf16.mxu1 %vm1266_vm9, %v20750_v25  ;;  %v18016_v25 = vld [vmem:[%s18332_s12 + $0x20] ss:$8 sps:$4 sm:$0xff]  }
 0xdb5   : > { %16951 = vmatprep.subr.bf16.mxu1 %v18008_v48  ;;  %13571 = vmatpush1.bf16.msra.mxu0 %v18016_v25 }
 0xdb8   : > { %16952 = vmatpush3.bf16.msra.mxu1 %v18008_v48 }
 0xdb9   : > { %16953 = vmatprep.subr.bf16.mxu1 %v18009_v56 }
 0xdbb   : > { %16946 = vmatmul.mubr.msk.bf16.gmra.mrb[100].mxu1 %vm1266_vm9, %v13233_v0 }
 0xdbc   : > { %16955 = vmatprep.mubr.msk.bf16.mxu1 %vm1266_vm9, %v20778_v42  ;;  %16954 = vmatpush3.bf16.msra.mxu1 %v18009_v56 }
 0xdc3   : > { %16956 = vmatmul.mubr.msk.bf16.vlgmr.msra.gmra.mrb[96].mxu1 %vm1266_vm9, %v20781_v52 }
 0xdc4   : > { %16959 = vmatprep.mubr.msk.bf16.mxu1 %vm1266_vm9, %v20788_v61 }
 0xdcb   : > { %16960 = vmatmul.mubr.msk.bf16.gmra.mrb[100].mxu1 %vm1266_vm9, %v13355_v11 }
 0xe96   : > { %v16957_v51 = vpop.f32.mrb[96].mxu1 }
 0xe97   : > { %v13474_v17 = vmul.f32 %v16957_v51, %v15206_v15  ;;  %v13427_v37 = vpop.f32.mrb[97].mxu1 }
 0xe98   : > { %v13472_v29 = vmul.f32 %v15206_v15, %v13427_v37  ;;  %v16958_v63 = vpop.f32.mrb[98].mxu1 }
 0xe99   : > { %v13488_v28 = vadd.f32 %v15207_v9, %v13474_v17  ;;  %v13475_v39 = vmul.f32 %v16958_v63, %v15206_v15  ;;  %v13430_v3 = vpop.f32.mrb[99].mxu1 }
 0xe9a   : > { %v13486_v43 = vadd.f32 %v15207_v9, %v13472_v29  ;;  %v13473_v21 = vmul.f32 %v15206_v15, %v13430_v3 }
 0xe9b   : > { %v13489_v57 = vadd.f32 %v15207_v9, %v13475_v39  ;;  %v13496_v62 = vmax.f32 %v13488_v28, 0.0 }
 0xe9c   : > { %v13487_v54 = vadd.f32 %v15207_v9, %v13473_v21  ;;  %v13494_v55 = vmax.f32 %v13486_v43, 0.0 }
 0xe9d   : > { %v13497_v16 = vmax.f32 %v13489_v57, 0.0 }
 0xe9e   : > { %v13495_v42 = vmax.f32 %v13487_v54, 0.0  ;;  %v16961_v58 = vpop.f32.mrb[100].mxu1 }
 0xe9f   : > { %v13503_v13 = vpack.c.bf16 %v13497_v16, %v13496_v62  ;;  %v13478_v52 = vmul.f32 %v16961_v58, %v15206_v15  ;;  %v13443_v36 = vpop.f32.mrb[101].mxu1 }
 0xea0   : > { %v13502_v18 = vpack.c.bf16 %v13495_v42, %v13494_v55  ;;  %v13476_v45 = vmul.f32 %v15206_v15, %v13443_v36  ;;  %v16962_v61 = vpop.f32.mrb[102].mxu1 }
 0xea1   : > { %v13492_v40 = vadd.f32 %v15207_v9, %v13478_v52  ;;  %v13479_v2 = vmul.f32 %v16962_v61, %v15206_v15  ;;  %v13446_v6 = vpop.f32.mrb[103].mxu1 }
 0xea2   : > { %v13490_v19 = vadd.f32 %v15207_v9, %v13476_v45  ;;  %v13477_v8 = vmul.f32 %v15206_v15, %v13446_v6  ;;  %15214 = vmatmul.mubr.msk.bf16.vlgmr.msra.gmra.mrb[156].mxu0 %vm1266_vm9, %v13502_v18 }
 0xea3   : > { %v13493_v32 = vadd.f32 %v15207_v9, %v13479_v2  ;;  %13608 = vmatprep.mubr.bf16.mxu0 %v20952_v38  ;;  %v13500_v27 = vmax.f32 %v13492_v40, 0.0 }
 0xea4   : > { %v13491_v35 = vadd.f32 %v15207_v9, %v13477_v8  ;;  %v13498_v5 = vmax.f32 %v13490_v19, 0.0 }
 0xea5   : > { %v13501_v60 = vmax.f32 %v13493_v32, 0.0 }
 0xea6   : > { %v13499_v20 = vmax.f32 %v13491_v35, 0.0 }
 0xea7   : > { %v13505_v4 = vpack.c.bf16 %v13501_v60, %v13500_v27 }
 0xea8   : > { %v13504_v50 = vpack.c.bf16 %v13499_v20, %v13498_v5 }
 0xeaa   : > { %15215 = vmatmul.mubr.msk.bf16.gmra.mrb[160].mxu0 %vm1266_vm9, %v13503_v13 }
 0xeab   : > { %13618 = vmatprep.mubr.bf16.mxu0 %v20952_v38 }
 0xeb2   : > { %15216 = vmatmul.mubr.msk.bf16.gmra.mrb[164].mxu0 %vm1266_vm9, %v13504_v50 }
 0xeb3   : > { %13628 = vmatprep.mubr.bf16.mxu0 %v20952_v38 }
 0xeba   : > { %15217 = vmatmul.mubr.msk.bf16.gmra.mrb[168].mxu0 %vm1266_vm9, %v13505_v4 }
 0xf75   : > { %v13600_v14 = vpop.f32.mrb[156].mxu0 }
 0xf76   : > { %v13601_v46 = vadd.f32 %v13600_v14, %v20863_v7  ;;  %v13602_v23 = vpop.f32.mrb[157].mxu0 }
 0xf77   : > { %v13603_v30 = vadd.f32 %v13602_v23, %v20866_v59  ;;  %v13604_v31 = vpop.f32.mrb[158].mxu0 }
 0xf78   : > { %v15218_v41 = vmul.f32 -1.442695, %v13601_v46  ;;  %v13605_v44 = vadd.f32 %v13604_v31, %v20863_v7  ;;  %v13606_v38 = vpop.f32.mrb[159].mxu0 }
 0xf79   : > { %v15219_v12 = vmul.f32 -1.442695, %v13603_v30  ;;  %v13607_v22 = vadd.f32 %v13606_v38, %v20866_v59 }
 0xf7a   : > { %18019 = vpow2.f32 %v15218_v41  ;;  %v15220_v24 = vmul.f32 -1.442695, %v13605_v44 }
 0xf7b   : > { %18021 = vpow2.f32 %v15219_v12  ;;  %v15221_v49 = vmul.f32 -1.442695, %v13607_v22 }
 0xf7c   : > { %18023 = vpow2.f32 %v15220_v24 }
 0xf7d   : > { %18025 = vpow2.f32 %v15221_v49  ;;  %v13610_v26 = vpop.f32.mrb[160].mxu0 }
 0xf7e   : > { %v13611_v34 = vadd.f32 %v13610_v26, %v20863_v7  ;;  %v13612_v47 = vpop.f32.mrb[161].mxu0 }
 0xf7f   : > { %v13613_v48 = vadd.f32 %v13612_v47, %v20866_v59  ;;  %v13614_v56 = vpop.f32.mrb[162].mxu0 }
 0xf80   : > { %v15222_v33 = vmul.f32 -1.442695, %v13611_v34  ;;  %v13615_v0 = vadd.f32 %v13614_v56, %v20863_v7  ;;  %v13616_v53 = vpop.f32.mrb[163].mxu0 }
 0xf81   : > { %v15223_v11 = vmul.f32 -1.442695, %v13613_v48  ;;  %v13617_v25 = vadd.f32 %v13616_v53, %v20866_v59 }
 0xf82   : > { %18027 = vpow2.f32 %v15222_v33  ;;  %v15224_v10 = vmul.f32 -1.442695, %v13615_v0 }
 0xf83   : > { %18029 = vpow2.f32 %v15223_v11  ;;  %v15225_v15 = vmul.f32 -1.442695, %v13617_v25 }
 0xf84   : > { %v18020_v9 = vpop.eup %18019  ;;  %18031 = vpow2.f32 %v15224_v10 }
 0xf85   : > { %v18022_v51 = vpop.eup %18021  ;;  %v13687_v17 = vadd.f32 1.0, %v18020_v9  ;;  %18033 = vpow2.f32 %v15225_v15  ;;  %v13620_v37 = vpop.f32.mrb[164].mxu0 }
 0xf86   : > { %v18024_v29 = vpop.eup %18023  ;;  %v13688_v63 = vadd.f32 1.0, %v18022_v51  ;;  %v13621_v28 = vadd.f32 %v13620_v37, %v20863_v7  ;;  %v13622_v39 = vpop.f32.mrb[165].mxu0 }
 0xf87   : > { %v18026_v3 = vpop.eup %18025  ;;  %18035 = vrcp.f32 %v13687_v17  ;;  %v13689_v43 = vadd.f32 1.0, %v18024_v29  ;;  %v13623_v21 = vadd.f32 %v13622_v39, %v20866_v59  ;;  %v13624_v57 = vpop.f32.mrb[166].mxu0 }
 0xf88   : > { %18037 = vrcp.f32 %v13688_v63  ;;  %v13690_v54 = vadd.f32 1.0, %v18026_v3  ;;  %v15226_v62 = vmul.f32 -1.442695, %v13621_v28  ;;  %v13625_v16 = vadd.f32 %v13624_v57, %v20863_v7  ;;  %v13626_v55 = vpop.f32.mrb[167].mxu0 }
 0xf89   : > { %18039 = vrcp.f32 %v13689_v43  ;;  %v15227_v42 = vmul.f32 -1.442695, %v13623_v21  ;;  %v13627_v58 = vadd.f32 %v13626_v55, %v20866_v59 }
 0xf8a   : > { %18041 = vrcp.f32 %v13690_v54  ;;  %v15228_v13 = vmul.f32 -1.442695, %v13625_v16 }
 0xf8b   : > { %18043 = vpow2.f32 %v15226_v62  ;;  %v15229_v52 = vmul.f32 -1.442695, %v13627_v58 }
 0xf8c   : > { %v18028_v36 = vpop.eup %18027  ;;  %18045 = vpow2.f32 %v15227_v42 }
 0xf8d   : > { %v18030_v18 = vpop.eup %18029  ;;  %v13691_v45 = vadd.f32 1.0, %v18028_v36  ;;  %18047 = vpow2.f32 %v15228_v13  ;;  %v13630_v61 = vpop.f32.mrb[168].mxu0 }
 0xf8e   : > { %v18032_v40 = vpop.eup %18031  ;;  %v13692_v2 = vadd.f32 1.0, %v18030_v18  ;;  %18049 = vpow2.f32 %v15229_v52  ;;  %v13631_v6 = vadd.f32 %v13630_v61, %v20863_v7  ;;  %v13632_v19 = vpop.f32.mrb[169].mxu0 }
 0xf8f   : > { %v18034_v8 = vpop.eup %18033  ;;  %18051 = vrcp.f32 %v13691_v45  ;;  %v13693_v32 = vadd.f32 1.0, %v18032_v40  ;;  %v13633_v35 = vadd.f32 %v13632_v19, %v20866_v59  ;;  %v13634_v27 = vpop.f32.mrb[170].mxu0 }
 0xf90   : > { %18053 = vrcp.f32 %v13692_v2  ;;  %v13694_v60 = vadd.f32 1.0, %v18034_v8  ;;  %v15230_v5 = vmul.f32 -1.442695, %v13631_v6  ;;  %v13635_v20 = vadd.f32 %v13634_v27, %v20863_v7  ;;  %v13636_v4 = vpop.f32.mrb[171].mxu0 }
 0xf91   : > { %v18036_v50 = vpop.eup %18035  ;;  %18055 = vrcp.f32 %v13693_v32  ;;  %v15231_v1 = vmul.f32 -1.442695, %v13633_v35  ;;  %v13637_v14 = vadd.f32 %v13636_v4, %v20866_v59 }
 0xf92   : > { %v18038_v46 = vpop.eup %18037  ;;  %13735 = vst [vmem:[%s20883_s22] sm:$0xff] %v18036_v50  ;;  %18057 = vrcp.f32 %v13694_v60  ;;  %v15232_v23 = vmul.f32 -1.442695, %v13635_v20 }
 0xf93   : > { %v18040_v30 = vpop.eup %18039  ;;  %13736 = vst.msk [vmem:[%s20883_s22 + $0x8] sm:$0xff] %vm1122_vm3, %v18038_v46  ;;  %18059 = vpow2.f32 %v15230_v5  ;;  %v15233_v31 = vmul.f32 -1.442695, %v13637_v14 }
 0xf94   : > { %v18042_v41 = vpop.eup %18041  ;;  %13737 = vst [vmem:[%s20883_s22 + $0x10] sm:$0xff] %v18040_v30  ;;  %18061 = vpow2.f32 %v15231_v1 }
 0xf95   : > { %v18044_v7 = vpop.eup %18043  ;;  %13738 = vst.msk [vmem:[%s20883_s22 + $0x18] sm:$0xff] %vm1122_vm3, %v18042_v41  ;;  %18063 = vpow2.f32 %v15232_v23 }
 0xf96   : > { %v18046_v44 = vpop.eup %18045  ;;  %v13695_v59 = vadd.f32 1.0, %v18044_v7  ;;  %18065 = vpow2.f32 %v15233_v31 }
 0xf97   : > { %v18048_v38 = vpop.eup %18047  ;;  %v13696_v12 = vadd.f32 1.0, %v18046_v44 }
 0xf98   : > { %v18050_v22 = vpop.eup %18049  ;;  %18067 = vrcp.f32 %v13695_v59  ;;  %v13697_v24 = vadd.f32 1.0, %v18048_v38 }
 0xf99   : > { %v18052_v49 = vpop.eup %18051  ;;  %18069 = vrcp.f32 %v13696_v12  ;;  %v13698_v26 = vadd.f32 1.0, %v18050_v22 }
 0xf9a   : > { %v18054_v34 = vpop.eup %18053  ;;  %13739 = vst [vmem:[%s20883_s22 + $0x20] sm:$0xff] %v18052_v49  ;;  %18071 = vrcp.f32 %v13697_v24 }
 0xf9b   : > { %v18056_v47 = vpop.eup %18055  ;;  %13740 = vst.msk [vmem:[%s20883_s22 + $0x28] sm:$0xff] %vm1122_vm3, %v18054_v34  ;;  %18073 = vrcp.f32 %v13698_v26 }
 0xf9c   : > { %v18058_v48 = vpop.eup %18057  ;;  %13741 = vst [vmem:[%s20883_s22 + $0x30] sm:$0xff] %v18056_v47 }
 0xf9d   : > { %v18060_v56 = vpop.eup %18059  ;;  %13742 = vst.msk [vmem:[%s20883_s22 + $0x38] sm:$0xff] %vm1122_vm3, %v18058_v48 }
 0xf9e   : > { %v18062_v33 = vpop.eup %18061  ;;  %v13699_v0 = vadd.f32 1.0, %v18060_v56 }
 0xf9f   : > { %v18064_v53 = vpop.eup %18063  ;;  %v13700_v11 = vadd.f32 1.0, %v18062_v33 }
 0xfa0   : > { %v18066_v25 = vpop.eup %18065  ;;  %18075 = vrcp.f32 %v13699_v0  ;;  %v13701_v10 = vadd.f32 1.0, %v18064_v53 }
 0xfa1   : > { %18077 = vrcp.f32 %v13700_v11  ;;  %v13702_v15 = vadd.f32 1.0, %v18066_v25 }
 0xfa2   : > { %v18068_v9 = vpop.eup %18067  ;;  %18079 = vrcp.f32 %v13701_v10 }
 0xfa3   : > { %v18070_v51 = vpop.eup %18069  ;;  %13743 = vst [vmem:[%s20883_s22 + $0x40] sm:$0xff] %v18068_v9  ;;  %18081 = vrcp.f32 %v13702_v15 }
 0xfa4   : > { %v18072_v17 = vpop.eup %18071  ;;  %13744 = vst.msk [vmem:[%s20883_s22 + $0x48] sm:$0xff] %vm1122_vm3, %v18070_v51 }
 0xfa5   : > { %v18074_v37 = vpop.eup %18073  ;;  %13745 = vst [vmem:[%s20883_s22 + $0x50] sm:$0xff] %v18072_v17 }
 0xfa6   : > { %13746 = vst.msk [vmem:[%s20883_s22 + $0x58] sm:$0xff] %vm1122_vm3, %v18074_v37 }
 0xfaa   : > { %v18076_v29 = vpop.eup %18075 }
 0xfab   : > { %v18078_v63 = vpop.eup %18077  ;;  %13747 = vst [vmem:[%s20883_s22 + $0x60] sm:$0xff] %v18076_v29 }
 0xfac   : > { %v18080_v28 = vpop.eup %18079  ;;  %13748 = vst.msk [vmem:[%s20883_s22 + $0x68] sm:$0xff] %vm1122_vm3, %v18078_v63 }
 0xfad   : > { %v18082_v39 = vpop.eup %18081  ;;  %13749 = vst [vmem:[%s20883_s22 + $0x70] sm:$0xff] %v18080_v28 }
 0xfae   : > { %13750 = vst.msk [vmem:[%s20883_s22 + $0x78] sm:$0xff] %vm1122_vm3, %v18082_v39 }
 0xfaf PF: > { %s83_s28 = sadd.s32 1, %s18113_s28  }
 0xfb0   : > { %p80_p4 = scmp.ge.s32.totalorder %s83_s28, 4  }
 0xfb2   :  { %82 = sbr.rel (!%p80_p4) target bundleno = 65 (0x41), region = 310 }

</bundles_post_ra>
